<compile_context>
chip_gen: v6e
topology: v6e:2x2x1
jax: 0.10.0
libtpu: 0.0.40
codegen_flags: <defaults>
</compile_context>

<pallas_src>
import functools
from dataclasses import dataclass
from typing import Optional

import numpy as np
import jax
import jax.numpy as jnp
from jax import lax
from jax.experimental import pallas as pl
from jax.experimental.pallas import tpu as pltpu

# 'highest' keeps the pure-JAX reference (and host-side weight fusions)
# accurate; every in-kernel dot overrides it (bf16 operands, precision=DEFAULT)
# so the MXU does single-pass bf16 matmuls.
jax.config.update("jax_default_matmul_precision", "highest")

_USE_APPROX_RECIP = True   # flip to False for exact divides if tolerance tightens


@dataclass(frozen=True)
class ModelConfig:
    n_embd: int = 32
    n_head: int = 4
    n_layer: int = 2
    block_size: int = 64
    n_intermediate: int = 128
    layer_norm_epsilon: float = 1e-5
    vocab_size: Optional[int] = None
    input_dim: Optional[int] = 3
    output_dim: Optional[int] = 3
    n_qubits: int = 4
    q_depth: int = 2


# ----------------------------- in-kernel helpers -----------------------------

def _recip(x):
    if _USE_APPROX_RECIP:
        return pl.reciprocal(x, approx=True)     # EUP vrcp, off the VPU
    return 1.0 / x


def _erf(x):
    # Abramowitz & Stegun 7.1.26, max abs error ~1.5e-7 (exp/mul/add only).
    a1, a2, a3, a4, a5 = 0.254829592, -0.284496736, 1.421413741, -1.453152027, 1.061405429
    p = 0.3275911
    s = jnp.where(x < 0.0, -1.0, 1.0)
    ax = jnp.abs(x)
    t = _recip(1.0 + p * ax)
    poly = ((((a5 * t + a4) * t + a3) * t + a2) * t + a1) * t
    return s * (1.0 - poly * jnp.exp(-ax * ax))


def _gelu_exact(x):
    return 0.5 * x * (1.0 + _erf(x * 0.7071067811865476))


def _sigmoid(x):
    return _recip(1.0 + jnp.exp(-x))


def _layernorm(x, g, b, eps):
    mu = jnp.mean(x, axis=-1, keepdims=True)
    var = jnp.mean((x - mu) ** 2, axis=-1, keepdims=True)
    return (x - mu) * lax.rsqrt(var + eps) * g + b


def _mxu_dot(a_f32, b_bf16):
    # bf16 operands, f32 accumulation, single MXU pass.
    return jnp.dot(a_f32.astype(jnp.bfloat16), b_bf16,
                   preferred_element_type=jnp.float32,
                   precision=lax.Precision.DEFAULT)


# ------------------------------ fused kernel ----------------------------------

def _fused_forward_kernel(
    xs_ref, in_w_ref, in_b_ref,
    ln1g_ref, ln1b_ref, wdec_ref, tf_ref,
    wkvr_ref, wo_ref,
    ln2g_ref, ln2b_ref, tmk_ref, tmr_ref,
    wcr_ref, wfc1q_ref, w2f_ref, zwf_ref, ublk_ref,
    qb_ref, qbm_ref, sgnre_ref, sgnim_ref,
    lnfg_ref, lnfb_ref, headw_ref,
    out_ref, aao_ref, bbo_ref, ppo_ref, cmo_ref,
    wkv_ref,
    *, L, T, BP, C, I, nq, eps):
    f32 = jnp.float32
    dim = 1 << nq

    # input projection (Din -> C) on the whole (T*BP, Din) slab
    x = _mxu_dot(xs_ref[...], in_w_ref[...]) + in_b_ref[...]

    for l in range(L):
        # ------------------------- RWKV time mixing -------------------------
        xn = _layernorm(x, ln1g_ref[l], ln1b_ref[l], eps)
        kvr = _mxu_dot(xn, wkvr_ref[l])            # one lane-dense (N, 3C) matmul
        k = kvr[:, 0:C]
        v = kvr[:, C:2 * C]
        r = _sigmoid(kvr[:, 2 * C:3 * C])
        w = wdec_ref[l]                            # exp(time_decay), precomputed
        u = tf_ref[l]
        # states=None initial recurrent state.
        # TODO(synk): plumb carried (aa, bb, pp) states through as inputs.
        aa = jnp.zeros((BP, C), f32)
        bb = jnp.zeros((BP, C), f32)
        pp = jnp.full((BP, C), -1e38, f32)
        for t in range(T):                         # serial WKV recurrence over time
            kt = k[t * BP:(t + 1) * BP, :]         # aligned (8, C) sublane tile
            vt = v[t * BP:(t + 1) * BP, :]
            ww = u + kt
            pm = jnp.maximum(pp, ww)
            ww2 = pp - w
            p2 = jnp.maximum(ww2, kt)
            # four (8, C) exp args lane-packed -> ONE full-vreg exp per step
            e = jnp.exp(jnp.concatenate(
                [pp - pm, ww - pm, ww2 - p2, kt - p2], axis=1))
            e1, e2 = e[:, 0:C], e[:, C:2 * C]
            e3, e4 = e[:, 2 * C:3 * C], e[:, 3 * C:4 * C]
            wkv_ref[t * BP:(t + 1) * BP, :] = (
                (e1 * aa + e2 * vt) * _recip(e1 * bb + e2))
            aa = e3 * aa + e4 * vt
            bb = e3 * bb + e4
            pp = p2
        aao_ref[l] = aa
        bbo_ref[l] = bb
        ppo_ref[l] = pp
        x = x + _mxu_dot(r * wkv_ref[...], wo_ref[l])

        # ---------------------- quantum channel mixing ----------------------
        xn2 = _layernorm(x, ln2g_ref[l], ln2b_ref[l], eps)
        # prev channel-mix state is zero for states=None, so the
        # prev * (1 - time_mix) term is dropped (dead compute otherwise).
        # TODO(synk): re-add the prev-state term when carrying channel-mix state.
        xk = xn2 * tmk_ref[l]
        xr = xn2 * tmr_ref[l]
        r2 = _sigmoid(_mxu_dot(xr, wcr_ref[l]))
        hq = _mxu_dot(xk, wfc1q_ref[l])            # fused [fc1 | q-input-projection]
        h = _gelu_exact(hq[:, 0:I])
        qproj = hq[:, I:I + nq]

        # VQC: lane-packed AngleEmbedding product state, entangler unitary as
        # ONE real block matmul, <Z_q> readout folded into zwf = zsign@wexp@wfus.
        cth = jnp.cos(0.5 * qproj)
        sth = jnp.sin(0.5 * qproj)
        mag = cth[:, 0:1] * qbm_ref[0] + sth[:, 0:1] * qb_ref[0]
        for q in range(1, nq):
            mag = mag * (cth[:, q:q + 1] * qbm_ref[q] + sth[:, q:q + 1] * qb_ref[q])
        psi = jnp.concatenate([mag * sgnre_ref[...], mag * sgnim_ref[...]], axis=1)
        o = _mxu_dot(psi, ublk_ref[l])              # -> [o_re | o_im]
        o_re, o_im = o[:, 0:dim], o[:, dim:2 * dim]
        probs = o_re * o_re + o_im * o_im

        fused = _mxu_dot(h, w2f_ref[l]) + _mxu_dot(probs, zwf_ref[l])
        x = x + r2 * fused
        cmo_ref[l] = xn2[(T - 1) * BP:T * BP, :]    # new channel-mix state = ln2(x)[:, -1]

    # ------------------------------ final head ------------------------------
    xnf = _layernorm(x, lnfg_ref[...], lnfb_ref[...], eps)
    out_ref[...] = _mxu_dot(xnf, headw_ref[...])


# -------------------- fixed entangler unitary (outside kernel) -----------------

def entangler_unitary(qw, nq):
    """Unitary of BasicEntanglerLayers (RX rotations + CNOT ring), wire 0 = MSB."""
    dim = 1 << nq
    U = jnp.eye(dim, dtype=jnp.complex64)
    for d in range(qw.shape[0]):
        layer = None
        for q in range(nq):
            cc = jnp.cos(0.5 * qw[d, q]).astype(jnp.complex64)
            ss = (-1j) * jnp.sin(0.5 * qw[d, q]).astype(jnp.complex64)
            m = jnp.stack([jnp.stack([cc, ss]), jnp.stack([ss, cc])])
            layer = m if layer is None else jnp.kron(layer, m)
        U = layer @ U
        if nq == 2:
            pairs = [(0, 1)]
        elif nq > 2:
            pairs = [(q, (q + 1) % nq) for q in range(nq)]
        else:
            pairs = []
        for cq, tq in pairs:
            cm = np.zeros((dim, dim), dtype=np.complex64)
            for i in range(dim):
                j = i ^ (1 << (nq - 1 - tq)) if ((i >> (nq - 1 - cq)) & 1) else i
                cm[j, i] = 1.0
            U = jnp.asarray(cm) @ U
    return U


# ------------------------------ model driver ----------------------------------

def model_forward(params, x_in, cfg):
    B, T, Din = x_in.shape
    C, L, I = cfg.n_embd, cfg.n_layer, cfg.n_intermediate
    nq, dim = cfg.n_qubits, 1 << cfg.n_qubits
    Dout = cfg.output_dim
    BP = ((B + 7) // 8) * 8                 # batch padded to full sublane tiles
    N = T * BP
    bf16 = jnp.bfloat16

    # time-major, batch-padded activation slab (batch in the 8 sublanes)
    xpad = jnp.zeros((T, BP, Din), jnp.float32).at[:, :B, :].set(
        jnp.transpose(x_in, (1, 0, 2)))
    xs = xpad.reshape(N, Din)

    # constants for the lane-packed product state / Z readout
    qbits_np = np.zeros((nq, 1, dim), np.float32)
    sgn_re_np = np.zeros((1, dim), np.float32)
    sgn_im_np = np.zeros((1, dim), np.float32)
    zsign_np = np.zeros((dim, nq), np.float32)
    for i in range(dim):
        kbits = 0
        for q in range(nq):
            bit = (i >> (nq - 1 - q)) & 1
            qbits_np[q, 0, i] = float(bit)
            zsign_np[i, q] = -1.0 if bit else 1.0
            kbits += bit
        sgn_re_np[0, i] = (1.0, 0.0, -1.0, 0.0)[kbits % 4]
        sgn_im_np[0, i] = (0.0, -1.0, 0.0, 1.0)[kbits % 4]
    qbits = jnp.asarray(qbits_np)
    one_m_qbits = jnp.asarray(1.0 - qbits_np)
    sgn_re = jnp.asarray(sgn_re_np)
    sgn_im = jnp.asarray(sgn_im_np)
    zsign = jnp.asarray(zsign_np)

    # host-side weight fusions (f32 'highest' precision, tiny one-off cost)
    wkvr = jnp.concatenate([params["wk"], params["wv"], params["wr"]], axis=-1)   # (L,C,3C)
    wfc1q = jnp.concatenate([params["wfc1"], params["winq"]], axis=-1)            # (L,C,I+nq)
    w2f = jnp.einsum("lic,lcd->lid", params["wfc2"], params["wfus"])              # (L,I,C)
    zwf = jnp.einsum("dq,lqc,lce->lde", zsign, params["wexp"], params["wfus"])    # (L,dim,C)
    wdec = jnp.exp(params["td"])                                                  # (L,1,C)

    # per-layer entangler unitary as one real (2*dim, 2*dim) block matrix (U^T)
    ublocks = []
    for l in range(L):
        ut = entangler_unitary(params["qw"][l], nq).T
        ure = jnp.real(ut).astype(jnp.float32)
        uim = jnp.imag(ut).astype(jnp.float32)
        ublocks.append(jnp.concatenate(
            [jnp.concatenate([ure, uim], axis=1),
             jnp.concatenate([-uim, ure], axis=1)], axis=0))
    ublock = jnp.stack(ublocks)

    kernel = functools.partial(_fused_forward_kernel, L=L, T=T, BP=BP, C=C, I=I,
                               nq=nq, eps=cfg.layer_norm_epsilon)
    out_shapes = (
        jax.ShapeDtypeStruct((N, Dout), jnp.float32),
        jax.ShapeDtypeStruct((L, BP, C), jnp.float32),
        jax.ShapeDtypeStruct((L, BP, C), jnp.float32),
        jax.ShapeDtypeStruct((L, BP, C), jnp.float32),
        jax.ShapeDtypeStruct((L, BP, C), jnp.float32),
    )
    # TODO(synk): parallel grid over batch sublane groups + vmem_limit_bytes
    #             budget (pltpu.CompilerParams) before scaling B/T on v7x.
    out_flat, aa_n, bb_n, pp_n, cm_n = pl.pallas_call(
        kernel,
        out_shape=out_shapes,               # no grid: everything VMEM-resident
        scratch_shapes=[pltpu.VMEM((N, C), jnp.float32)],
    )(
        xs,
        params["in_w"].astype(bf16), params["in_b"],
        params["ln1_g"], params["ln1_b"], wdec, params["tf"],
        wkvr.astype(bf16), params["wo"].astype(bf16),
        params["ln2_g"], params["ln2_b"], params["tmk"], params["tmr"],
        params["wcr"].astype(bf16), wfc1q.astype(bf16),
        w2f.astype(bf16), zwf.astype(bf16), ublock.astype(bf16),
        qbits, one_m_qbits, sgn_re, sgn_im,
        params["lnf_g"], params["lnf_b"], params["head_w"].astype(bf16),
    )
    preds = out_flat.reshape(T, BP, Dout)[:, :B, :].transpose(1, 0, 2)
    new_states = [((aa_n[l, :B], bb_n[l, :B], pp_n[l, :B]), cm_n[l, :B])
                  for l in range(L)]
    return preds, new_states


# ------------------------------ parameter init --------------------------------

def init_params(cfg, key):
    C, I = cfg.n_embd, cfg.n_intermediate
    nq, qd, L = cfg.n_qubits, cfg.q_depth, cfg.n_layer
    Din, Dout = cfg.input_dim, cfg.output_dim
    keys = list(jax.random.split(key, 3 + 12 * L))
    kit = iter(keys)

    def lin(shape, scale=0.1):
        return scale * jax.random.normal(next(kit), shape, jnp.float32)

    def stackL(fn):
        return jnp.stack([fn() for _ in range(L)])

    ratio = (jnp.arange(C, dtype=jnp.float32) /
             (C - 1 if C > 1 else 1)).reshape(1, C)
    td1 = (-5.0 + 8.0 * (jnp.arange(C, dtype=jnp.float32) /
                         (C - 1 if C > 1 else 1.0)) ** 0.7).reshape(1, C)
    tf1 = jnp.full((1, C), -3.0, jnp.float32)

    params = dict(
        in_w=lin((Din, C)), in_b=lin((1, C)),
        ln1_g=jnp.ones((L, 1, C), jnp.float32), ln1_b=jnp.zeros((L, 1, C), jnp.float32),
        td=jnp.broadcast_to(td1, (L, 1, C)) + 0.0,
        tf=jnp.broadcast_to(tf1, (L, 1, C)) + 0.0,
        wk=stackL(lambda: lin((C, C))), wv=stackL(lambda: lin((C, C))),
        wr=stackL(lambda: lin((C, C))), wo=stackL(lambda: lin((C, C))),
        ln2_g=jnp.ones((L, 1, C), jnp.float32), ln2_b=jnp.zeros((L, 1, C), jnp.float32),
        tmk=jnp.broadcast_to(ratio, (L, 1, C)) + 0.0,
        tmr=jnp.broadcast_to(ratio, (L, 1, C)) + 0.0,
        wcr=stackL(lambda: lin((C, C))),
        wfc1=stackL(lambda: lin((C, I))), wfc2=stackL(lambda: lin((I, C))),
        winq=stackL(lambda: lin((C, nq))), wexp=stackL(lambda: lin((nq, C))),
        wfus=stackL(lambda: lin((C, C))),
        qw=jnp.stack([jax.random.uniform(next(kit), (qd, nq), jnp.float32,
                                         0.0, 2.0 * np.pi) for _ in range(L)]),
        lnf_g=jnp.ones((1, C), jnp.float32), lnf_b=jnp.zeros((1, C), jnp.float32),
        head_w=lin((C, Dout)),
    )
    return params


# --------------------------- pure-JAX reference --------------------------------

def ref_layernorm(x, g, b, eps):
    mu = jnp.mean(x, axis=-1, keepdims=True)
    var = jnp.mean((x - mu) ** 2, axis=-1, keepdims=True)
    return (x - mu) / jnp.sqrt(var + eps) * g + b


def ref_vqc(angles, qw):
    N, nq = angles.shape
    dim = 1 << nq
    c = jnp.cos(0.5 * angles)
    s = jnp.sin(0.5 * angles)
    state = jnp.ones((N, 1), dtype=jnp.complex64)
    for q in range(nq):
        sq = jnp.stack([c[:, q].astype(jnp.complex64),
                        (-1j) * s[:, q].astype(jnp.complex64)], axis=-1)
        state = (state[:, :, None] * sq[:, None, :]).reshape(N, -1)
    U = entangler_unitary(qw, nq)
    state = state @ U.T
    probs = jnp.abs(state) ** 2
    zs = []
    for q in range(nq):
        sign = np.array([1.0 if ((i >> (nq - 1 - q)) & 1) == 0 else -1.0
                         for i in range(dim)], dtype=np.float32)
        zs.append(probs @ jnp.asarray(sign))
    return jnp.stack(zs, axis=-1)


def ref_forward(params, x_in, cfg):
    B, T, _ = x_in.shape
    C = cfg.n_embd
    eps = cfg.layer_norm_epsilon
    x = x_in @ params["in_w"] + params["in_b"]
    for l in range(cfg.n_layer):
        xn = ref_layernorm(x, params["ln1_g"][l], params["ln1_b"][l], eps)
        aa = jnp.zeros((B, C)); bb = jnp.zeros((B, C)); pp = jnp.full((B, C), -1e38)
        k = xn @ params["wk"][l]; v = xn @ params["wv"][l]
        r = jax.nn.sigmoid(xn @ params["wr"][l])
        w = jnp.exp(params["td"][l]); u = params["tf"][l]
        outs = []
        for t in range(T):
            kt = k[:, t, :]; vt = v[:, t, :]
            ww = u + kt
            pm = jnp.maximum(pp, ww)
            e1 = jnp.exp(pp - pm); e2 = jnp.exp(ww - pm)
            outs.append((e1 * aa + e2 * vt) / (e1 * bb + e2))
            ww2 = pp - w
            p2 = jnp.maximum(ww2, kt)
            e1 = jnp.exp(ww2 - p2); e2 = jnp.exp(kt - p2)
            aa = e1 * aa + e2 * vt; bb = e1 * bb + e2; pp = p2
        wkv = jnp.stack(outs, axis=1)
        x = x + (r * wkv) @ params["wo"][l]
        xn2 = ref_layernorm(x, params["ln2_g"][l], params["ln2_b"][l], eps)
        prev = jnp.zeros((B, 1, C))
        xk = xn2 * params["tmk"][l] + prev * (1.0 - params["tmk"][l])
        xr = xn2 * params["tmr"][l] + prev * (1.0 - params["tmr"][l])
        rr = jax.nn.sigmoid(xr @ params["wcr"][l])
        ffn_c = jax.nn.gelu(xk @ params["wfc1"][l], approximate=False) @ params["wfc2"][l]
        qin = (xk @ params["winq"][l]).reshape(-1, cfg.n_qubits)
        z = ref_vqc(qin, params["qw"][l]).reshape(B, T, cfg.n_qubits)
        ffn_q = z @ params["wexp"][l]
        x = x + rr * ((ffn_c + ffn_q) @ params["wfus"][l])
    xn = ref_layernorm(x, params["lnf_g"], params["lnf_b"], eps)
    return xn @ params["head_w"]


# ------------------------------------ main -------------------------------------

if __name__ == "__main__":
    cfg = ModelConfig()
    key = jax.random.PRNGKey(0)
    pkey, xkey = jax.random.split(key)
    params = init_params(cfg, pkey)

    B, T = 2, 8
    x_in = jax.random.normal(xkey, (B, T, cfg.input_dim), jnp.float32)

    fwd = jax.jit(lambda p, x: model_forward(p, x, cfg)[0])
    out = jax.block_until_ready(fwd(params, x_in))

    assert out.shape == (B, T, cfg.output_dim)
    assert bool(jnp.all(jnp.isfinite(out)))

    ref = ref_forward(params, x_in, cfg)
    np.testing.assert_allclose(np.asarray(out), np.asarray(ref), atol=2e-2, rtol=2e-2)

    print("KERNEL_OK")
</pallas_src>

<mosaic_0001>
module attributes {stable_mosaic.version = 11 : i64} {
  func.func @_fused_forward_kernel(%arg0: memref<64x3xf32, #tpu.memory_space<vmem>>, %arg1: memref<3x32xbf16, #tpu.memory_space<vmem>>, %arg2: memref<1x32xf32, #tpu.memory_space<vmem>>, %arg3: memref<2x1x32xf32, #tpu.memory_space<vmem>>, %arg4: memref<2x1x32xf32, #tpu.memory_space<vmem>>, %arg5: memref<2x1x32xf32, #tpu.memory_space<vmem>>, %arg6: memref<2x1x32xf32, #tpu.memory_space<vmem>>, %arg7: memref<2x32x96xbf16, #tpu.memory_space<vmem>>, %arg8: memref<2x32x32xbf16, #tpu.memory_space<vmem>>, %arg9: memref<2x1x32xf32, #tpu.memory_space<vmem>>, %arg10: memref<2x1x32xf32, #tpu.memory_space<vmem>>, %arg11: memref<2x1x32xf32, #tpu.memory_space<vmem>>, %arg12: memref<2x1x32xf32, #tpu.memory_space<vmem>>, %arg13: memref<2x32x32xbf16, #tpu.memory_space<vmem>>, %arg14: memref<2x32x132xbf16, #tpu.memory_space<vmem>>, %arg15: memref<2x128x32xbf16, #tpu.memory_space<vmem>>, %arg16: memref<2x16x32xbf16, #tpu.memory_space<vmem>>, %arg17: memref<2x32x32xbf16, #tpu.memory_space<vmem>>, %arg18: memref<4x1x16xf32, #tpu.memory_space<vmem>>, %arg19: memref<4x1x16xf32, #tpu.memory_space<vmem>>, %arg20: memref<1x16xf32, #tpu.memory_space<vmem>>, %arg21: memref<1x16xf32, #tpu.memory_space<vmem>>, %arg22: memref<1x32xf32, #tpu.memory_space<vmem>>, %arg23: memref<1x32xf32, #tpu.memory_space<vmem>>, %arg24: memref<32x3xbf16, #tpu.memory_space<vmem>>, %arg25: memref<64x3xf32, #tpu.memory_space<vmem>>, %arg26: memref<2x8x32xf32, #tpu.memory_space<vmem>>, %arg27: memref<2x8x32xf32, #tpu.memory_space<vmem>>, %arg28: memref<2x8x32xf32, #tpu.memory_space<vmem>>, %arg29: memref<2x8x32xf32, #tpu.memory_space<vmem>>, %arg30: memref<64x32xf32, #tpu.memory_space<vmem>>) attributes {dimension_semantics = [], scalar_prefetch = 0 : i64, scratch_operands = 1 : i64, tpu.core_type = #tpu.core_type<tc>} {
    %c0 = arith.constant 0 : index
    %c0_0 = arith.constant 0 : index
    %0 = vector.load %arg0[%c0, %c0_0] : memref<64x3xf32, #tpu.memory_space<vmem>>, vector<64x3xf32>
    %c0_1 = arith.constant 0 : index
    %c0_2 = arith.constant 0 : index
    %1 = vector.load %arg1[%c0_1, %c0_2] : memref<3x32xbf16, #tpu.memory_space<vmem>>, vector<3x32xbf16>
    %2 = arith.truncf %0 : vector<64x3xf32> to vector<64x3xbf16>
    %cst = arith.constant dense<0.000000e+00> : vector<64x32xf32>
    %3 = tpu.matmul %2, %1, %cst {dimension_numbers = #tpu.dot_dimension_numbers<[1], [0], [0], [1], [0, 0, 1, 1], [], []>} : vector<64x3xbf16>, vector<3x32xbf16>, vector<64x32xf32> -> vector<64x32xf32>
    %c0_3 = arith.constant 0 : index
    %c0_4 = arith.constant 0 : index
    %4 = vector.load %arg2[%c0_3, %c0_4] : memref<1x32xf32, #tpu.memory_space<vmem>>, vector<1x32xf32>
    %5 = vector.broadcast %4 : vector<1x32xf32> to vector<64x32xf32>
    %6 = arith.addf %3, %5 : vector<64x32xf32>
    %c0_5 = arith.constant 0 : index
    %c0_6 = arith.constant 0 : index
    %c0_7 = arith.constant 0 : index
    %7 = vector.load %arg3[%c0_5, %c0_6, %c0_7] : memref<2x1x32xf32, #tpu.memory_space<vmem>>, vector<1x1x32xf32>
    %8 = vector.shape_cast %7 : vector<1x1x32xf32> to vector<1x32xf32>
    %c0_8 = arith.constant 0 : index
    %c0_9 = arith.constant 0 : index
    %c0_10 = arith.constant 0 : index
    %9 = vector.load %arg4[%c0_8, %c0_9, %c0_10] : memref<2x1x32xf32, #tpu.memory_space<vmem>>, vector<1x1x32xf32>
    %10 = vector.shape_cast %9 : vector<1x1x32xf32> to vector<1x32xf32>
    %cst_11 = arith.constant dense<0.000000e+00> : vector<64xf32>
    %11 = vector.multi_reduction <add>, %6, %cst_11 [1] : vector<64x32xf32> to vector<64xf32>
    %12 = vector.shape_cast %11 : vector<64xf32> to vector<64x1xf32>
    %cst_12 = arith.constant 3.200000e+01 : f32
    %13 = vector.broadcast %cst_12 : f32 to vector<64x1xf32>
    %14 = arith.divf %12, %13 : vector<64x1xf32>
    %15 = vector.broadcast %14 : vector<64x1xf32> to vector<64x32xf32>
    %16 = arith.subf %6, %15 : vector<64x32xf32>
    %17 = arith.mulf %16, %16 : vector<64x32xf32>
    %cst_13 = arith.constant dense<0.000000e+00> : vector<64xf32>
    %18 = vector.multi_reduction <add>, %17, %cst_13 [1] : vector<64x32xf32> to vector<64xf32>
    %19 = vector.shape_cast %18 : vector<64xf32> to vector<64x1xf32>
    %cst_14 = arith.constant 3.200000e+01 : f32
    %20 = vector.broadcast %cst_14 : f32 to vector<64x1xf32>
    %21 = arith.divf %19, %20 : vector<64x1xf32>
    %22 = vector.broadcast %14 : vector<64x1xf32> to vector<64x32xf32>
    %23 = arith.subf %6, %22 : vector<64x32xf32>
    %cst_15 = arith.constant 9.99999974E-6 : f32
    %24 = vector.broadcast %cst_15 : f32 to vector<64x1xf32>
    %25 = arith.addf %21, %24 : vector<64x1xf32>
    %26 = math.rsqrt %25 : vector<64x1xf32>
    %27 = vector.broadcast %26 : vector<64x1xf32> to vector<64x32xf32>
    %28 = arith.mulf %23, %27 : vector<64x32xf32>
    %29 = vector.broadcast %8 : vector<1x32xf32> to vector<64x32xf32>
    %30 = arith.mulf %28, %29 : vector<64x32xf32>
    %31 = vector.broadcast %10 : vector<1x32xf32> to vector<64x32xf32>
    %32 = arith.addf %30, %31 : vector<64x32xf32>
    %c0_16 = arith.constant 0 : index
    %c0_17 = arith.constant 0 : index
    %c0_18 = arith.constant 0 : index
    %33 = vector.load %arg7[%c0_16, %c0_17, %c0_18] : memref<2x32x96xbf16, #tpu.memory_space<vmem>>, vector<1x32x96xbf16>
    %34 = vector.shape_cast %33 : vector<1x32x96xbf16> to vector<32x96xbf16>
    %35 = arith.truncf %32 : vector<64x32xf32> to vector<64x32xbf16>
    %cst_19 = arith.constant dense<0.000000e+00> : vector<64x96xf32>
    %36 = tpu.matmul %35, %34, %cst_19 {dimension_numbers = #tpu.dot_dimension_numbers<[1], [0], [0], [1], [0, 0, 1, 1], [], []>} : vector<64x32xbf16>, vector<32x96xbf16>, vector<64x96xf32> -> vector<64x96xf32>
    %37 = vector.extract_strided_slice %36 {offsets = [0, 0], sizes = [64, 32], strides = [1, 1]} : vector<64x96xf32> to vector<64x32xf32>
    %38 = vector.extract_strided_slice %36 {offsets = [0, 32], sizes = [64, 32], strides = [1, 1]} : vector<64x96xf32> to vector<64x32xf32>
    %39 = vector.extract_strided_slice %36 {offsets = [0, 64], sizes = [64, 32], strides = [1, 1]} : vector<64x96xf32> to vector<64x32xf32>
    %cst_20 = arith.constant 0.000000e+00 : f32
    %40 = vector.broadcast %cst_20 : f32 to vector<64x32xf32>
    %41 = arith.subf %40, %39 : vector<64x32xf32>
    %42 = math.exp %41 : vector<64x32xf32>
    %cst_21 = arith.constant 1.000000e+00 : f32
    %43 = vector.broadcast %cst_21 : f32 to vector<64x32xf32>
    %44 = arith.addf %43, %42 : vector<64x32xf32>
    %45 = tpu.reciprocal %44 {approx = true} : vector<64x32xf32> -> vector<64x32xf32>
    %c0_22 = arith.constant 0 : index
    %c0_23 = arith.constant 0 : index
    %c0_24 = arith.constant 0 : index
    %46 = vector.load %arg5[%c0_22, %c0_23, %c0_24] : memref<2x1x32xf32, #tpu.memory_space<vmem>>, vector<1x1x32xf32>
    %47 = vector.shape_cast %46 : vector<1x1x32xf32> to vector<1x32xf32>
    %c0_25 = arith.constant 0 : index
    %c0_26 = arith.constant 0 : index
    %c0_27 = arith.constant 0 : index
    %48 = vector.load %arg6[%c0_25, %c0_26, %c0_27] : memref<2x1x32xf32, #tpu.memory_space<vmem>>, vector<1x1x32xf32>
    %49 = vector.shape_cast %48 : vector<1x1x32xf32> to vector<1x32xf32>
    %cst_28 = arith.constant 0.000000e+00 : f32
    %50 = vector.broadcast %cst_28 : f32 to vector<8x32xf32>
    %cst_29 = arith.constant 0.000000e+00 : f32
    %51 = vector.broadcast %cst_29 : f32 to vector<8x32xf32>
    %cst_30 = arith.constant -9.99999968E+37 : f32
    %52 = vector.broadcast %cst_30 : f32 to vector<8x32xf32>
    %53 = vector.extract_strided_slice %37 {offsets = [0, 0], sizes = [8, 32], strides = [1, 1]} : vector<64x32xf32> to vector<8x32xf32>
    %54 = vector.extract_strided_slice %38 {offsets = [0, 0], sizes = [8, 32], strides = [1, 1]} : vector<64x32xf32> to vector<8x32xf32>
    %55 = vector.broadcast %49 : vector<1x32xf32> to vector<8x32xf32>
    %56 = arith.addf %55, %53 : vector<8x32xf32>
    %57 = arith.maximumf %52, %56 : vector<8x32xf32>
    %58 = vector.broadcast %47 : vector<1x32xf32> to vector<8x32xf32>
    %59 = arith.subf %52, %58 : vector<8x32xf32>
    %60 = arith.maximumf %59, %53 : vector<8x32xf32>
    %61 = arith.subf %52, %57 : vector<8x32xf32>
    %62 = arith.subf %56, %57 : vector<8x32xf32>
    %63 = arith.subf %59, %60 : vector<8x32xf32>
    %64 = arith.subf %53, %60 : vector<8x32xf32>
    %65 = tpu.concatenate %61, %62, %63, %64 in 1 : vector<8x32xf32>, vector<8x32xf32>, vector<8x32xf32>, vector<8x32xf32> -> vector<8x128xf32>
    %66 = math.exp %65 : vector<8x128xf32>
    %67 = vector.extract_strided_slice %66 {offsets = [0, 0], sizes = [8, 32], strides = [1, 1]} : vector<8x128xf32> to vector<8x32xf32>
    %68 = vector.extract_strided_slice %66 {offsets = [0, 32], sizes = [8, 32], strides = [1, 1]} : vector<8x128xf32> to vector<8x32xf32>
    %69 = vector.extract_strided_slice %66 {offsets = [0, 64], sizes = [8, 32], strides = [1, 1]} : vector<8x128xf32> to vector<8x32xf32>
    %70 = vector.extract_strided_slice %66 {offsets = [0, 96], sizes = [8, 32], strides = [1, 1]} : vector<8x128xf32> to vector<8x32xf32>
    %71 = arith.mulf %67, %50 : vector<8x32xf32>
    %72 = arith.mulf %68, %54 : vector<8x32xf32>
    %73 = arith.addf %71, %72 : vector<8x32xf32>
    %74 = arith.mulf %67, %51 : vector<8x32xf32>
    %75 = arith.addf %74, %68 : vector<8x32xf32>
    %76 = tpu.reciprocal %75 {approx = true} : vector<8x32xf32> -> vector<8x32xf32>
    %77 = arith.mulf %73, %76 : vector<8x32xf32>
    %c0_31 = arith.constant 0 : index
    %c0_32 = arith.constant 0 : index
    %78 = vector.load %arg30[%c0_31, %c0_32] : memref<64x32xf32, #tpu.memory_space<vmem>>, vector<8x32xf32>
    tpu.vector_store %arg30[%c0_31, %c0_32], %77 {strides = array<i32>} : memref<64x32xf32, #tpu.memory_space<vmem>>, vector<8x32xf32>,
    %79 = arith.mulf %69, %50 : vector<8x32xf32>
    %80 = arith.mulf %70, %54 : vector<8x32xf32>
    %81 = arith.addf %79, %80 : vector<8x32xf32>
    %82 = arith.mulf %69, %51 : vector<8x32xf32>
    %83 = arith.addf %82, %70 : vector<8x32xf32>
    %84 = vector.extract_strided_slice %37 {offsets = [8, 0], sizes = [8, 32], strides = [1, 1]} : vector<64x32xf32> to vector<8x32xf32>
    %85 = vector.extract_strided_slice %38 {offsets = [8, 0], sizes = [8, 32], strides = [1, 1]} : vector<64x32xf32> to vector<8x32xf32>
    %86 = vector.broadcast %49 : vector<1x32xf32> to vector<8x32xf32>
    %87 = arith.addf %86, %84 : vector<8x32xf32>
    %88 = arith.maximumf %60, %87 : vector<8x32xf32>
    %89 = vector.broadcast %47 : vector<1x32xf32> to vector<8x32xf32>
    %90 = arith.subf %60, %89 : vector<8x32xf32>
    %91 = arith.maximumf %90, %84 : vector<8x32xf32>
    %92 = arith.subf %60, %88 : vector<8x32xf32>
    %93 = arith.subf %87, %88 : vector<8x32xf32>
    %94 = arith.subf %90, %91 : vector<8x32xf32>
    %95 = arith.subf %84, %91 : vector<8x32xf32>
    %96 = tpu.concatenate %92, %93, %94, %95 in 1 : vector<8x32xf32>, vector<8x32xf32>, vector<8x32xf32>, vector<8x32xf32> -> vector<8x128xf32>
    %97 = math.exp %96 : vector<8x128xf32>
    %98 = vector.extract_strided_slice %97 {offsets = [0, 0], sizes = [8, 32], strides = [1, 1]} : vector<8x128xf32> to vector<8x32xf32>
    %99 = vector.extract_strided_slice %97 {offsets = [0, 32], sizes = [8, 32], strides = [1, 1]} : vector<8x128xf32> to vector<8x32xf32>
    %100 = vector.extract_strided_slice %97 {offsets = [0, 64], sizes = [8, 32], strides = [1, 1]} : vector<8x128xf32> to vector<8x32xf32>
    %101 = vector.extract_strided_slice %97 {offsets = [0, 96], sizes = [8, 32], strides = [1, 1]} : vector<8x128xf32> to vector<8x32xf32>
    %102 = arith.mulf %98, %81 : vector<8x32xf32>
    %103 = arith.mulf %99, %85 : vector<8x32xf32>
    %104 = arith.addf %102, %103 : vector<8x32xf32>
    %105 = arith.mulf %98, %83 : vector<8x32xf32>
    %106 = arith.addf %105, %99 : vector<8x32xf32>
    %107 = tpu.reciprocal %106 {approx = true} : vector<8x32xf32> -> vector<8x32xf32>
    %108 = arith.mulf %104, %107 : vector<8x32xf32>
    %c8 = arith.constant 8 : index
    %c0_33 = arith.constant 0 : index
    %109 = vector.load %arg30[%c8, %c0_33] : memref<64x32xf32, #tpu.memory_space<vmem>>, vector<8x32xf32>
    tpu.vector_store %arg30[%c8, %c0_33], %108 {strides = array<i32>} : memref<64x32xf32, #tpu.memory_space<vmem>>, vector<8x32xf32>,
    %110 = arith.mulf %100, %81 : vector<8x32xf32>
    %111 = arith.mulf %101, %85 : vector<8x32xf32>
    %112 = arith.addf %110, %111 : vector<8x32xf32>
    %113 = arith.mulf %100, %83 : vector<8x32xf32>
    %114 = arith.addf %113, %101 : vector<8x32xf32>
    %115 = vector.extract_strided_slice %37 {offsets = [16, 0], sizes = [8, 32], strides = [1, 1]} : vector<64x32xf32> to vector<8x32xf32>
    %116 = vector.extract_strided_slice %38 {offsets = [16, 0], sizes = [8, 32], strides = [1, 1]} : vector<64x32xf32> to vector<8x32xf32>
    %117 = vector.broadcast %49 : vector<1x32xf32> to vector<8x32xf32>
    %118 = arith.addf %117, %115 : vector<8x32xf32>
    %119 = arith.maximumf %91, %118 : vector<8x32xf32>
    %120 = vector.broadcast %47 : vector<1x32xf32> to vector<8x32xf32>
    %121 = arith.subf %91, %120 : vector<8x32xf32>
    %122 = arith.maximumf %121, %115 : vector<8x32xf32>
    %123 = arith.subf %91, %119 : vector<8x32xf32>
    %124 = arith.subf %118, %119 : vector<8x32xf32>
    %125 = arith.subf %121, %122 : vector<8x32xf32>
    %126 = arith.subf %115, %122 : vector<8x32xf32>
    %127 = tpu.concatenate %123, %124, %125, %126 in 1 : vector<8x32xf32>, vector<8x32xf32>, vector<8x32xf32>, vector<8x32xf32> -> vector<8x128xf32>
    %128 = math.exp %127 : vector<8x128xf32>
    %129 = vector.extract_strided_slice %128 {offsets = [0, 0], sizes = [8, 32], strides = [1, 1]} : vector<8x128xf32> to vector<8x32xf32>
    %130 = vector.extract_strided_slice %128 {offsets = [0, 32], sizes = [8, 32], strides = [1, 1]} : vector<8x128xf32> to vector<8x32xf32>
    %131 = vector.extract_strided_slice %128 {offsets = [0, 64], sizes = [8, 32], strides = [1, 1]} : vector<8x128xf32> to vector<8x32xf32>
    %132 = vector.extract_strided_slice %128 {offsets = [0, 96], sizes = [8, 32], strides = [1, 1]} : vector<8x128xf32> to vector<8x32xf32>
    %133 = arith.mulf %129, %112 : vector<8x32xf32>
    %134 = arith.mulf %130, %116 : vector<8x32xf32>
    %135 = arith.addf %133, %134 : vector<8x32xf32>
    %136 = arith.mulf %129, %114 : vector<8x32xf32>
    %137 = arith.addf %136, %130 : vector<8x32xf32>
    %138 = tpu.reciprocal %137 {approx = true} : vector<8x32xf32> -> vector<8x32xf32>
    %139 = arith.mulf %135, %138 : vector<8x32xf32>
    %c16 = arith.constant 16 : index
    %c0_34 = arith.constant 0 : index
    %140 = vector.load %arg30[%c16, %c0_34] : memref<64x32xf32, #tpu.memory_space<vmem>>, vector<8x32xf32>
    tpu.vector_store %arg30[%c16, %c0_34], %139 {strides = array<i32>} : memref<64x32xf32, #tpu.memory_space<vmem>>, vector<8x32xf32>,
    %141 = arith.mulf %131, %112 : vector<8x32xf32>
    %142 = arith.mulf %132, %116 : vector<8x32xf32>
    %143 = arith.addf %141, %142 : vector<8x32xf32>
    %144 = arith.mulf %131, %114 : vector<8x32xf32>
    %145 = arith.addf %144, %132 : vector<8x32xf32>
    %146 = vector.extract_strided_slice %37 {offsets = [24, 0], sizes = [8, 32], strides = [1, 1]} : vector<64x32xf32> to vector<8x32xf32>
    %147 = vector.extract_strided_slice %38 {offsets = [24, 0], sizes = [8, 32], strides = [1, 1]} : vector<64x32xf32> to vector<8x32xf32>
    %148 = vector.broadcast %49 : vector<1x32xf32> to vector<8x32xf32>
    %149 = arith.addf %148, %146 : vector<8x32xf32>
    %150 = arith.maximumf %122, %149 : vector<8x32xf32>
    %151 = vector.broadcast %47 : vector<1x32xf32> to vector<8x32xf32>
    %152 = arith.subf %122, %151 : vector<8x32xf32>
    %153 = arith.maximumf %152, %146 : vector<8x32xf32>
    %154 = arith.subf %122, %150 : vector<8x32xf32>
    %155 = arith.subf %149, %150 : vector<8x32xf32>
    %156 = arith.subf %152, %153 : vector<8x32xf32>
    %157 = arith.subf %146, %153 : vector<8x32xf32>
    %158 = tpu.concatenate %154, %155, %156, %157 in 1 : vector<8x32xf32>, vector<8x32xf32>, vector<8x32xf32>, vector<8x32xf32> -> vector<8x128xf32>
    %159 = math.exp %158 : vector<8x128xf32>
    %160 = vector.extract_strided_slice %159 {offsets = [0, 0], sizes = [8, 32], strides = [1, 1]} : vector<8x128xf32> to vector<8x32xf32>
    %161 = vector.extract_strided_slice %159 {offsets = [0, 32], sizes = [8, 32], strides = [1, 1]} : vector<8x128xf32> to vector<8x32xf32>
    %162 = vector.extract_strided_slice %159 {offsets = [0, 64], sizes = [8, 32], strides = [1, 1]} : vector<8x128xf32> to vector<8x32xf32>
    %163 = vector.extract_strided_slice %159 {offsets = [0, 96], sizes = [8, 32], strides = [1, 1]} : vector<8x128xf32> to vector<8x32xf32>
    %164 = arith.mulf %160, %143 : vector<8x32xf32>
    %165 = arith.mulf %161, %147 : vector<8x32xf32>
    %166 = arith.addf %164, %165 : vector<8x32xf32>
    %167 = arith.mulf %160, %145 : vector<8x32xf32>
    %168 = arith.addf %167, %161 : vector<8x32xf32>
    %169 = tpu.reciprocal %168 {approx = true} : vector<8x32xf32> -> vector<8x32xf32>
    %170 = arith.mulf %166, %169 : vector<8x32xf32>
    %c24 = arith.constant 24 : index
    %c0_35 = arith.constant 0 : index
    %171 = vector.load %arg30[%c24, %c0_35] : memref<64x32xf32, #tpu.memory_space<vmem>>, vector<8x32xf32>
    tpu.vector_store %arg30[%c24, %c0_35], %170 {strides = array<i32>} : memref<64x32xf32, #tpu.memory_space<vmem>>, vector<8x32xf32>,
    %172 = arith.mulf %162, %143 : vector<8x32xf32>
    %173 = arith.mulf %163, %147 : vector<8x32xf32>
    %174 = arith.addf %172, %173 : vector<8x32xf32>
    %175 = arith.mulf %162, %145 : vector<8x32xf32>
    %176 = arith.addf %175, %163 : vector<8x32xf32>
    %177 = vector.extract_strided_slice %37 {offsets = [32, 0], sizes = [8, 32], strides = [1, 1]} : vector<64x32xf32> to vector<8x32xf32>
    %178 = vector.extract_strided_slice %38 {offsets = [32, 0], sizes = [8, 32], strides = [1, 1]} : vector<64x32xf32> to vector<8x32xf32>
    %179 = vector.broadcast %49 : vector<1x32xf32> to vector<8x32xf32>
    %180 = arith.addf %179, %177 : vector<8x32xf32>
    %181 = arith.maximumf %153, %180 : vector<8x32xf32>
    %182 = vector.broadcast %47 : vector<1x32xf32> to vector<8x32xf32>
    %183 = arith.subf %153, %182 : vector<8x32xf32>
    %184 = arith.maximumf %183, %177 : vector<8x32xf32>
    %185 = arith.subf %153, %181 : vector<8x32xf32>
    %186 = arith.subf %180, %181 : vector<8x32xf32>
    %187 = arith.subf %183, %184 : vector<8x32xf32>
    %188 = arith.subf %177, %184 : vector<8x32xf32>
    %189 = tpu.concatenate %185, %186, %187, %188 in 1 : vector<8x32xf32>, vector<8x32xf32>, vector<8x32xf32>, vector<8x32xf32> -> vector<8x128xf32>
    %190 = math.exp %189 : vector<8x128xf32>
    %191 = vector.extract_strided_slice %190 {offsets = [0, 0], sizes = [8, 32], strides = [1, 1]} : vector<8x128xf32> to vector<8x32xf32>
    %192 = vector.extract_strided_slice %190 {offsets = [0, 32], sizes = [8, 32], strides = [1, 1]} : vector<8x128xf32> to vector<8x32xf32>
    %193 = vector.extract_strided_slice %190 {offsets = [0, 64], sizes = [8, 32], strides = [1, 1]} : vector<8x128xf32> to vector<8x32xf32>
    %194 = vector.extract_strided_slice %190 {offsets = [0, 96], sizes = [8, 32], strides = [1, 1]} : vector<8x128xf32> to vector<8x32xf32>
    %195 = arith.mulf %191, %174 : vector<8x32xf32>
    %196 = arith.mulf %192, %178 : vector<8x32xf32>
    %197 = arith.addf %195, %196 : vector<8x32xf32>
    %198 = arith.mulf %191, %176 : vector<8x32xf32>
    %199 = arith.addf %198, %192 : vector<8x32xf32>
    %200 = tpu.reciprocal %199 {approx = true} : vector<8x32xf32> -> vector<8x32xf32>
    %201 = arith.mulf %197, %200 : vector<8x32xf32>
    %c32 = arith.constant 32 : index
    %c0_36 = arith.constant 0 : index
    %202 = vector.load %arg30[%c32, %c0_36] : memref<64x32xf32, #tpu.memory_space<vmem>>, vector<8x32xf32>
    tpu.vector_store %arg30[%c32, %c0_36], %201 {strides = array<i32>} : memref<64x32xf32, #tpu.memory_space<vmem>>, vector<8x32xf32>,
    %203 = arith.mulf %193, %174 : vector<8x32xf32>
    %204 = arith.mulf %194, %178 : vector<8x32xf32>
    %205 = arith.addf %203, %204 : vector<8x32xf32>
    %206 = arith.mulf %193, %176 : vector<8x32xf32>
    %207 = arith.addf %206, %194 : vector<8x32xf32>
    %208 = vector.extract_strided_slice %37 {offsets = [40, 0], sizes = [8, 32], strides = [1, 1]} : vector<64x32xf32> to vector<8x32xf32>
    %209 = vector.extract_strided_slice %38 {offsets = [40, 0], sizes = [8, 32], strides = [1, 1]} : vector<64x32xf32> to vector<8x32xf32>
    %210 = vector.broadcast %49 : vector<1x32xf32> to vector<8x32xf32>
    %211 = arith.addf %210, %208 : vector<8x32xf32>
    %212 = arith.maximumf %184, %211 : vector<8x32xf32>
    %213 = vector.broadcast %47 : vector<1x32xf32> to vector<8x32xf32>
    %214 = arith.subf %184, %213 : vector<8x32xf32>
    %215 = arith.maximumf %214, %208 : vector<8x32xf32>
    %216 = arith.subf %184, %212 : vector<8x32xf32>
    %217 = arith.subf %211, %212 : vector<8x32xf32>
    %218 = arith.subf %214, %215 : vector<8x32xf32>
    %219 = arith.subf %208, %215 : vector<8x32xf32>
    %220 = tpu.concatenate %216, %217, %218, %219 in 1 : vector<8x32xf32>, vector<8x32xf32>, vector<8x32xf32>, vector<8x32xf32> -> vector<8x128xf32>
    %221 = math.exp %220 : vector<8x128xf32>
    %222 = vector.extract_strided_slice %221 {offsets = [0, 0], sizes = [8, 32], strides = [1, 1]} : vector<8x128xf32> to vector<8x32xf32>
    %223 = vector.extract_strided_slice %221 {offsets = [0, 32], sizes = [8, 32], strides = [1, 1]} : vector<8x128xf32> to vector<8x32xf32>
    %224 = vector.extract_strided_slice %221 {offsets = [0, 64], sizes = [8, 32], strides = [1, 1]} : vector<8x128xf32> to vector<8x32xf32>
    %225 = vector.extract_strided_slice %221 {offsets = [0, 96], sizes = [8, 32], strides = [1, 1]} : vector<8x128xf32> to vector<8x32xf32>
    %226 = arith.mulf %222, %205 : vector<8x32xf32>
    %227 = arith.mulf %223, %209 : vector<8x32xf32>
    %228 = arith.addf %226, %227 : vector<8x32xf32>
    %229 = arith.mulf %222, %207 : vector<8x32xf32>
    %230 = arith.addf %229, %223 : vector<8x32xf32>
    %231 = tpu.reciprocal %230 {approx = true} : vector<8x32xf32> -> vector<8x32xf32>
    %232 = arith.mulf %228, %231 : vector<8x32xf32>
    %c40 = arith.constant 40 : index
    %c0_37 = arith.constant 0 : index
    %233 = vector.load %arg30[%c40, %c0_37] : memref<64x32xf32, #tpu.memory_space<vmem>>, vector<8x32xf32>
    tpu.vector_store %arg30[%c40, %c0_37], %232 {strides = array<i32>} : memref<64x32xf32, #tpu.memory_space<vmem>>, vector<8x32xf32>,
    %234 = arith.mulf %224, %205 : vector<8x32xf32>
    %235 = arith.mulf %225, %209 : vector<8x32xf32>
    %236 = arith.addf %234, %235 : vector<8x32xf32>
    %237 = arith.mulf %224, %207 : vector<8x32xf32>
    %238 = arith.addf %237, %225 : vector<8x32xf32>
    %239 = vector.extract_strided_slice %37 {offsets = [48, 0], sizes = [8, 32], strides = [1, 1]} : vector<64x32xf32> to vector<8x32xf32>
    %240 = vector.extract_strided_slice %38 {offsets = [48, 0], sizes = [8, 32], strides = [1, 1]} : vector<64x32xf32> to vector<8x32xf32>
    %241 = vector.broadcast %49 : vector<1x32xf32> to vector<8x32xf32>
    %242 = arith.addf %241, %239 : vector<8x32xf32>
    %243 = arith.maximumf %215, %242 : vector<8x32xf32>
    %244 = vector.broadcast %47 : vector<1x32xf32> to vector<8x32xf32>
    %245 = arith.subf %215, %244 : vector<8x32xf32>
    %246 = arith.maximumf %245, %239 : vector<8x32xf32>
    %247 = arith.subf %215, %243 : vector<8x32xf32>
    %248 = arith.subf %242, %243 : vector<8x32xf32>
    %249 = arith.subf %245, %246 : vector<8x32xf32>
    %250 = arith.subf %239, %246 : vector<8x32xf32>
    %251 = tpu.concatenate %247, %248, %249, %250 in 1 : vector<8x32xf32>, vector<8x32xf32>, vector<8x32xf32>, vector<8x32xf32> -> vector<8x128xf32>
    %252 = math.exp %251 : vector<8x128xf32>
    %253 = vector.extract_strided_slice %252 {offsets = [0, 0], sizes = [8, 32], strides = [1, 1]} : vector<8x128xf32> to vector<8x32xf32>
    %254 = vector.extract_strided_slice %252 {offsets = [0, 32], sizes = [8, 32], strides = [1, 1]} : vector<8x128xf32> to vector<8x32xf32>
    %255 = vector.extract_strided_slice %252 {offsets = [0, 64], sizes = [8, 32], strides = [1, 1]} : vector<8x128xf32> to vector<8x32xf32>
    %256 = vector.extract_strided_slice %252 {offsets = [0, 96], sizes = [8, 32], strides = [1, 1]} : vector<8x128xf32> to vector<8x32xf32>
    %257 = arith.mulf %253, %236 : vector<8x32xf32>
    %258 = arith.mulf %254, %240 : vector<8x32xf32>
    %259 = arith.addf %257, %258 : vector<8x32xf32>
    %260 = arith.mulf %253, %238 : vector<8x32xf32>
    %261 = arith.addf %260, %254 : vector<8x32xf32>
    %262 = tpu.reciprocal %261 {approx = true} : vector<8x32xf32> -> vector<8x32xf32>
    %263 = arith.mulf %259, %262 : vector<8x32xf32>
    %c48 = arith.constant 48 : index
    %c0_38 = arith.constant 0 : index
    %264 = vector.load %arg30[%c48, %c0_38] : memref<64x32xf32, #tpu.memory_space<vmem>>, vector<8x32xf32>
    tpu.vector_store %arg30[%c48, %c0_38], %263 {strides = array<i32>} : memref<64x32xf32, #tpu.memory_space<vmem>>, vector<8x32xf32>,
    %265 = arith.mulf %255, %236 : vector<8x32xf32>
    %266 = arith.mulf %256, %240 : vector<8x32xf32>
    %267 = arith.addf %265, %266 : vector<8x32xf32>
    %268 = arith.mulf %255, %238 : vector<8x32xf32>
    %269 = arith.addf %268, %256 : vector<8x32xf32>
    %270 = vector.extract_strided_slice %37 {offsets = [56, 0], sizes = [8, 32], strides = [1, 1]} : vector<64x32xf32> to vector<8x32xf32>
    %271 = vector.extract_strided_slice %38 {offsets = [56, 0], sizes = [8, 32], strides = [1, 1]} : vector<64x32xf32> to vector<8x32xf32>
    %272 = vector.broadcast %49 : vector<1x32xf32> to vector<8x32xf32>
    %273 = arith.addf %272, %270 : vector<8x32xf32>
    %274 = arith.maximumf %246, %273 : vector<8x32xf32>
    %275 = vector.broadcast %47 : vector<1x32xf32> to vector<8x32xf32>
    %276 = arith.subf %246, %275 : vector<8x32xf32>
    %277 = arith.maximumf %276, %270 : vector<8x32xf32>
    %278 = arith.subf %246, %274 : vector<8x32xf32>
    %279 = arith.subf %273, %274 : vector<8x32xf32>
    %280 = arith.subf %276, %277 : vector<8x32xf32>
    %281 = arith.subf %270, %277 : vector<8x32xf32>
    %282 = tpu.concatenate %278, %279, %280, %281 in 1 : vector<8x32xf32>, vector<8x32xf32>, vector<8x32xf32>, vector<8x32xf32> -> vector<8x128xf32>
    %283 = math.exp %282 : vector<8x128xf32>
    %284 = vector.extract_strided_slice %283 {offsets = [0, 0], sizes = [8, 32], strides = [1, 1]} : vector<8x128xf32> to vector<8x32xf32>
    %285 = vector.extract_strided_slice %283 {offsets = [0, 32], sizes = [8, 32], strides = [1, 1]} : vector<8x128xf32> to vector<8x32xf32>
    %286 = vector.extract_strided_slice %283 {offsets = [0, 64], sizes = [8, 32], strides = [1, 1]} : vector<8x128xf32> to vector<8x32xf32>
    %287 = vector.extract_strided_slice %283 {offsets = [0, 96], sizes = [8, 32], strides = [1, 1]} : vector<8x128xf32> to vector<8x32xf32>
    %288 = arith.mulf %284, %267 : vector<8x32xf32>
    %289 = arith.mulf %285, %271 : vector<8x32xf32>
    %290 = arith.addf %288, %289 : vector<8x32xf32>
    %291 = arith.mulf %284, %269 : vector<8x32xf32>
    %292 = arith.addf %291, %285 : vector<8x32xf32>
    %293 = tpu.reciprocal %292 {approx = true} : vector<8x32xf32> -> vector<8x32xf32>
    %294 = arith.mulf %290, %293 : vector<8x32xf32>
    %c56 = arith.constant 56 : index
    %c0_39 = arith.constant 0 : index
    %295 = vector.load %arg30[%c56, %c0_39] : memref<64x32xf32, #tpu.memory_space<vmem>>, vector<8x32xf32>
    tpu.vector_store %arg30[%c56, %c0_39], %294 {strides = array<i32>} : memref<64x32xf32, #tpu.memory_space<vmem>>, vector<8x32xf32>,
    %296 = arith.mulf %286, %267 : vector<8x32xf32>
    %297 = arith.mulf %287, %271 : vector<8x32xf32>
    %298 = arith.addf %296, %297 : vector<8x32xf32>
    %299 = arith.mulf %286, %269 : vector<8x32xf32>
    %300 = arith.addf %299, %287 : vector<8x32xf32>
    %c0_40 = arith.constant 0 : index
    %c0_41 = arith.constant 0 : index
    %c0_42 = arith.constant 0 : index
    %301 = vector.load %arg26[%c0_40, %c0_41, %c0_42] : memref<2x8x32xf32, #tpu.memory_space<vmem>>, vector<1x8x32xf32>
    %302 = vector.shape_cast %301 : vector<1x8x32xf32> to vector<8x32xf32>
    %303 = vector.shape_cast %298 : vector<8x32xf32> to vector<1x8x32xf32>
    tpu.vector_store %arg26[%c0_40, %c0_41, %c0_42], %303 {strides = array<i32>} : memref<2x8x32xf32, #tpu.memory_space<vmem>>, vector<1x8x32xf32>,
    %c0_43 = arith.constant 0 : index
    %c0_44 = arith.constant 0 : index
    %c0_45 = arith.constant 0 : index
    %304 = vector.load %arg27[%c0_43, %c0_44, %c0_45] : memref<2x8x32xf32, #tpu.memory_space<vmem>>, vector<1x8x32xf32>
    %305 = vector.shape_cast %304 : vector<1x8x32xf32> to vector<8x32xf32>
    %306 = vector.shape_cast %300 : vector<8x32xf32> to vector<1x8x32xf32>
    tpu.vector_store %arg27[%c0_43, %c0_44, %c0_45], %306 {strides = array<i32>} : memref<2x8x32xf32, #tpu.memory_space<vmem>>, vector<1x8x32xf32>,
    %c0_46 = arith.constant 0 : index
    %c0_47 = arith.constant 0 : index
    %c0_48 = arith.constant 0 : index
    %307 = vector.load %arg28[%c0_46, %c0_47, %c0_48] : memref<2x8x32xf32, #tpu.memory_space<vmem>>, vector<1x8x32xf32>
    %308 = vector.shape_cast %307 : vector<1x8x32xf32> to vector<8x32xf32>
    %309 = vector.shape_cast %277 : vector<8x32xf32> to vector<1x8x32xf32>
    tpu.vector_store %arg28[%c0_46, %c0_47, %c0_48], %309 {strides = array<i32>} : memref<2x8x32xf32, #tpu.memory_space<vmem>>, vector<1x8x32xf32>,
    %c0_49 = arith.constant 0 : index
    %c0_50 = arith.constant 0 : index
    %310 = vector.load %arg30[%c0_49, %c0_50] : memref<64x32xf32, #tpu.memory_space<vmem>>, vector<64x32xf32>
    %311 = arith.mulf %45, %310 : vector<64x32xf32>
    %c0_51 = arith.constant 0 : index
    %c0_52 = arith.constant 0 : index
    %c0_53 = arith.constant 0 : index
    %312 = vector.load %arg8[%c0_51, %c0_52, %c0_53] : memref<2x32x32xbf16, #tpu.memory_space<vmem>>, vector<1x32x32xbf16>
    %313 = vector.shape_cast %312 : vector<1x32x32xbf16> to vector<32x32xbf16>
    %314 = arith.truncf %311 : vector<64x32xf32> to vector<64x32xbf16>
    %cst_54 = arith.constant dense<0.000000e+00> : vector<64x32xf32>
    %315 = tpu.matmul %314, %313, %cst_54 {dimension_numbers = #tpu.dot_dimension_numbers<[1], [0], [0], [1], [0, 0, 1, 1], [], []>} : vector<64x32xbf16>, vector<32x32xbf16>, vector<64x32xf32> -> vector<64x32xf32>
    %316 = arith.addf %6, %315 : vector<64x32xf32>
    %c0_55 = arith.constant 0 : index
    %c0_56 = arith.constant 0 : index
    %c0_57 = arith.constant 0 : index
    %317 = vector.load %arg9[%c0_55, %c0_56, %c0_57] : memref<2x1x32xf32, #tpu.memory_space<vmem>>, vector<1x1x32xf32>
    %318 = vector.shape_cast %317 : vector<1x1x32xf32> to vector<1x32xf32>
    %c0_58 = arith.constant 0 : index
    %c0_59 = arith.constant 0 : index
    %c0_60 = arith.constant 0 : index
    %319 = vector.load %arg10[%c0_58, %c0_59, %c0_60] : memref<2x1x32xf32, #tpu.memory_space<vmem>>, vector<1x1x32xf32>
    %320 = vector.shape_cast %319 : vector<1x1x32xf32> to vector<1x32xf32>
    %cst_61 = arith.constant dense<0.000000e+00> : vector<64xf32>
    %321 = vector.multi_reduction <add>, %316, %cst_61 [1] : vector<64x32xf32> to vector<64xf32>
    %322 = vector.shape_cast %321 : vector<64xf32> to vector<64x1xf32>
    %cst_62 = arith.constant 3.200000e+01 : f32
    %323 = vector.broadcast %cst_62 : f32 to vector<64x1xf32>
    %324 = arith.divf %322, %323 : vector<64x1xf32>
    %325 = vector.broadcast %324 : vector<64x1xf32> to vector<64x32xf32>
    %326 = arith.subf %316, %325 : vector<64x32xf32>
    %327 = arith.mulf %326, %326 : vector<64x32xf32>
    %cst_63 = arith.constant dense<0.000000e+00> : vector<64xf32>
    %328 = vector.multi_reduction <add>, %327, %cst_63 [1] : vector<64x32xf32> to vector<64xf32>
    %329 = vector.shape_cast %328 : vector<64xf32> to vector<64x1xf32>
    %cst_64 = arith.constant 3.200000e+01 : f32
    %330 = vector.broadcast %cst_64 : f32 to vector<64x1xf32>
    %331 = arith.divf %329, %330 : vector<64x1xf32>
    %332 = vector.broadcast %324 : vector<64x1xf32> to vector<64x32xf32>
    %333 = arith.subf %316, %332 : vector<64x32xf32>
    %cst_65 = arith.constant 9.99999974E-6 : f32
    %334 = vector.broadcast %cst_65 : f32 to vector<64x1xf32>
    %335 = arith.addf %331, %334 : vector<64x1xf32>
    %336 = math.rsqrt %335 : vector<64x1xf32>
    %337 = vector.broadcast %336 : vector<64x1xf32> to vector<64x32xf32>
    %338 = arith.mulf %333, %337 : vector<64x32xf32>
    %339 = vector.broadcast %318 : vector<1x32xf32> to vector<64x32xf32>
    %340 = arith.mulf %338, %339 : vector<64x32xf32>
    %341 = vector.broadcast %320 : vector<1x32xf32> to vector<64x32xf32>
    %342 = arith.addf %340, %341 : vector<64x32xf32>
    %c0_66 = arith.constant 0 : index
    %c0_67 = arith.constant 0 : index
    %c0_68 = arith.constant 0 : index
    %343 = vector.load %arg11[%c0_66, %c0_67, %c0_68] : memref<2x1x32xf32, #tpu.memory_space<vmem>>, vector<1x1x32xf32>
    %344 = vector.shape_cast %343 : vector<1x1x32xf32> to vector<1x32xf32>
    %345 = vector.broadcast %344 : vector<1x32xf32> to vector<64x32xf32>
    %346 = arith.mulf %342, %345 : vector<64x32xf32>
    %c0_69 = arith.constant 0 : index
    %c0_70 = arith.constant 0 : index
    %c0_71 = arith.constant 0 : index
    %347 = vector.load %arg12[%c0_69, %c0_70, %c0_71] : memref<2x1x32xf32, #tpu.memory_space<vmem>>, vector<1x1x32xf32>
    %348 = vector.shape_cast %347 : vector<1x1x32xf32> to vector<1x32xf32>
    %349 = vector.broadcast %348 : vector<1x32xf32> to vector<64x32xf32>
    %350 = arith.mulf %342, %349 : vector<64x32xf32>
    %c0_72 = arith.constant 0 : index
    %c0_73 = arith.constant 0 : index
    %c0_74 = arith.constant 0 : index
    %351 = vector.load %arg13[%c0_72, %c0_73, %c0_74] : memref<2x32x32xbf16, #tpu.memory_space<vmem>>, vector<1x32x32xbf16>
    %352 = vector.shape_cast %351 : vector<1x32x32xbf16> to vector<32x32xbf16>
    %353 = arith.truncf %350 : vector<64x32xf32> to vector<64x32xbf16>
    %cst_75 = arith.constant dense<0.000000e+00> : vector<64x32xf32>
    %354 = tpu.matmul %353, %352, %cst_75 {dimension_numbers = #tpu.dot_dimension_numbers<[1], [0], [0], [1], [0, 0, 1, 1], [], []>} : vector<64x32xbf16>, vector<32x32xbf16>, vector<64x32xf32> -> vector<64x32xf32>
    %cst_76 = arith.constant 0.000000e+00 : f32
    %355 = vector.broadcast %cst_76 : f32 to vector<64x32xf32>
    %356 = arith.subf %355, %354 : vector<64x32xf32>
    %357 = math.exp %356 : vector<64x32xf32>
    %cst_77 = arith.constant 1.000000e+00 : f32
    %358 = vector.broadcast %cst_77 : f32 to vector<64x32xf32>
    %359 = arith.addf %358, %357 : vector<64x32xf32>
    %360 = tpu.reciprocal %359 {approx = true} : vector<64x32xf32> -> vector<64x32xf32>
    %c0_78 = arith.constant 0 : index
    %c0_79 = arith.constant 0 : index
    %c0_80 = arith.constant 0 : index
    %361 = vector.load %arg14[%c0_78, %c0_79, %c0_80] : memref<2x32x132xbf16, #tpu.memory_space<vmem>>, vector<1x32x132xbf16>
    %362 = vector.shape_cast %361 : vector<1x32x132xbf16> to vector<32x132xbf16>
    %363 = arith.truncf %346 : vector<64x32xf32> to vector<64x32xbf16>
    %cst_81 = arith.constant dense<0.000000e+00> : vector<64x132xf32>
    %364 = tpu.matmul %363, %362, %cst_81 {dimension_numbers = #tpu.dot_dimension_numbers<[1], [0], [0], [1], [0, 0, 1, 1], [], []>} : vector<64x32xbf16>, vector<32x132xbf16>, vector<64x132xf32> -> vector<64x132xf32>
    %365 = vector.extract_strided_slice %364 {offsets = [0, 0], sizes = [64, 128], strides = [1, 1]} : vector<64x132xf32> to vector<64x128xf32>
    %cst_82 = arith.constant 5.000000e-01 : f32
    %366 = vector.broadcast %cst_82 : f32 to vector<64x128xf32>
    %367 = arith.mulf %366, %365 : vector<64x128xf32>
    %cst_83 = arith.constant 0.707106769 : f32
    %368 = vector.broadcast %cst_83 : f32 to vector<64x128xf32>
    %369 = arith.mulf %365, %368 : vector<64x128xf32>
    %cst_84 = arith.constant 0.000000e+00 : f32
    %370 = vector.broadcast %cst_84 : f32 to vector<64x128xf32>
    %371 = arith.cmpf olt, %369, %370 : vector<64x128xf32>
    %cst_85 = arith.constant -1.000000e+00 : f32
    %cst_86 = arith.constant 1.000000e+00 : f32
    %372 = vector.broadcast %cst_85 : f32 to vector<64x128xf32>
    %373 = vector.broadcast %cst_86 : f32 to vector<64x128xf32>
    %374 = arith.select %371, %372, %373 : vector<64x128xi1>, vector<64x128xf32>
    %375 = math.absf %369 : vector<64x128xf32>
    %cst_87 = arith.constant 0.327591091 : f32
    %376 = vector.broadcast %cst_87 : f32 to vector<64x128xf32>
    %377 = arith.mulf %376, %375 : vector<64x128xf32>
    %cst_88 = arith.constant 1.000000e+00 : f32
    %378 = vector.broadcast %cst_88 : f32 to vector<64x128xf32>
    %379 = arith.addf %378, %377 : vector<64x128xf32>
    %380 = tpu.reciprocal %379 {approx = true} : vector<64x128xf32> -> vector<64x128xf32>
    %cst_89 = arith.constant 1.06140542 : f32
    %381 = vector.broadcast %cst_89 : f32 to vector<64x128xf32>
    %382 = arith.mulf %381, %380 : vector<64x128xf32>
    %cst_90 = arith.constant -1.45315206 : f32
    %383 = vector.broadcast %cst_90 : f32 to vector<64x128xf32>
    %384 = arith.addf %382, %383 : vector<64x128xf32>
    %385 = arith.mulf %384, %380 : vector<64x128xf32>
    %cst_91 = arith.constant 1.42141378 : f32
    %386 = vector.broadcast %cst_91 : f32 to vector<64x128xf32>
    %387 = arith.addf %385, %386 : vector<64x128xf32>
    %388 = arith.mulf %387, %380 : vector<64x128xf32>
    %cst_92 = arith.constant -0.284496725 : f32
    %389 = vector.broadcast %cst_92 : f32 to vector<64x128xf32>
    %390 = arith.addf %388, %389 : vector<64x128xf32>
    %391 = arith.mulf %390, %380 : vector<64x128xf32>
    %cst_93 = arith.constant 0.254829586 : f32
    %392 = vector.broadcast %cst_93 : f32 to vector<64x128xf32>
    %393 = arith.addf %391, %392 : vector<64x128xf32>
    %394 = arith.mulf %393, %380 : vector<64x128xf32>
    %cst_94 = arith.constant 0.000000e+00 : f32
    %395 = vector.broadcast %cst_94 : f32 to vector<64x128xf32>
    %396 = arith.subf %395, %375 : vector<64x128xf32>
    %397 = arith.mulf %396, %375 : vector<64x128xf32>
    %398 = math.exp %397 : vector<64x128xf32>
    %399 = arith.mulf %394, %398 : vector<64x128xf32>
    %cst_95 = arith.constant 1.000000e+00 : f32
    %400 = vector.broadcast %cst_95 : f32 to vector<64x128xf32>
    %401 = arith.subf %400, %399 : vector<64x128xf32>
    %402 = arith.mulf %374, %401 : vector<64x128xf32>
    %cst_96 = arith.constant 1.000000e+00 : f32
    %403 = vector.broadcast %cst_96 : f32 to vector<64x128xf32>
    %404 = arith.addf %403, %402 : vector<64x128xf32>
    %405 = arith.mulf %367, %404 : vector<64x128xf32>
    %406 = vector.extract_strided_slice %364 {offsets = [0, 128], sizes = [64, 4], strides = [1, 1]} : vector<64x132xf32> to vector<64x4xf32>
    %cst_97 = arith.constant 5.000000e-01 : f32
    %407 = vector.broadcast %cst_97 : f32 to vector<64x4xf32>
    %408 = arith.mulf %407, %406 : vector<64x4xf32>
    %409 = math.cos %408 : vector<64x4xf32>
    %cst_98 = arith.constant 5.000000e-01 : f32
    %410 = vector.broadcast %cst_98 : f32 to vector<64x4xf32>
    %411 = arith.mulf %410, %406 : vector<64x4xf32>
    %412 = math.sin %411 : vector<64x4xf32>
    %413 = vector.extract_strided_slice %409 {offsets = [0, 0], sizes = [64, 1], strides = [1, 1]} : vector<64x4xf32> to vector<64x1xf32>
    %c0_99 = arith.constant 0 : index
    %c0_100 = arith.constant 0 : index
    %c0_101 = arith.constant 0 : index
    %414 = vector.load %arg19[%c0_99, %c0_100, %c0_101] : memref<4x1x16xf32, #tpu.memory_space<vmem>>, vector<1x1x16xf32>
    %415 = vector.shape_cast %414 : vector<1x1x16xf32> to vector<1x16xf32>
    %416 = vector.broadcast %413 : vector<64x1xf32> to vector<64x16xf32>
    %417 = vector.broadcast %415 : vector<1x16xf32> to vector<64x16xf32>
    %418 = arith.mulf %416, %417 : vector<64x16xf32>
    %419 = vector.extract_strided_slice %412 {offsets = [0, 0], sizes = [64, 1], strides = [1, 1]} : vector<64x4xf32> to vector<64x1xf32>
    %c0_102 = arith.constant 0 : index
    %c0_103 = arith.constant 0 : index
    %c0_104 = arith.constant 0 : index
    %420 = vector.load %arg18[%c0_102, %c0_103, %c0_104] : memref<4x1x16xf32, #tpu.memory_space<vmem>>, vector<1x1x16xf32>
    %421 = vector.shape_cast %420 : vector<1x1x16xf32> to vector<1x16xf32>
    %422 = vector.broadcast %419 : vector<64x1xf32> to vector<64x16xf32>
    %423 = vector.broadcast %421 : vector<1x16xf32> to vector<64x16xf32>
    %424 = arith.mulf %422, %423 : vector<64x16xf32>
    %425 = arith.addf %418, %424 : vector<64x16xf32>
    %426 = vector.extract_strided_slice %409 {offsets = [0, 1], sizes = [64, 1], strides = [1, 1]} : vector<64x4xf32> to vector<64x1xf32>
    %c1 = arith.constant 1 : index
    %c0_105 = arith.constant 0 : index
    %c0_106 = arith.constant 0 : index
    %427 = vector.load %arg19[%c1, %c0_105, %c0_106] : memref<4x1x16xf32, #tpu.memory_space<vmem>>, vector<1x1x16xf32>
    %428 = vector.shape_cast %427 : vector<1x1x16xf32> to vector<1x16xf32>
    %429 = vector.broadcast %426 : vector<64x1xf32> to vector<64x16xf32>
    %430 = vector.broadcast %428 : vector<1x16xf32> to vector<64x16xf32>
    %431 = arith.mulf %429, %430 : vector<64x16xf32>
    %432 = vector.extract_strided_slice %412 {offsets = [0, 1], sizes = [64, 1], strides = [1, 1]} : vector<64x4xf32> to vector<64x1xf32>
    %c1_107 = arith.constant 1 : index
    %c0_108 = arith.constant 0 : index
    %c0_109 = arith.constant 0 : index
    %433 = vector.load %arg18[%c1_107, %c0_108, %c0_109] : memref<4x1x16xf32, #tpu.memory_space<vmem>>, vector<1x1x16xf32>
    %434 = vector.shape_cast %433 : vector<1x1x16xf32> to vector<1x16xf32>
    %435 = vector.broadcast %432 : vector<64x1xf32> to vector<64x16xf32>
    %436 = vector.broadcast %434 : vector<1x16xf32> to vector<64x16xf32>
    %437 = arith.mulf %435, %436 : vector<64x16xf32>
    %438 = arith.addf %431, %437 : vector<64x16xf32>
    %439 = arith.mulf %425, %438 : vector<64x16xf32>
    %440 = vector.extract_strided_slice %409 {offsets = [0, 2], sizes = [64, 1], strides = [1, 1]} : vector<64x4xf32> to vector<64x1xf32>
    %c2 = arith.constant 2 : index
    %c0_110 = arith.constant 0 : index
    %c0_111 = arith.constant 0 : index
    %441 = vector.load %arg19[%c2, %c0_110, %c0_111] : memref<4x1x16xf32, #tpu.memory_space<vmem>>, vector<1x1x16xf32>
    %442 = vector.shape_cast %441 : vector<1x1x16xf32> to vector<1x16xf32>
    %443 = vector.broadcast %440 : vector<64x1xf32> to vector<64x16xf32>
    %444 = vector.broadcast %442 : vector<1x16xf32> to vector<64x16xf32>
    %445 = arith.mulf %443, %444 : vector<64x16xf32>
    %446 = vector.extract_strided_slice %412 {offsets = [0, 2], sizes = [64, 1], strides = [1, 1]} : vector<64x4xf32> to vector<64x1xf32>
    %c2_112 = arith.constant 2 : index
    %c0_113 = arith.constant 0 : index
    %c0_114 = arith.constant 0 : index
    %447 = vector.load %arg18[%c2_112, %c0_113, %c0_114] : memref<4x1x16xf32, #tpu.memory_space<vmem>>, vector<1x1x16xf32>
    %448 = vector.shape_cast %447 : vector<1x1x16xf32> to vector<1x16xf32>
    %449 = vector.broadcast %446 : vector<64x1xf32> to vector<64x16xf32>
    %450 = vector.broadcast %448 : vector<1x16xf32> to vector<64x16xf32>
    %451 = arith.mulf %449, %450 : vector<64x16xf32>
    %452 = arith.addf %445, %451 : vector<64x16xf32>
    %453 = arith.mulf %439, %452 : vector<64x16xf32>
    %454 = vector.extract_strided_slice %409 {offsets = [0, 3], sizes = [64, 1], strides = [1, 1]} : vector<64x4xf32> to vector<64x1xf32>
    %c3 = arith.constant 3 : index
    %c0_115 = arith.constant 0 : index
    %c0_116 = arith.constant 0 : index
    %455 = vector.load %arg19[%c3, %c0_115, %c0_116] : memref<4x1x16xf32, #tpu.memory_space<vmem>>, vector<1x1x16xf32>
    %456 = vector.shape_cast %455 : vector<1x1x16xf32> to vector<1x16xf32>
    %457 = vector.broadcast %454 : vector<64x1xf32> to vector<64x16xf32>
    %458 = vector.broadcast %456 : vector<1x16xf32> to vector<64x16xf32>
    %459 = arith.mulf %457, %458 : vector<64x16xf32>
    %460 = vector.extract_strided_slice %412 {offsets = [0, 3], sizes = [64, 1], strides = [1, 1]} : vector<64x4xf32> to vector<64x1xf32>
    %c3_117 = arith.constant 3 : index
    %c0_118 = arith.constant 0 : index
    %c0_119 = arith.constant 0 : index
    %461 = vector.load %arg18[%c3_117, %c0_118, %c0_119] : memref<4x1x16xf32, #tpu.memory_space<vmem>>, vector<1x1x16xf32>
    %462 = vector.shape_cast %461 : vector<1x1x16xf32> to vector<1x16xf32>
    %463 = vector.broadcast %460 : vector<64x1xf32> to vector<64x16xf32>
    %464 = vector.broadcast %462 : vector<1x16xf32> to vector<64x16xf32>
    %465 = arith.mulf %463, %464 : vector<64x16xf32>
    %466 = arith.addf %459, %465 : vector<64x16xf32>
    %467 = arith.mulf %453, %466 : vector<64x16xf32>
    %c0_120 = arith.constant 0 : index
    %c0_121 = arith.constant 0 : index
    %468 = vector.load %arg20[%c0_120, %c0_121] : memref<1x16xf32, #tpu.memory_space<vmem>>, vector<1x16xf32>
    %469 = vector.broadcast %468 : vector<1x16xf32> to vector<64x16xf32>
    %470 = arith.mulf %467, %469 : vector<64x16xf32>
    %c0_122 = arith.constant 0 : index
    %c0_123 = arith.constant 0 : index
    %471 = vector.load %arg21[%c0_122, %c0_123] : memref<1x16xf32, #tpu.memory_space<vmem>>, vector<1x16xf32>
    %472 = vector.broadcast %471 : vector<1x16xf32> to vector<64x16xf32>
    %473 = arith.mulf %467, %472 : vector<64x16xf32>
    %474 = tpu.concatenate %470, %473 in 1 : vector<64x16xf32>, vector<64x16xf32> -> vector<64x32xf32>
    %c0_124 = arith.constant 0 : index
    %c0_125 = arith.constant 0 : index
    %c0_126 = arith.constant 0 : index
    %475 = vector.load %arg17[%c0_124, %c0_125, %c0_126] : memref<2x32x32xbf16, #tpu.memory_space<vmem>>, vector<1x32x32xbf16>
    %476 = vector.shape_cast %475 : vector<1x32x32xbf16> to vector<32x32xbf16>
    %477 = arith.truncf %474 : vector<64x32xf32> to vector<64x32xbf16>
    %cst_127 = arith.constant dense<0.000000e+00> : vector<64x32xf32>
    %478 = tpu.matmul %477, %476, %cst_127 {dimension_numbers = #tpu.dot_dimension_numbers<[1], [0], [0], [1], [0, 0, 1, 1], [], []>} : vector<64x32xbf16>, vector<32x32xbf16>, vector<64x32xf32> -> vector<64x32xf32>
    %479 = vector.extract_strided_slice %478 {offsets = [0, 0], sizes = [64, 16], strides = [1, 1]} : vector<64x32xf32> to vector<64x16xf32>
    %480 = vector.extract_strided_slice %478 {offsets = [0, 16], sizes = [64, 16], strides = [1, 1]} : vector<64x32xf32> to vector<64x16xf32>
    %481 = arith.mulf %479, %479 : vector<64x16xf32>
    %482 = arith.mulf %480, %480 : vector<64x16xf32>
    %483 = arith.addf %481, %482 : vector<64x16xf32>
    %c0_128 = arith.constant 0 : index
    %c0_129 = arith.constant 0 : index
    %c0_130 = arith.constant 0 : index
    %484 = vector.load %arg15[%c0_128, %c0_129, %c0_130] : memref<2x128x32xbf16, #tpu.memory_space<vmem>>, vector<1x128x32xbf16>
    %485 = vector.shape_cast %484 : vector<1x128x32xbf16> to vector<128x32xbf16>
    %486 = arith.truncf %405 : vector<64x128xf32> to vector<64x128xbf16>
    %cst_131 = arith.constant dense<0.000000e+00> : vector<64x32xf32>
    %487 = tpu.matmul %486, %485, %cst_131 {dimension_numbers = #tpu.dot_dimension_numbers<[1], [0], [0], [1], [0, 0, 1, 1], [], []>} : vector<64x128xbf16>, vector<128x32xbf16>, vector<64x32xf32> -> vector<64x32xf32>
    %c0_132 = arith.constant 0 : index
    %c0_133 = arith.constant 0 : index
    %c0_134 = arith.constant 0 : index
    %488 = vector.load %arg16[%c0_132, %c0_133, %c0_134] : memref<2x16x32xbf16, #tpu.memory_space<vmem>>, vector<1x16x32xbf16>
    %489 = vector.shape_cast %488 : vector<1x16x32xbf16> to vector<16x32xbf16>
    %490 = arith.truncf %483 : vector<64x16xf32> to vector<64x16xbf16>
    %cst_135 = arith.constant dense<0.000000e+00> : vector<64x32xf32>
    %491 = tpu.matmul %490, %489, %cst_135 {dimension_numbers = #tpu.dot_dimension_numbers<[1], [0], [0], [1], [0, 0, 1, 1], [], []>} : vector<64x16xbf16>, vector<16x32xbf16>, vector<64x32xf32> -> vector<64x32xf32>
    %492 = arith.addf %487, %491 : vector<64x32xf32>
    %493 = arith.mulf %360, %492 : vector<64x32xf32>
    %494 = arith.addf %316, %493 : vector<64x32xf32>
    %495 = vector.extract_strided_slice %342 {offsets = [56, 0], sizes = [8, 32], strides = [1, 1]} : vector<64x32xf32> to vector<8x32xf32>
    %c0_136 = arith.constant 0 : index
    %c0_137 = arith.constant 0 : index
    %c0_138 = arith.constant 0 : index
    %496 = vector.load %arg29[%c0_136, %c0_137, %c0_138] : memref<2x8x32xf32, #tpu.memory_space<vmem>>, vector<1x8x32xf32>
    %497 = vector.shape_cast %496 : vector<1x8x32xf32> to vector<8x32xf32>
    %498 = vector.shape_cast %495 : vector<8x32xf32> to vector<1x8x32xf32>
    tpu.vector_store %arg29[%c0_136, %c0_137, %c0_138], %498 {strides = array<i32>} : memref<2x8x32xf32, #tpu.memory_space<vmem>>, vector<1x8x32xf32>,
    %c1_139 = arith.constant 1 : index
    %c0_140 = arith.constant 0 : index
    %c0_141 = arith.constant 0 : index
    %499 = vector.load %arg3[%c1_139, %c0_140, %c0_141] : memref<2x1x32xf32, #tpu.memory_space<vmem>>, vector<1x1x32xf32>
    %500 = vector.shape_cast %499 : vector<1x1x32xf32> to vector<1x32xf32>
    %c1_142 = arith.constant 1 : index
    %c0_143 = arith.constant 0 : index
    %c0_144 = arith.constant 0 : index
    %501 = vector.load %arg4[%c1_142, %c0_143, %c0_144] : memref<2x1x32xf32, #tpu.memory_space<vmem>>, vector<1x1x32xf32>
    %502 = vector.shape_cast %501 : vector<1x1x32xf32> to vector<1x32xf32>
    %cst_145 = arith.constant dense<0.000000e+00> : vector<64xf32>
    %503 = vector.multi_reduction <add>, %494, %cst_145 [1] : vector<64x32xf32> to vector<64xf32>
    %504 = vector.shape_cast %503 : vector<64xf32> to vector<64x1xf32>
    %cst_146 = arith.constant 3.200000e+01 : f32
    %505 = vector.broadcast %cst_146 : f32 to vector<64x1xf32>
    %506 = arith.divf %504, %505 : vector<64x1xf32>
    %507 = vector.broadcast %506 : vector<64x1xf32> to vector<64x32xf32>
    %508 = arith.subf %494, %507 : vector<64x32xf32>
    %509 = arith.mulf %508, %508 : vector<64x32xf32>
    %cst_147 = arith.constant dense<0.000000e+00> : vector<64xf32>
    %510 = vector.multi_reduction <add>, %509, %cst_147 [1] : vector<64x32xf32> to vector<64xf32>
    %511 = vector.shape_cast %510 : vector<64xf32> to vector<64x1xf32>
    %cst_148 = arith.constant 3.200000e+01 : f32
    %512 = vector.broadcast %cst_148 : f32 to vector<64x1xf32>
    %513 = arith.divf %511, %512 : vector<64x1xf32>
    %514 = vector.broadcast %506 : vector<64x1xf32> to vector<64x32xf32>
    %515 = arith.subf %494, %514 : vector<64x32xf32>
    %cst_149 = arith.constant 9.99999974E-6 : f32
    %516 = vector.broadcast %cst_149 : f32 to vector<64x1xf32>
    %517 = arith.addf %513, %516 : vector<64x1xf32>
    %518 = math.rsqrt %517 : vector<64x1xf32>
    %519 = vector.broadcast %518 : vector<64x1xf32> to vector<64x32xf32>
    %520 = arith.mulf %515, %519 : vector<64x32xf32>
    %521 = vector.broadcast %500 : vector<1x32xf32> to vector<64x32xf32>
    %522 = arith.mulf %520, %521 : vector<64x32xf32>
    %523 = vector.broadcast %502 : vector<1x32xf32> to vector<64x32xf32>
    %524 = arith.addf %522, %523 : vector<64x32xf32>
    %c1_150 = arith.constant 1 : index
    %c0_151 = arith.constant 0 : index
    %c0_152 = arith.constant 0 : index
    %525 = vector.load %arg7[%c1_150, %c0_151, %c0_152] : memref<2x32x96xbf16, #tpu.memory_space<vmem>>, vector<1x32x96xbf16>
    %526 = vector.shape_cast %525 : vector<1x32x96xbf16> to vector<32x96xbf16>
    %527 = arith.truncf %524 : vector<64x32xf32> to vector<64x32xbf16>
    %cst_153 = arith.constant dense<0.000000e+00> : vector<64x96xf32>
    %528 = tpu.matmul %527, %526, %cst_153 {dimension_numbers = #tpu.dot_dimension_numbers<[1], [0], [0], [1], [0, 0, 1, 1], [], []>} : vector<64x32xbf16>, vector<32x96xbf16>, vector<64x96xf32> -> vector<64x96xf32>
    %529 = vector.extract_strided_slice %528 {offsets = [0, 0], sizes = [64, 32], strides = [1, 1]} : vector<64x96xf32> to vector<64x32xf32>
    %530 = vector.extract_strided_slice %528 {offsets = [0, 32], sizes = [64, 32], strides = [1, 1]} : vector<64x96xf32> to vector<64x32xf32>
    %531 = vector.extract_strided_slice %528 {offsets = [0, 64], sizes = [64, 32], strides = [1, 1]} : vector<64x96xf32> to vector<64x32xf32>
    %cst_154 = arith.constant 0.000000e+00 : f32
    %532 = vector.broadcast %cst_154 : f32 to vector<64x32xf32>
    %533 = arith.subf %532, %531 : vector<64x32xf32>
    %534 = math.exp %533 : vector<64x32xf32>
    %cst_155 = arith.constant 1.000000e+00 : f32
    %535 = vector.broadcast %cst_155 : f32 to vector<64x32xf32>
    %536 = arith.addf %535, %534 : vector<64x32xf32>
    %537 = tpu.reciprocal %536 {approx = true} : vector<64x32xf32> -> vector<64x32xf32>
    %c1_156 = arith.constant 1 : index
    %c0_157 = arith.constant 0 : index
    %c0_158 = arith.constant 0 : index
    %538 = vector.load %arg5[%c1_156, %c0_157, %c0_158] : memref<2x1x32xf32, #tpu.memory_space<vmem>>, vector<1x1x32xf32>
    %539 = vector.shape_cast %538 : vector<1x1x32xf32> to vector<1x32xf32>
    %c1_159 = arith.constant 1 : index
    %c0_160 = arith.constant 0 : index
    %c0_161 = arith.constant 0 : index
    %540 = vector.load %arg6[%c1_159, %c0_160, %c0_161] : memref<2x1x32xf32, #tpu.memory_space<vmem>>, vector<1x1x32xf32>
    %541 = vector.shape_cast %540 : vector<1x1x32xf32> to vector<1x32xf32>
    %cst_162 = arith.constant 0.000000e+00 : f32
    %542 = vector.broadcast %cst_162 : f32 to vector<8x32xf32>
    %cst_163 = arith.constant 0.000000e+00 : f32
    %543 = vector.broadcast %cst_163 : f32 to vector<8x32xf32>
    %cst_164 = arith.constant -9.99999968E+37 : f32
    %544 = vector.broadcast %cst_164 : f32 to vector<8x32xf32>
    %545 = vector.extract_strided_slice %529 {offsets = [0, 0], sizes = [8, 32], strides = [1, 1]} : vector<64x32xf32> to vector<8x32xf32>
    %546 = vector.extract_strided_slice %530 {offsets = [0, 0], sizes = [8, 32], strides = [1, 1]} : vector<64x32xf32> to vector<8x32xf32>
    %547 = vector.broadcast %541 : vector<1x32xf32> to vector<8x32xf32>
    %548 = arith.addf %547, %545 : vector<8x32xf32>
    %549 = arith.maximumf %544, %548 : vector<8x32xf32>
    %550 = vector.broadcast %539 : vector<1x32xf32> to vector<8x32xf32>
    %551 = arith.subf %544, %550 : vector<8x32xf32>
    %552 = arith.maximumf %551, %545 : vector<8x32xf32>
    %553 = arith.subf %544, %549 : vector<8x32xf32>
    %554 = arith.subf %548, %549 : vector<8x32xf32>
    %555 = arith.subf %551, %552 : vector<8x32xf32>
    %556 = arith.subf %545, %552 : vector<8x32xf32>
    %557 = tpu.concatenate %553, %554, %555, %556 in 1 : vector<8x32xf32>, vector<8x32xf32>, vector<8x32xf32>, vector<8x32xf32> -> vector<8x128xf32>
    %558 = math.exp %557 : vector<8x128xf32>
    %559 = vector.extract_strided_slice %558 {offsets = [0, 0], sizes = [8, 32], strides = [1, 1]} : vector<8x128xf32> to vector<8x32xf32>
    %560 = vector.extract_strided_slice %558 {offsets = [0, 32], sizes = [8, 32], strides = [1, 1]} : vector<8x128xf32> to vector<8x32xf32>
    %561 = vector.extract_strided_slice %558 {offsets = [0, 64], sizes = [8, 32], strides = [1, 1]} : vector<8x128xf32> to vector<8x32xf32>
    %562 = vector.extract_strided_slice %558 {offsets = [0, 96], sizes = [8, 32], strides = [1, 1]} : vector<8x128xf32> to vector<8x32xf32>
    %563 = arith.mulf %559, %542 : vector<8x32xf32>
    %564 = arith.mulf %560, %546 : vector<8x32xf32>
    %565 = arith.addf %563, %564 : vector<8x32xf32>
    %566 = arith.mulf %559, %543 : vector<8x32xf32>
    %567 = arith.addf %566, %560 : vector<8x32xf32>
    %568 = tpu.reciprocal %567 {approx = true} : vector<8x32xf32> -> vector<8x32xf32>
    %569 = arith.mulf %565, %568 : vector<8x32xf32>
    %c0_165 = arith.constant 0 : index
    %c0_166 = arith.constant 0 : index
    %570 = vector.load %arg30[%c0_165, %c0_166] : memref<64x32xf32, #tpu.memory_space<vmem>>, vector<8x32xf32>
    tpu.vector_store %arg30[%c0_165, %c0_166], %569 {strides = array<i32>} : memref<64x32xf32, #tpu.memory_space<vmem>>, vector<8x32xf32>,
    %571 = arith.mulf %561, %542 : vector<8x32xf32>
    %572 = arith.mulf %562, %546 : vector<8x32xf32>
    %573 = arith.addf %571, %572 : vector<8x32xf32>
    %574 = arith.mulf %561, %543 : vector<8x32xf32>
    %575 = arith.addf %574, %562 : vector<8x32xf32>
    %576 = vector.extract_strided_slice %529 {offsets = [8, 0], sizes = [8, 32], strides = [1, 1]} : vector<64x32xf32> to vector<8x32xf32>
    %577 = vector.extract_strided_slice %530 {offsets = [8, 0], sizes = [8, 32], strides = [1, 1]} : vector<64x32xf32> to vector<8x32xf32>
    %578 = vector.broadcast %541 : vector<1x32xf32> to vector<8x32xf32>
    %579 = arith.addf %578, %576 : vector<8x32xf32>
    %580 = arith.maximumf %552, %579 : vector<8x32xf32>
    %581 = vector.broadcast %539 : vector<1x32xf32> to vector<8x32xf32>
    %582 = arith.subf %552, %581 : vector<8x32xf32>
    %583 = arith.maximumf %582, %576 : vector<8x32xf32>
    %584 = arith.subf %552, %580 : vector<8x32xf32>
    %585 = arith.subf %579, %580 : vector<8x32xf32>
    %586 = arith.subf %582, %583 : vector<8x32xf32>
    %587 = arith.subf %576, %583 : vector<8x32xf32>
    %588 = tpu.concatenate %584, %585, %586, %587 in 1 : vector<8x32xf32>, vector<8x32xf32>, vector<8x32xf32>, vector<8x32xf32> -> vector<8x128xf32>
    %589 = math.exp %588 : vector<8x128xf32>
    %590 = vector.extract_strided_slice %589 {offsets = [0, 0], sizes = [8, 32], strides = [1, 1]} : vector<8x128xf32> to vector<8x32xf32>
    %591 = vector.extract_strided_slice %589 {offsets = [0, 32], sizes = [8, 32], strides = [1, 1]} : vector<8x128xf32> to vector<8x32xf32>
    %592 = vector.extract_strided_slice %589 {offsets = [0, 64], sizes = [8, 32], strides = [1, 1]} : vector<8x128xf32> to vector<8x32xf32>
    %593 = vector.extract_strided_slice %589 {offsets = [0, 96], sizes = [8, 32], strides = [1, 1]} : vector<8x128xf32> to vector<8x32xf32>
    %594 = arith.mulf %590, %573 : vector<8x32xf32>
    %595 = arith.mulf %591, %577 : vector<8x32xf32>
    %596 = arith.addf %594, %595 : vector<8x32xf32>
    %597 = arith.mulf %590, %575 : vector<8x32xf32>
    %598 = arith.addf %597, %591 : vector<8x32xf32>
    %599 = tpu.reciprocal %598 {approx = true} : vector<8x32xf32> -> vector<8x32xf32>
    %600 = arith.mulf %596, %599 : vector<8x32xf32>
    %c8_167 = arith.constant 8 : index
    %c0_168 = arith.constant 0 : index
    %601 = vector.load %arg30[%c8_167, %c0_168] : memref<64x32xf32, #tpu.memory_space<vmem>>, vector<8x32xf32>
    tpu.vector_store %arg30[%c8_167, %c0_168], %600 {strides = array<i32>} : memref<64x32xf32, #tpu.memory_space<vmem>>, vector<8x32xf32>,
    %602 = arith.mulf %592, %573 : vector<8x32xf32>
    %603 = arith.mulf %593, %577 : vector<8x32xf32>
    %604 = arith.addf %602, %603 : vector<8x32xf32>
    %605 = arith.mulf %592, %575 : vector<8x32xf32>
    %606 = arith.addf %605, %593 : vector<8x32xf32>
    %607 = vector.extract_strided_slice %529 {offsets = [16, 0], sizes = [8, 32], strides = [1, 1]} : vector<64x32xf32> to vector<8x32xf32>
    %608 = vector.extract_strided_slice %530 {offsets = [16, 0], sizes = [8, 32], strides = [1, 1]} : vector<64x32xf32> to vector<8x32xf32>
    %609 = vector.broadcast %541 : vector<1x32xf32> to vector<8x32xf32>
    %610 = arith.addf %609, %607 : vector<8x32xf32>
    %611 = arith.maximumf %583, %610 : vector<8x32xf32>
    %612 = vector.broadcast %539 : vector<1x32xf32> to vector<8x32xf32>
    %613 = arith.subf %583, %612 : vector<8x32xf32>
    %614 = arith.maximumf %613, %607 : vector<8x32xf32>
    %615 = arith.subf %583, %611 : vector<8x32xf32>
    %616 = arith.subf %610, %611 : vector<8x32xf32>
    %617 = arith.subf %613, %614 : vector<8x32xf32>
    %618 = arith.subf %607, %614 : vector<8x32xf32>
    %619 = tpu.concatenate %615, %616, %617, %618 in 1 : vector<8x32xf32>, vector<8x32xf32>, vector<8x32xf32>, vector<8x32xf32> -> vector<8x128xf32>
    %620 = math.exp %619 : vector<8x128xf32>
    %621 = vector.extract_strided_slice %620 {offsets = [0, 0], sizes = [8, 32], strides = [1, 1]} : vector<8x128xf32> to vector<8x32xf32>
    %622 = vector.extract_strided_slice %620 {offsets = [0, 32], sizes = [8, 32], strides = [1, 1]} : vector<8x128xf32> to vector<8x32xf32>
    %623 = vector.extract_strided_slice %620 {offsets = [0, 64], sizes = [8, 32], strides = [1, 1]} : vector<8x128xf32> to vector<8x32xf32>
    %624 = vector.extract_strided_slice %620 {offsets = [0, 96], sizes = [8, 32], strides = [1, 1]} : vector<8x128xf32> to vector<8x32xf32>
    %625 = arith.mulf %621, %604 : vector<8x32xf32>
    %626 = arith.mulf %622, %608 : vector<8x32xf32>
    %627 = arith.addf %625, %626 : vector<8x32xf32>
    %628 = arith.mulf %621, %606 : vector<8x32xf32>
    %629 = arith.addf %628, %622 : vector<8x32xf32>
    %630 = tpu.reciprocal %629 {approx = true} : vector<8x32xf32> -> vector<8x32xf32>
    %631 = arith.mulf %627, %630 : vector<8x32xf32>
    %c16_169 = arith.constant 16 : index
    %c0_170 = arith.constant 0 : index
    %632 = vector.load %arg30[%c16_169, %c0_170] : memref<64x32xf32, #tpu.memory_space<vmem>>, vector<8x32xf32>
    tpu.vector_store %arg30[%c16_169, %c0_170], %631 {strides = array<i32>} : memref<64x32xf32, #tpu.memory_space<vmem>>, vector<8x32xf32>,
    %633 = arith.mulf %623, %604 : vector<8x32xf32>
    %634 = arith.mulf %624, %608 : vector<8x32xf32>
    %635 = arith.addf %633, %634 : vector<8x32xf32>
    %636 = arith.mulf %623, %606 : vector<8x32xf32>
    %637 = arith.addf %636, %624 : vector<8x32xf32>
    %638 = vector.extract_strided_slice %529 {offsets = [24, 0], sizes = [8, 32], strides = [1, 1]} : vector<64x32xf32> to vector<8x32xf32>
    %639 = vector.extract_strided_slice %530 {offsets = [24, 0], sizes = [8, 32], strides = [1, 1]} : vector<64x32xf32> to vector<8x32xf32>
    %640 = vector.broadcast %541 : vector<1x32xf32> to vector<8x32xf32>
    %641 = arith.addf %640, %638 : vector<8x32xf32>
    %642 = arith.maximumf %614, %641 : vector<8x32xf32>
    %643 = vector.broadcast %539 : vector<1x32xf32> to vector<8x32xf32>
    %644 = arith.subf %614, %643 : vector<8x32xf32>
    %645 = arith.maximumf %644, %638 : vector<8x32xf32>
    %646 = arith.subf %614, %642 : vector<8x32xf32>
    %647 = arith.subf %641, %642 : vector<8x32xf32>
    %648 = arith.subf %644, %645 : vector<8x32xf32>
    %649 = arith.subf %638, %645 : vector<8x32xf32>
    %650 = tpu.concatenate %646, %647, %648, %649 in 1 : vector<8x32xf32>, vector<8x32xf32>, vector<8x32xf32>, vector<8x32xf32> -> vector<8x128xf32>
    %651 = math.exp %650 : vector<8x128xf32>
    %652 = vector.extract_strided_slice %651 {offsets = [0, 0], sizes = [8, 32], strides = [1, 1]} : vector<8x128xf32> to vector<8x32xf32>
    %653 = vector.extract_strided_slice %651 {offsets = [0, 32], sizes = [8, 32], strides = [1, 1]} : vector<8x128xf32> to vector<8x32xf32>
    %654 = vector.extract_strided_slice %651 {offsets = [0, 64], sizes = [8, 32], strides = [1, 1]} : vector<8x128xf32> to vector<8x32xf32>
    %655 = vector.extract_strided_slice %651 {offsets = [0, 96], sizes = [8, 32], strides = [1, 1]} : vector<8x128xf32> to vector<8x32xf32>
    %656 = arith.mulf %652, %635 : vector<8x32xf32>
    %657 = arith.mulf %653, %639 : vector<8x32xf32>
    %658 = arith.addf %656, %657 : vector<8x32xf32>
    %659 = arith.mulf %652, %637 : vector<8x32xf32>
    %660 = arith.addf %659, %653 : vector<8x32xf32>
    %661 = tpu.reciprocal %660 {approx = true} : vector<8x32xf32> -> vector<8x32xf32>
    %662 = arith.mulf %658, %661 : vector<8x32xf32>
    %c24_171 = arith.constant 24 : index
    %c0_172 = arith.constant 0 : index
    %663 = vector.load %arg30[%c24_171, %c0_172] : memref<64x32xf32, #tpu.memory_space<vmem>>, vector<8x32xf32>
    tpu.vector_store %arg30[%c24_171, %c0_172], %662 {strides = array<i32>} : memref<64x32xf32, #tpu.memory_space<vmem>>, vector<8x32xf32>,
    %664 = arith.mulf %654, %635 : vector<8x32xf32>
    %665 = arith.mulf %655, %639 : vector<8x32xf32>
    %666 = arith.addf %664, %665 : vector<8x32xf32>
    %667 = arith.mulf %654, %637 : vector<8x32xf32>
    %668 = arith.addf %667, %655 : vector<8x32xf32>
    %669 = vector.extract_strided_slice %529 {offsets = [32, 0], sizes = [8, 32], strides = [1, 1]} : vector<64x32xf32> to vector<8x32xf32>
    %670 = vector.extract_strided_slice %530 {offsets = [32, 0], sizes = [8, 32], strides = [1, 1]} : vector<64x32xf32> to vector<8x32xf32>
    %671 = vector.broadcast %541 : vector<1x32xf32> to vector<8x32xf32>
    %672 = arith.addf %671, %669 : vector<8x32xf32>
    %673 = arith.maximumf %645, %672 : vector<8x32xf32>
    %674 = vector.broadcast %539 : vector<1x32xf32> to vector<8x32xf32>
    %675 = arith.subf %645, %674 : vector<8x32xf32>
    %676 = arith.maximumf %675, %669 : vector<8x32xf32>
    %677 = arith.subf %645, %673 : vector<8x32xf32>
    %678 = arith.subf %672, %673 : vector<8x32xf32>
    %679 = arith.subf %675, %676 : vector<8x32xf32>
    %680 = arith.subf %669, %676 : vector<8x32xf32>
    %681 = tpu.concatenate %677, %678, %679, %680 in 1 : vector<8x32xf32>, vector<8x32xf32>, vector<8x32xf32>, vector<8x32xf32> -> vector<8x128xf32>
    %682 = math.exp %681 : vector<8x128xf32>
    %683 = vector.extract_strided_slice %682 {offsets = [0, 0], sizes = [8, 32], strides = [1, 1]} : vector<8x128xf32> to vector<8x32xf32>
    %684 = vector.extract_strided_slice %682 {offsets = [0, 32], sizes = [8, 32], strides = [1, 1]} : vector<8x128xf32> to vector<8x32xf32>
    %685 = vector.extract_strided_slice %682 {offsets = [0, 64], sizes = [8, 32], strides = [1, 1]} : vector<8x128xf32> to vector<8x32xf32>
    %686 = vector.extract_strided_slice %682 {offsets = [0, 96], sizes = [8, 32], strides = [1, 1]} : vector<8x128xf32> to vector<8x32xf32>
    %687 = arith.mulf %683, %666 : vector<8x32xf32>
    %688 = arith.mulf %684, %670 : vector<8x32xf32>
    %689 = arith.addf %687, %688 : vector<8x32xf32>
    %690 = arith.mulf %683, %668 : vector<8x32xf32>
    %691 = arith.addf %690, %684 : vector<8x32xf32>
    %692 = tpu.reciprocal %691 {approx = true} : vector<8x32xf32> -> vector<8x32xf32>
    %693 = arith.mulf %689, %692 : vector<8x32xf32>
    %c32_173 = arith.constant 32 : index
    %c0_174 = arith.constant 0 : index
    %694 = vector.load %arg30[%c32_173, %c0_174] : memref<64x32xf32, #tpu.memory_space<vmem>>, vector<8x32xf32>
    tpu.vector_store %arg30[%c32_173, %c0_174], %693 {strides = array<i32>} : memref<64x32xf32, #tpu.memory_space<vmem>>, vector<8x32xf32>,
    %695 = arith.mulf %685, %666 : vector<8x32xf32>
    %696 = arith.mulf %686, %670 : vector<8x32xf32>
    %697 = arith.addf %695, %696 : vector<8x32xf32>
    %698 = arith.mulf %685, %668 : vector<8x32xf32>
    %699 = arith.addf %698, %686 : vector<8x32xf32>
    %700 = vector.extract_strided_slice %529 {offsets = [40, 0], sizes = [8, 32], strides = [1, 1]} : vector<64x32xf32> to vector<8x32xf32>
    %701 = vector.extract_strided_slice %530 {offsets = [40, 0], sizes = [8, 32], strides = [1, 1]} : vector<64x32xf32> to vector<8x32xf32>
    %702 = vector.broadcast %541 : vector<1x32xf32> to vector<8x32xf32>
    %703 = arith.addf %702, %700 : vector<8x32xf32>
    %704 = arith.maximumf %676, %703 : vector<8x32xf32>
    %705 = vector.broadcast %539 : vector<1x32xf32> to vector<8x32xf32>
    %706 = arith.subf %676, %705 : vector<8x32xf32>
    %707 = arith.maximumf %706, %700 : vector<8x32xf32>
    %708 = arith.subf %676, %704 : vector<8x32xf32>
    %709 = arith.subf %703, %704 : vector<8x32xf32>
    %710 = arith.subf %706, %707 : vector<8x32xf32>
    %711 = arith.subf %700, %707 : vector<8x32xf32>
    %712 = tpu.concatenate %708, %709, %710, %711 in 1 : vector<8x32xf32>, vector<8x32xf32>, vector<8x32xf32>, vector<8x32xf32> -> vector<8x128xf32>
    %713 = math.exp %712 : vector<8x128xf32>
    %714 = vector.extract_strided_slice %713 {offsets = [0, 0], sizes = [8, 32], strides = [1, 1]} : vector<8x128xf32> to vector<8x32xf32>
    %715 = vector.extract_strided_slice %713 {offsets = [0, 32], sizes = [8, 32], strides = [1, 1]} : vector<8x128xf32> to vector<8x32xf32>
    %716 = vector.extract_strided_slice %713 {offsets = [0, 64], sizes = [8, 32], strides = [1, 1]} : vector<8x128xf32> to vector<8x32xf32>
    %717 = vector.extract_strided_slice %713 {offsets = [0, 96], sizes = [8, 32], strides = [1, 1]} : vector<8x128xf32> to vector<8x32xf32>
    %718 = arith.mulf %714, %697 : vector<8x32xf32>
    %719 = arith.mulf %715, %701 : vector<8x32xf32>
    %720 = arith.addf %718, %719 : vector<8x32xf32>
    %721 = arith.mulf %714, %699 : vector<8x32xf32>
    %722 = arith.addf %721, %715 : vector<8x32xf32>
    %723 = tpu.reciprocal %722 {approx = true} : vector<8x32xf32> -> vector<8x32xf32>
    %724 = arith.mulf %720, %723 : vector<8x32xf32>
    %c40_175 = arith.constant 40 : index
    %c0_176 = arith.constant 0 : index
    %725 = vector.load %arg30[%c40_175, %c0_176] : memref<64x32xf32, #tpu.memory_space<vmem>>, vector<8x32xf32>
    tpu.vector_store %arg30[%c40_175, %c0_176], %724 {strides = array<i32>} : memref<64x32xf32, #tpu.memory_space<vmem>>, vector<8x32xf32>,
    %726 = arith.mulf %716, %697 : vector<8x32xf32>
    %727 = arith.mulf %717, %701 : vector<8x32xf32>
    %728 = arith.addf %726, %727 : vector<8x32xf32>
    %729 = arith.mulf %716, %699 : vector<8x32xf32>
    %730 = arith.addf %729, %717 : vector<8x32xf32>
    %731 = vector.extract_strided_slice %529 {offsets = [48, 0], sizes = [8, 32], strides = [1, 1]} : vector<64x32xf32> to vector<8x32xf32>
    %732 = vector.extract_strided_slice %530 {offsets = [48, 0], sizes = [8, 32], strides = [1, 1]} : vector<64x32xf32> to vector<8x32xf32>
    %733 = vector.broadcast %541 : vector<1x32xf32> to vector<8x32xf32>
    %734 = arith.addf %733, %731 : vector<8x32xf32>
    %735 = arith.maximumf %707, %734 : vector<8x32xf32>
    %736 = vector.broadcast %539 : vector<1x32xf32> to vector<8x32xf32>
    %737 = arith.subf %707, %736 : vector<8x32xf32>
    %738 = arith.maximumf %737, %731 : vector<8x32xf32>
    %739 = arith.subf %707, %735 : vector<8x32xf32>
    %740 = arith.subf %734, %735 : vector<8x32xf32>
    %741 = arith.subf %737, %738 : vector<8x32xf32>
    %742 = arith.subf %731, %738 : vector<8x32xf32>
    %743 = tpu.concatenate %739, %740, %741, %742 in 1 : vector<8x32xf32>, vector<8x32xf32>, vector<8x32xf32>, vector<8x32xf32> -> vector<8x128xf32>
    %744 = math.exp %743 : vector<8x128xf32>
    %745 = vector.extract_strided_slice %744 {offsets = [0, 0], sizes = [8, 32], strides = [1, 1]} : vector<8x128xf32> to vector<8x32xf32>
    %746 = vector.extract_strided_slice %744 {offsets = [0, 32], sizes = [8, 32], strides = [1, 1]} : vector<8x128xf32> to vector<8x32xf32>
    %747 = vector.extract_strided_slice %744 {offsets = [0, 64], sizes = [8, 32], strides = [1, 1]} : vector<8x128xf32> to vector<8x32xf32>
    %748 = vector.extract_strided_slice %744 {offsets = [0, 96], sizes = [8, 32], strides = [1, 1]} : vector<8x128xf32> to vector<8x32xf32>
    %749 = arith.mulf %745, %728 : vector<8x32xf32>
    %750 = arith.mulf %746, %732 : vector<8x32xf32>
    %751 = arith.addf %749, %750 : vector<8x32xf32>
    %752 = arith.mulf %745, %730 : vector<8x32xf32>
    %753 = arith.addf %752, %746 : vector<8x32xf32>
    %754 = tpu.reciprocal %753 {approx = true} : vector<8x32xf32> -> vector<8x32xf32>
    %755 = arith.mulf %751, %754 : vector<8x32xf32>
    %c48_177 = arith.constant 48 : index
    %c0_178 = arith.constant 0 : index
    %756 = vector.load %arg30[%c48_177, %c0_178] : memref<64x32xf32, #tpu.memory_space<vmem>>, vector<8x32xf32>
    tpu.vector_store %arg30[%c48_177, %c0_178], %755 {strides = array<i32>} : memref<64x32xf32, #tpu.memory_space<vmem>>, vector<8x32xf32>,
    %757 = arith.mulf %747, %728 : vector<8x32xf32>
    %758 = arith.mulf %748, %732 : vector<8x32xf32>
    %759 = arith.addf %757, %758 : vector<8x32xf32>
    %760 = arith.mulf %747, %730 : vector<8x32xf32>
    %761 = arith.addf %760, %748 : vector<8x32xf32>
    %762 = vector.extract_strided_slice %529 {offsets = [56, 0], sizes = [8, 32], strides = [1, 1]} : vector<64x32xf32> to vector<8x32xf32>
    %763 = vector.extract_strided_slice %530 {offsets = [56, 0], sizes = [8, 32], strides = [1, 1]} : vector<64x32xf32> to vector<8x32xf32>
    %764 = vector.broadcast %541 : vector<1x32xf32> to vector<8x32xf32>
    %765 = arith.addf %764, %762 : vector<8x32xf32>
    %766 = arith.maximumf %738, %765 : vector<8x32xf32>
    %767 = vector.broadcast %539 : vector<1x32xf32> to vector<8x32xf32>
    %768 = arith.subf %738, %767 : vector<8x32xf32>
    %769 = arith.maximumf %768, %762 : vector<8x32xf32>
    %770 = arith.subf %738, %766 : vector<8x32xf32>
    %771 = arith.subf %765, %766 : vector<8x32xf32>
    %772 = arith.subf %768, %769 : vector<8x32xf32>
    %773 = arith.subf %762, %769 : vector<8x32xf32>
    %774 = tpu.concatenate %770, %771, %772, %773 in 1 : vector<8x32xf32>, vector<8x32xf32>, vector<8x32xf32>, vector<8x32xf32> -> vector<8x128xf32>
    %775 = math.exp %774 : vector<8x128xf32>
    %776 = vector.extract_strided_slice %775 {offsets = [0, 0], sizes = [8, 32], strides = [1, 1]} : vector<8x128xf32> to vector<8x32xf32>
    %777 = vector.extract_strided_slice %775 {offsets = [0, 32], sizes = [8, 32], strides = [1, 1]} : vector<8x128xf32> to vector<8x32xf32>
    %778 = vector.extract_strided_slice %775 {offsets = [0, 64], sizes = [8, 32], strides = [1, 1]} : vector<8x128xf32> to vector<8x32xf32>
    %779 = vector.extract_strided_slice %775 {offsets = [0, 96], sizes = [8, 32], strides = [1, 1]} : vector<8x128xf32> to vector<8x32xf32>
    %780 = arith.mulf %776, %759 : vector<8x32xf32>
    %781 = arith.mulf %777, %763 : vector<8x32xf32>
    %782 = arith.addf %780, %781 : vector<8x32xf32>
    %783 = arith.mulf %776, %761 : vector<8x32xf32>
    %784 = arith.addf %783, %777 : vector<8x32xf32>
    %785 = tpu.reciprocal %784 {approx = true} : vector<8x32xf32> -> vector<8x32xf32>
    %786 = arith.mulf %782, %785 : vector<8x32xf32>
    %c56_179 = arith.constant 56 : index
    %c0_180 = arith.constant 0 : index
    %787 = vector.load %arg30[%c56_179, %c0_180] : memref<64x32xf32, #tpu.memory_space<vmem>>, vector<8x32xf32>
    tpu.vector_store %arg30[%c56_179, %c0_180], %786 {strides = array<i32>} : memref<64x32xf32, #tpu.memory_space<vmem>>, vector<8x32xf32>,
    %788 = arith.mulf %778, %759 : vector<8x32xf32>
    %789 = arith.mulf %779, %763 : vector<8x32xf32>
    %790 = arith.addf %788, %789 : vector<8x32xf32>
    %791 = arith.mulf %778, %761 : vector<8x32xf32>
    %792 = arith.addf %791, %779 : vector<8x32xf32>
    %c1_181 = arith.constant 1 : index
    %c0_182 = arith.constant 0 : index
    %c0_183 = arith.constant 0 : index
    %793 = vector.load %arg26[%c1_181, %c0_182, %c0_183] : memref<2x8x32xf32, #tpu.memory_space<vmem>>, vector<1x8x32xf32>
    %794 = vector.shape_cast %793 : vector<1x8x32xf32> to vector<8x32xf32>
    %795 = vector.shape_cast %790 : vector<8x32xf32> to vector<1x8x32xf32>
    tpu.vector_store %arg26[%c1_181, %c0_182, %c0_183], %795 {strides = array<i32>} : memref<2x8x32xf32, #tpu.memory_space<vmem>>, vector<1x8x32xf32>,
    %c1_184 = arith.constant 1 : index
    %c0_185 = arith.constant 0 : index
    %c0_186 = arith.constant 0 : index
    %796 = vector.load %arg27[%c1_184, %c0_185, %c0_186] : memref<2x8x32xf32, #tpu.memory_space<vmem>>, vector<1x8x32xf32>
    %797 = vector.shape_cast %796 : vector<1x8x32xf32> to vector<8x32xf32>
    %798 = vector.shape_cast %792 : vector<8x32xf32> to vector<1x8x32xf32>
    tpu.vector_store %arg27[%c1_184, %c0_185, %c0_186], %798 {strides = array<i32>} : memref<2x8x32xf32, #tpu.memory_space<vmem>>, vector<1x8x32xf32>,
    %c1_187 = arith.constant 1 : index
    %c0_188 = arith.constant 0 : index
    %c0_189 = arith.constant 0 : index
    %799 = vector.load %arg28[%c1_187, %c0_188, %c0_189] : memref<2x8x32xf32, #tpu.memory_space<vmem>>, vector<1x8x32xf32>
    %800 = vector.shape_cast %799 : vector<1x8x32xf32> to vector<8x32xf32>
    %801 = vector.shape_cast %769 : vector<8x32xf32> to vector<1x8x32xf32>
    tpu.vector_store %arg28[%c1_187, %c0_188, %c0_189], %801 {strides = array<i32>} : memref<2x8x32xf32, #tpu.memory_space<vmem>>, vector<1x8x32xf32>,
    %c0_190 = arith.constant 0 : index
    %c0_191 = arith.constant 0 : index
    %802 = vector.load %arg30[%c0_190, %c0_191] : memref<64x32xf32, #tpu.memory_space<vmem>>, vector<64x32xf32>
    %803 = arith.mulf %537, %802 : vector<64x32xf32>
    %c1_192 = arith.constant 1 : index
    %c0_193 = arith.constant 0 : index
    %c0_194 = arith.constant 0 : index
    %804 = vector.load %arg8[%c1_192, %c0_193, %c0_194] : memref<2x32x32xbf16, #tpu.memory_space<vmem>>, vector<1x32x32xbf16>
    %805 = vector.shape_cast %804 : vector<1x32x32xbf16> to vector<32x32xbf16>
    %806 = arith.truncf %803 : vector<64x32xf32> to vector<64x32xbf16>
    %cst_195 = arith.constant dense<0.000000e+00> : vector<64x32xf32>
    %807 = tpu.matmul %806, %805, %cst_195 {dimension_numbers = #tpu.dot_dimension_numbers<[1], [0], [0], [1], [0, 0, 1, 1], [], []>} : vector<64x32xbf16>, vector<32x32xbf16>, vector<64x32xf32> -> vector<64x32xf32>
    %808 = arith.addf %494, %807 : vector<64x32xf32>
    %c1_196 = arith.constant 1 : index
    %c0_197 = arith.constant 0 : index
    %c0_198 = arith.constant 0 : index
    %809 = vector.load %arg9[%c1_196, %c0_197, %c0_198] : memref<2x1x32xf32, #tpu.memory_space<vmem>>, vector<1x1x32xf32>
    %810 = vector.shape_cast %809 : vector<1x1x32xf32> to vector<1x32xf32>
    %c1_199 = arith.constant 1 : index
    %c0_200 = arith.constant 0 : index
    %c0_201 = arith.constant 0 : index
    %811 = vector.load %arg10[%c1_199, %c0_200, %c0_201] : memref<2x1x32xf32, #tpu.memory_space<vmem>>, vector<1x1x32xf32>
    %812 = vector.shape_cast %811 : vector<1x1x32xf32> to vector<1x32xf32>
    %cst_202 = arith.constant dense<0.000000e+00> : vector<64xf32>
    %813 = vector.multi_reduction <add>, %808, %cst_202 [1] : vector<64x32xf32> to vector<64xf32>
    %814 = vector.shape_cast %813 : vector<64xf32> to vector<64x1xf32>
    %cst_203 = arith.constant 3.200000e+01 : f32
    %815 = vector.broadcast %cst_203 : f32 to vector<64x1xf32>
    %816 = arith.divf %814, %815 : vector<64x1xf32>
    %817 = vector.broadcast %816 : vector<64x1xf32> to vector<64x32xf32>
    %818 = arith.subf %808, %817 : vector<64x32xf32>
    %819 = arith.mulf %818, %818 : vector<64x32xf32>
    %cst_204 = arith.constant dense<0.000000e+00> : vector<64xf32>
    %820 = vector.multi_reduction <add>, %819, %cst_204 [1] : vector<64x32xf32> to vector<64xf32>
    %821 = vector.shape_cast %820 : vector<64xf32> to vector<64x1xf32>
    %cst_205 = arith.constant 3.200000e+01 : f32
    %822 = vector.broadcast %cst_205 : f32 to vector<64x1xf32>
    %823 = arith.divf %821, %822 : vector<64x1xf32>
    %824 = vector.broadcast %816 : vector<64x1xf32> to vector<64x32xf32>
    %825 = arith.subf %808, %824 : vector<64x32xf32>
    %cst_206 = arith.constant 9.99999974E-6 : f32
    %826 = vector.broadcast %cst_206 : f32 to vector<64x1xf32>
    %827 = arith.addf %823, %826 : vector<64x1xf32>
    %828 = math.rsqrt %827 : vector<64x1xf32>
    %829 = vector.broadcast %828 : vector<64x1xf32> to vector<64x32xf32>
    %830 = arith.mulf %825, %829 : vector<64x32xf32>
    %831 = vector.broadcast %810 : vector<1x32xf32> to vector<64x32xf32>
    %832 = arith.mulf %830, %831 : vector<64x32xf32>
    %833 = vector.broadcast %812 : vector<1x32xf32> to vector<64x32xf32>
    %834 = arith.addf %832, %833 : vector<64x32xf32>
    %c1_207 = arith.constant 1 : index
    %c0_208 = arith.constant 0 : index
    %c0_209 = arith.constant 0 : index
    %835 = vector.load %arg11[%c1_207, %c0_208, %c0_209] : memref<2x1x32xf32, #tpu.memory_space<vmem>>, vector<1x1x32xf32>
    %836 = vector.shape_cast %835 : vector<1x1x32xf32> to vector<1x32xf32>
    %837 = vector.broadcast %836 : vector<1x32xf32> to vector<64x32xf32>
    %838 = arith.mulf %834, %837 : vector<64x32xf32>
    %c1_210 = arith.constant 1 : index
    %c0_211 = arith.constant 0 : index
    %c0_212 = arith.constant 0 : index
    %839 = vector.load %arg12[%c1_210, %c0_211, %c0_212] : memref<2x1x32xf32, #tpu.memory_space<vmem>>, vector<1x1x32xf32>
    %840 = vector.shape_cast %839 : vector<1x1x32xf32> to vector<1x32xf32>
    %841 = vector.broadcast %840 : vector<1x32xf32> to vector<64x32xf32>
    %842 = arith.mulf %834, %841 : vector<64x32xf32>
    %c1_213 = arith.constant 1 : index
    %c0_214 = arith.constant 0 : index
    %c0_215 = arith.constant 0 : index
    %843 = vector.load %arg13[%c1_213, %c0_214, %c0_215] : memref<2x32x32xbf16, #tpu.memory_space<vmem>>, vector<1x32x32xbf16>
    %844 = vector.shape_cast %843 : vector<1x32x32xbf16> to vector<32x32xbf16>
    %845 = arith.truncf %842 : vector<64x32xf32> to vector<64x32xbf16>
    %cst_216 = arith.constant dense<0.000000e+00> : vector<64x32xf32>
    %846 = tpu.matmul %845, %844, %cst_216 {dimension_numbers = #tpu.dot_dimension_numbers<[1], [0], [0], [1], [0, 0, 1, 1], [], []>} : vector<64x32xbf16>, vector<32x32xbf16>, vector<64x32xf32> -> vector<64x32xf32>
    %cst_217 = arith.constant 0.000000e+00 : f32
    %847 = vector.broadcast %cst_217 : f32 to vector<64x32xf32>
    %848 = arith.subf %847, %846 : vector<64x32xf32>
    %849 = math.exp %848 : vector<64x32xf32>
    %cst_218 = arith.constant 1.000000e+00 : f32
    %850 = vector.broadcast %cst_218 : f32 to vector<64x32xf32>
    %851 = arith.addf %850, %849 : vector<64x32xf32>
    %852 = tpu.reciprocal %851 {approx = true} : vector<64x32xf32> -> vector<64x32xf32>
    %c1_219 = arith.constant 1 : index
    %c0_220 = arith.constant 0 : index
    %c0_221 = arith.constant 0 : index
    %853 = vector.load %arg14[%c1_219, %c0_220, %c0_221] : memref<2x32x132xbf16, #tpu.memory_space<vmem>>, vector<1x32x132xbf16>
    %854 = vector.shape_cast %853 : vector<1x32x132xbf16> to vector<32x132xbf16>
    %855 = arith.truncf %838 : vector<64x32xf32> to vector<64x32xbf16>
    %cst_222 = arith.constant dense<0.000000e+00> : vector<64x132xf32>
    %856 = tpu.matmul %855, %854, %cst_222 {dimension_numbers = #tpu.dot_dimension_numbers<[1], [0], [0], [1], [0, 0, 1, 1], [], []>} : vector<64x32xbf16>, vector<32x132xbf16>, vector<64x132xf32> -> vector<64x132xf32>
    %857 = vector.extract_strided_slice %856 {offsets = [0, 0], sizes = [64, 128], strides = [1, 1]} : vector<64x132xf32> to vector<64x128xf32>
    %cst_223 = arith.constant 5.000000e-01 : f32
    %858 = vector.broadcast %cst_223 : f32 to vector<64x128xf32>
    %859 = arith.mulf %858, %857 : vector<64x128xf32>
    %cst_224 = arith.constant 0.707106769 : f32
    %860 = vector.broadcast %cst_224 : f32 to vector<64x128xf32>
    %861 = arith.mulf %857, %860 : vector<64x128xf32>
    %cst_225 = arith.constant 0.000000e+00 : f32
    %862 = vector.broadcast %cst_225 : f32 to vector<64x128xf32>
    %863 = arith.cmpf olt, %861, %862 : vector<64x128xf32>
    %cst_226 = arith.constant -1.000000e+00 : f32
    %cst_227 = arith.constant 1.000000e+00 : f32
    %864 = vector.broadcast %cst_226 : f32 to vector<64x128xf32>
    %865 = vector.broadcast %cst_227 : f32 to vector<64x128xf32>
    %866 = arith.select %863, %864, %865 : vector<64x128xi1>, vector<64x128xf32>
    %867 = math.absf %861 : vector<64x128xf32>
    %cst_228 = arith.constant 0.327591091 : f32
    %868 = vector.broadcast %cst_228 : f32 to vector<64x128xf32>
    %869 = arith.mulf %868, %867 : vector<64x128xf32>
    %cst_229 = arith.constant 1.000000e+00 : f32
    %870 = vector.broadcast %cst_229 : f32 to vector<64x128xf32>
    %871 = arith.addf %870, %869 : vector<64x128xf32>
    %872 = tpu.reciprocal %871 {approx = true} : vector<64x128xf32> -> vector<64x128xf32>
    %cst_230 = arith.constant 1.06140542 : f32
    %873 = vector.broadcast %cst_230 : f32 to vector<64x128xf32>
    %874 = arith.mulf %873, %872 : vector<64x128xf32>
    %cst_231 = arith.constant -1.45315206 : f32
    %875 = vector.broadcast %cst_231 : f32 to vector<64x128xf32>
    %876 = arith.addf %874, %875 : vector<64x128xf32>
    %877 = arith.mulf %876, %872 : vector<64x128xf32>
    %cst_232 = arith.constant 1.42141378 : f32
    %878 = vector.broadcast %cst_232 : f32 to vector<64x128xf32>
    %879 = arith.addf %877, %878 : vector<64x128xf32>
    %880 = arith.mulf %879, %872 : vector<64x128xf32>
    %cst_233 = arith.constant -0.284496725 : f32
    %881 = vector.broadcast %cst_233 : f32 to vector<64x128xf32>
    %882 = arith.addf %880, %881 : vector<64x128xf32>
    %883 = arith.mulf %882, %872 : vector<64x128xf32>
    %cst_234 = arith.constant 0.254829586 : f32
    %884 = vector.broadcast %cst_234 : f32 to vector<64x128xf32>
    %885 = arith.addf %883, %884 : vector<64x128xf32>
    %886 = arith.mulf %885, %872 : vector<64x128xf32>
    %cst_235 = arith.constant 0.000000e+00 : f32
    %887 = vector.broadcast %cst_235 : f32 to vector<64x128xf32>
    %888 = arith.subf %887, %867 : vector<64x128xf32>
    %889 = arith.mulf %888, %867 : vector<64x128xf32>
    %890 = math.exp %889 : vector<64x128xf32>
    %891 = arith.mulf %886, %890 : vector<64x128xf32>
    %cst_236 = arith.constant 1.000000e+00 : f32
    %892 = vector.broadcast %cst_236 : f32 to vector<64x128xf32>
    %893 = arith.subf %892, %891 : vector<64x128xf32>
    %894 = arith.mulf %866, %893 : vector<64x128xf32>
    %cst_237 = arith.constant 1.000000e+00 : f32
    %895 = vector.broadcast %cst_237 : f32 to vector<64x128xf32>
    %896 = arith.addf %895, %894 : vector<64x128xf32>
    %897 = arith.mulf %859, %896 : vector<64x128xf32>
    %898 = vector.extract_strided_slice %856 {offsets = [0, 128], sizes = [64, 4], strides = [1, 1]} : vector<64x132xf32> to vector<64x4xf32>
    %cst_238 = arith.constant 5.000000e-01 : f32
    %899 = vector.broadcast %cst_238 : f32 to vector<64x4xf32>
    %900 = arith.mulf %899, %898 : vector<64x4xf32>
    %901 = math.cos %900 : vector<64x4xf32>
    %cst_239 = arith.constant 5.000000e-01 : f32
    %902 = vector.broadcast %cst_239 : f32 to vector<64x4xf32>
    %903 = arith.mulf %902, %898 : vector<64x4xf32>
    %904 = math.sin %903 : vector<64x4xf32>
    %905 = vector.extract_strided_slice %901 {offsets = [0, 0], sizes = [64, 1], strides = [1, 1]} : vector<64x4xf32> to vector<64x1xf32>
    %c0_240 = arith.constant 0 : index
    %c0_241 = arith.constant 0 : index
    %c0_242 = arith.constant 0 : index
    %906 = vector.load %arg19[%c0_240, %c0_241, %c0_242] : memref<4x1x16xf32, #tpu.memory_space<vmem>>, vector<1x1x16xf32>
    %907 = vector.shape_cast %906 : vector<1x1x16xf32> to vector<1x16xf32>
    %908 = vector.broadcast %905 : vector<64x1xf32> to vector<64x16xf32>
    %909 = vector.broadcast %907 : vector<1x16xf32> to vector<64x16xf32>
    %910 = arith.mulf %908, %909 : vector<64x16xf32>
    %911 = vector.extract_strided_slice %904 {offsets = [0, 0], sizes = [64, 1], strides = [1, 1]} : vector<64x4xf32> to vector<64x1xf32>
    %c0_243 = arith.constant 0 : index
    %c0_244 = arith.constant 0 : index
    %c0_245 = arith.constant 0 : index
    %912 = vector.load %arg18[%c0_243, %c0_244, %c0_245] : memref<4x1x16xf32, #tpu.memory_space<vmem>>, vector<1x1x16xf32>
    %913 = vector.shape_cast %912 : vector<1x1x16xf32> to vector<1x16xf32>
    %914 = vector.broadcast %911 : vector<64x1xf32> to vector<64x16xf32>
    %915 = vector.broadcast %913 : vector<1x16xf32> to vector<64x16xf32>
    %916 = arith.mulf %914, %915 : vector<64x16xf32>
    %917 = arith.addf %910, %916 : vector<64x16xf32>
    %918 = vector.extract_strided_slice %901 {offsets = [0, 1], sizes = [64, 1], strides = [1, 1]} : vector<64x4xf32> to vector<64x1xf32>
    %c1_246 = arith.constant 1 : index
    %c0_247 = arith.constant 0 : index
    %c0_248 = arith.constant 0 : index
    %919 = vector.load %arg19[%c1_246, %c0_247, %c0_248] : memref<4x1x16xf32, #tpu.memory_space<vmem>>, vector<1x1x16xf32>
    %920 = vector.shape_cast %919 : vector<1x1x16xf32> to vector<1x16xf32>
    %921 = vector.broadcast %918 : vector<64x1xf32> to vector<64x16xf32>
    %922 = vector.broadcast %920 : vector<1x16xf32> to vector<64x16xf32>
    %923 = arith.mulf %921, %922 : vector<64x16xf32>
    %924 = vector.extract_strided_slice %904 {offsets = [0, 1], sizes = [64, 1], strides = [1, 1]} : vector<64x4xf32> to vector<64x1xf32>
    %c1_249 = arith.constant 1 : index
    %c0_250 = arith.constant 0 : index
    %c0_251 = arith.constant 0 : index
    %925 = vector.load %arg18[%c1_249, %c0_250, %c0_251] : memref<4x1x16xf32, #tpu.memory_space<vmem>>, vector<1x1x16xf32>
    %926 = vector.shape_cast %925 : vector<1x1x16xf32> to vector<1x16xf32>
    %927 = vector.broadcast %924 : vector<64x1xf32> to vector<64x16xf32>
    %928 = vector.broadcast %926 : vector<1x16xf32> to vector<64x16xf32>
    %929 = arith.mulf %927, %928 : vector<64x16xf32>
    %930 = arith.addf %923, %929 : vector<64x16xf32>
    %931 = arith.mulf %917, %930 : vector<64x16xf32>
    %932 = vector.extract_strided_slice %901 {offsets = [0, 2], sizes = [64, 1], strides = [1, 1]} : vector<64x4xf32> to vector<64x1xf32>
    %c2_252 = arith.constant 2 : index
    %c0_253 = arith.constant 0 : index
    %c0_254 = arith.constant 0 : index
    %933 = vector.load %arg19[%c2_252, %c0_253, %c0_254] : memref<4x1x16xf32, #tpu.memory_space<vmem>>, vector<1x1x16xf32>
    %934 = vector.shape_cast %933 : vector<1x1x16xf32> to vector<1x16xf32>
    %935 = vector.broadcast %932 : vector<64x1xf32> to vector<64x16xf32>
    %936 = vector.broadcast %934 : vector<1x16xf32> to vector<64x16xf32>
    %937 = arith.mulf %935, %936 : vector<64x16xf32>
    %938 = vector.extract_strided_slice %904 {offsets = [0, 2], sizes = [64, 1], strides = [1, 1]} : vector<64x4xf32> to vector<64x1xf32>
    %c2_255 = arith.constant 2 : index
    %c0_256 = arith.constant 0 : index
    %c0_257 = arith.constant 0 : index
    %939 = vector.load %arg18[%c2_255, %c0_256, %c0_257] : memref<4x1x16xf32, #tpu.memory_space<vmem>>, vector<1x1x16xf32>
    %940 = vector.shape_cast %939 : vector<1x1x16xf32> to vector<1x16xf32>
    %941 = vector.broadcast %938 : vector<64x1xf32> to vector<64x16xf32>
    %942 = vector.broadcast %940 : vector<1x16xf32> to vector<64x16xf32>
    %943 = arith.mulf %941, %942 : vector<64x16xf32>
    %944 = arith.addf %937, %943 : vector<64x16xf32>
    %945 = arith.mulf %931, %944 : vector<64x16xf32>
    %946 = vector.extract_strided_slice %901 {offsets = [0, 3], sizes = [64, 1], strides = [1, 1]} : vector<64x4xf32> to vector<64x1xf32>
    %c3_258 = arith.constant 3 : index
    %c0_259 = arith.constant 0 : index
    %c0_260 = arith.constant 0 : index
    %947 = vector.load %arg19[%c3_258, %c0_259, %c0_260] : memref<4x1x16xf32, #tpu.memory_space<vmem>>, vector<1x1x16xf32>
    %948 = vector.shape_cast %947 : vector<1x1x16xf32> to vector<1x16xf32>
    %949 = vector.broadcast %946 : vector<64x1xf32> to vector<64x16xf32>
    %950 = vector.broadcast %948 : vector<1x16xf32> to vector<64x16xf32>
    %951 = arith.mulf %949, %950 : vector<64x16xf32>
    %952 = vector.extract_strided_slice %904 {offsets = [0, 3], sizes = [64, 1], strides = [1, 1]} : vector<64x4xf32> to vector<64x1xf32>
    %c3_261 = arith.constant 3 : index
    %c0_262 = arith.constant 0 : index
    %c0_263 = arith.constant 0 : index
    %953 = vector.load %arg18[%c3_261, %c0_262, %c0_263] : memref<4x1x16xf32, #tpu.memory_space<vmem>>, vector<1x1x16xf32>
    %954 = vector.shape_cast %953 : vector<1x1x16xf32> to vector<1x16xf32>
    %955 = vector.broadcast %952 : vector<64x1xf32> to vector<64x16xf32>
    %956 = vector.broadcast %954 : vector<1x16xf32> to vector<64x16xf32>
    %957 = arith.mulf %955, %956 : vector<64x16xf32>
    %958 = arith.addf %951, %957 : vector<64x16xf32>
    %959 = arith.mulf %945, %958 : vector<64x16xf32>
    %c0_264 = arith.constant 0 : index
    %c0_265 = arith.constant 0 : index
    %960 = vector.load %arg20[%c0_264, %c0_265] : memref<1x16xf32, #tpu.memory_space<vmem>>, vector<1x16xf32>
    %961 = vector.broadcast %960 : vector<1x16xf32> to vector<64x16xf32>
    %962 = arith.mulf %959, %961 : vector<64x16xf32>
    %c0_266 = arith.constant 0 : index
    %c0_267 = arith.constant 0 : index
    %963 = vector.load %arg21[%c0_266, %c0_267] : memref<1x16xf32, #tpu.memory_space<vmem>>, vector<1x16xf32>
    %964 = vector.broadcast %963 : vector<1x16xf32> to vector<64x16xf32>
    %965 = arith.mulf %959, %964 : vector<64x16xf32>
    %966 = tpu.concatenate %962, %965 in 1 : vector<64x16xf32>, vector<64x16xf32> -> vector<64x32xf32>
    %c1_268 = arith.constant 1 : index
    %c0_269 = arith.constant 0 : index
    %c0_270 = arith.constant 0 : index
    %967 = vector.load %arg17[%c1_268, %c0_269, %c0_270] : memref<2x32x32xbf16, #tpu.memory_space<vmem>>, vector<1x32x32xbf16>
    %968 = vector.shape_cast %967 : vector<1x32x32xbf16> to vector<32x32xbf16>
    %969 = arith.truncf %966 : vector<64x32xf32> to vector<64x32xbf16>
    %cst_271 = arith.constant dense<0.000000e+00> : vector<64x32xf32>
    %970 = tpu.matmul %969, %968, %cst_271 {dimension_numbers = #tpu.dot_dimension_numbers<[1], [0], [0], [1], [0, 0, 1, 1], [], []>} : vector<64x32xbf16>, vector<32x32xbf16>, vector<64x32xf32> -> vector<64x32xf32>
    %971 = vector.extract_strided_slice %970 {offsets = [0, 0], sizes = [64, 16], strides = [1, 1]} : vector<64x32xf32> to vector<64x16xf32>
    %972 = vector.extract_strided_slice %970 {offsets = [0, 16], sizes = [64, 16], strides = [1, 1]} : vector<64x32xf32> to vector<64x16xf32>
    %973 = arith.mulf %971, %971 : vector<64x16xf32>
    %974 = arith.mulf %972, %972 : vector<64x16xf32>
    %975 = arith.addf %973, %974 : vector<64x16xf32>
    %c1_272 = arith.constant 1 : index
    %c0_273 = arith.constant 0 : index
    %c0_274 = arith.constant 0 : index
    %976 = vector.load %arg15[%c1_272, %c0_273, %c0_274] : memref<2x128x32xbf16, #tpu.memory_space<vmem>>, vector<1x128x32xbf16>
    %977 = vector.shape_cast %976 : vector<1x128x32xbf16> to vector<128x32xbf16>
    %978 = arith.truncf %897 : vector<64x128xf32> to vector<64x128xbf16>
    %cst_275 = arith.constant dense<0.000000e+00> : vector<64x32xf32>
    %979 = tpu.matmul %978, %977, %cst_275 {dimension_numbers = #tpu.dot_dimension_numbers<[1], [0], [0], [1], [0, 0, 1, 1], [], []>} : vector<64x128xbf16>, vector<128x32xbf16>, vector<64x32xf32> -> vector<64x32xf32>
    %c1_276 = arith.constant 1 : index
    %c0_277 = arith.constant 0 : index
    %c0_278 = arith.constant 0 : index
    %980 = vector.load %arg16[%c1_276, %c0_277, %c0_278] : memref<2x16x32xbf16, #tpu.memory_space<vmem>>, vector<1x16x32xbf16>
    %981 = vector.shape_cast %980 : vector<1x16x32xbf16> to vector<16x32xbf16>
    %982 = arith.truncf %975 : vector<64x16xf32> to vector<64x16xbf16>
    %cst_279 = arith.constant dense<0.000000e+00> : vector<64x32xf32>
    %983 = tpu.matmul %982, %981, %cst_279 {dimension_numbers = #tpu.dot_dimension_numbers<[1], [0], [0], [1], [0, 0, 1, 1], [], []>} : vector<64x16xbf16>, vector<16x32xbf16>, vector<64x32xf32> -> vector<64x32xf32>
    %984 = arith.addf %979, %983 : vector<64x32xf32>
    %985 = arith.mulf %852, %984 : vector<64x32xf32>
    %986 = arith.addf %808, %985 : vector<64x32xf32>
    %987 = vector.extract_strided_slice %834 {offsets = [56, 0], sizes = [8, 32], strides = [1, 1]} : vector<64x32xf32> to vector<8x32xf32>
    %c1_280 = arith.constant 1 : index
    %c0_281 = arith.constant 0 : index
    %c0_282 = arith.constant 0 : index
    %988 = vector.load %arg29[%c1_280, %c0_281, %c0_282] : memref<2x8x32xf32, #tpu.memory_space<vmem>>, vector<1x8x32xf32>
    %989 = vector.shape_cast %988 : vector<1x8x32xf32> to vector<8x32xf32>
    %990 = vector.shape_cast %987 : vector<8x32xf32> to vector<1x8x32xf32>
    tpu.vector_store %arg29[%c1_280, %c0_281, %c0_282], %990 {strides = array<i32>} : memref<2x8x32xf32, #tpu.memory_space<vmem>>, vector<1x8x32xf32>,
    %c0_283 = arith.constant 0 : index
    %c0_284 = arith.constant 0 : index
    %991 = vector.load %arg22[%c0_283, %c0_284] : memref<1x32xf32, #tpu.memory_space<vmem>>, vector<1x32xf32>
    %c0_285 = arith.constant 0 : index
    %c0_286 = arith.constant 0 : index
    %992 = vector.load %arg23[%c0_285, %c0_286] : memref<1x32xf32, #tpu.memory_space<vmem>>, vector<1x32xf32>
    %cst_287 = arith.constant dense<0.000000e+00> : vector<64xf32>
    %993 = vector.multi_reduction <add>, %986, %cst_287 [1] : vector<64x32xf32> to vector<64xf32>
    %994 = vector.shape_cast %993 : vector<64xf32> to vector<64x1xf32>
    %cst_288 = arith.constant 3.200000e+01 : f32
    %995 = vector.broadcast %cst_288 : f32 to vector<64x1xf32>
    %996 = arith.divf %994, %995 : vector<64x1xf32>
    %997 = vector.broadcast %996 : vector<64x1xf32> to vector<64x32xf32>
    %998 = arith.subf %986, %997 : vector<64x32xf32>
    %999 = arith.mulf %998, %998 : vector<64x32xf32>
    %cst_289 = arith.constant dense<0.000000e+00> : vector<64xf32>
    %1000 = vector.multi_reduction <add>, %999, %cst_289 [1] : vector<64x32xf32> to vector<64xf32>
    %1001 = vector.shape_cast %1000 : vector<64xf32> to vector<64x1xf32>
    %cst_290 = arith.constant 3.200000e+01 : f32
    %1002 = vector.broadcast %cst_290 : f32 to vector<64x1xf32>
    %1003 = arith.divf %1001, %1002 : vector<64x1xf32>
    %1004 = vector.broadcast %996 : vector<64x1xf32> to vector<64x32xf32>
    %1005 = arith.subf %986, %1004 : vector<64x32xf32>
    %cst_291 = arith.constant 9.99999974E-6 : f32
    %1006 = vector.broadcast %cst_291 : f32 to vector<64x1xf32>
    %1007 = arith.addf %1003, %1006 : vector<64x1xf32>
    %1008 = math.rsqrt %1007 : vector<64x1xf32>
    %1009 = vector.broadcast %1008 : vector<64x1xf32> to vector<64x32xf32>
    %1010 = arith.mulf %1005, %1009 : vector<64x32xf32>
    %1011 = vector.broadcast %991 : vector<1x32xf32> to vector<64x32xf32>
    %1012 = arith.mulf %1010, %1011 : vector<64x32xf32>
    %1013 = vector.broadcast %992 : vector<1x32xf32> to vector<64x32xf32>
    %1014 = arith.addf %1012, %1013 : vector<64x32xf32>
    %c0_292 = arith.constant 0 : index
    %c0_293 = arith.constant 0 : index
    %1015 = vector.load %arg24[%c0_292, %c0_293] : memref<32x3xbf16, #tpu.memory_space<vmem>>, vector<32x3xbf16>
    %1016 = arith.truncf %1014 : vector<64x32xf32> to vector<64x32xbf16>
    %cst_294 = arith.constant dense<0.000000e+00> : vector<64x3xf32>
    %1017 = tpu.matmul %1016, %1015, %cst_294 {dimension_numbers = #tpu.dot_dimension_numbers<[1], [0], [0], [1], [0, 0, 1, 1], [], []>} : vector<64x32xbf16>, vector<32x3xbf16>, vector<64x3xf32> -> vector<64x3xf32>
    %c0_295 = arith.constant 0 : index
    %c0_296 = arith.constant 0 : index
    %1018 = vector.load %arg25[%c0_295, %c0_296] : memref<64x3xf32, #tpu.memory_space<vmem>>, vector<64x3xf32>
    tpu.vector_store %arg25[%c0_295, %c0_296], %1017 {strides = array<i32>} : memref<64x3xf32, #tpu.memory_space<vmem>>, vector<64x3xf32>,
    return
  }
}

</mosaic_0001>

<bundles_post_ra>
// kernel: _lambda_.1
= control target key start
LH: loop header
LB: loop body
LE: loop exit
PB: predicated region body
PF: predicated region fallthrough
CT: control target
= control target key end

     0   :  { %s10242_s6 = smov 1   ;;  %s10243_s10 = smov 2   ;;  %s14690_s0 = inlined_call_operand.smem [shape: u32[30], index: -1, kind: input, shape index: {}] }
   0x1   :  { %s10302_s5 = sld [smem:[%s14690_s0]]   ;;  %s10244_s14 = smov 3  }
   0x2   :  { %s10307_s9 = sld [smem:[%s14690_s0 + %s10242_s6]]   ;;  %s10245_s18 = smov 4  }
   0x3   :  { %s10312_s13 = sld [smem:[%s14690_s0 + %s10243_s10]]   ;;  %s10246_s22 = smov 5  }
   0x4   :  { %s10317_s17 = sld [smem:[%s14690_s0 + %s10244_s14]]   ;;  %s10247_s26 = smov 6  }
   0x5   :  { %s10322_s21 = sld [smem:[%s14690_s0 + %s10245_s18]]   ;;  %s10248_s30 = smov 7  }
   0x6   :  { %s10327_s25 = sld [smem:[%s14690_s0 + %s10246_s22]]   ;;  %s10249_s4 = smov 8  }
   0x7   :  { %s10332_s29 = sld [smem:[%s14690_s0 + %s10247_s26]]   ;;  %s10250_s10 = smov 9  }
   0x8   :  { %s10337_s3 = sld [smem:[%s14690_s0 + %s10248_s30]]   ;;  %s10251_s15 = smov 10  }
   0x9   :  { %s10342_s8 = sld [smem:[%s14690_s0 + %s10249_s4]]   ;;  %s10252_s20 = smov 11  }
   0xa   :  { %s10347_s14 = sld [smem:[%s14690_s0 + %s10250_s10]]   ;;  %s10253_s26 = smov 12  }
   0xb   :  { %s10352_s19 = sld [smem:[%s14690_s0 + %s10251_s15]]   ;;  %s10254_s1 = smov 13  }
   0xc   :  { %s10357_s24 = sld [smem:[%s14690_s0 + %s10252_s20]]   ;;  %s10255_s7 = smov 14  }
   0xd   :  { %s10362_s30 = sld [smem:[%s14690_s0 + %s10253_s26]]   ;;  %s10256_s15 = smov 15  }
   0xe   :  { %s10367_s6 = sld [smem:[%s14690_s0 + %s10254_s1]]   ;;  %s10257_s22 = smov 16  }
   0xf   :  { %s10372_s12 = sld [smem:[%s14690_s0 + %s10255_s7]]   ;;  %s10258_s28 = smov 17  }
  0x10   :  { %s10377_s20 = sld [smem:[%s14690_s0 + %s10256_s15]]   ;;  %s10259_s7 = smov 18  }
  0x11   :  { %s10382_s27 = sld [smem:[%s14690_s0 + %s10257_s22]]   ;;  %s10260_s15 = smov 19  }
  0x12   :  { %s10387_s4 = sld [smem:[%s14690_s0 + %s10258_s28]]   ;;  %s10261_s22 = smov 20  }
  0x13   :  { %14816 = sst [smem:[#allocation13_spill]] %s10362_s30  ;;  %s10262_s28 = smov 21  }
  0x14   :  { %s10392_s30 = sld [smem:[%s14690_s0 + %s10259_s7]]   ;;  %s10263_s7 = smov 22  }
  0x16   :  { %14817 = sst [smem:[#allocation14_spill]] %s10377_s20 }
  0x17   :  { %14818 = sst [smem:[#allocation15_spill]] %s10382_s27 }
  0x18   :  { %14819 = sst [smem:[#allocation16_spill]] %s10387_s4 }
  0x19   :  { %s10397_s20 = sld [smem:[%s14690_s0 + %s10260_s15]]   ;;  %s10264_s15 = smov 23  }
  0x1a   :  { %14820 = sst [smem:[#allocation17_spill]] %s10392_s30 }
  0x1b   :  { %s10402_s27 = sld [smem:[%s14690_s0 + %s10261_s22]]   ;;  %s10265_s22 = smov 24  }
  0x1c   :  { %s10407_s4 = sld [smem:[%s14690_s0 + %s10262_s28]]   ;;  %s10266_s28 = smov 25  }
  0x1d   :  { %s10412_s30 = sld [smem:[%s14690_s0 + %s10263_s7]]   ;;  %s10267_s7 = smov 26  }
  0x1f   :  { %14821 = sst [smem:[#allocation18_spill]] %s10397_s20 }
  0x20   :  { %s10417_s20 = sld [smem:[%s14690_s0 + %s10264_s15]]   ;;  %s10268_s15 = smov 27  }
  0x21   :  { %14822 = sst [smem:[#allocation19_spill]] %s10402_s27 }
  0x22   :  { %14823 = sst [smem:[#allocation20_spill]] %s10407_s4 }
  0x23   :  { %14824 = sst [smem:[#allocation21_spill]] %s10412_s30 }
  0x24   :  { %s10422_s27 = sld [smem:[%s14690_s0 + %s10265_s22]]   ;;  %s10269_s22 = smov 28  }
  0x25   :  { %s10427_s4 = sld [smem:[%s14690_s0 + %s10266_s28]]   ;;  %s10270_s28 = smov 29  }
  0x26   :  { %14825 = sst [smem:[#allocation22_spill]] %s10417_s20 }
  0x27   :  { %s10432_s30 = sld [smem:[%s14690_s0 + %s10267_s7]]  }
  0x28   :  { %s10437_s20 = sld [smem:[%s14690_s0 + %s10268_s15]]  }
  0x2a   :  { %14826 = sst [smem:[#allocation23_spill]] %s10422_s27 }
  0x2b   :  { %14827 = sst [smem:[#allocation24_spill]] %s10427_s4 }
  0x2c   :  { %s10442_s27 = sld [smem:[%s14690_s0 + %s10269_s22]]  }
  0x2d   :  { %s10447_s4 = sld [smem:[%s14690_s0 + %s10270_s28]]  }
  0x2e   :  { %65 = vsyncpa [#allocation4], 0 }
  0x2f   :  { %66 = vsyncpa [#allocation6], 0  ;;  %v127_v0 = vld [vmem:[%s10307_s9] sm:$0x3]  ;;  %vm152_vm0 = vcmask 1040384   ;;  %vm153_vm1 = vcmask 1041408  }
  0x30   :  { %v119_v1 = vld [vmem:[%s10302_s5] sm:$0xff]  ;;  %v10271_v2 = vmov 65535   ;;  %v120_v4 = vld [vmem:[%s10302_s5 + $0x8] sm:$0xff]  ;;  %vm14759_vm2 = vcmask 23552   ;;  %v121_v7 = vld [vmem:[%s10302_s5 + $0x10] sm:$0xff] }
  0x31   :  { %v154_v3 = vsel %vm152_vm0, 4294967295, %v10271_v2  ;;  %v128_v6 = vpack.c.bf16 %v120_v4, %v119_v1  ;;  %v122_v8 = vld [vmem:[%s10302_s5 + $0x18] sm:$0xff]  ;;  %v123_v9 = vld [vmem:[%s10302_s5 + $0x20] sm:$0xff]  ;;  %v124_v11 = vld [vmem:[%s10302_s5 + $0x28] sm:$0xff] }
  0x32   :  { %v155_v5 = vsel %vm153_vm1, %v154_v3, 0  ;;  %v129_v12 = vpack.c.bf16 %v122_v8, %v121_v7  ;;  %v130_v13 = vpack.c.bf16 %v124_v11, %v123_v9  ;;  %v125_v14 = vld [vmem:[%s10302_s5 + $0x30] sm:$0xff]  ;;  %v126_v15 = vld [vmem:[%s10302_s5 + $0x38] sm:$0xff] }
  0x33   :  { %v157_v10 = vand.u32 %v155_v5, %v127_v0  ;;  %9275 = vmatprep.mubr.msk.bf16.mxu0 %vm14759_vm2, %v128_v6  ;;  %v131_v16 = vpack.c.bf16 %v126_v15, %v125_v14 }
  0x35   :  { %9273 = vmatprep.subr.bf16.mxu0 %v157_v10 }
  0x36   :  { %9274 = vmatpush3.bf16.msra.mxu0 %v157_v10 }
  0x39   :  { %9276 = vmatmul.mubr.msk.bf16.vlgmr.msra.gmra.mxu0 %vm14759_vm2, %v129_v12 }
  0x3a   :  { %9279 = vmatprep.mubr.msk.bf16.mxu0 %vm14759_vm2, %v130_v13 }
  0x41   :  { %9280 = vmatmul.mubr.msk.bf16.gmra.mxu0 %vm14759_vm2, %v131_v16 }
  0x42   :  { %67 = vsyncpa [#allocation9], 0  ;;  %v8855_v17 = vld [vmem:[%s10312_s13] ss:$0 sm:$0xff]  ;;  %vm226_vm3 = vcmask 261120   ;;  %s10272_s0 = smov 64  }
  0x43   :  { %s10273_s5 = smov 32   ;;  %s10274_s9 = smov 96   ;;  %vm14761_vm4 = vcmask 523264   ;;  %vm14760_vm5 = vcmask 785408  }
  0x44   :  { %s14841_s13 = sld [smem:[#allocation13_spill]]  ;;  %s10286_s18 = smov 16  }
  0x45   :  { %s14844_s7 = sld [smem:[#allocation14_spill]]  ;;  %s10287_s26 = smov 112  }
  0x46   :  { %s14905_s10 = sld [smem:[#allocation17_spill]] }
  0x47   :  { %s14906_s11 = sld [smem:[#allocation18_spill]] }
  0x48   :  { %s14907_s15 = sld [smem:[#allocation20_spill]] }
  0x49   :  { %s14908_s16 = sld [smem:[#allocation16_spill]] }
  0x4a   :  { %s14909_s22 = sld [smem:[#allocation19_spill]] }
  0x4b   :  { %s14910_s23 = sld [smem:[#allocation15_spill]] }
  0xf9   :  { %v9277_v18 = vpop.f32.mrf.mxu0 }
  0xfa   :  { %v10463_v19 = vadd.f32 %v9277_v18, %v8855_v17  ;;  %v9708_v18 = vld [vmem:[%s10337_s3 + $0x8] sm:$0xff]  }
  0xfb   :  { %v193_v20 = vpop.f32.mrf.mxu0  ;;  %9283 = vmatprep.subr.bf16.mxu1 %v9708_v18 }
  0xfc   :  { %v10465_v21 = vadd.f32 %v8855_v17, %v193_v20  ;;  %v233_v22 = vsel %vm226_vm3, %v10463_v19, 0.0  ;;  %v9709_v20 = vld [vmem:[%s10337_s3] sm:$0xff]   ;;  %9284 = vmatpush3.bf16.msra.mxu1 %v9708_v18 }
  0xfd   :  { %234 = vadd.xlane.f32.xlu1 %v233_v22  ;;  %v9278_v23 = vpop.f32.mrf.mxu0  ;;  %9285 = vmatprep.subr.bf16.mxu1 %v9709_v20 }
  0xfe   :  { %v10469_v24 = vadd.f32 %v9278_v23, %v8855_v17  ;;  %v227_v25 = vsel %vm226_vm3, %v10465_v21, 0.0 }
  0xff   :  { %v196_v26 = vpop.f32.mrf.mxu0  ;;  %228 = vadd.xlane.f32.xlu0 %v227_v25 }
 0x100   :  { %v10473_v27 = vadd.f32 %v8855_v17, %v196_v26  ;;  %v236_v28 = vsel %vm226_vm3, %v10469_v24, 0.0  ;;  %9286 = vmatpush3.bf16.msra.mxu1 %v9709_v20 }
 0x101   :  { %237 = vadd.xlane.f32.xlu1 %v236_v28  ;;  %v9281_v29 = vpop.f32.mrf.mxu0 }
 0x102   :  { %v230_v30 = vsel %vm226_vm3, %v10473_v27, 0.0  ;;  %v10479_v32 = vadd.f32 %v9281_v29, %v8855_v17 }
 0x103   :  { %v209_v31 = vpop.f32.mrf.mxu0  ;;  %231 = vadd.xlane.f32.xlu0 %v230_v30 }
 0x104   :  { %v10481_v33 = vadd.f32 %v8855_v17, %v209_v31  ;;  %v245_v39 = vsel %vm226_vm3, %v10479_v32, 0.0 }
 0x105   :  { %v9282_v34 = vpop.f32.mrf.mxu0 }
 0x106   :  { %v239_v35 = vsel %vm226_vm3, %v10481_v33, 0.0  ;;  %v10485_v37 = vadd.f32 %v9282_v34, %v8855_v17 }
 0x107   :  { %v212_v36 = vpop.f32.mrf.mxu0  ;;  %240 = vadd.xlane.f32.xlu0 %v239_v35 }
 0x108   :  { %v10487_v38 = vadd.f32 %v8855_v17, %v212_v36  ;;  %v248_v41 = vsel %vm226_vm3, %v10485_v37, 0.0 }
 0x10a   :  { %v242_v40 = vsel %vm226_vm3, %v10487_v38, 0.0 }
 0x10b   :  { %243 = vadd.xlane.f32.xlu1 %v242_v40  ;;  %246 = vadd.xlane.f32.xlu0 %v245_v39 }
 0x10f   :  { %249 = vadd.xlane.f32.xlu1 %v248_v41 }
 0x186   :  { %v235_v42 = vpop.xlane.xlu1 %234 }
 0x187   :  { %v254_v43 = vmul.f32 0.03125, %v235_v42 }
 0x188   :  { %v229_v44 = vpop.xlane.xlu0 %228 }
 0x189   :  { %v252_v45 = vmul.f32 0.03125, %v229_v44  ;;  %v10496_v47 = vsub.f32 %v10463_v19, %v254_v43 }
 0x18a   :  { %v238_v46 = vpop.xlane.xlu1 %237 }
 0x18b   :  { %v10499_v48 = vsub.f32 %v10465_v21, %v252_v45  ;;  %v255_v49 = vmul.f32 0.03125, %v238_v46  ;;  %v270_v56 = vmul.f32 %v10496_v47, %v10496_v47 }
 0x18c   :  { %v232_v50 = vpop.xlane.xlu0 %231 }
 0x18d   :  { %v253_v51 = vmul.f32 0.03125, %v232_v50  ;;  %v268_v52 = vmul.f32 %v10499_v48, %v10499_v48  ;;  %v10504_v53 = vsub.f32 %v10469_v24, %v255_v49  ;;  %v282_v61 = vsel %vm226_vm3, %v270_v56, 0.0 }
 0x18f   :  { %v10507_v54 = vsub.f32 %v10473_v27, %v253_v51  ;;  %v276_v55 = vsel %vm226_vm3, %v268_v52, 0.0  ;;  %v271_v63 = vmul.f32 %v10504_v53, %v10504_v53 }
 0x190   :  { %277 = vadd.xlane.f32.xlu0 %v276_v55  ;;  %v241_v57 = vpop.xlane.xlu0 %240 }
 0x191   :  { %v256_v58 = vmul.f32 0.03125, %v241_v57  ;;  %v269_v59 = vmul.f32 %v10507_v54, %v10507_v54  ;;  %v285_v7 = vsel %vm226_vm3, %v271_v63, 0.0 }
 0x193   :  { %v10515_v60 = vsub.f32 %v10481_v33, %v256_v58  ;;  %v279_v62 = vsel %vm226_vm3, %v269_v59, 0.0  ;;  %v8860_v58 = vld [vmem:[%s10317_s17] ss:$0 sm:$0xff] }
 0x194   :  { %v244_v0 = vpop.xlane.xlu1 %243  ;;  %283 = vadd.xlane.f32.xlu0 %v282_v61  ;;  %280 = vadd.xlane.f32.xlu1 %v279_v62  ;;  %v247_v1 = vpop.xlane.xlu0 %246 }
 0x195   :  { %v257_v2 = vmul.f32 0.03125, %v244_v0  ;;  %v258_v3 = vmul.f32 0.03125, %v247_v1  ;;  %v272_v4 = vmul.f32 %v10515_v60, %v10515_v60  ;;  %v8861_v0 = vld [vmem:[%s10322_s21] ss:$0 sm:$0xff] }
 0x197   :  { %v10524_v5 = vsub.f32 %v10487_v38, %v257_v2  ;;  %v10527_v6 = vsub.f32 %v10479_v32, %v258_v3  ;;  %v288_v8 = vsel %vm226_vm3, %v272_v4, 0.0 }
 0x198   :  { %v250_v9 = vpop.xlane.xlu1 %249  ;;  %286 = vadd.xlane.f32.xlu1 %v285_v7  ;;  %289 = vadd.xlane.f32.xlu0 %v288_v8 }
 0x199   :  { %v259_v10 = vmul.f32 0.03125, %v250_v9  ;;  %v273_v11 = vmul.f32 %v10524_v5, %v10524_v5  ;;  %v274_v12 = vmul.f32 %v10527_v6, %v10527_v6 }
 0x19b   :  { %v10536_v13 = vsub.f32 %v10485_v37, %v259_v10  ;;  %v291_v14 = vsel %vm226_vm3, %v273_v11, 0.0  ;;  %v294_v15 = vsel %vm226_vm3, %v274_v12, 0.0 }
 0x19c   :  { %292 = vadd.xlane.f32.xlu1 %v291_v14  ;;  %295 = vadd.xlane.f32.xlu0 %v294_v15 }
 0x19d   :  { %v275_v16 = vmul.f32 %v10536_v13, %v10536_v13 }
 0x19f   :  { %v297_v17 = vsel %vm226_vm3, %v275_v16, 0.0 }
 0x1a0   :  { %298 = vadd.xlane.f32.xlu1 %v297_v17 }
 0x219   :  { %v278_v22 = vpop.xlane.xlu0 %277 }
 0x21a   :  { %v300_v23 = vmul.f32 0.03125, %v278_v22 }
 0x21c   :  { %v308_v25 = vadd.f32 1e-05, %v300_v23 }
 0x21d   :  { %v281_v26 = vpop.xlane.xlu1 %280  ;;  %v284_v28 = vpop.xlane.xlu0 %283 }
 0x21e   :  { %9756 = vrsqrt.f32 %v308_v25  ;;  %v301_v29 = vmul.f32 0.03125, %v281_v26  ;;  %v302_v30 = vmul.f32 0.03125, %v284_v28 }
 0x220   :  { %v309_v31 = vadd.f32 1e-05, %v301_v29  ;;  %v310_v34 = vadd.f32 1e-05, %v302_v30 }
 0x221   :  { %v287_v35 = vpop.xlane.xlu1 %286  ;;  %v290_v36 = vpop.xlane.xlu0 %289 }
 0x222   :  { %9758 = vrsqrt.f32 %v309_v31  ;;  %v303_v39 = vmul.f32 0.03125, %v287_v35  ;;  %v304_v40 = vmul.f32 0.03125, %v290_v36 }
 0x223   :  { %9760 = vrsqrt.f32 %v310_v34 }
 0x224   :  { %v311_v41 = vadd.f32 1e-05, %v303_v39  ;;  %v312_v42 = vadd.f32 1e-05, %v304_v40  ;;  %v10568_v39 = vld [vmem:[%s10332_s29] ss:$0 sm:$0xff] }
 0x225   :  { %v293_v43 = vpop.xlane.xlu1 %292  ;;  %v296_v44 = vpop.xlane.xlu0 %295 }
 0x226   :  { %9762 = vrsqrt.f32 %v311_v41  ;;  %v305_v45 = vmul.f32 0.03125, %v293_v43  ;;  %v306_v46 = vmul.f32 0.03125, %v296_v44 }
 0x227   :  { %9764 = vrsqrt.f32 %v312_v42 }
 0x228   :  { %v313_v49 = vadd.f32 1e-05, %v305_v45  ;;  %v314_v50 = vadd.f32 1e-05, %v306_v46 }
 0x229   :  { %v299_v51 = vpop.xlane.xlu1 %298 }
 0x22a   :  { %9766 = vrsqrt.f32 %v313_v49  ;;  %v307_v52 = vmul.f32 0.03125, %v299_v51 }
 0x22b   :  { %v9757_v55 = vpop.eup %9756  ;;  %9768 = vrsqrt.f32 %v314_v50 }
 0x22c   :  { %v315_v56 = vadd.f32 1e-05, %v307_v52  ;;  %v324_v57 = vmul.f32 %v9757_v55, %v10499_v48 }
 0x22e   :  { %9770 = vrsqrt.f32 %v315_v56  ;;  %v338_v63 = vmul.f32 %v8860_v58, %v324_v57 }
 0x22f   :  { %v9759_v59 = vpop.eup %9758 }
 0x230   :  { %v9761_v61 = vpop.eup %9760  ;;  %v325_v62 = vmul.f32 %v9759_v59, %v10507_v54  ;;  %v352_v7 = vadd.f32 %v8861_v0, %v338_v63 }
 0x231   :  { %v326_v1 = vmul.f32 %v9761_v61, %v10496_v47 }
 0x232   :  { %v339_v2 = vmul.f32 %v8860_v58, %v325_v62 }
 0x233   :  { %v9763_v3 = vpop.eup %9762  ;;  %v340_v10 = vmul.f32 %v8860_v58, %v326_v1 }
 0x234   :  { %v9765_v4 = vpop.eup %9764  ;;  %v353_v8 = vadd.f32 %v8861_v0, %v339_v2  ;;  %v327_v9 = vmul.f32 %v9763_v3, %v10504_v53 }
 0x235   :  { %v328_v48 = vmul.f32 %v9765_v4, %v10515_v60  ;;  %v354_v54 = vadd.f32 %v8861_v0, %v340_v10 }
 0x236   :  { %v364_v11 = vpack.c.bf16 %v353_v8, %v352_v7  ;;  %v341_v12 = vmul.f32 %v8860_v58, %v327_v9 }
 0x237   :  { %v9767_v14 = vpop.eup %9766  ;;  %v342_v17 = vmul.f32 %v8860_v58, %v328_v48 }
 0x238   :  { %v9769_v15 = vpop.eup %9768  ;;  %9287 = vmatprep.mubr.msk.bf16.mxu1 %vm226_vm3, %v364_v11  ;;  %v355_v16 = vadd.f32 %v8861_v0, %v341_v12  ;;  %v329_v47 = vmul.f32 %v9767_v14, %v10524_v5 }
 0x239   :  { %v330_v18 = vmul.f32 %v9769_v15, %v10527_v6  ;;  %v356_v60 = vadd.f32 %v8861_v0, %v342_v17  ;;  %v10560_v6 = vld [vmem:[%s10327_s25] ss:$0 sm:$0xff] }
 0x23a   :  { %v365_v20 = vpack.c.bf16 %v355_v16, %v354_v54  ;;  %v343_v22 = vmul.f32 %v8860_v58, %v329_v47  ;;  %v513_v34 = vsub.f32 -1e+38, %v10560_v6 }
 0x23b   :  { %v9771_v53 = vpop.eup %9770  ;;  %v344_v26 = vmul.f32 %v8860_v58, %v330_v18 }
 0x23c   :  { %9288 = vmatmul.mubr.msk.bf16.vlgmr.msra.gmra.mxu1 %vm226_vm3, %v365_v20  ;;  %v357_v23 = vadd.f32 %v8861_v0, %v343_v22  ;;  %v331_v25 = vmul.f32 %v9771_v53, %v10536_v13 }
 0x23d   :  { %v358_v5 = vadd.f32 %v8861_v0, %v344_v26 }
 0x23e   :  { %v366_v28 = vpack.c.bf16 %v357_v23, %v356_v60  ;;  %v345_v29 = vmul.f32 %v8860_v58, %v331_v25 }
 0x240   :  { %9291 = vmatprep.mubr.msk.bf16.mxu1 %vm226_vm3, %v366_v28  ;;  %v359_v30 = vadd.f32 %v8861_v0, %v345_v29 }
 0x242   :  { %v367_v31 = vpack.c.bf16 %v359_v30, %v358_v5 }
 0x244   :  { %9292 = vmatmul.mubr.msk.bf16.gmra.mxu1 %vm226_vm3, %v367_v31 }
 0x2fc   :  { %v10563_v35 = vpop.f32.mrf.mxu1 }
 0x2fd   :  { %v625_v51 = vadd.f32 %v10563_v35, %v10568_v39 }
 0x2fe   :  { %v10565_v36 = vpop.f32.mrf.mxu1 }
 0x2ff   :  { %v10571_v13 = vmax.f32 %v513_v34, %v10565_v36  ;;  %v10575_v40 = vadd.f32 %v10568_v39, %v10565_v36 }
 0x300   :  { %v10577_v41 = vpop.f32.mrf.mxu1 }
 0x301   :  { %v517_v42 = vsub.f32 %v513_v34, %v10571_v13  ;;  %v506_v44 = vmax.f32 %v10575_v40, -1e+38  ;;  %v565_v45 = vsub.f32 %v10571_v13, %v10560_v6  ;;  %v518_v55 = vsub.f32 %v10565_v36, %v10571_v13 }
 0x302   :  { %v10580_v43 = vpop.f32.mrf.mxu1  ;;  %v687_v63 = vadd.f32 %v10577_v41, %v10568_v39 }
 0x303   :  { %524 = vrot.lane.b32.xlu1 %v517_v42, %s10272_s0  ;;  %v516_v49 = vsub.f32 %v10575_v40, %v506_v44  ;;  %v10592_v50 = vmax.f32 %v565_v45, %v10580_v43  ;;  %v563_v52 = vadd.f32 %v10568_v39, %v10580_v43 }
 0x304   :  { %v10586_v46 = vpop.f32.mrf.mxu1 }
 0x305   :  { %520 = vrot.lane.b32.xlu0 %v516_v49, %s10273_s5  ;;  %v10604_v57 = vmax.f32 %v10592_v50, %v625_v51  ;;  %v627_v58 = vsub.f32 %v10592_v50, %v10560_v6  ;;  %v569_v59 = vsub.f32 %v565_v45, %v10592_v50  ;;  %v10611_v61 = vmax.f32 %v10571_v13, %v563_v52 }
 0x306   :  { %v10601_v56 = vpop.f32.mrf.mxu1  ;;  %v570_v1 = vsub.f32 %v10580_v43, %v10592_v50  ;;  %v873_v23 = vadd.f32 %v10586_v46, %v10568_v39 }
 0x307   :  { %528 = vrot.lane.b32.xlu1 %v518_v55, %s10274_s9  ;;  %v10614_v62 = vmax.f32 %v627_v58, %v10563_v35  ;;  %v629_v2 = vsub.f32 %v10592_v50, %v10604_v57  ;;  %v630_v7 = vsub.f32 %v625_v51, %v10604_v57  ;;  %v749_v9 = vadd.f32 %v10568_v39, %v10601_v56 }
 0x308   :  { %v10618_v0 = vpop.f32.mrf.mxu1  ;;  %v567_v10 = vsub.f32 %v10571_v13, %v10611_v61  ;;  %v568_v12 = vsub.f32 %v563_v52, %v10611_v61 }
 0x309   :  { %14828 = vst [vmem:[#allocation25_spill] sm:$0xff] %v10618_v0  ;;  %576 = vrot.lane.b32.xlu0 %v569_v59, %s10272_s0  ;;  %v689_v3 = vsub.f32 %v10614_v62, %v10560_v6  ;;  %v10628_v4 = vmax.f32 %v10614_v62, %v687_v63  ;;  %v632_v54 = vsub.f32 %v10563_v35, %v10614_v62 }
 0x30a   :  { %v10641_v11 = vpop.f32.mrf.mxu1  ;;  %v631_v18 = vsub.f32 %v627_v58, %v10614_v62  ;;  %v10692_v34 = vadd.f32 %v10618_v0, %v10568_v39 }
 0x30b   :  { %580 = vrot.lane.b32.xlu1 %v570_v1, %s10274_s9  ;;  %v10633_v8 = vmax.f32 %v689_v3, %v10577_v41  ;;  %v691_v48 = vsub.f32 %v10614_v62, %v10628_v4  ;;  %v811_v47 = vadd.f32 %v10568_v39, %v10641_v11  ;;  %v692_v26 = vsub.f32 %v687_v63, %v10628_v4 }
 0x30d   :  { %634 = vrot.lane.b32.xlu0 %v630_v7, %s10273_s5  ;;  %v10646_v14 = vmax.f32 %v10633_v8, %v749_v9  ;;  %v751_v15 = vsub.f32 %v10633_v8, %v10560_v6  ;;  %v693_v53 = vsub.f32 %v689_v3, %v10633_v8  ;;  %v694_v42 = vsub.f32 %v10577_v41, %v10633_v8 }
 0x30f   :  { %572 = vrot.lane.b32.xlu1 %v568_v12, %s10273_s5  ;;  %v10654_v16 = vmax.f32 %v751_v15, %v10601_v56  ;;  %v753_v17 = vsub.f32 %v10633_v8, %v10646_v14  ;;  %v754_v5 = vsub.f32 %v749_v9, %v10646_v14 }
 0x311   :  { %642 = vrot.lane.b32.xlu0 %v632_v54, %s10274_s9  ;;  %v813_v20 = vsub.f32 %v10654_v16, %v10560_v6  ;;  %v10665_v22 = vmax.f32 %v10654_v16, %v811_v47  ;;  %v756_v51 = vsub.f32 %v10601_v56, %v10654_v16  ;;  %v755_v55 = vsub.f32 %v751_v15, %v10654_v16 }
 0x312   :  { %v515_v15 = vsub.f32 -1e+38, %v506_v44 }
 0x313   :  { %638 = vrot.lane.b32.xlu1 %v631_v18, %s10272_s0  ;;  %v10670_v60 = vmax.f32 %v813_v20, %v10641_v11  ;;  %v815_v25 = vsub.f32 %v10654_v16, %v10665_v22  ;;  %v816_v63 = vsub.f32 %v811_v47, %v10665_v22 }
 0x315   :  { %700 = vrot.lane.b32.xlu0 %v693_v53, %s10272_s0  ;;  %v10679_v28 = vmax.f32 %v10670_v60, %v873_v23  ;;  %v875_v29 = vsub.f32 %v10670_v60, %v10560_v6  ;;  %v817_v59 = vsub.f32 %v813_v20, %v10670_v60  ;;  %v818_v3 = vsub.f32 %v10641_v11, %v10670_v60 }
 0x317   :  { %696 = vrot.lane.b32.xlu1 %v692_v26, %s10273_s5  ;;  %v10686_v30 = vmax.f32 %v875_v29, %v10586_v46  ;;  %v877_v31 = vsub.f32 %v10670_v60, %v10679_v28  ;;  %v878_v1 = vsub.f32 %v873_v23, %v10679_v28 }
 0x319   :  { %758 = vrot.lane.b32.xlu0 %v754_v5, %s10273_s5  ;;  %v10699_v45 = vsub.f32 %v10686_v30, %v10560_v6  ;;  %v10703_v49 = vmax.f32 %v10686_v30, %v10692_v34  ;;  %v880_v7 = vsub.f32 %v10586_v46, %v10686_v30  ;;  %v879_v9 = vsub.f32 %v875_v29, %v10686_v30 }
 0x31b   :  { %704 = vrot.lane.b32.xlu1 %v694_v42, %s10274_s9  ;;  %v10710_v39 = vmax.f32 %v10699_v45, %v10618_v0  ;;  %v940_v52 = vsub.f32 %v10692_v34, %v10703_v49  ;;  %v939_v6 = vsub.f32 %v10686_v30, %v10703_v49 }
 0x31d   :  { %766 = vrot.lane.b32.xlu0 %v756_v51, %s10274_s9  ;;  %v941_v58 = vsub.f32 %v10699_v45, %v10710_v39  ;;  %1007 = vst.msk [vmem:[#allocation7] sm:$0xff] %vm226_vm3, %v10710_v39  ;;  %v942_v16 = vsub.f32 %v10618_v0, %v10710_v39 }
 0x31f   :  { %762 = vrot.lane.b32.xlu1 %v755_v55, %s10272_s0 }
 0x321   :  { %824 = vrot.lane.b32.xlu0 %v817_v59, %s10272_s0 }
 0x323   :  { %820 = vrot.lane.b32.xlu1 %v816_v63, %s10273_s5 }
 0x325   :  { %882 = vrot.lane.b32.xlu0 %v878_v1, %s10273_s5 }
 0x327   :  { %828 = vrot.lane.b32.xlu1 %v818_v3, %s10274_s9 }
 0x329   :  { %890 = vrot.lane.b32.xlu0 %v880_v7, %s10274_s9 }
 0x32b   :  { %886 = vrot.lane.b32.xlu1 %v879_v9, %s10272_s0 }
 0x32d   :  { %614 = vrot.lane.b32.xlu0 %v10580_v43, %s10272_s0 }
 0x32f   :  { %554 = vrot.lane.b32.xlu1 %v10565_v36, %s10272_s0 }
 0x331   :  { %738 = vrot.lane.b32.xlu0 %v10577_v41, %s10272_s0 }
 0x333   :  { %676 = vrot.lane.b32.xlu1 %v10563_v35, %s10272_s0 }
 0x335   :  { %862 = vrot.lane.b32.xlu0 %v10641_v11, %s10272_s0 }
 0x337   :  { %800 = vrot.lane.b32.xlu1 %v10601_v56, %s10272_s0 }
 0x33b   :  { %924 = vrot.lane.b32.xlu1 %v10586_v46, %s10272_s0 }
 0x375   :  { %v525_v12 = vpop.permute.xlu1 %524 }
 0x377   :  { %v521_v54 = vpop.permute.xlu0 %520 }
 0x378   :  { %v531_v47 = vsel %vm226_vm3, %v515_v15, %v521_v54 }
 0x379   :  { %v529_v18 = vpop.permute.xlu1 %528  ;;  %v533_v20 = vsel %vm14761_vm4, %v531_v47, %v525_v12 }
 0x37a   :  { %v535_v53 = vsel %vm14760_vm5, %v533_v20, %v529_v18 }
 0x37b   :  { %v536_v23 = vmul.f32 1.442695, %v535_v53  ;;  %v577_v26 = vpop.permute.xlu0 %576 }
 0x37d   :  { %v581_v29 = vpop.permute.xlu1 %580  ;;  %9772 = vpow2.f32 %v536_v23 }
 0x37f   :  { %v635_v5 = vpop.permute.xlu0 %634 }
 0x380   :  { %v645_v55 = vsel %vm226_vm3, %v629_v2, %v635_v5 }
 0x381   :  { %v573_v42 = vpop.permute.xlu1 %572 }
 0x382   :  { %v583_v40 = vsel %vm226_vm3, %v567_v10, %v573_v42 }
 0x383   :  { %v584_v44 = vsel %vm14761_vm4, %v583_v40, %v577_v26  ;;  %v643_v51 = vpop.permute.xlu0 %642 }
 0x384   :  { %v585_v45 = vsel %vm14760_vm5, %v584_v44, %v581_v29 }
 0x385   :  { %v586_v59 = vmul.f32 1.442695, %v585_v45  ;;  %v639_v63 = vpop.permute.xlu1 %638 }
 0x386   :  { %v646_v1 = vsel %vm14761_vm4, %v645_v55, %v639_v63 }
 0x387   :  { %9774 = vpow2.f32 %v586_v59  ;;  %v647_v3 = vsel %vm14760_vm5, %v646_v1, %v643_v51  ;;  %v701_v61 = vpop.permute.xlu0 %700 }
 0x388   :  { %v648_v13 = vmul.f32 1.442695, %v647_v3 }
 0x389   :  { %v697_v10 = vpop.permute.xlu1 %696 }
 0x38a   :  { %9776 = vpow2.f32 %v648_v13  ;;  %v707_v7 = vsel %vm226_vm3, %v691_v48, %v697_v10  ;;  %v10772_v9 = vpop.eup %9772 }
 0x38b   :  { %546 = vrot.lane.b32.xlu0 %v10772_v9, %s10274_s9  ;;  %v759_v50 = vpop.permute.xlu0 %758  ;;  %v708_v2 = vsel %vm14761_vm4, %v707_v7, %v701_v61 }
 0x38c   :  { %v769_v62 = vsel %vm226_vm3, %v753_v17, %v759_v50 }
 0x38d   :  { %v705_v57 = vpop.permute.xlu1 %704 }
 0x38e   :  { %v709_v12 = vsel %vm14760_vm5, %v708_v2, %v705_v57  ;;  %v539_v2 = vmul.f32 %v10772_v9, %v10565_v36 }
 0x38f   :  { %v710_v15 = vmul.f32 1.442695, %v709_v12  ;;  %948 = vrot.lane.b32.xlu0 %v941_v58, %s10272_s0  ;;  %v767_v54 = vpop.permute.xlu0 %766 }
 0x391   :  { %9778 = vpow2.f32 %v710_v15  ;;  %v763_v4 = vpop.permute.xlu1 %762  ;;  %v538_v15 = vmul.f32 0.0, %v10772_v9 }
 0x392   :  { %v770_v48 = vsel %vm14761_vm4, %v769_v62, %v763_v4 }
 0x393   :  { %v771_v47 = vsel %vm14760_vm5, %v770_v48, %v767_v54  ;;  %v825_v53 = vpop.permute.xlu0 %824 }
 0x394   :  { %v10785_v18 = vpop.eup %9774  ;;  %v772_v20 = vmul.f32 1.442695, %v771_v47 }
 0x395   :  { %v821_v23 = vpop.permute.xlu1 %820  ;;  %605 = vrot.lane.b32.xlu1 %v10785_v18, %s10274_s9  ;;  %v593_v12 = vmul.f32 %v10785_v18, %v10580_v43 }
 0x396   :  { %9780 = vpow2.f32 %v772_v20  ;;  %v831_v8 = vsel %vm226_vm3, %v815_v25, %v821_v23 }
 0x397   :  { %v10793_v14 = vpop.eup %9776  ;;  %v883_v17 = vpop.permute.xlu0 %882  ;;  %v832_v26 = vsel %vm14761_vm4, %v831_v8, %v825_v53 }
 0x398   :  { %667 = vrot.lane.b32.xlu0 %v10793_v14, %s10274_s9  ;;  %v893_v22 = vsel %vm226_vm3, %v877_v31, %v883_v17 }
 0x399   :  { %v829_v58 = vpop.permute.xlu1 %828  ;;  %944 = vrot.lane.b32.xlu1 %v940_v52, %s10273_s5 }
 0x39a   :  { %v833_v29 = vsel %vm14760_vm5, %v832_v26, %v829_v58 }
 0x39b   :  { %v834_v5 = vmul.f32 1.442695, %v833_v29  ;;  %v891_v25 = vpop.permute.xlu0 %890 }
 0x39d   :  { %9782 = vpow2.f32 %v834_v5  ;;  %v887_v42 = vpop.permute.xlu1 %886  ;;  %952 = vrot.lane.b32.xlu1 %v942_v16, %s10274_s9 }
 0x39e   :  { %v10810_v40 = vpop.eup %9778  ;;  %v894_v34 = vsel %vm14761_vm4, %v893_v22, %v887_v42 }
 0x39f   :  { %v895_v52 = vsel %vm14760_vm5, %v894_v34, %v891_v25  ;;  %729 = vrot.lane.b32.xlu0 %v10810_v40, %s10274_s9  ;;  %v615_v31 = vpop.permute.xlu0 %614 }
 0x3a0   :  { %v896_v39 = vmul.f32 1.442695, %v895_v52  ;;  %v617_v45 = vmul.f32 %v10785_v18, %v615_v31 }
 0x3a1   :  { %v555_v44 = vpop.permute.xlu1 %554 }
 0x3a2   :  { %9784 = vpow2.f32 %v896_v39  ;;  %v557_v60 = vmul.f32 %v10772_v9, %v555_v44 }
 0x3a3   :  { %v10817_v28 = vpop.eup %9780  ;;  %v739_v63 = vpop.permute.xlu0 %738 }
 0x3a4   :  { %559 = vrot.lane.b32.xlu1 %v557_v60, %s10274_s9  ;;  %791 = vrot.lane.b32.xlu0 %v10817_v28, %s10274_s9  ;;  %v741_v1 = vmul.f32 %v10810_v40, %v739_v63 }
 0x3a5   :  { %v677_v51 = vpop.permute.xlu1 %676 }
 0x3a6   :  { %v679_v59 = vmul.f32 %v10793_v14, %v677_v51 }
 0x3a7   :  { %v863_v61 = vpop.permute.xlu0 %862 }
 0x3a8   :  { %619 = vrot.lane.b32.xlu1 %v617_v45, %s10274_s9 }
 0x3a9   :  { %v801_v13 = vpop.permute.xlu1 %800 }
 0x3aa   :  { %v10824_v55 = vpop.eup %9782  ;;  %v803_v7 = vmul.f32 %v10817_v28, %v801_v13 }
 0x3ab   :  { %853 = vrot.lane.b32.xlu0 %v10824_v55, %s10274_s9  ;;  %v865_v10 = vmul.f32 %v10824_v55, %v863_v61 }
 0x3ac   :  { %681 = vrot.lane.b32.xlu1 %v679_v59, %s10274_s9  ;;  %v717_v59 = vmul.f32 %v10810_v40, %v10577_v41 }
 0x3ad   :  { %v925_v50 = vpop.permute.xlu1 %924 }
 0x3af   :  { %v10831_v3 = vpop.eup %9784 }
 0x3b0   :  { %915 = vrot.lane.b32.xlu0 %v10831_v3, %s10274_s9  ;;  %743 = vrot.lane.b32.xlu1 %v741_v1, %s10274_s9  ;;  %v927_v57 = vmul.f32 %v10831_v3, %v925_v50  ;;  %v655_v50 = vmul.f32 %v10793_v14, %v10563_v35 }
 0x3b4   :  { %805 = vrot.lane.b32.xlu0 %v803_v7, %s10274_s9  ;;  %867 = vrot.lane.b32.xlu1 %v865_v10, %s10274_s9 }
 0x3b8   :  { %929 = vrot.lane.b32.xlu0 %v927_v57, %s10274_s9  ;;  %541 = vrot.lane.b32.xlu1 %v539_v2, %s10274_s9 }
 0x3bc   :  { %595 = vrot.lane.b32.xlu0 %v593_v12, %s10274_s9 }
 0x3fd   :  { %v547_v54 = vpop.permute.xlu0 %546 }
 0x3fe   :  { %v549_v62 = vadd.f32 %v547_v54, %v538_v15 }
 0x400   :  { %600 = vrot.lane.b32.xlu1 %v549_v62, %s10272_s0  ;;  %v623_v4 = vmul.f32 %v10785_v18, %v549_v62 }
 0x401   :  { %v949_v47 = vpop.permute.xlu0 %948 }
 0x407   :  { %v10851_v48 = vpop.permute.xlu1 %605 }
 0x408   :  { %v624_v20 = vadd.f32 %v623_v4, %v10851_v48 }
 0x40a   :  { %v685_v53 = vmul.f32 %v10793_v14, %v624_v20  ;;  %v10855_v8 = vpop.permute.xlu0 %667 }
 0x40b   :  { %v945_v23 = vpop.permute.xlu1 %944 }
 0x40c   :  { %v686_v17 = vadd.f32 %v685_v53, %v10855_v8  ;;  %v955_v9 = vsel %vm226_vm3, %v939_v6, %v945_v23 }
 0x40d   :  { %v956_v29 = vsel %vm14761_vm4, %v955_v9, %v949_v47 }
 0x40e   :  { %v747_v5 = vmul.f32 %v10810_v40, %v686_v17 }
 0x40f   :  { %v953_v58 = vpop.permute.xlu1 %952 }
 0x410   :  { %v957_v16 = vsel %vm14760_vm5, %v956_v29, %v953_v58  ;;  %v841_v29 = vmul.f32 %v10824_v55, %v10641_v11 }
 0x411   :  { %v10862_v26 = vpop.permute.xlu0 %729  ;;  %v958_v42 = vmul.f32 1.442695, %v957_v16 }
 0x412   :  { %v748_v22 = vadd.f32 %v747_v5, %v10862_v26  ;;  %v779_v5 = vmul.f32 %v10817_v28, %v10601_v56 }
 0x413   :  { %9786 = vpow2.f32 %v958_v42 }
 0x414   :  { %v809_v52 = vmul.f32 %v10817_v28, %v748_v22  ;;  %9788 = vrcp.f32 %v549_v62 }
 0x416   :  { %v560_v25 = vpop.permute.xlu1 %559  ;;  %v10869_v39 = vpop.permute.xlu0 %791 }
 0x417   :  { %v562_v34 = vadd.f32 %v560_v25, %v538_v15  ;;  %v810_v44 = vadd.f32 %v809_v52, %v10869_v39  ;;  %v903_v25 = vmul.f32 %v10831_v3, %v10586_v46 }
 0x419   :  { %589 = vrot.lane.b32.xlu0 %v562_v34, %s10272_s0  ;;  %v612_v30 = vmul.f32 %v10785_v18, %v562_v34  ;;  %v871_v63 = vmul.f32 %v10824_v55, %v810_v44 }
 0x41a   :  { %v620_v49 = vpop.permute.xlu1 %619 }
 0x41b   :  { %v622_v6 = vadd.f32 %v620_v49, %v612_v30 }
 0x41d   :  { %651 = vrot.lane.b32.xlu1 %v622_v6, %s10272_s0  ;;  %662 = vrot.lane.b32.xlu0 %v624_v20, %s10272_s0  ;;  %v10876_v60 = vpop.permute.xlu0 %853  ;;  %v674_v31 = vmul.f32 %v10793_v14, %v622_v6 }
 0x41e   :  { %v682_v45 = vpop.permute.xlu1 %681  ;;  %v872_v10 = vadd.f32 %v871_v63, %v10876_v60 }
 0x41f   :  { %v684_v51 = vadd.f32 %v682_v45, %v674_v31 }
 0x420   :  { %v933_v2 = vmul.f32 %v10831_v3, %v872_v10  ;;  %v10894_v54 = vpop.eup %9786 }
 0x421   :  { %719 = vrot.lane.b32.xlu0 %v717_v59, %s10274_s9  ;;  %724 = vrot.lane.b32.xlu1 %v686_v17, %s10272_s0  ;;  %v736_v1 = vmul.f32 %v10810_v40, %v684_v51  ;;  %14829 = vst [vmem:[#allocation26_spill] sm:$0xff] %v10894_v54  ;;  %v9789_v23 = vpop.eup %9788  ;;  %v965_v42 = vmul.f32 %v10894_v54, %v10618_v0 }
 0x422   :  { %v744_v13 = vpop.permute.xlu1 %743  ;;  %v10885_v61 = vpop.permute.xlu0 %915 }
 0x423   :  { %v746_v7 = vadd.f32 %v744_v13, %v736_v1  ;;  %v10900_v47 = vadd.f32 %v933_v2, %v10885_v61 }
 0x425   :  { %713 = vrot.lane.b32.xlu0 %v684_v51, %s10272_s0  ;;  %657 = vrot.lane.b32.xlu1 %v655_v50, %s10274_s9  ;;  %v798_v12 = vmul.f32 %v10817_v28, %v746_v7  ;;  %14830 = vst [vmem:[#allocation27_spill] sm:$0xff] %v10900_v47 }
 0x426   :  { %v868_v57 = vpop.permute.xlu1 %867  ;;  %v806_v62 = vpop.permute.xlu0 %805 }
 0x427   :  { %v808_v20 = vadd.f32 %v806_v62, %v798_v12 }
 0x429   :  { %977 = vrot.lane.b32.xlu1 %v10894_v54, %s10274_s9  ;;  %848 = vrot.lane.b32.xlu0 %v810_v44, %s10272_s0  ;;  %v860_v9 = vmul.f32 %v10824_v55, %v808_v20 }
 0x42a   :  { %v542_v4 = vpop.permute.xlu1 %541  ;;  %v930_v16 = vpop.permute.xlu0 %929 }
 0x42b   :  { %v544_v53 = vadd.f32 %v542_v4, %v538_v15  ;;  %v870_v58 = vadd.f32 %v868_v57, %v860_v9 }
 0x42d   :  { %v551_v17 = vmul.f32 %v9789_v23, %v544_v53  ;;  %786 = vrot.lane.b32.xlu1 %v748_v22, %s10272_s0  ;;  %972 = vrot.lane.b32.xlu0 %v10900_v47, %s10272_s0  ;;  %v922_v15 = vmul.f32 %v10831_v3, %v870_v58 }
 0x42e   :  { %v596_v6 = vpop.permute.xlu0 %595 }
 0x42f   :  { %552 = vst.msk [vmem:[#allocation2] sm:$0xff] %vm226_vm3, %v551_v17  ;;  %v10918_v22 = vadd.f32 %v930_v16, %v922_v15 }
 0x431   :  { %910 = vrot.lane.b32.xlu1 %v872_v10, %s10272_s0  ;;  %775 = vrot.lane.b32.xlu0 %v746_v7, %s10272_s0  ;;  %14831 = vst [vmem:[#allocation28_spill] sm:$0xff] %v10918_v22 }
 0x435   :  { %837 = vrot.lane.b32.xlu1 %v808_v20, %s10272_s0  ;;  %899 = vrot.lane.b32.xlu0 %v870_v58, %s10272_s0 }
 0x436   :  { %v1008_v34 = vld [vmem:[#allocation2] sm:$0xff] }
 0x439   :  { %843 = vrot.lane.b32.xlu1 %v841_v29, %s10274_s9  ;;  %781 = vrot.lane.b32.xlu0 %v779_v5, %s10274_s9 }
 0x43d   :  { %905 = vrot.lane.b32.xlu0 %v903_v25, %s10274_s9  ;;  %961 = vrot.lane.b32.xlu1 %v10918_v22, %s10272_s0 }
 0x441   :  { %1024 = vrot.lane.b32.xlu0 %v1008_v34, %s10272_s0  ;;  %967 = vrot.lane.b32.xlu1 %v965_v42, %s10274_s9 }
 0x472   :  { %v601_v52 = vpop.permute.xlu1 %600 }
 0x473   :  { %v603_v30 = vmul.f32 %v10785_v18, %v601_v52 }
 0x475   :  { %v608_v49 = vadd.f32 %v10851_v48, %v603_v30 }
 0x477   :  { %9790 = vrcp.f32 %v608_v49 }
 0x484   :  { %v9791_v51 = vpop.eup %9790 }
 0x48b   :  { %v590_v44 = vpop.permute.xlu0 %589 }
 0x48c   :  { %v592_v31 = vmul.f32 %v10785_v18, %v590_v44 }
 0x48e   :  { %v598_v45 = vadd.f32 %v596_v6, %v592_v31 }
 0x48f   :  { %v652_v59 = vpop.permute.xlu1 %651  ;;  %v663_v63 = vpop.permute.xlu0 %662 }
 0x490   :  { %v610_v1 = vmul.f32 %v9791_v51, %v598_v45  ;;  %v665_v13 = vmul.f32 %v10793_v14, %v663_v63 }
 0x492   :  { %611 = vst.msk [vmem:[#allocation2 + $0x8] sm:$0xff] %vm226_vm3, %v610_v1  ;;  %v670_v10 = vadd.f32 %v10855_v8, %v665_v13  ;;  %v654_v8 = vmul.f32 %v10793_v14, %v652_v59 }
 0x493   :  { %v725_v7 = vpop.permute.xlu1 %724  ;;  %v720_v50 = vpop.permute.xlu0 %719 }
 0x494   :  { %9792 = vrcp.f32 %v670_v10  ;;  %v727_v48 = vmul.f32 %v10810_v40, %v725_v7 }
 0x496   :  { %v732_v57 = vadd.f32 %v10862_v26, %v727_v48 }
 0x497   :  { %v658_v2 = vpop.permute.xlu1 %657  ;;  %v714_v18 = vpop.permute.xlu0 %713 }
 0x498   :  { %9794 = vrcp.f32 %v732_v57  ;;  %v660_v23 = vadd.f32 %v658_v2, %v654_v8  ;;  %v716_v26 = vmul.f32 %v10810_v40, %v714_v18 }
 0x499   :  { %v1009_v12 = vld [vmem:[#allocation2 + $0x8] sm:$0xff] }
 0x49a   :  { %1026 = vrot.lane.b32.xlu1 %v1009_v12, %s10272_s0 }
 0x49b   :  { %v10938_v62 = vpop.permute.xlu1 %977  ;;  %v849_v4 = vpop.permute.xlu0 %848 }
 0x49c   :  { %14832 = vst [vmem:[#allocation29_spill] sm:$0xff] %v10938_v62  ;;  %v851_v20 = vmul.f32 %v10824_v55, %v849_v4 }
 0x49e   :  { %v856_v53 = vadd.f32 %v10876_v60, %v851_v20  ;;  %v722_v60 = vadd.f32 %v720_v50, %v716_v26  ;;  %v458_v26 = vsub.f32 0.0, %v10580_v43  ;;  %v9710_v43 = vld [vmem:[%s10342_s8 + $0x8] sm:$0xff]  }
 0x49f   :  { %v787_v17 = vpop.permute.xlu1 %786  ;;  %v973_v9 = vpop.permute.xlu0 %972  ;;  %9295 = vmatprep.subr.bf16.mxu0 %v9710_v43 }
 0x4a0   :  { %9796 = vrcp.f32 %v856_v53  ;;  %v789_v58 = vmul.f32 %v10817_v28, %v787_v17  ;;  %v975_v15 = vmul.f32 %v10894_v54, %v973_v9  ;;  %v457_v9 = vsub.f32 0.0, %v10565_v36  ;;  %9296 = vmatpush3.bf16.msra.mxu0 %v9710_v43 }
 0x4a1   :  { %v9793_v29 = vpop.eup %9792  ;;  %v461_v36 = vsub.f32 0.0, %v10601_v56 }
 0x4a2   :  { %v672_v5 = vmul.f32 %v9793_v29, %v660_v23  ;;  %v794_v16 = vadd.f32 %v10869_v39, %v789_v58  ;;  %v980_v25 = vadd.f32 %v10938_v62, %v975_v15  ;;  %v465_v58 = vmul.f32 1.442695, %v457_v9 }
 0x4a3   :  { %v911_v42 = vpop.permute.xlu1 %910  ;;  %v776_v14 = vpop.permute.xlu0 %775  ;;  %v467_v15 = vmul.f32 1.442695, %v458_v26  ;;  %v14845_v62 = vmov 2131351028  }
 0x4a4   :  { %673 = vst.msk [vmem:[#allocation2 + $0x10] sm:$0xff] %vm226_vm3, %v672_v5  ;;  %9798 = vrcp.f32 %v794_v16  ;;  %v913_v34 = vmul.f32 %v10831_v3, %v911_v42  ;;  %v778_v63 = vmul.f32 %v10817_v28, %v776_v14  ;;  %v459_v16 = vsub.f32 0.0, %v10563_v35 }
 0x4a5   :  { %v9795_v40 = vpop.eup %9794  ;;  %9800 = vrcp.f32 %v980_v25  ;;  %v460_v25 = vsub.f32 0.0, %v10577_v41  ;;  %v463_v35 = vsub.f32 0.0, %v10586_v46  ;;  %v464_v41 = vsub.f32 0.0, %v10618_v0 }
 0x4a6   :  { %v734_v52 = vmul.f32 %v9795_v40, %v722_v60  ;;  %v918_v30 = vadd.f32 %v10885_v61, %v913_v34  ;;  %v469_v60 = vmul.f32 1.442695, %v459_v16  ;;  %v9711_v40 = vld [vmem:[%s10342_s8] sm:$0xff]  }
 0x4a7   :  { %v838_v49 = vpop.permute.xlu1 %837  ;;  %v900_v6 = vpop.permute.xlu0 %899  ;;  %v471_v34 = vmul.f32 1.442695, %v460_v25  ;;  %9297 = vmatprep.subr.bf16.mxu0 %v9711_v40 }
 0x4a8   :  { %735 = vst.msk [vmem:[#allocation2 + $0x18] sm:$0xff] %vm226_vm3, %v734_v52  ;;  %9802 = vrcp.f32 %v918_v30  ;;  %v840_v39 = vmul.f32 %v10824_v55, %v838_v49  ;;  %v902_v55 = vmul.f32 %v10831_v3, %v900_v6  ;;  %v462_v52 = vsub.f32 0.0, %v10641_v11  ;;  %9298 = vmatpush3.bf16.msra.mxu0 %v9711_v40 }
 0x4a9   :  { %9804 = vpow2.f32 %v465_v58  ;;  %v473_v30 = vmul.f32 1.442695, %v461_v36 }
 0x4aa   :  { %9806 = vpow2.f32 %v467_v15  ;;  %v475_v49 = vmul.f32 1.442695, %v462_v52 }
 0x4ab   :  { %v844_v44 = vpop.permute.xlu1 %843  ;;  %v782_v31 = vpop.permute.xlu0 %781  ;;  %v1010_v45 = vld [vmem:[#allocation2 + $0x10] sm:$0xff] }
 0x4ac   :  { %v846_v51 = vadd.f32 %v844_v44, %v840_v39  ;;  %1028 = vrot.lane.b32.xlu0 %v1010_v45, %s10272_s0  ;;  %v784_v10 = vadd.f32 %v782_v31, %v778_v63  ;;  %v477_v31 = vmul.f32 1.442695, %v463_v35 }
 0x4ad   :  { %v9797_v59 = vpop.eup %9796 }
 0x4ae   :  { %v858_v1 = vmul.f32 %v9797_v59, %v846_v51  ;;  %v479_v51 = vmul.f32 1.442695, %v464_v41 }
 0x4af   :  { %v962_v13 = vpop.permute.xlu1 %961  ;;  %v1011_v61 = vld [vmem:[#allocation2 + $0x18] sm:$0xff]  ;;  %v906_v50 = vpop.permute.xlu0 %905 }
 0x4b0   :  { %859 = vst.msk [vmem:[#allocation2 + $0x28] sm:$0xff] %vm226_vm3, %v858_v1  ;;  %1030 = vrot.lane.b32.xlu1 %v1011_v61, %s10272_s0  ;;  %v964_v57 = vmul.f32 %v10894_v54, %v962_v13  ;;  %v908_v28 = vadd.f32 %v906_v50, %v902_v55 }
 0x4b1   :  { %v9799_v7 = vpop.eup %9798 }
 0x4b2   :  { %v796_v48 = vmul.f32 %v9799_v7, %v784_v10  ;;  %v9801_v18 = vpop.eup %9800 }
 0x4b3   :  { %v968_v2 = vpop.permute.xlu1 %967  ;;  %v1025_v6 = vpop.permute.xlu0 %1024 }
 0x4b4   :  { %797 = vst.msk [vmem:[#allocation2 + $0x20] sm:$0xff] %vm226_vm3, %v796_v48  ;;  %v970_v12 = vadd.f32 %v968_v2, %v964_v57 }
 0x4b5   :  { %v9803_v4 = vpop.eup %9802 }
 0x4b6   :  { %v920_v20 = vmul.f32 %v9803_v4, %v908_v28  ;;  %v982_v8 = vmul.f32 %v9801_v18, %v970_v12  ;;  %v9805_v29 = vpop.eup %9804 }
 0x4b7   :  { %v1013_v53 = vld [vmem:[#allocation2 + $0x28] sm:$0xff]  ;;  %v9807_v5 = vpop.eup %9806  ;;  %v481_v42 = vadd.f32 1.0, %v9805_v29 }
 0x4b8   :  { %921 = vst.msk [vmem:[#allocation2 + $0x30] sm:$0xff] %vm226_vm3, %v920_v20  ;;  %983 = vst.msk [vmem:[#allocation2 + $0x38] sm:$0xff] %vm226_vm3, %v982_v8  ;;  %1034 = vrot.lane.b32.xlu1 %v1013_v53, %s10272_s0  ;;  %v482_v14 = vadd.f32 1.0, %v9807_v5 }
 0x4b9   :  { %9808 = vrcp.f32 %v481_v42 }
 0x4ba   :  { %9810 = vrcp.f32 %v482_v14 }
 0x4bb   :  { %v1012_v3 = vld [vmem:[#allocation2 + $0x20] sm:$0xff]  ;;  %9812 = vpow2.f32 %v469_v60 }
 0x4bc   :  { %1032 = vrot.lane.b32.xlu0 %v1012_v3, %s10272_s0  ;;  %9814 = vpow2.f32 %v471_v34 }
 0x4bd   :  { %9816 = vpow2.f32 %v473_v30 }
 0x4be   :  { %9818 = vpow2.f32 %v475_v49 }
 0x4bf   :  { %v1015_v23 = vld [vmem:[#allocation2 + $0x38] sm:$0xff]  ;;  %v1014_v17 = vld [vmem:[#allocation2 + $0x30] sm:$0xff]  ;;  %9820 = vpow2.f32 %v477_v31 }
 0x4c0   :  { %1038 = vrot.lane.b32.xlu1 %v1015_v23, %s10272_s0  ;;  %1036 = vrot.lane.b32.xlu0 %v1014_v17, %s10272_s0  ;;  %9822 = vpow2.f32 %v479_v51 }
 0x4c6   :  { %v9809_v39 = vpop.eup %9808 }
 0x4c7   :  { %v9811_v44 = vpop.eup %9810  ;;  %v1048_v11 = vmul.f32 %v9809_v39, %v1025_v6 }
 0x4c8   :  { %v9813_v45 = vpop.eup %9812 }
 0x4c9   :  { %v9815_v63 = vpop.eup %9814  ;;  %v483_v46 = vadd.f32 1.0, %v9813_v45 }
 0x4ca   :  { %v484_v13 = vadd.f32 1.0, %v9815_v63  ;;  %v9817_v61 = vpop.eup %9816 }
 0x4cb   :  { %9824 = vrcp.f32 %v483_v46  ;;  %v9819_v10 = vpop.eup %9818  ;;  %v485_v7 = vadd.f32 1.0, %v9817_v61 }
 0x4cc   :  { %9826 = vrcp.f32 %v484_v13  ;;  %v9821_v50 = vpop.eup %9820  ;;  %v486_v55 = vadd.f32 1.0, %v9819_v10 }
 0x4cd   :  { %v9823_v48 = vpop.eup %9822  ;;  %9828 = vrcp.f32 %v485_v7  ;;  %v487_v2 = vadd.f32 1.0, %v9821_v50 }
 0x4ce   :  { %9830 = vrcp.f32 %v486_v55  ;;  %v488_v28 = vadd.f32 1.0, %v9823_v48 }
 0x4cf   :  { %9832 = vrcp.f32 %v487_v2 }
 0x4d0   :  { %9834 = vrcp.f32 %v488_v28 }
 0x4d8   :  { %v9825_v18 = vpop.eup %9824 }
 0x4d9   :  { %v9827_v12 = vpop.eup %9826 }
 0x4da   :  { %v9829_v23 = vpop.eup %9828 }
 0x4db   :  { %v9831_v17 = vpop.eup %9830 }
 0x4dc   :  { %v9833_v15 = vpop.eup %9832 }
 0x4dd   :  { %v9835_v5 = vpop.eup %9834 }
 0x50c   :  { %v1027_v56 = vpop.permute.xlu1 %1026 }
 0x50d   :  { %v1049_v59 = vmul.f32 %v9811_v44, %v1027_v56 }
 0x50f   :  { %v1060_v1 = vpack.c.bf16 %v1049_v59, %v1048_v11 }
 0x511   :  { %1068 = vrot.lane.b32.xlu0 %v1060_v1, %s10272_s0 }
 0x51e   :  { %v1029_v57 = vpop.permute.xlu0 %1028 }
 0x51f   :  { %v1050_v20 = vmul.f32 %v9825_v18, %v1029_v57 }
 0x522   :  { %v1031_v4 = vpop.permute.xlu1 %1030 }
 0x523   :  { %v1051_v8 = vmul.f32 %v9827_v12, %v1031_v4 }
 0x525   :  { %v1061_v53 = vpack.c.bf16 %v1051_v8, %v1050_v20 }
 0x527   :  { %1070 = vrot.lane.b32.xlu1 %v1061_v53, %s10272_s0 }
 0x52a   :  { %v1035_v3 = vpop.permute.xlu1 %1034 }
 0x52b   :  { %v1053_v26 = vmul.f32 %v9831_v17, %v1035_v3 }
 0x52e   :  { %v1033_v9 = vpop.permute.xlu0 %1032 }
 0x52f   :  { %v1052_v58 = vmul.f32 %v9829_v23, %v1033_v9 }
 0x531   :  { %v1062_v29 = vpack.c.bf16 %v1053_v26, %v1052_v58 }
 0x532   :  { %v1039_v16 = vpop.permute.xlu1 %1038  ;;  %v1037_v25 = vpop.permute.xlu0 %1036 }
 0x533   :  { %v1055_v42 = vmul.f32 %v9835_v5, %v1039_v16  ;;  %v1054_v14 = vmul.f32 %v9833_v15, %v1037_v25  ;;  %1072 = vrot.lane.b32.xlu0 %v1062_v29, %s10272_s0 }
 0x535   :  { %v1063_v60 = vpack.c.bf16 %v1055_v42, %v1054_v14 }
 0x537   :  { %1074 = vrot.lane.b32.xlu1 %v1063_v60, %s10272_s0 }
 0x583   :  { %v1069_v34 = vpop.permute.xlu0 %1068 }
 0x584   :  { %9299 = vmatprep.mubr.msk.bf16.mxu0 %vm226_vm3, %v1069_v34 }
 0x599   :  { %v1071_v36 = vpop.permute.xlu1 %1070 }
 0x59a   :  { %9300 = vmatmul.mubr.msk.bf16.vlgmr.msra.gmra.mxu0 %vm226_vm3, %v1071_v36 }
 0x5a5   :  { %v1073_v43 = vpop.permute.xlu0 %1072 }
 0x5a6   :  { %9303 = vmatprep.mubr.msk.bf16.mxu0 %vm226_vm3, %v1073_v43 }
 0x5a9   :  { %v1075_v40 = vpop.permute.xlu1 %1074 }
 0x5aa   :  { %9304 = vmatmul.mubr.msk.bf16.gmra.mxu0 %vm226_vm3, %v1075_v40 }
 0x65a   :  { %v9301_v52 = vpop.f32.mrf.mxu0 }
 0x65b   :  { %v10988_v49 = vadd.f32 %v9301_v52, %v10463_v19 }
 0x65c   :  { %v1134_v35 = vpop.f32.mrf.mxu0 }
 0x65d   :  { %v10985_v30 = vadd.f32 %v1134_v35, %v10465_v21  ;;  %14834 = vst [vmem:[#allocation31_spill] sm:$0xff] %v10988_v49  ;;  %v1181_v56 = vsel %vm226_vm3, %v10988_v49, 0.0 }
 0x65e   :  { %v9302_v41 = vpop.f32.mrf.mxu0 }
 0x65f   :  { %14833 = vst [vmem:[#allocation30_spill] sm:$0xff] %v10985_v30  ;;  %v1175_v6 = vsel %vm226_vm3, %v10985_v30, 0.0  ;;  %v10996_v31 = vadd.f32 %v9302_v41, %v10469_v24 }
 0x660   :  { %1176 = vadd.xlane.f32.xlu0 %v1175_v6  ;;  %v1137_v39 = vpop.f32.mrf.mxu0 }
 0x661   :  { %v10993_v44 = vadd.f32 %v1137_v39, %v10473_v27  ;;  %14836 = vst [vmem:[#allocation33_spill] sm:$0xff] %v10996_v31  ;;  %v1184_v19 = vsel %vm226_vm3, %v10996_v31, 0.0 }
 0x663   :  { %14835 = vst [vmem:[#allocation32_spill] sm:$0xff] %v10993_v44  ;;  %v1178_v21 = vsel %vm226_vm3, %v10993_v44, 0.0 }
 0x664   :  { %1182 = vadd.xlane.f32.xlu0 %v1181_v56  ;;  %1179 = vadd.xlane.f32.xlu1 %v1178_v21  ;;  %v9714_v56 = vld [vmem:[%s10372_s12 + $0x14] ss:$8 sps:$4 sm:$0xff]   ;;  %v9712_v21 = vld [vmem:[%s10372_s12 + $0x10] ss:$8 sps:$4 sm:$0xff]  }
 0x665   :  { %1526 = vmatprep.subr.bf16.mxu0 %v9714_v56 }
 0x666   :  { %1527 = vmatpush1.bf16.msra.mxu0 %v9712_v21 }
 0x668   :  { %1185 = vadd.xlane.f32.xlu0 %v1184_v19  ;;  %v9715_v19 = vld [vmem:[%s10372_s12] ss:$8 sps:$4 sm:$0xff]  }
 0x66a   :  { %v9305_v45 = vpop.f32.mrf.mxu0 }
 0x66b   :  { %v11008_v24 = vadd.f32 %v9305_v45, %v10479_v32  ;;  %v9717_v45 = vld [vmem:[%s10372_s12 + $0x4] ss:$8 sps:$4 sm:$0xff]  }
 0x66c   :  { %v1150_v51 = vpop.f32.mrf.mxu0  ;;  %1528 = vmatprep.subr.bf16.mxu0 %v9717_v45 }
 0x66d   :  { %v11005_v27 = vadd.f32 %v1150_v51, %v10481_v33  ;;  %14838 = vst [vmem:[#allocation35_spill] sm:$0xff] %v11008_v24  ;;  %v1193_v13 = vsel %vm226_vm3, %v11008_v24, 0.0  ;;  %v9718_v51 = vld [vmem:[%s10367_s6 + $0x8] sm:$0xff]   ;;  %1529 = vmatpush1.bf16.msra.mxu0 %v9715_v19 }
 0x66e   :  { %v9306_v11 = vpop.f32.mrf.mxu0  ;;  %9307 = vmatprep.subr.bf16.mxu1 %v9718_v51 }
 0x66f   :  { %14837 = vst [vmem:[#allocation34_spill] sm:$0xff] %v11005_v27  ;;  %v1187_v59 = vsel %vm226_vm3, %v11005_v27, 0.0  ;;  %v11016_v46 = vadd.f32 %v9306_v11, %v10485_v37  ;;  %9308 = vmatpush3.bf16.msra.mxu1 %v9718_v51  ;;  %v9719_v11 = vld [vmem:[%s10367_s6] sm:$0xff]  }
 0x670   :  { %1188 = vadd.xlane.f32.xlu0 %v1187_v59  ;;  %v1153_v63 = vpop.f32.mrf.mxu0  ;;  %v14701_v59 = vmov 0   ;;  %9309 = vmatprep.subr.bf16.mxu1 %v9719_v11 }
 0x671   :  { %v11013_v1 = vadd.f32 %v1153_v63, %v10487_v38  ;;  %14840 = vst [vmem:[#allocation37_spill] sm:$0xff] %v11016_v46  ;;  %v1196_v32 = vsel %vm226_vm3, %v11016_v46, 0.0  ;;  %1546 = vmatprep.mubr.bf16.mxu0 %v14701_v59  ;;  %9576 = vset.pattern.permute.xlu1 %v14701_v59 }
 0x672   :  { %9575 = vset.pattern.permute.xlu0 %v14701_v59 }
 0x673   :  { %14839 = vst [vmem:[#allocation36_spill] sm:$0xff] %v11013_v1  ;;  %v1190_v33 = vsel %vm226_vm3, %v11013_v1, 0.0  ;;  %9310 = vmatpush3.bf16.msra.mxu1 %v9719_v11 }
 0x674   :  { %1194 = vadd.xlane.f32.xlu0 %v1193_v13  ;;  %1191 = vadd.xlane.f32.xlu1 %v1190_v33 }
 0x678   :  { %1197 = vadd.xlane.f32.xlu1 %v1196_v32 }
 0x6e9   :  { %v1177_v61 = vpop.xlane.xlu0 %1176 }
 0x6ea   :  { %v1199_v10 = vmul.f32 0.03125, %v1177_v61 }
 0x6ec   :  { %v11025_v38 = vsub.f32 %v10985_v30, %v1199_v10 }
 0x6ed   :  { %v1180_v7 = vpop.xlane.xlu1 %1179  ;;  %v1183_v37 = vpop.xlane.xlu0 %1182 }
 0x6ee   :  { %v1200_v50 = vmul.f32 0.03125, %v1180_v7  ;;  %v1201_v55 = vmul.f32 0.03125, %v1183_v37  ;;  %v1215_v48 = vmul.f32 %v11025_v38, %v11025_v38 }
 0x6f0   :  { %v11030_v57 = vsub.f32 %v10993_v44, %v1200_v50  ;;  %v11033_v2 = vsub.f32 %v10988_v49, %v1201_v55  ;;  %v1223_v18 = vsel %vm226_vm3, %v1215_v48, 0.0 }
 0x6f1   :  { %1224 = vadd.xlane.f32.xlu0 %v1223_v18  ;;  %v1186_v28 = vpop.xlane.xlu0 %1185 }
 0x6f2   :  { %v1202_v12 = vmul.f32 0.03125, %v1186_v28  ;;  %v1216_v4 = vmul.f32 %v11030_v57, %v11030_v57  ;;  %v1217_v20 = vmul.f32 %v11033_v2, %v11033_v2 }
 0x6f4   :  { %v11041_v8 = vsub.f32 %v10996_v31, %v1202_v12  ;;  %v1226_v53 = vsel %vm226_vm3, %v1216_v4, 0.0  ;;  %v1229_v3 = vsel %vm226_vm3, %v1217_v20, 0.0  ;;  %v11082_v20 = vld [vmem:[%s10347_s14] ss:$0 sm:$0xff] }
 0x6f5   :  { %1227 = vadd.xlane.f32.xlu1 %v1226_v53  ;;  %1230 = vadd.xlane.f32.xlu0 %v1229_v3 }
 0x6f6   :  { %v1218_v23 = vmul.f32 %v11041_v8, %v11041_v8 }
 0x6f8   :  { %v1232_v17 = vsel %vm226_vm3, %v1218_v23, 0.0 }
 0x6f9   :  { %1233 = vadd.xlane.f32.xlu1 %v1232_v17  ;;  %v1189_v9 = vpop.xlane.xlu0 %1188 }
 0x6fa   :  { %v1203_v26 = vmul.f32 0.03125, %v1189_v9  ;;  %v11086_v9 = vld [vmem:[%s10352_s19] ss:$0 sm:$0xff] }
 0x6fc   :  { %v11049_v58 = vsub.f32 %v11005_v27, %v1203_v26 }
 0x6fd   :  { %v1192_v15 = vpop.xlane.xlu1 %1191  ;;  %v1195_v29 = vpop.xlane.xlu0 %1194 }
 0x6fe   :  { %v1204_v5 = vmul.f32 0.03125, %v1192_v15  ;;  %v1205_v16 = vmul.f32 0.03125, %v1195_v29  ;;  %v1219_v25 = vmul.f32 %v11049_v58, %v11049_v58 }
 0x700   :  { %v11054_v42 = vsub.f32 %v11013_v1, %v1204_v5  ;;  %v11057_v14 = vsub.f32 %v11008_v24, %v1205_v16  ;;  %v1235_v60 = vsel %vm226_vm3, %v1219_v25, 0.0  ;;  %v9720_v1 = vld [vmem:[%s14844_s7 + $0x38] sm:$0xff]  }
 0x701   :  { %v1198_v34 = vpop.xlane.xlu1 %1197  ;;  %1236 = vadd.xlane.f32.xlu0 %v1235_v60  ;;  %9341 = vmatprep.subr.bf16.mxu0 %v9720_v1 }
 0x702   :  { %v1206_v36 = vmul.f32 0.03125, %v1198_v34  ;;  %v1220_v43 = vmul.f32 %v11054_v42, %v11054_v42  ;;  %v1221_v40 = vmul.f32 %v11057_v14, %v11057_v14 }
 0x704   :  { %v11065_v52 = vsub.f32 %v11016_v46, %v1206_v36  ;;  %v1238_v35 = vsel %vm226_vm3, %v1220_v43, 0.0  ;;  %v1241_v41 = vsel %vm226_vm3, %v1221_v40, 0.0 }
 0x705   :  { %1239 = vadd.xlane.f32.xlu1 %v1238_v35  ;;  %1242 = vadd.xlane.f32.xlu0 %v1241_v41  ;;  %v8878_v41 = vld [vmem:[%s10357_s24] ss:$0 sm:$0xff] }
 0x706   :  { %v1222_v6 = vmul.f32 %v11065_v52, %v11065_v52 }
 0x708   :  { %v1244_v39 = vsel %vm226_vm3, %v1222_v6, 0.0  ;;  %v8879_v6 = vld [vmem:[%s14841_s13] ss:$0 sm:$0xff] }
 0x709   :  { %1245 = vadd.xlane.f32.xlu1 %v1244_v39 }
 0x77a   :  { %v1225_v63 = vpop.xlane.xlu0 %1224 }
 0x77b   :  { %v1247_v13 = vmul.f32 0.03125, %v1225_v63 }
 0x77d   :  { %v1255_v33 = vadd.f32 1e-05, %v1247_v13 }
 0x77e   :  { %v1228_v32 = vpop.xlane.xlu1 %1227  ;;  %v1231_v61 = vpop.xlane.xlu0 %1230 }
 0x77f   :  { %9836 = vrsqrt.f32 %v1255_v33  ;;  %v1248_v10 = vmul.f32 0.03125, %v1228_v32  ;;  %v1249_v7 = vmul.f32 0.03125, %v1231_v61 }
 0x781   :  { %v1256_v37 = vadd.f32 1e-05, %v1248_v10  ;;  %v1257_v50 = vadd.f32 1e-05, %v1249_v7 }
 0x782   :  { %v1234_v55 = vpop.xlane.xlu1 %1233 }
 0x783   :  { %9838 = vrsqrt.f32 %v1256_v37  ;;  %v1250_v48 = vmul.f32 0.03125, %v1234_v55 }
 0x784   :  { %9840 = vrsqrt.f32 %v1257_v50 }
 0x785   :  { %v1258_v18 = vadd.f32 1e-05, %v1250_v48 }
 0x787   :  { %9842 = vrsqrt.f32 %v1258_v18 }
 0x78a   :  { %v1237_v28 = vpop.xlane.xlu0 %1236 }
 0x78b   :  { %v1251_v12 = vmul.f32 0.03125, %v1237_v28 }
 0x78c   :  { %v9837_v4 = vpop.eup %9836 }
 0x78d   :  { %v1259_v53 = vadd.f32 1e-05, %v1251_v12  ;;  %v1271_v3 = vmul.f32 %v9837_v4, %v11025_v38 }
 0x78e   :  { %v1240_v23 = vpop.xlane.xlu1 %1239  ;;  %v1243_v17 = vpop.xlane.xlu0 %1242 }
 0x78f   :  { %9844 = vrsqrt.f32 %v1259_v53  ;;  %v1252_v26 = vmul.f32 0.03125, %v1240_v23  ;;  %v1253_v15 = vmul.f32 0.03125, %v1243_v17  ;;  %v1285_v29 = vmul.f32 %v11082_v20, %v1271_v3 }
 0x790   :  { %v9839_v5 = vpop.eup %9838 }
 0x791   :  { %v9841_v16 = vpop.eup %9840  ;;  %v1260_v25 = vadd.f32 1e-05, %v1252_v26  ;;  %v1261_v60 = vadd.f32 1e-05, %v1253_v15  ;;  %v1272_v34 = vmul.f32 %v9839_v5, %v11030_v57  ;;  %v1299_v43 = vadd.f32 %v11086_v9, %v1285_v29 }
 0x792   :  { %v1273_v36 = vmul.f32 %v9841_v16, %v11033_v2  ;;  %v1246_v38 = vpop.xlane.xlu1 %1245 }
 0x793   :  { %9846 = vrsqrt.f32 %v1260_v25  ;;  %v1254_v40 = vmul.f32 0.03125, %v1246_v38  ;;  %v1286_v35 = vmul.f32 %v11082_v20, %v1272_v34  ;;  %v1314_v45 = vmul.f32 %v8878_v41, %v1299_v43 }
 0x794   :  { %v9843_v39 = vpop.eup %9842  ;;  %v1287_v56 = vmul.f32 %v11082_v20, %v1273_v36  ;;  %9848 = vrsqrt.f32 %v1261_v60  ;;  %v1329_v51 = vmul.f32 %v8879_v6, %v1299_v43 }
 0x795   :  { %v1274_v21 = vmul.f32 %v9843_v39, %v11041_v8  ;;  %v1262_v19 = vadd.f32 1e-05, %v1254_v40  ;;  %v1300_v57 = vadd.f32 %v11086_v9, %v1286_v35 }
 0x796   :  { %v1301_v2 = vadd.f32 %v11086_v9, %v1287_v56 }
 0x797   :  { %v1288_v11 = vmul.f32 %v11082_v20, %v1274_v21  ;;  %9850 = vrsqrt.f32 %v1262_v19  ;;  %v1315_v63 = vmul.f32 %v8878_v41, %v1300_v57  ;;  %v1330_v13 = vmul.f32 %v8879_v6, %v1300_v57 }
 0x798   :  { %v1331_v8 = vmul.f32 %v8879_v6, %v1301_v2  ;;  %v1316_v48 = vmul.f32 %v8878_v41, %v1301_v2 }
 0x799   :  { %v1302_v33 = vadd.f32 %v11086_v9, %v1288_v11  ;;  %v1341_v32 = vpack.c.bf16 %v1330_v13, %v1329_v51  ;;  %v1478_v61 = vpack.c.bf16 %v1315_v63, %v1314_v45 }
 0x79b   :  { %9311 = vmatprep.mubr.msk.bf16.mxu1 %vm226_vm3, %v1341_v32  ;;  %8890 = vmatmul.mubr.msk.bf16.vlgmr.msra.gmra.mxu0 %vm226_vm3, %v1478_v61  ;;  %v1332_v10 = vmul.f32 %v8879_v6, %v1302_v33  ;;  %v1317_v50 = vmul.f32 %v8878_v41, %v1302_v33 }
 0x79c   :  { %v9845_v7 = vpop.eup %9844  ;;  %1556 = vmatprep.mubr.bf16.mxu0 %v14701_v59  ;;  %9342 = vmatpush3.bf16.msra.mxu0 %v9720_v1 }
 0x79d   :  { %v1342_v37 = vpack.c.bf16 %v1332_v10, %v1331_v8  ;;  %v1275_v55 = vmul.f32 %v9845_v7, %v11049_v58  ;;  %v1479_v4 = vpack.c.bf16 %v1317_v50, %v1316_v48 }
 0x79f   :  { %9312 = vmatmul.mubr.msk.bf16.vlgmr.msra.gmra.mxu1 %vm226_vm3, %v1342_v37  ;;  %v1289_v18 = vmul.f32 %v11082_v20, %v1275_v55 }
 0x7a0   :  { %v9847_v28 = vpop.eup %9846 }
 0x7a1   :  { %v9849_v12 = vpop.eup %9848  ;;  %v1276_v53 = vmul.f32 %v9847_v28, %v11054_v42  ;;  %v1303_v3 = vadd.f32 %v11086_v9, %v1289_v18 }
 0x7a2   :  { %v1277_v23 = vmul.f32 %v9849_v12, %v11057_v14 }
 0x7a3   :  { %8891 = vmatmul.mubr.msk.bf16.gmra.mxu0 %vm226_vm3, %v1479_v4  ;;  %v1290_v17 = vmul.f32 %v11082_v20, %v1276_v53  ;;  %v1333_v5 = vmul.f32 %v8879_v6, %v1303_v3  ;;  %v1318_v16 = vmul.f32 %v8878_v41, %v1303_v3  ;;  %v14718_v4 = vmov 683565275  }
 0x7a4   :  { %v9851_v26 = vpop.eup %9850  ;;  %1566 = vmatprep.mubr.bf16.mxu0 %v14701_v59  ;;  %v1291_v58 = vmul.f32 %v11082_v20, %v1277_v23  ;;  %v14720_v3 = vmov 2475754826  }
 0x7a5   :  { %v1278_v15 = vmul.f32 %v9851_v26, %v11065_v52  ;;  %v1304_v29 = vadd.f32 %v11086_v9, %v1290_v17 }
 0x7a6   :  { %v1305_v14 = vadd.f32 %v11086_v9, %v1291_v58  ;;  %v14711_v58 = vmov 2131351028  }
 0x7a7   :  { %v1334_v42 = vmul.f32 %v8879_v6, %v1304_v29  ;;  %v1319_v25 = vmul.f32 %v8878_v41, %v1304_v29  ;;  %v1292_v60 = vmul.f32 %v11082_v20, %v1278_v15 }
 0x7a8   :  { %v1335_v43 = vmul.f32 %v8879_v6, %v1305_v14  ;;  %v1320_v20 = vmul.f32 %v8878_v41, %v1305_v14 }
 0x7a9   :  { %v1343_v34 = vpack.c.bf16 %v1334_v42, %v1333_v5  ;;  %v1480_v36 = vpack.c.bf16 %v1319_v25, %v1318_v16  ;;  %v1306_v38 = vadd.f32 %v11086_v9, %v1292_v60  ;;  %v14724_v5 = vmov 2102212464  }
 0x7aa   :  { %v14735_v25 = vmov 920167782  }
 0x7ab   :  { %9315 = vmatprep.mubr.msk.bf16.mxu1 %vm226_vm3, %v1343_v34  ;;  %8892 = vmatmul.mubr.msk.bf16.gmra.mxu0 %vm226_vm3, %v1480_v36  ;;  %v1336_v52 = vmul.f32 %v8879_v6, %v1306_v38  ;;  %4367 = vst.msk [vmem:[#allocation8] sm:$0xff] %vm226_vm3, %v1306_v38  ;;  %v1321_v35 = vmul.f32 %v8878_v41, %v1306_v38  ;;  %v14708_v34 = vmov 1326507024  }
 0x7ac   :  { %1576 = vmatprep.mubr.bf16.mxu0 %v14701_v59 }
 0x7ad   :  { %v1344_v40 = vpack.c.bf16 %v1336_v52, %v1335_v43  ;;  %v1481_v39 = vpack.c.bf16 %v1321_v35, %v1320_v20 }
 0x7af   :  { %9316 = vmatmul.mubr.msk.bf16.gmra.mxu1 %vm226_vm3, %v1344_v40 }
 0x7b3   :  { %8893 = vmatmul.mubr.msk.bf16.gmra.mxu0 %vm226_vm3, %v1481_v39 }
 0x85b   :  { %v11125_v56 = vpop.f32.mrf.mxu0 }
 0x85c   :  { %v11128_v9 = vmul.f32 0.70710677, %v11125_v56 }
 0x85d   :  { %v1550_v21 = vpop.f32.mrf.mxu0 }
 0x85e   :  { %v11130_v19 = vmul.f32 0.5, %v1550_v21  ;;  %v11133_v6 = vand.u32 2147483647, %v11128_v9 }
 0x85f   :  { %v11135_v57 = vpop.f32.mrf.mxu0 }
 0x860   :  { %v1806_v2 = vand.u32 2139095040, %v11130_v19  ;;  %v14705_v41 = vand.u32 2147483647, %v11130_v19  ;;  %v1627_v45 = vmul.f32 0.3275911, %v11133_v6  ;;  %vm1895_vm5 = vweird.f32 %v11130_v19 }
 0x861   :  { %v1554_v11 = vpop.f32.mrf.mxu0  ;;  %v11141_v13 = vmul.f32 0.70710677, %v11135_v57 }
 0x862   :  { %v1807_v51 = vshrl.u32 %v1806_v2, 23  ;;  %v1810_v33 = vand.u32 8388607, %v14705_v41  ;;  %v11145_v32 = vmul.f32 0.5, %v1554_v11  ;;  %v1635_v61 = vadd.f32 1.0, %v1627_v45 }
 0x863   :  { %v11148_v10 = vand.u32 2147483647, %v11141_v13 }
 0x864   :  { %v8894_v63 = vadd.s32 4294967169, %v1807_v51  ;;  %14842 = vst [vmem:[#allocation38_spill] sm:$0xff] %v11145_v32  ;;  %v1909_v7 = vand.u32 2139095040, %v11145_v32  ;;  %v1811_v37 = vor.u32 8388608, %v1810_v33  ;;  %9852 = vrcp.f32 %v1635_v61 }
 0x865   :  { %v1628_v18 = vmul.f32 0.3275911, %v11148_v10 }
 0x866   :  { %v1813_v8 = vadd.s32 1, %v8894_v63  ;;  %v1910_v28 = vshrl.u32 %v1909_v7, 23  ;;  %v1851_v17 = vshll.u32 %v1811_v37, 8 }
 0x867   :  { %v1636_v45 = vadd.f32 1.0, %v1628_v18 }
 0x868   :  { %vm1814_vm6 = vcmp.gt.s32.totalorder %v1813_v8, 0  ;;  %v8898_v40 = vadd.s32 4294967169, %v1910_v28 }
 0x869   :  { %v1815_v50 = vsel %vm1814_vm6, %v1813_v8, 0  ;;  %9854 = vrcp.f32 %v1636_v45 }
 0x86a   :  { %v1817_v55 = vand.u32 31, %v1815_v50  ;;  %v1816_v12 = vshrl.u32 %v1815_v50, 5  ;;  %v1916_v8 = vadd.s32 1, %v8898_v40 }
 0x86c   :  { %v1818_v48 = vsub.s32 32, %v1817_v55  ;;  %v1820_v53 = vshll.u32 %v14718_v4, %v1817_v55  ;;  %v1823_v23 = vshll.u32 %v14720_v3, %v1817_v55  ;;  %v1826_v29 = vshll.u32 %v14711_v58, %v1817_v55 }
 0x86d   :  { %v1829_v42 = vshll.u32 %v14724_v5, %v1817_v55  ;;  %v1832_v14 = vshll.u32 %v14735_v25, %v1817_v55  ;;  %vm1835_vm7 = vcmp.lt.s32.totalorder %v1816_v12, 1  ;;  %vm1838_vm8 = vcmp.lt.s32.totalorder %v1816_v12, 4 }
 0x86e   :  { %v1821_v26 = vshrl.u32 %v14720_v3, %v1818_v48  ;;  %v1824_v15 = vshrl.u32 %v14711_v58, %v1818_v48  ;;  %v1827_v16 = vshrl.u32 %v14724_v5, %v1818_v48  ;;  %v1830_v60 = vshrl.u32 %v14735_v25, %v1818_v48 }
 0x86f   :  { %v1833_v36 = vshrl.u32 %v14708_v34, %v1818_v48  ;;  %v1819_v51 = vshrl.u32 %v14718_v4, %v1818_v48  ;;  %vm1837_vm9 = vcmp.lt.s32.totalorder %v1816_v12, 3  ;;  %vm1836_vm10 = vcmp.lt.s32.totalorder %v1816_v12, 2 }
 0x870   :  { %v1822_v38 = vor.u32 %v1821_v26, %v1820_v53  ;;  %v1825_v43 = vor.u32 %v1824_v15, %v1823_v23  ;;  %v1828_v52 = vor.u32 %v1827_v16, %v1826_v29  ;;  %v1831_v35 = vor.u32 %v1830_v60, %v1829_v42 }
 0x871   :  { %v1834_v20 = vor.u32 %v1833_v36, %v1832_v14  ;;  %v11170_v18 = vpop.eup %9852  ;;  %vm1917_vm11 = vcmp.gt.s32.totalorder %v1916_v8, 0  ;;  %v14704_v12 = vand.u32 2147483647, %v11145_v32 }
 0x872   :  { %v1840_v39 = vsel %vm1838_vm8, %v1828_v52, 2102212464  ;;  %v1843_v21 = vsel %vm1835_vm7, %v1822_v38, %v1825_v43  ;;  %v1847_v2 = vsel %vm1835_vm7, %v1825_v43, %v1828_v52  ;;  %v1844_v11 = vsel %vm1838_vm8, %v1831_v35, 920167782 }
 0x873   :  { %v1848_v63 = vsel %vm1838_vm8, %v1834_v20, 1326507024  ;;  %v1845_v33 = vsel %vm1837_vm9, %v1828_v52, %v1844_v11  ;;  %v1839_v7 = vsel %vm1835_vm7, %v1819_v51, %v1822_v38  ;;  %v1841_v37 = vsel %vm1837_vm9, %v1825_v43, %v1840_v39  ;;  %v11187_v51 = vpop.f32.mrf.mxu0 }
 0x874   :  { %v1849_v61 = vsel %vm1837_vm9, %v1831_v35, %v1848_v63  ;;  %v1846_v50 = vsel %vm1836_vm10, %v1843_v21, %v1845_v33  ;;  %v1842_v48 = vsel %vm1836_vm10, %v1839_v7, %v1841_v37  ;;  %v1918_v15 = vsel %vm1917_vm11, %v1916_v8, 0 }
 0x875   :  { %v1850_v55 = vsel %vm1836_vm10, %v1847_v2, %v1849_v61  ;;  %v11166_v23 = vmul.u32.u64.low %v1851_v17, %v1846_v50  ;;  %v11167_v26 = vmul.u32.u64.high %v1851_v17, %v1846_v50, %v11166_v23  ;;  %v1651_v29 = vmul.f32 1.0614054, %v11170_v18 }
 0x876   :  { %v11163_v28 = vmul.u32.u64.low %v1851_v17, %v1850_v55  ;;  %v11164_v53 = vmul.u32.u64.high %v1851_v17, %v1850_v55, %v11163_v28  ;;  %v1858_v42 = vmul.u32 %v1851_v17, %v1842_v48  ;;  %v1920_v60 = vand.u32 31, %v1918_v15 }
 0x877   :  { %v1861_v16 = vadd.s32 1, %v11167_v26  ;;  %v1659_v43 = vadd.f32 -1.4531521, %v1651_v29  ;;  %v1913_v52 = vand.u32 8388607, %v14704_v12  ;;  %v1919_v63 = vshrl.u32 %v1918_v15, 5 }
 0x878   :  { %vm1860_vm12 = vc.u32 %v11164_v53, %v11166_v23  ;;  %v1921_v38 = vsub.s32 32, %v1920_v60  ;;  %v1923_v35 = vshll.u32 %v14718_v4, %v1920_v60  ;;  %v1926_v20 = vshll.u32 %v14720_v3, %v1920_v60 }
 0x879   :  { %v1862_v14 = vsel %vm1860_vm12, %v1861_v16, %v11167_v26  ;;  %v1932_v39 = vshll.u32 %v14724_v5, %v1920_v60  ;;  %v1929_v8 = vshll.u32 %v14711_v58, %v1920_v60  ;;  %v1914_v37 = vor.u32 8388608, %v1913_v52  ;;  %v11201_v52 = vpop.eup %9854 }
 0x87a   :  { %v1863_v36 = vadd.s32 %v1862_v14, %v1858_v42  ;;  %v1924_v21 = vshrl.u32 %v14720_v3, %v1921_v38  ;;  %v1927_v17 = vshrl.u32 %v14711_v58, %v1921_v38  ;;  %v1930_v2 = vshrl.u32 %v14724_v5, %v1921_v38 }
 0x87b   :  { %v1933_v45 = vshrl.u32 %v14735_v25, %v1921_v38  ;;  %v1935_v50 = vshll.u32 %v14735_v25, %v1920_v60  ;;  %v1936_v55 = vshrl.u32 %v14708_v34, %v1921_v38  ;;  %v11195_v28 = vmul.f32 0.70710677, %v11187_v51 }
 0x87c   :  { %v1864_v40 = vadd.s32 536870912, %v1863_v36  ;;  %v1925_v33 = vor.u32 %v1924_v21, %v1923_v35  ;;  %v1928_v61 = vor.u32 %v1927_v17, %v1926_v20  ;;  %v1667_v26 = vmul.f32 %v11170_v18, %v1659_v43 }
 0x87d   :  { %v1934_v7 = vor.u32 %v1933_v45, %v1932_v39  ;;  %v1931_v48 = vor.u32 %v1930_v2, %v1929_v8  ;;  %v1937_v16 = vor.u32 %v1936_v55, %v1935_v50  ;;  %vm1938_vm13 = vcmp.lt.s32.totalorder %v1919_v63, 1 }
 0x87e   :  { %v11189_v11 = vshrl.u32 %v1864_v40, 30  ;;  %vm1941_vm14 = vcmp.lt.s32.totalorder %v1919_v63, 4  ;;  %v1723_v15 = vsub.f32 0.0, %v11133_v6  ;;  %v1946_v42 = vsel %vm1938_vm13, %v1925_v33, %v1928_v61 }
 0x87f   :  { %v1947_v14 = vsel %vm1941_vm14, %v1934_v7, 920167782  ;;  %vm1939_vm15 = vcmp.lt.s32.totalorder %v1919_v63, 2  ;;  %vm1940_vm0 = vcmp.lt.s32.totalorder %v1919_v63, 3  ;;  %v1954_v60 = vshll.u32 %v1914_v37, 8 }
 0x880   :  { %v1866_v29 = vshll.u32 %v11189_v11, 30  ;;  %v11204_v40 = vand.u32 2147483647, %v11195_v28  ;;  %v1943_v43 = vsel %vm1941_vm14, %v1931_v48, 2102212464  ;;  %v1948_v35 = vsel %vm1940_vm0, %v1931_v48, %v1947_v14 }
 0x881   :  { %v1950_v20 = vsel %vm1938_vm13, %v1928_v61, %v1931_v48  ;;  %v1951_v39 = vsel %vm1941_vm14, %v1937_v16, 1326507024  ;;  %v1675_v21 = vadd.f32 1.4214138, %v1667_v26  ;;  %v1922_v2 = vshrl.u32 %v14718_v4, %v1921_v38 }
 0x882   :  { %v11207_v17 = vsub.s32 %v1863_v36, %v1866_v29  ;;  %v1949_v45 = vsel %vm1939_vm15, %v1946_v42, %v1948_v35  ;;  %v1652_v8 = vmul.f32 1.0614054, %v11201_v52  ;;  %v1952_v50 = vsel %vm1940_vm0, %v1934_v7, %v1951_v39  ;;  %v1560_v42 = vpop.f32.mrf.mxu0 }
 0x883   :  { %v11212_v55 = vmul.u32.u64.low %v1954_v60, %v1949_v45  ;;  %v11213_v37 = vmul.u32.u64.high %v1954_v60, %v1949_v45, %v11212_v55  ;;  %v1942_v59 = vsel %vm1938_vm13, %v1922_v2, %v1925_v33  ;;  %v1944_v14 = vsel %vm1940_vm0, %v1928_v61, %v1943_v43 }
 0x884   :  { %v1953_v48 = vsel %vm1939_vm15, %v1950_v20, %v1952_v50  ;;  %v1629_v26 = vmul.f32 0.3275911, %v11204_v40  ;;  %v1731_v36 = vmul.f32 %v1723_v15, %v11133_v6  ;;  %v1869_v16 = vsub.s32 0, %v11207_v17  ;;  %v11232_v2 = vpop.f32.mrf.mxu0 }
 0x885   :  { %v11220_v29 = vmul.u32.u64.low %v1954_v60, %v1953_v48  ;;  %v11221_v38 = vmul.u32.u64.high %v1954_v60, %v1953_v48, %v11220_v29  ;;  %v1683_v7 = vmul.f32 %v11170_v18, %v1675_v21  ;;  %v1660_v35 = vadd.f32 -1.4531521, %v1652_v8 }
 0x886   :  { %v1945_v39 = vsel %vm1939_vm15, %v1942_v59, %v1944_v14  ;;  %v1964_v33 = vadd.s32 1, %v11213_v37  ;;  %v1637_v61 = vadd.f32 1.0, %v1629_v26  ;;  %v1739_v43 = vmul.f32 1.442695, %v1731_v36 }
 0x887   :  { %vm1963_vm1 = vc.u32 %v11221_v38, %v11212_v55  ;;  %v11229_v20 = vmul.f32 0.5, %v1560_v42  ;;  %v8895_v6 = vmin.u32 %v1869_v16, %v11207_v17  ;;  %v1961_v15 = vmul.u32 %v1954_v60, %v1945_v39 }
 0x888   :  { %v1691_v45 = vadd.f32 -0.28449672, %v1683_v7  ;;  %v1668_v21 = vmul.f32 %v11201_v52, %v1660_v35  ;;  %v1965_v63 = vsel %vm1963_vm1, %v1964_v33, %v11213_v37  ;;  %9856 = vrcp.f32 %v1637_v61 }
 0x889   :  { %v1966_v59 = vadd.s32 %v1965_v63, %v1961_v15  ;;  %9858 = vpow2.f32 %v1739_v43  ;;  %v2012_v8 = vand.u32 2139095040, %v11229_v20  ;;  %v11238_v50 = vmul.f32 0.70710677, %v11232_v2 }
 0x88a   :  { %v1871_v14 = vclz %v8895_v6  ;;  %v1724_v48 = vsub.f32 0.0, %v11148_v10  ;;  %v1699_v60 = vmul.f32 %v11170_v18, %v1691_v45  ;;  %v1676_v36 = vadd.f32 1.4214138, %v1668_v21  ;;  %v1564_v21 = vpop.f32.mrf.mxu0 }
 0x88b   :  { %v1967_v26 = vadd.s32 536870912, %v1966_v59  ;;  %v2013_v29 = vshrl.u32 %v2012_v8, 23  ;;  %v11243_v16 = vand.u32 2147483647, %v11238_v50  ;;  %v14703_v15 = vand.u32 2147483647, %v11229_v20 }
 0x88c   :  { %v8896_v35 = vadd.s32 4294967294, %v1871_v14  ;;  %v1732_v39 = vmul.f32 %v1724_v48, %v11148_v10  ;;  %v1707_v61 = vadd.f32 0.2548296, %v1699_v60  ;;  %v1684_v43 = vmul.f32 %v11201_v52, %v1676_v36 }
 0x88d   :  { %v11245_v37 = vshrl.u32 %v1967_v26, 30  ;;  %v8902_v42 = vadd.s32 4294967169, %v2013_v29  ;;  %v1630_v7 = vmul.f32 0.3275911, %v11243_v16  ;;  %vm1603_vm8 = vcmp.lt.f32.partialorder %v11128_v9, 0.0 }
 0x88e   :  { %vm8897_vm7 = vcmp.lt.s32.totalorder %v8896_v35, 0  ;;  %v1741_v63 = vmul.f32 1.442695, %v1732_v39  ;;  %v1715_v10 = vmul.f32 %v11170_v18, %v1707_v61  ;;  %v1692_v14 = vadd.f32 -0.28449672, %v1684_v43 }
 0x88f   :  { %14843 = vst [vmem:[#allocation39_spill] sm:$0xff] %v11245_v37  ;;  %v1969_v33 = vshll.u32 %v11245_v37, 30  ;;  %v2019_v6 = vadd.s32 1, %v8902_v42  ;;  %v1638_v45 = vadd.f32 1.0, %v1630_v7  ;;  %v11257_v60 = vmul.f32 0.5, %v11125_v56 }
 0x890   :  { %v11259_v36 = vmul.f32 0.5, %v1564_v21  ;;  %v11263_v42 = vsel %vm8897_vm7, 0, %v8896_v35  ;;  %v14706_v9 = vmov 1.0   ;;  %v1700_v35 = vmul.f32 %v11201_v52, %v1692_v14 }
 0x891   :  { %vm2020_vm6 = vcmp.gt.s32.totalorder %v2019_v6, 0  ;;  %v11252_v8 = vsub.s32 %v1966_v59, %v1969_v33  ;;  %v2016_v59 = vand.u32 8388607, %v14703_v15  ;;  %9860 = vrcp.f32 %v1638_v45 }
 0x892   :  { %v2021_v26 = vsel %vm2020_vm6, %v2019_v6, 0  ;;  %v11268_v18 = vsel %vm1603_vm8, -1.0, %v14706_v9  ;;  %v11271_v33 = vmul.f32 0.5, %v11135_v57  ;;  %9862 = vpow2.f32 %v1741_v63 }
 0x893   :  { %v2023_v48 = vand.u32 31, %v2021_v26  ;;  %v1972_v56 = vsub.s32 0, %v11252_v8  ;;  %v1725_v43 = vsub.f32 0.0, %v11204_v40  ;;  %v1879_v45 = vsub.s32 4294967266, %v11263_v42 }
 0x894   :  { %v2115_v57 = vand.u32 2139095040, %v11259_v36  ;;  %v2017_v12 = vor.u32 8388608, %v2016_v59  ;;  %v11287_v41 = vshrl.u32 %v2021_v26, 5  ;;  %v14846_v59 = vmov 1326507024  }
 0x895   :  { %v11261_v29 = vpop.eup %9856  ;;  %v2024_v7 = vsub.s32 32, %v2023_v48  ;;  %v2026_v63 = vshll.u32 %v14718_v4, %v2023_v48  ;;  %v2035_v9 = vshll.u32 %v14724_v5, %v2023_v48  ;;  %v2032_v47 = vshll.u32 %v14845_v62, %v2023_v48 }
 0x896   :  { %v9859_v39 = vpop.eup %9858  ;;  %v1653_v21 = vmul.f32 1.0614054, %v11261_v29  ;;  %v2116_v46 = vshrl.u32 %v2115_v57, 23  ;;  %v11298_v26 = vadd.s32 %v11166_v23, %v11164_v53  ;;  %vm2041_vm9 = vcmp.lt.s32.totalorder %v11287_v41, 1 }
 0x897   :  { %v11274_v61 = vmul.f32 %v9859_v39, %v1715_v10  ;;  %v2027_v6 = vshrl.u32 %v14720_v3, %v2024_v7  ;;  %v2030_v15 = vshrl.u32 %v14711_v58, %v2024_v7  ;;  %v2029_v10 = vshll.u32 %v14720_v3, %v2023_v48 }
 0x898   :  { %v2033_v14 = vshrl.u32 %v14724_v5, %v2024_v7  ;;  %v8899_v39 = vmin.u32 %v1972_v56, %v11252_v8  ;;  %v2036_v34 = vshrl.u32 %v14735_v25, %v2024_v7  ;;  %v2039_v54 = vshrl.u32 %v14846_v59, %v2024_v7 }
 0x899   :  { %v2028_v22 = vor.u32 %v2027_v6, %v2026_v63  ;;  %v2031_v58 = vor.u32 %v2030_v15, %v2029_v10  ;;  %v1661_v0 = vadd.f32 -1.4531521, %v1653_v21  ;;  %v2038_v3 = vshll.u32 %v14735_v25, %v2023_v48 }
 0x89a   :  { %v2037_v4 = vor.u32 %v2036_v34, %v2035_v9  ;;  %v1708_v5 = vadd.f32 0.2548296, %v1700_v35  ;;  %v2034_v6 = vor.u32 %v2033_v14, %v2032_v47  ;;  %v11300_v15 = vadd.s32 127, %v1879_v45 }
 0x89b   :  { %v1733_v63 = vmul.f32 %v1725_v43, %v11204_v40  ;;  %v2040_v10 = vor.u32 %v2039_v54, %v2038_v3  ;;  %v1974_v34 = vclz %v8899_v39  ;;  %vm2044_vm10 = vcmp.lt.s32.totalorder %v11287_v41, 4  ;;  %v9721_v3 = vld [vmem:[%s14844_s7 + $0x30] sm:$0xff]  }
 0x89c   :  { %v2049_v48 = vsel %vm2041_vm9, %v2028_v22, %v2031_v58  ;;  %v11307_v9 = vshll.u32 %v2017_v12, 8  ;;  %v1669_v53 = vmul.f32 %v11261_v29, %v1661_v0  ;;  %vm2043_vm11 = vcmp.lt.s32.totalorder %v11287_v41, 3  ;;  %9343 = vmatprep.subr.bf16.mxu0 %v9721_v3 }
 0x89d   :  { %v2050_v47 = vsel %vm2044_vm10, %v2037_v4, 920167782  ;;  %v8906_v54 = vadd.s32 4294967169, %v2116_v46  ;;  %vm2042_vm12 = vcmp.lt.s32.totalorder %v11287_v41, 2  ;;  %v2046_v23 = vsel %vm2044_vm10, %v2034_v6, 2102212464  ;;  %9344 = vmatpush3.bf16.msra.mxu0 %v9721_v3 }
 0x89e   :  { %v2051_v40 = vsel %vm2043_vm11, %v2034_v6, %v2050_v47  ;;  %v2053_v1 = vsel %vm2041_vm9, %v2031_v58, %v2034_v6  ;;  %v11321_v0 = vpop.eup %9860  ;;  %v14847_v12 = vmov 683565275   ;;  %v2054_v43 = vsel %vm2044_vm10, %v2040_v10, 1326507024 }
 0x89f   :  { %v2025_v35 = vshrl.u32 %v14847_v12, %v2024_v7  ;;  %v2052_v46 = vsel %vm2042_vm12, %v2049_v48, %v2051_v40  ;;  %v14726_v45 = vand.u32 2147483647, %v11259_v36  ;;  %v11329_v21 = vpop.eup %9862  ;;  %v8900_v57 = vadd.s32 4294967294, %v1974_v34  ;;  %v9722_v34 = vld [vmem:[%s14844_s7 + $0x28] sm:$0xff]  }
 0x8a0   :  { %v2055_v14 = vsel %vm2043_vm11, %v2037_v4, %v2054_v43  ;;  %v11334_v39 = vmul.u32.u64.low %v11307_v9, %v2052_v46  ;;  %v11335_v6 = vmul.u32.u64.high %v11307_v9, %v2052_v46, %v11334_v39  ;;  %v1677_v7 = vadd.f32 1.4214138, %v1669_v53  ;;  %9345 = vmatprep.subr.bf16.mxu0 %v9722_v34 }
 0x8a1   :  { %v2045_v48 = vsel %vm2041_vm9, %v2025_v35, %v2028_v22  ;;  %v2047_v10 = vsel %vm2043_vm11, %v2031_v58, %v2046_v23  ;;  %v2056_v47 = vsel %vm2042_vm12, %v2053_v1, %v2055_v14  ;;  %v1654_v46 = vmul.f32 1.0614054, %v11321_v0  ;;  %9346 = vmatpush3.bf16.msra.mxu0 %v9722_v34  ;;  %v9723_v14 = vld [vmem:[%s14844_s7 + $0x20] sm:$0xff]  }
 0x8a2   :  { %v11346_v40 = vmul.u32.u64.low %v11307_v9, %v2056_v47  ;;  %v11347_v4 = vmul.u32.u64.high %v11307_v9, %v2056_v47, %v11346_v40  ;;  %v2122_v43 = vadd.s32 1, %v8906_v54  ;;  %v1875_v53 = vsub.s32 32, %v11263_v42  ;;  %9347 = vmatprep.subr.bf16.mxu0 %v9723_v14  ;;  %v9725_v47 = vld [vmem:[%s14844_s7 + $0x10] sm:$0xff]  }
 0x8a3   :  { %v1881_v3 = vshll.u32 %v11300_v15, 23  ;;  %v1743_v22 = vmul.f32 1.442695, %v1733_v63  ;;  %v1726_v35 = vsub.f32 0.0, %v11243_v16  ;;  %vm8901_vm13 = vcmp.lt.s32.totalorder %v8900_v57, 0 }
 0x8a4   :  { %v2048_v58 = vsel %vm2042_vm12, %v2045_v48, %v2047_v10  ;;  %v2067_v23 = vadd.s32 1, %v11335_v6  ;;  %vm2123_vm14 = vcmp.gt.s32.totalorder %v2122_v43, 0  ;;  %v11357_v1 = vmul.f32 %v11201_v52, %v1708_v5 }
 0x8a5   :  { %v1685_v54 = vmul.f32 %v11261_v29, %v1677_v7  ;;  %v2119_v15 = vand.u32 8388607, %v14726_v45  ;;  %v2124_v63 = vsel %vm2123_vm14, %v2122_v43, 0  ;;  %v11367_v41 = vadd.s32 %v11212_v55, %v11221_v38  ;;  %9348 = vmatpush3.bf16.msra.mxu0 %v9723_v14 }
 0x8a6   :  { %vm2066_vm15 = vc.u32 %v11347_v4, %v11334_v39  ;;  %v1662_v5 = vadd.f32 -1.4531521, %v1654_v46  ;;  %v11371_v52 = vsel %vm8901_vm13, 0, %v8900_v57  ;;  %v2064_v7 = vmul.u32 %v11307_v9, %v2048_v58  ;;  %v9724_v9 = vld [vmem:[%s14844_s7 + $0x18] sm:$0xff]  }
 0x8a7   :  { %v2068_v48 = vsel %vm2066_vm15, %v2067_v23, %v11335_v6  ;;  %v2126_v10 = vand.u32 31, %v2124_v63  ;;  %v11376_v34 = vshrl.u32 %v11298_v26, %v1875_v53  ;;  %v11378_v40 = vor.u32 4788187, %v1881_v3  ;;  %9349 = vmatprep.subr.bf16.mxu0 %v9724_v9 }
 0x8a8   :  { %9864 = vpow2.f32 %v1743_v22  ;;  %v11381_v55 = vmul.f32 %v1726_v35, %v11243_v16  ;;  %v1693_v38 = vadd.f32 -0.28449672, %v1685_v54  ;;  %v11383_v46 = vadd.s32 %v2068_v48, %v2064_v7 }
 0x8a9   :  { %v2120_v57 = vor.u32 8388608, %v2119_v15  ;;  %v2127_v43 = vsub.s32 32, %v2126_v10  ;;  %v1982_v58 = vsub.s32 4294967266, %v11371_v52  ;;  %v1670_v26 = vmul.f32 %v11321_v0, %v1662_v5  ;;  %9350 = vmatpush3.bf16.msra.mxu0 %v9724_v9 }
 0x8aa   :  { %v11389_v53 = vshrl.u32 %v2124_v63, 5  ;;  %v2129_v3 = vshll.u32 %v14847_v12, %v2126_v10  ;;  %v14848_v16 = vmov 2475754826   ;;  %v2135_v54 = vshll.u32 %v14845_v62, %v2126_v10  ;;  %v11399_v63 = vpop.f32.mrf.mxu0  ;;  %9351 = vmatprep.subr.bf16.mxu0 %v9725_v47 }
 0x8ab   :  { %v2130_v22 = vshrl.u32 %v14848_v16, %v2127_v43  ;;  %v2132_v35 = vshll.u32 %v14848_v16, %v2126_v10  ;;  %v2133_v23 = vshrl.u32 %v14845_v62, %v2127_v43  ;;  %v14849_v15 = vmov 2102212464  }
 0x8ac   :  { %v2136_v14 = vshrl.u32 %v14849_v15, %v2127_v43  ;;  %v2138_v7 = vshll.u32 %v14849_v15, %v2126_v10  ;;  %v2139_v5 = vshrl.u32 %v14735_v25, %v2127_v43  ;;  %v1701_v48 = vmul.f32 %v11261_v29, %v1693_v38 }
 0x8ad   :  { %v2070_v45 = vadd.s32 536870912, %v11383_v46  ;;  %v2131_v56 = vor.u32 %v2130_v22, %v2129_v3  ;;  %v2134_v6 = vor.u32 %v2133_v23, %v2132_v35  ;;  %v2141_v31 = vshll.u32 %v14735_v25, %v2126_v10  ;;  %v1570_v22 = vpop.f32.mrf.mxu0  ;;  %9352 = vmatpush3.bf16.msra.mxu0 %v9725_v47 }
 0x8ae   :  { %v2137_v24 = vor.u32 %v2136_v14, %v2135_v54  ;;  %v2140_v27 = vor.u32 %v2139_v5, %v2138_v7  ;;  %v2142_v44 = vshrl.u32 %v14846_v59, %v2127_v43  ;;  %v1983_v49 = vadd.s32 127, %v1982_v58 }
 0x8af   :  { %v1678_v30 = vadd.f32 1.4214138, %v1670_v26  ;;  %v11406_v37 = vshll.u32 %v2120_v57, 8  ;;  %v11409_v9 = vmul.f32 0.70710677, %v11399_v63  ;;  %v2128_v38 = vshrl.u32 %v14847_v12, %v2127_v43  ;;  %v9726_v57 = vld [vmem:[%s14844_s7 + $0x8] sm:$0xff]  }
 0x8b0   :  { %v2143_v3 = vor.u32 %v2142_v44, %v2141_v31  ;;  %vm2144_vm0 = vcmp.lt.s32.totalorder %v11389_v53, 1  ;;  %vm2147_vm1 = vcmp.lt.s32.totalorder %v11389_v53, 4  ;;  %vm2146_vm6 = vcmp.lt.s32.totalorder %v11389_v53, 3  ;;  %9353 = vmatprep.subr.bf16.mxu0 %v9726_v57 }
 0x8b1   :  { %v2149_v10 = vsel %vm2147_vm1, %v2137_v24, 2102212464  ;;  %v2152_v58 = vsel %vm2144_vm0, %v2131_v56, %v2134_v6  ;;  %v2153_v26 = vsel %vm2147_vm1, %v2140_v27, 920167782  ;;  %v11416_v35 = vshrl.u32 %v2070_v45, 30  ;;  %9354 = vmatpush3.bf16.msra.mxu0 %v9726_v57 }
 0x8b2   :  { %vm2145_vm7 = vcmp.lt.s32.totalorder %v11389_v53, 2  ;;  %v2154_v23 = vsel %vm2146_vm6, %v2137_v24, %v2153_v26  ;;  %v2156_v43 = vsel %vm2144_vm0, %v2134_v6, %v2137_v24  ;;  %v2148_v44 = vsel %vm2144_vm0, %v2128_v38, %v2131_v56 }
 0x8b3   :  { %14850 = vst [vmem:[#allocation40_spill] sm:$0xff] %v11416_v35  ;;  %v2155_v31 = vsel %vm2145_vm7, %v2152_v58, %v2154_v23  ;;  %v2157_v54 = vsel %vm2147_vm1, %v2143_v3, 1326507024  ;;  %v11421_v14 = vmul.f32 0.5, %v1570_v22  ;;  %v2150_v47 = vsel %vm2146_vm6, %v2134_v6, %v2149_v10  ;;  %v9727_v3 = vld [vmem:[%s14844_s7] sm:$0xff]  }
 0x8b4   :  { %v2158_v7 = vsel %vm2146_vm6, %v2140_v27, %v2157_v54  ;;  %v11424_v5 = vmul.u32.u64.low %v11406_v37, %v2155_v31  ;;  %v11425_v25 = vmul.u32.u64.high %v11406_v37, %v2155_v31, %v11424_v5  ;;  %v1984_v26 = vshll.u32 %v1983_v49, 23  ;;  %9355 = vmatprep.subr.bf16.mxu0 %v9727_v3 }
 0x8b5   :  { %v9865_v45 = vpop.eup %9864  ;;  %v1686_v24 = vmul.f32 %v11321_v0, %v1678_v30  ;;  %v2159_v56 = vsel %vm2145_vm7, %v2156_v43, %v2158_v7  ;;  %v11432_v38 = vand.u32 2147483647, %v11409_v9  ;;  %v1756_v27 = vmul.f32 %v11329_v21, %v11357_v1  ;;  %9356 = vmatpush3.bf16.msra.mxu0 %v9727_v3 }
 0x8b6   :  { %v2072_v6 = vshll.u32 %v11416_v35, 30  ;;  %v11439_v22 = vmul.u32.u64.low %v11406_v37, %v2159_v56  ;;  %v11440_v10 = vmul.u32.u64.high %v11406_v37, %v2159_v56, %v11439_v22  ;;  %v14851_v49 = vshll.u32 %v11207_v17, %v11263_v42 }
 0x8b7   :  { %v14852_v58 = vsub.s32 32, %v11371_v52  ;;  %v2151_v23 = vsel %vm2145_vm7, %v2148_v44, %v2150_v47  ;;  %v1631_v21 = vmul.f32 0.3275911, %v11432_v38  ;;  %v1883_v1 = vand.u32 2147483647, %v11378_v40 }
 0x8b8   :  { %v1878_v30 = vor.u32 %v11376_v34, %v14851_v49  ;;  %v1745_v43 = vmul.f32 1.442695, %v11381_v55  ;;  %v2170_v31 = vadd.s32 1, %v11425_v25  ;;  %v2218_v17 = vand.u32 2139095040, %v11421_v14 }
 0x8b9   :  { %v1980_v57 = vshrl.u32 %v11367_v41, %v14852_v58  ;;  %v1979_v42 = vshll.u32 %v11252_v8, %v11371_v52  ;;  %v1985_v34 = vor.u32 4788187, %v1984_v26  ;;  %v1709_v41 = vadd.f32 0.2548296, %v1701_v48 }
 0x8ba   :  { %v1694_v54 = vadd.f32 -0.28449672, %v1686_v24  ;;  %v11459_v53 = vsub.s32 %v11383_v46, %v2072_v6  ;;  %v2167_v44 = vmul.u32 %v11406_v37, %v2151_v23  ;;  %vm2169_vm8 = vc.u32 %v11440_v10, %v11424_v5 }
 0x8bb   :  { %v2219_v40 = vshrl.u32 %v2218_v17, 23  ;;  %v1885_v55 = vcvt.s32.f32 %v1878_v30  ;;  %v1981_v47 = vor.u32 %v1980_v57, %v1979_v42  ;;  %v2171_v7 = vsel %vm2169_vm8, %v2170_v31, %v11425_v25 }
 0x8bc   :  { %v1639_v56 = vadd.f32 1.0, %v1631_v21  ;;  %v14853_v8 = vsub.f32 1.0, %v11274_v61  ;;  %vm1805_vm9 = vcmp.lt.s32.totalorder %v11130_v19, 0  ;;  %vm1604_vm10 = vcmp.lt.f32.partialorder %v11141_v13, 0.0 }
 0x8bd   :  { %v1764_v46 = vsub.f32 1.0, %v1756_v27  ;;  %v2172_v48 = vadd.s32 %v2171_v7, %v2167_v44  ;;  %v1886_v37 = vmul.f32 %v1885_v55, %v1883_v1  ;;  %v1986_v26 = vand.u32 2147483647, %v1985_v34 }
 0x8be   :  { %v1771_v52 = vmul.f32 %v14853_v8, %v11268_v18  ;;  %v1717_v24 = vmul.f32 %v11261_v29, %v1709_v41  ;;  %v8910_v3 = vadd.s32 4294967169, %v2219_v40  ;;  %v2075_v6 = vsub.s32 0, %v11459_v53 }
 0x8bf   :  { %v1702_v25 = vmul.f32 %v11321_v0, %v1694_v54  ;;  %9866 = vpow2.f32 %v1745_v43  ;;  %v2173_v22 = vadd.s32 536870912, %v2172_v48  ;;  %v14854_v49 = vmov 1.0  }
 0x8c0   :  { %v1612_v61 = vsel %vm1604_vm10, -1.0, %v14854_v49  ;;  %v1988_v18 = vcvt.s32.f32 %v1981_v47  ;;  %9868 = vrcp.f32 %v1639_v56  ;;  %v2225_v30 = vadd.s32 1, %v8910_v3 }
 0x8c1   :  { %v1779_v58 = vadd.f32 1.0, %v1771_v52  ;;  %v1772_v13 = vmul.f32 %v1764_v46, %v1612_v61  ;;  %vm1605_vm11 = vcmp.lt.f32.partialorder %v11195_v28, 0.0  ;;  %v11475_v27 = vshrl.u32 %v2173_v22, 30 }
 0x8c2   :  { %v1887_v57 = vxor.u32 2147483648, %v1886_v37  ;;  %v1989_v29 = vmul.f32 %v1988_v18, %v1986_v26  ;;  %v1757_v23 = vmul.f32 %v9865_v45, %v1717_v24  ;;  %vm2226_vm12 = vcmp.gt.s32.totalorder %v2225_v30, 0 }
 0x8c3   :  { %14855 = vst [vmem:[#allocation41_spill] sm:$0xff] %v11475_v27  ;;  %v8903_v21 = vmin.u32 %v2075_v6, %v11459_v53  ;;  %v1710_v1 = vadd.f32 0.2548296, %v1702_v25  ;;  %v14737_v43 = vand.u32 2147483647, %v11421_v14  ;;  %v2227_v31 = vsel %vm2226_vm12, %v2225_v30, 0 }
 0x8c4   :  { %v14856_v17 = vand.u32 2147483647, %v11130_v19  ;;  %vm1908_vm14 = vcmp.lt.s32.totalorder %v11145_v32, 0  ;;  %v2175_v34 = vshll.u32 %v11475_v27, 30  ;;  %v2229_v41 = vand.u32 31, %v2227_v31 }
 0x8c5   :  { %v11488_v45 = vmul.f32 %v1779_v58, %v11257_v60  ;;  %v11491_v54 = vmul.f32 0.5, %v11187_v51  ;;  %v1613_v44 = vsel %vm1605_vm11, -1.0, %v14854_v49  ;;  %v11497_v40 = vmul.f32 0.5, %v11232_v2 }
 0x8c6   :  { %vm11481_vm13 = vcmp.le.f32.partialorder %v14856_v17, 0.7853982  ;;  %v1888_v55 = vsel %vm1805_vm9, %v1887_v57, %v1886_v37  ;;  %v1780_v47 = vadd.f32 1.0, %v1772_v13  ;;  %v1765_v7 = vsub.f32 1.0, %v1757_v23  ;;  %v11519_v57 = vpop.f32.mrf.mxu0 }
 0x8c7   :  { %v2230_v56 = vsub.s32 32, %v2229_v41  ;;  %v1990_v8 = vxor.u32 2147483648, %v1989_v29  ;;  %v2077_v52 = vclz %v8903_v21  ;;  %v1718_v60 = vmul.f32 %v11321_v0, %v1710_v1 }
 0x8c8   :  { %v2222_v51 = vand.u32 8388607, %v14737_v43  ;;  %v11504_v46 = vsub.s32 %v2172_v48, %v2175_v34  ;;  %v2232_v37 = vshll.u32 %v14847_v12, %v2229_v41  ;;  %v2235_v24 = vshll.u32 %v14848_v16, %v2229_v41  ;;  %v1574_v43 = vpop.f32.mrf.mxu0 }
 0x8c9   :  { %v2233_v28 = vshrl.u32 %v14848_v16, %v2230_v56  ;;  %v2236_v2 = vshrl.u32 %v14845_v62, %v2230_v56  ;;  %v2239_v26 = vshrl.u32 %v14849_v15, %v2230_v56  ;;  %v2241_v3 = vshll.u32 %v14849_v15, %v2229_v41 }
 0x8ca   :  { %v14859_v6 = vmov 920167782   ;;  %v11514_v0 = vmul.f32 %v1780_v47, %v11271_v33  ;;  %v2228_v22 = vshrl.u32 %v2227_v31, 5  ;;  %v2238_v48 = vshll.u32 %v14845_v62, %v2229_v41 }
 0x8cb   :  { %v2242_v25 = vshrl.u32 %v14859_v6, %v2230_v56  ;;  %v2245_v61 = vshrl.u32 %v14846_v59, %v2230_v56  ;;  %v8904_v18 = vadd.s32 4294967294, %v2077_v52  ;;  %vm1606_vm15 = vcmp.lt.f32.partialorder %v11238_v50, 0.0 }
 0x8cc   :  { %v2234_v30 = vor.u32 %v2233_v28, %v2232_v37  ;;  %v2237_v58 = vor.u32 %v2236_v2, %v2235_v24  ;;  %v9867_v23 = vpop.eup %9866  ;;  %v11524_v21 = vsel %vm11481_vm13, %v11130_v19, %v1888_v55  ;;  %v1773_v33 = vmul.f32 %v1765_v7, %v1613_v44 }
 0x8cd   :  { %v2243_v13 = vor.u32 %v2242_v25, %v2241_v3  ;;  %v2240_v1 = vor.u32 %v2239_v26, %v2238_v48  ;;  %v2244_v31 = vshll.u32 %v14859_v6, %v2229_v41  ;;  %v11527_v17 = vpop.eup %9868  ;;  %v1991_v34 = vsel %vm1908_vm14, %v1990_v8, %v1989_v29 }
 0x8ce   :  { %v1758_v47 = vmul.f32 %v9867_v23, %v1718_v60  ;;  %v2178_v52 = vsub.s32 0, %v11504_v46  ;;  %v2223_v28 = vor.u32 8388608, %v2222_v51  ;;  %v14860_v2 = vand.u32 2147483647, %v11145_v32 }
 0x8cf   :  { %v14861_v37 = vmov 0  ;;  %v2246_v55 = vor.u32 %v2245_v61, %v2244_v31  ;;  %vm2247_vm1 = vcmp.lt.s32.totalorder %v2228_v22, 1  ;;  %vm2250_vm6 = vcmp.lt.s32.totalorder %v2228_v22, 4 }
 0x8d0   :  { %vm11534_vm0 = vcmp.le.f32.partialorder %v14860_v2, 0.7853982  ;;  %v11539_v41 = vmul.f32 0.70710677, %v11519_v57  ;;  %vm8905_vm7 = vcmp.lt.s32.totalorder %v8904_v18, 0  ;;  %vm2249_vm8 = vcmp.lt.s32.totalorder %v2228_v22, 3 }
 0x8d1   :  { %v14862_v37 = vsel %vm11534_vm0, 4294967295, %v14861_v37  ;;  %v2255_v29 = vsel %vm2247_vm1, %v2234_v30, %v2237_v58  ;;  %v2256_v44 = vsel %vm2250_vm6, %v2243_v13, 920167782  ;;  %v1655_v7 = vmul.f32 1.0614054, %v11527_v17 }
 0x8d2   :  { %14863 = vst [vmem:[#allocation42_spill] sm:$0xff] %v14862_v37  ;;  %vm2248_vm10 = vcmp.lt.s32.totalorder %v2228_v22, 2  ;;  %v2252_v8 = vsel %vm2250_vm6, %v2240_v1, 2102212464  ;;  %v2257_v60 = vsel %vm2249_vm8, %v2240_v1, %v2256_v44  ;;  %v1766_v51 = vsub.f32 1.0, %v1758_v47 }
 0x8d3   :  { %v8907_v26 = vmin.u32 %v2178_v52, %v11504_v46  ;;  %v2231_v24 = vshrl.u32 %v14847_v12, %v2230_v56  ;;  %v2258_v3 = vsel %vm2248_vm10, %v2255_v29, %v2257_v60  ;;  %v2259_v25 = vsel %vm2247_vm1, %v2237_v58, %v2240_v1 }
 0x8d4   :  { %v2260_v48 = vsel %vm2250_vm6, %v2246_v55, 1326507024  ;;  %v2263_v61 = vshll.u32 %v2223_v28, 8  ;;  %v11549_v23 = vand.u32 2147483647, %v11539_v41  ;;  %v11552_v31 = vsel %vm8905_vm7, 0, %v8904_v18 }
 0x8d5   :  { %v2251_v2 = vsel %vm2247_vm1, %v2231_v24, %v2234_v30  ;;  %v2253_v47 = vsel %vm2249_vm8, %v2237_v58, %v2252_v8  ;;  %v2261_v52 = vsel %vm2249_vm8, %v2243_v13, %v2260_v48  ;;  %v1663_v44 = vadd.f32 -1.4531521, %v1655_v7 }
 0x8d6   :  { %v2262_v56 = vsel %vm2248_vm10, %v2259_v25, %v2261_v52  ;;  %v11558_v29 = vmul.u32.u64.low %v2263_v61, %v2258_v3  ;;  %v11559_v60 = vmul.u32.u64.high %v2263_v61, %v2258_v3, %v11558_v29  ;;  %v2180_v1 = vclz %v8907_v26 }
 0x8d7   :  { %v11563_v28 = vmul.f32 0.5, %v11399_v63  ;;  %v11565_v55 = vmul.u32.u64.low %v2263_v61, %v2262_v56  ;;  %v11566_v18 = vmul.u32.u64.high %v2263_v61, %v2262_v56, %v11565_v55  ;;  %v2085_v30 = vsub.s32 4294967266, %v11552_v31 }
 0x8d8   :  { %v1614_v58 = vsel %vm1606_vm15, -1.0, %v14854_v49  ;;  %v2254_v13 = vsel %vm2248_vm10, %v2251_v2, %v2253_v47  ;;  %v1632_v7 = vmul.f32 0.3275911, %v11549_v23  ;;  %9870 = vcosq.f32 %v11524_v21 }
 0x8d9   :  { %v1994_v63 = vsel %vm11534_vm0, %v11145_v32, %v1991_v34  ;;  %v1781_v8 = vadd.f32 1.0, %v1773_v33  ;;  %v1774_v26 = vmul.f32 %v1766_v51, %v1614_v58  ;;  %v1671_v24 = vmul.f32 %v11527_v17, %v1663_v44  ;;  %v11589_v51 = vpop.f32.mrf.mxu0 }
 0x8da   :  { %v2273_v3 = vadd.s32 1, %v11559_v60  ;;  %v1640_v25 = vadd.f32 1.0, %v1632_v7  ;;  %v11580_v48 = vmul.f32 0.5, %v1574_v43  ;;  %v8908_v50 = vadd.s32 4294967294, %v2180_v1 }
 0x8db   :  { %v1727_v22 = vsub.f32 0.0, %v11432_v38  ;;  %v2270_v2 = vmul.u32 %v2263_v61, %v2254_v13  ;;  %vm2272_vm11 = vc.u32 %v11566_v18, %v11558_v29  ;;  %v2081_v47 = vsub.s32 32, %v11552_v31 }
 0x8dc   :  { %14864 = vst [vmem:[#allocation43_spill] sm:$0xff] %v11580_v48  ;;  %v2086_v52 = vadd.s32 127, %v2085_v30  ;;  %v2274_v33 = vsel %vm2272_vm11, %v2273_v3, %v11559_v60  ;;  %9872 = vrcp.f32 %v1640_v25  ;;  %v1782_v34 = vadd.f32 1.0, %v1774_v26 }
 0x8dd   :  { %9874 = vsinq.f32 %v11524_v21  ;;  %vm1607_vm12 = vcmp.lt.f32.partialorder %v11409_v9, 0.0  ;;  %v2275_v43 = vadd.s32 %v2274_v33, %v2270_v2  ;;  %v11592_v44 = vmul.f32 %v1781_v8, %v11491_v54 }
 0x8de   :  { %v2065_v61 = vadd.s32 %v11334_v39, %v11347_v4  ;;  %v1679_v56 = vadd.f32 1.4214138, %v1671_v24  ;;  %v2321_v1 = vand.u32 2139095040, %v11580_v48  ;;  %9876 = vcosq.f32 %v1994_v63 }
 0x8df   :  { %vm8909_vm15 = vcmp.lt.s32.totalorder %v8908_v50, 0  ;;  %v1735_v60 = vmul.f32 %v1727_v22, %v11432_v38  ;;  %v2276_v21 = vadd.s32 536870912, %v2275_v43  ;;  %v2087_v30 = vshll.u32 %v2086_v52, 23 }
 0x8e0   :  { %v2083_v55 = vshrl.u32 %v2065_v61, %v2081_v47  ;;  %v2322_v58 = vshrl.u32 %v2321_v1, 23  ;;  %v11599_v13 = vmul.f32 0.70710677, %v11589_v51  ;;  %9878 = vsinq.f32 %v1994_v63 }
 0x8e1   :  { %v2082_v54 = vshll.u32 %v11459_v53, %v11552_v31  ;;  %v11604_v39 = vmul.f32 %v1782_v34, %v11497_v40  ;;  %v11606_v4 = vshrl.u32 %v2276_v21, 30  ;;  %v2183_v7 = vsel %vm8909_vm15, 0, %v8908_v50 }
 0x8e2   :  { %v1687_v8 = vmul.f32 %v11527_v17, %v1679_v56  ;;  %v1728_v38 = vsub.f32 0.0, %v11549_v23  ;;  %v8914_v26 = vadd.s32 4294967169, %v2322_v58  ;;  %v2168_v24 = vadd.s32 %v11424_v5, %v11440_v10 }
 0x8e3   :  { %14865 = vst [vmem:[#allocation44_spill] sm:$0xff] %v11606_v4  ;;  %v11615_v63 = vsel %vm1607_vm12, -1.0, %v14854_v49  ;;  %v2278_v53 = vshll.u32 %v11606_v4, 30  ;;  %v11619_v40 = vand.u32 2147483647, %v11599_v13  ;;  %v2084_v31 = vor.u32 %v2083_v55, %v2082_v54 }
 0x8e4   :  { %v2088_v3 = vor.u32 4788187, %v2087_v30  ;;  %v1747_v25 = vmul.f32 1.442695, %v1735_v60  ;;  %v2328_v50 = vadd.s32 1, %v8914_v26  ;;  %v2184_v22 = vsub.s32 32, %v2183_v7 }
 0x8e5   :  { %v2188_v2 = vsub.s32 4294967266, %v2183_v7  ;;  %v11621_v47 = vsub.s32 %v2275_v43, %v2278_v53  ;;  %v1633_v5 = vmul.f32 0.3275911, %v11619_v40  ;;  %v11624_v10 = vpop.eup %9870  ;;  %v1695_v52 = vadd.f32 -0.28449672, %v1687_v8 }
 0x8e6   :  { %14866 = vst [vmem:[#allocation45_spill] sm:$0xff] %v11624_v10  ;;  %v1736_v33 = vmul.f32 %v1728_v38, %v11549_v23  ;;  %vm2329_vm1 = vcmp.gt.s32.totalorder %v2328_v50, 0  ;;  %v14738_v61 = vand.u32 2147483647, %v11580_v48  ;;  %v2089_v60 = vand.u32 2147483647, %v2088_v3 }
 0x8e7   :  { %v2281_v34 = vsub.s32 0, %v11621_v47  ;;  %v2330_v56 = vsel %vm2329_vm1, %v2328_v50, 0  ;;  %v1641_v1 = vadd.f32 1.0, %v1633_v5  ;;  %v2091_v43 = vcvt.s32.f32 %v2084_v31 }
 0x8e8   :  { %9880 = vpow2.f32 %v1747_v25  ;;  %v2332_v21 = vand.u32 31, %v2330_v56  ;;  %v2185_v30 = vshll.u32 %v11504_v46, %v2183_v7  ;;  %v2186_v58 = vshrl.u32 %v2168_v24, %v2184_v22 }
 0x8e9   :  { %v11631_v55 = vpop.eup %9872  ;;  %v11634_v54 = vadd.s32 127, %v2188_v2  ;;  %9882 = vrcp.f32 %v1641_v1  ;;  %v1703_v8 = vmul.f32 %v11527_v17, %v1695_v52  ;;  %v1749_v26 = vmul.f32 1.442695, %v1736_v33 }
 0x8ea   :  { %v11636_v23 = vpop.eup %9874  ;;  %v1656_v38 = vmul.f32 1.0614054, %v11631_v55  ;;  %v2333_v53 = vsub.s32 32, %v2332_v21  ;;  %v8911_v31 = vmin.u32 %v2281_v34, %v11621_v47  ;;  %v2325_v3 = vand.u32 8388607, %v14738_v61 }
 0x8eb   :  { %14867 = vst [vmem:[#allocation46_spill] sm:$0xff] %v11636_v23  ;;  %v11643_v25 = vshrl.u32 %v2330_v56, 5  ;;  %v2335_v46 = vshll.u32 %v14847_v12, %v2332_v21  ;;  %v11646_v7 = vpop.eup %9876  ;;  %v2338_v22 = vshll.u32 %v14848_v16, %v2332_v21  ;;  %v2341_v5 = vshll.u32 %v14845_v62, %v2332_v21 }
 0x8ec   :  { %14868 = vst [vmem:[#allocation47_spill] sm:$0xff] %v11646_v7  ;;  %v1664_v24 = vadd.f32 -1.4531521, %v1656_v38  ;;  %v2336_v50 = vshrl.u32 %v14848_v16, %v2333_v53  ;;  %v2339_v2 = vshrl.u32 %v14845_v62, %v2333_v53  ;;  %v2342_v52 = vshrl.u32 %v14849_v15, %v2333_v53 }
 0x8ed   :  { %v2344_v33 = vshll.u32 %v14849_v15, %v2332_v21  ;;  %v2345_v34 = vshrl.u32 %v14859_v6, %v2333_v53  ;;  %v11655_v56 = vpop.eup %9878  ;;  %v2348_v9 = vshrl.u32 %v14846_v59, %v2333_v53  ;;  %v11659_v4 = vmul.f32 %v2091_v43, %v2089_v60 }
 0x8ee   :  { %14869 = vst [vmem:[#allocation48_spill] sm:$0xff] %v11655_v56  ;;  %v1672_v1 = vmul.f32 %v11631_v55, %v1664_v24  ;;  %v2337_v61 = vor.u32 %v2336_v50, %v2335_v46  ;;  %v2340_v38 = vor.u32 %v2339_v2, %v2338_v22  ;;  %v2283_v48 = vclz %v8911_v31 }
 0x8ef   :  { %v2326_v27 = vor.u32 8388608, %v2325_v3  ;;  %v2346_v35 = vor.u32 %v2345_v34, %v2344_v33  ;;  %v11661_v7 = vor.u32 %v2186_v58, %v2185_v30  ;;  %v2343_v32 = vor.u32 %v2342_v52, %v2341_v5 }
 0x8f0   :  { %v1680_v37 = vadd.f32 1.4214138, %v1672_v1  ;;  %v2347_v10 = vshll.u32 %v14859_v6, %v2332_v21  ;;  %v2190_v23 = vshll.u32 %v11634_v54, 23  ;;  %v1711_v56 = vadd.f32 0.2548296, %v1703_v8 }
 0x8f1   :  { %9884 = vpow2.f32 %v1749_v26  ;;  %vm2350_vm6 = vcmp.lt.s32.totalorder %v11643_v25, 1  ;;  %vm2353_vm7 = vcmp.lt.s32.totalorder %v11643_v25, 4  ;;  %v8912_v43 = vadd.s32 4294967294, %v2283_v48 }
 0x8f2   :  { %v1688_v46 = vmul.f32 %v11631_v55, %v1680_v37  ;;  %v2349_v24 = vor.u32 %v2348_v9, %v2347_v10  ;;  %v2358_v60 = vsel %vm2350_vm6, %v2337_v61, %v2340_v38  ;;  %vm2352_vm8 = vcmp.lt.s32.totalorder %v11643_v25, 3  ;;  %v1580_v10 = vpop.f32.mrf.mxu0 }
 0x8f3   :  { %v2359_v21 = vsel %vm2353_vm7, %v2346_v35, 920167782  ;;  %v2366_v30 = vshll.u32 %v2326_v27, 8  ;;  %vm2351_vm10 = vcmp.lt.s32.totalorder %v11643_v25, 2  ;;  %v2355_v54 = vsel %vm2353_vm7, %v2343_v32, 2102212464 }
 0x8f4   :  { %v1696_v58 = vadd.f32 -0.28449672, %v1688_v46  ;;  %v2360_v37 = vsel %vm2352_vm8, %v2343_v32, %v2359_v21  ;;  %v1719_v8 = vmul.f32 %v11527_v17, %v1711_v56  ;;  %v2334_v48 = vshrl.u32 %v14847_v12, %v2333_v53 }
 0x8f5   :  { %v9881_v9 = vpop.eup %9880  ;;  %v2361_v26 = vsel %vm2351_vm10, %v2358_v60, %v2360_v37  ;;  %v2362_v27 = vsel %vm2350_vm6, %v2340_v38, %v2343_v32  ;;  %v2363_v50 = vsel %vm2353_vm7, %v2349_v24, 1326507024  ;;  %vm2011_vm11 = vcmp.lt.s32.totalorder %v11229_v20, 0 }
 0x8f6   :  { %v11684_v31 = vpop.eup %9882  ;;  %v1704_v3 = vmul.f32 %v11631_v55, %v1696_v58  ;;  %v11689_v22 = vmul.u32.u64.low %v2366_v30, %v2361_v26  ;;  %v11690_v2 = vmul.u32.u64.high %v2366_v30, %v2361_v26, %v11689_v22  ;;  %v2354_v17 = vsel %vm2350_vm6, %v2334_v48, %v2337_v61 }
 0x8f7   :  { %v2356_v53 = vsel %vm2352_vm8, %v2340_v38, %v2355_v54  ;;  %v2364_v32 = vsel %vm2352_vm8, %v2346_v35, %v2363_v50  ;;  %v11700_v5 = vmul.f32 0.5, %v1580_v10  ;;  %vm8913_vm12 = vcmp.lt.s32.totalorder %v8912_v43, 0 }
 0x8f8   :  { %v1712_v52 = vadd.f32 0.2548296, %v1704_v3  ;;  %v2365_v33 = vsel %vm2351_vm10, %v2362_v27, %v2364_v32  ;;  %v1657_v34 = vmul.f32 1.0614054, %v11684_v31  ;;  %v2191_v56 = vor.u32 4788187, %v2190_v23  ;;  %v11727_v3 = vpop.f32.mrf.mxu0 }
 0x8f9   :  { %14870 = vst [vmem:[#allocation49_spill] sm:$0xff] %v11700_v5  ;;  %v1759_v1 = vmul.f32 %v9881_v9, %v1719_v8  ;;  %v11705_v46 = vmul.u32.u64.low %v2366_v30, %v2365_v33  ;;  %v11706_v24 = vmul.u32.u64.high %v2366_v30, %v2365_v33, %v11705_v46  ;;  %v11709_v61 = vmul.f32 0.5, %v11519_v57 }
 0x8fa   :  { %v2357_v35 = vsel %vm2351_vm10, %v2354_v17, %v2356_v53  ;;  %v2376_v38 = vadd.s32 1, %v11690_v2  ;;  %v1665_v60 = vadd.f32 -1.4531521, %v1657_v34  ;;  %v11714_v21 = vsel %vm8913_vm12, 0, %v8912_v43 }
 0x8fb   :  { %vm1608_vm15 = vcmp.lt.f32.partialorder %v11539_v41, 0.0  ;;  %v1720_v58 = vmul.f32 %v11631_v55, %v1712_v52  ;;  %v1729_v23 = vsub.f32 0.0, %v11619_v40  ;;  %v2093_v54 = vxor.u32 2147483648, %v11659_v4 }
 0x8fc   :  { %v2194_v37 = vcvt.s32.f32 %v11661_v7  ;;  %v1673_v57 = vmul.f32 %v11684_v31, %v1665_v60  ;;  %v2424_v25 = vand.u32 2139095040, %v11700_v5  ;;  %v2192_v10 = vand.u32 2147483647, %v2191_v56 }
 0x8fd   :  { %v1767_v9 = vsub.f32 1.0, %v1759_v1  ;;  %v2373_v8 = vmul.u32 %v2366_v30, %v2357_v35  ;;  %vm2375_vm1 = vc.u32 %v11706_v24, %v11689_v22  ;;  %v2291_v48 = vsub.s32 4294967266, %v11714_v21 }
 0x8fe   :  { %v9885_v43 = vpop.eup %9884  ;;  %v2377_v55 = vsel %vm2375_vm1, %v2376_v38, %v11690_v2  ;;  %v1681_v26 = vadd.f32 1.4214138, %v1673_v57  ;;  %v2425_v27 = vshrl.u32 %v2424_v25, 23  ;;  %v1737_v17 = vmul.f32 %v1729_v23, %v11619_v40 }
 0x8ff   :  { %v1760_v7 = vmul.f32 %v9885_v43, %v1720_v58  ;;  %v2378_v50 = vadd.s32 %v2377_v55, %v2373_v8  ;;  %v14754_v53 = vand.u32 2147483647, %v11700_v5  ;;  %v11734_v30 = vsel %vm2011_vm11, %v2093_v54, %v11659_v4 }
 0x900   :  { %v1616_v32 = vsel %vm1608_vm15, -1.0, %v14854_v49  ;;  %v1689_v2 = vmul.f32 %v11684_v31, %v1681_v26  ;;  %v8918_v52 = vadd.s32 4294967169, %v2425_v27  ;;  %v11740_v33 = vmul.f32 %v2194_v37, %v2192_v10 }
 0x901   :  { %v1775_v34 = vmul.f32 %v1767_v9, %v11615_v63  ;;  %v2379_v56 = vadd.s32 536870912, %v2378_v50  ;;  %v11744_v40 = vmul.f32 0.70710677, %v11727_v3  ;;  %v2287_v1 = vsub.s32 32, %v11714_v21 }
 0x902   :  { %v2292_v46 = vadd.s32 127, %v2291_v48  ;;  %v1697_v4 = vadd.f32 -0.28449672, %v1689_v2  ;;  %v2431_v35 = vadd.s32 1, %v8918_v52  ;;  %v1768_v38 = vsub.f32 1.0, %v1760_v7 }
 0x903   :  { %v11747_v60 = vshrl.u32 %v2379_v56, 30  ;;  %v1751_v41 = vmul.f32 1.442695, %v1737_v17  ;;  %v2428_v58 = vand.u32 8388607, %v14754_v53  ;;  %v2271_v23 = vadd.s32 %v11558_v29, %v11566_v18 }
 0x904   :  { %v1705_v63 = vmul.f32 %v11684_v31, %v1697_v4  ;;  %vm2432_vm6 = vcmp.gt.s32.totalorder %v2431_v35, 0  ;;  %v11755_v54 = vand.u32 2147483647, %v11744_v40  ;;  %v11758_v57 = vadd.f32 1.0, %v1775_v34 }
 0x905   :  { %14871 = vst [vmem:[#allocation50_spill] sm:$0xff] %v11747_v60  ;;  %v2381_v25 = vshll.u32 %v11747_v60, 30  ;;  %v2433_v10 = vsel %vm2432_vm6, %v2431_v35, 0  ;;  %v2288_v9 = vshll.u32 %v11621_v47, %v11714_v21  ;;  %v2289_v8 = vshrl.u32 %v2271_v23, %v2287_v1 }
 0x906   :  { %v2293_v43 = vshll.u32 %v2292_v46, 23  ;;  %v2435_v48 = vand.u32 31, %v2433_v10  ;;  %v1776_v29 = vmul.f32 %v1768_v38, %v1616_v32  ;;  %9886 = vpow2.f32 %v1751_v41 }
 0x907   :  { %v11763_v18 = vsub.s32 %v2378_v50, %v2381_v25  ;;  %v2429_v55 = vor.u32 8388608, %v2428_v58  ;;  %v1713_v26 = vadd.f32 0.2548296, %v1705_v63  ;;  %v2434_v27 = vshrl.u32 %v2433_v10, 5 }
 0x908   :  { %v2436_v7 = vsub.s32 32, %v2435_v48  ;;  %v1634_v17 = vmul.f32 0.3275911, %v11755_v54  ;;  %v2438_v52 = vshll.u32 %v14847_v12, %v2435_v48  ;;  %v2441_v34 = vshll.u32 %v14848_v16, %v2435_v48 }
 0x909   :  { %v2384_v2 = vsub.s32 0, %v11763_v18  ;;  %v2444_v47 = vshll.u32 %v14845_v62, %v2435_v48  ;;  %v2447_v32 = vshll.u32 %v14849_v15, %v2435_v48  ;;  %v2450_v56 = vshll.u32 %v14859_v6, %v2435_v48 }
 0x90a   :  { %v2439_v21 = vshrl.u32 %v14848_v16, %v2436_v7  ;;  %v2442_v50 = vshrl.u32 %v14845_v62, %v2436_v7  ;;  %v2445_v46 = vshrl.u32 %v14849_v15, %v2436_v7  ;;  %v2448_v4 = vshrl.u32 %v14859_v6, %v2436_v7 }
 0x90b   :  { %v8915_v1 = vmin.u32 %v2384_v2, %v11763_v18  ;;  %v2451_v35 = vshrl.u32 %v14846_v59, %v2436_v7  ;;  %v2290_v38 = vor.u32 %v2289_v8, %v2288_v9  ;;  %v2294_v41 = vor.u32 4788187, %v2293_v43 }
 0x90c   :  { %v2440_v58 = vor.u32 %v2439_v21, %v2438_v52  ;;  %v2443_v23 = vor.u32 %v2442_v50, %v2441_v34  ;;  %v2446_v25 = vor.u32 %v2445_v46, %v2444_v47  ;;  %v2449_v10 = vor.u32 %v2448_v4, %v2447_v32  ;;  %v1584_v52 = vpop.f32.mrf.mxu0 }
 0x90d   :  { %v2386_v63 = vclz %v8915_v1  ;;  %v2452_v53 = vor.u32 %v2451_v35, %v2450_v56  ;;  %v14872_v37 = vand.u32 2147483647, %v11229_v20  ;;  %v1784_v2 = vadd.f32 1.0, %v1776_v29 }
 0x90e   :  { %vm2453_vm8 = vcmp.lt.s32.totalorder %v2434_v27, 1  ;;  %v2469_v5 = vshll.u32 %v2429_v55, 8  ;;  %v1642_v60 = vadd.f32 1.0, %v1634_v17  ;;  %vm2114_vm10 = vcmp.lt.s32.totalorder %v11259_v36, 0 }
 0x90f   :  { %vm11780_vm7 = vcmp.le.f32.partialorder %v14872_v37, 0.7853982  ;;  %v8916_v9 = vadd.s32 4294967294, %v2386_v63  ;;  %v1721_v8 = vmul.f32 %v11684_v31, %v1713_v26  ;;  %vm2456_vm12 = vcmp.lt.s32.totalorder %v2434_v27, 4 }
 0x910   :  { %v2461_v43 = vsel %vm2453_vm8, %v2440_v58, %v2443_v23  ;;  %vm2455_vm15 = vcmp.lt.s32.totalorder %v2434_v27, 3  ;;  %v2458_v34 = vsel %vm2456_vm12, %v2446_v25, 2102212464  ;;  %v2462_v47 = vsel %vm2456_vm12, %v2449_v10, 920167782 }
 0x911   :  { %v2465_v37 = vsel %vm2453_vm8, %v2443_v23, %v2446_v25  ;;  %v2437_v21 = vshrl.u32 %v14847_v12, %v2436_v7  ;;  %vm2454_vm1 = vcmp.lt.s32.totalorder %v2434_v27, 2  ;;  %v2463_v29 = vsel %vm2455_vm15, %v2446_v25, %v2462_v47 }
 0x912   :  { %v2466_v55 = vsel %vm2456_vm12, %v2452_v53, 1326507024  ;;  %v1792_v17 = vmul.f32 %v1784_v2, %v11709_v61  ;;  %v2464_v50 = vsel %vm2454_vm1, %v2461_v43, %v2463_v29  ;;  %v11791_v31 = vmul.f32 0.5, %v1584_v52 }
 0x913   :  { %v2467_v32 = vsel %vm2455_vm15, %v2449_v10, %v2466_v55  ;;  %v14875_v26 = vand.u32 2147483647, %v11259_v36  ;;  %vm8917_vm2 = vcmp.lt.s32.totalorder %v8916_v9, 0  ;;  %v2457_v1 = vsel %vm2453_vm8, %v2437_v21, %v2440_v58  ;;  %v9887_v53 = vpop.eup %9886 }
 0x914   :  { %v2459_v7 = vsel %vm2455_vm15, %v2443_v23, %v2458_v34  ;;  %v2468_v46 = vsel %vm2454_vm1, %v2465_v37, %v2467_v32  ;;  %v11804_v35 = vmul.u32.u64.low %v2469_v5, %v2464_v50  ;;  %v11805_v63 = vmul.u32.u64.high %v2469_v5, %v2464_v50, %v11804_v35 }
 0x915   :  { %vm11795_vm6 = vcmp.le.f32.partialorder %v14875_v26, 0.7853982  ;;  %v11801_v4 = vmul.u32.u64.low %v2469_v5, %v2468_v46  ;;  %v11802_v61 = vmul.u32.u64.high %v2469_v5, %v2468_v46, %v11801_v4  ;;  %v1791_v25 = vmul.f32 %v11758_v57, %v11563_v28 }
 0x916   :  { %v2295_v10 = vand.u32 2147483647, %v2294_v41  ;;  %v1761_v2 = vmul.f32 %v9887_v53, %v1721_v8  ;;  %9888 = vrcp.f32 %v1642_v60  ;;  %v2460_v43 = vsel %vm2454_vm1, %v2457_v1, %v2459_v7 }
 0x917   :  { %v1730_v58 = vsub.f32 0.0, %v11755_v54  ;;  %v2527_v23 = vand.u32 2139095040, %v11791_v31  ;;  %v4145_v52 = vpack.c.bf16 %v11514_v0, %v11488_v45  ;;  %v2097_v34 = vsel %vm11780_vm7, %v11229_v20, %v11734_v30 }
 0x918   :  { %v2297_v47 = vcvt.s32.f32 %v2290_v38  ;;  %v2389_v28 = vsel %vm8917_vm2, 0, %v8916_v9  ;;  %v4147_v57 = vpack.c.bf16 %v1792_v17, %v1791_v25  ;;  %v14878_v60 = vxor.u32 2147483648, %v11740_v33 }
 0x919   :  { %vm2217_vm8 = vcmp.lt.s32.totalorder %v11421_v14, 0  ;;  %vm1609_vm12 = vcmp.lt.f32.partialorder %v11599_v13, 0.0  ;;  %vm2478_vm15 = vc.u32 %v11802_v61, %v11804_v35  ;;  %v2479_v45 = vadd.s32 1, %v11805_v63  ;;  %9357 = vmatprep.mubr.bf16.mxu0 %v4145_v52 }
 0x91a   :  { %v2197_v27 = vsel %vm2114_vm10, %v14878_v60, %v11740_v33  ;;  %v2298_v0 = vmul.f32 %v2297_v47, %v2295_v10  ;;  %v1769_v30 = vsub.f32 1.0, %v1761_v2  ;;  %v2476_v38 = vmul.u32 %v2469_v5, %v2460_v43  ;;  %v14880_v47 = vld [vmem:[#allocation46_spill] sm:$0xff] }
 0x91b   :  { %v2528_v41 = vshrl.u32 %v2527_v23, 23  ;;  %v14879_v9 = vpack.c.bf16 %v11604_v39, %v11592_v44  ;;  %v2390_v8 = vsub.s32 32, %v2389_v28  ;;  %v2480_v33 = vsel %vm2478_vm15, %v2479_v45, %v11805_v63 }
 0x91c   :  { %v1738_v37 = vmul.f32 %v1730_v58, %v11755_v54  ;;  %v1889_v21 = vsub.s32 4, %v11189_v11  ;;  %9890 = vcosq.f32 %v2097_v34  ;;  %v2481_v29 = vadd.s32 %v2480_v33, %v2476_v38 }
 0x91d   :  { %9358 = vmatmul.mubr.bf16.vlgmr.msra.gmra.mxu0 %v14879_v9  ;;  %v2524_v55 = vand.u32 2147483647, %v11791_v31  ;;  %v8922_v17 = vadd.s32 4294967169, %v2528_v41  ;;  %9892 = vsinq.f32 %v2097_v34  ;;  %v2200_v5 = vsel %vm11795_vm6, %v11259_v36, %v2197_v27 }
 0x91e   :  { %9361 = vmatprep.mubr.bf16.mxu0 %v4147_v57  ;;  %v2374_v44 = vadd.s32 %v11689_v22, %v11706_v24  ;;  %v1617_v39 = vsel %vm1609_vm12, -1.0, %v14854_v49  ;;  %v2299_v54 = vxor.u32 2147483648, %v2298_v0  ;;  %v2482_v32 = vadd.s32 536870912, %v2481_v29 }
 0x91f   :  { %v1777_v50 = vmul.f32 %v1769_v30, %v1617_v39  ;;  %v2534_v26 = vadd.s32 1, %v8922_v17  ;;  %v2394_v7 = vsub.s32 4294967266, %v2389_v28  ;;  %v1753_v46 = vmul.f32 1.442695, %v1738_v37 }
 0x920   :  { %v2392_v1 = vshrl.u32 %v2374_v44, %v2390_v8  ;;  %v1890_v53 = vsel %vm1805_vm9, %v1889_v21, %v11189_v11  ;;  %9894 = vcosq.f32 %v2200_v5  ;;  %v11849_v4 = vmul.f32 0.5, %v11589_v51 }
 0x921   :  { %v2531_v22 = vand.u32 8388607, %v2524_v55  ;;  %vm2535_vm2 = vcmp.gt.s32.totalorder %v2534_v26, 0  ;;  %9896 = vsinq.f32 %v2200_v5  ;;  %v2391_v13 = vshll.u32 %v11763_v18, %v2389_v28 }
 0x922   :  { %v11854_v24 = vshrl.u32 %v2482_v32, 30  ;;  %v2536_v63 = vsel %vm2535_vm2, %v2534_v26, 0  ;;  %v11858_v25 = vsel %vm2217_vm8, %v2299_v54, %v2298_v0  ;;  %v11861_v11 = vmul.f32 0.5, %v11727_v3 }
 0x923   :  { %v2538_v10 = vand.u32 31, %v2536_v63  ;;  %v1892_v51 = vsel %vm11481_vm13, 0, %v1890_v53  ;;  %v11865_v2 = vpop.eup %9888  ;;  %v11867_v43 = vor.u32 %v2392_v1, %v2391_v13  ;;  %v11869_v58 = vadd.s32 127, %v2394_v7  ;;  %v14881_v1 = vld [vmem:[#allocation45_spill] sm:$0xff]  ;;  %v14882_v53 = vld [vmem:[#allocation39_spill] sm:$0xff] }
 0x924   :  { %v11871_v18 = vadd.f32 1.0, %v1777_v50  ;;  %9898 = vpow2.f32 %v1753_v46  ;;  %v1658_v23 = vmul.f32 1.0614054, %v11865_v2  ;;  %v2532_v52 = vor.u32 8388608, %v2531_v22 }
 0x925   :  { %v2539_v34 = vsub.s32 32, %v2538_v10  ;;  %v1899_v3 = vxor.u32 2147483648, %v14880_v47  ;;  %v2484_v28 = vshll.u32 %v11854_v24, 30  ;;  %v11876_v57 = vshrl.u32 %v2536_v63, 5 }
 0x926   :  { %v2541_v42 = vshll.u32 %v14847_v12, %v2538_v10  ;;  %v2720_v60 = vadd.s32 3, %v1892_v51  ;;  %v1666_v27 = vadd.f32 -1.4531521, %v1658_v23  ;;  %v2544_v0 = vshll.u32 %v14848_v16, %v2538_v10 }
 0x927   :  { %v2542_v45 = vshrl.u32 %v14848_v16, %v2539_v34  ;;  %v2547_v30 = vshll.u32 %v14845_v62, %v2538_v10  ;;  %v2545_v38 = vshrl.u32 %v14845_v62, %v2539_v34  ;;  %v2548_v41 = vshrl.u32 %v14849_v15, %v2539_v34 }
 0x928   :  { %v2550_v9 = vshll.u32 %v14849_v15, %v2538_v10  ;;  %v2551_v8 = vshrl.u32 %v14859_v6, %v2539_v34  ;;  %v1674_v33 = vmul.f32 %v11865_v2, %v1666_v27  ;;  %v2553_v21 = vshll.u32 %v14859_v6, %v2538_v10 }
 0x929   :  { %v2543_v37 = vor.u32 %v2542_v45, %v2541_v42  ;;  %v11888_v17 = vshll.u32 %v2532_v52, 8  ;;  %v11890_v5 = vpop.eup %9890  ;;  %v2546_v44 = vor.u32 %v2545_v38, %v2544_v0  ;;  %v2549_v39 = vor.u32 %v2548_v41, %v2547_v30 }
 0x92a   :  { %v2552_v54 = vor.u32 %v2551_v8, %v2550_v9  ;;  %v2554_v50 = vshrl.u32 %v14846_v59, %v2539_v34  ;;  %v11893_v32 = vpop.eup %9892  ;;  %v1682_v26 = vadd.f32 1.4214138, %v1674_v33  ;;  %v1902_v7 = vxor.u32 2147483648, %v14881_v1 }
 0x92b   :  { %v1896_v46 = vand.u32 3, %v1892_v51  ;;  %v1992_v22 = vsub.s32 4, %v14882_v53  ;;  %v11897_v13 = vsub.s32 %v2481_v29, %v2484_v28  ;;  %vm2556_vm9 = vcmp.lt.s32.totalorder %v11876_v57, 1 }
 0x92c   :  { %v2555_v63 = vor.u32 %v2554_v50, %v2553_v21  ;;  %v2721_v10 = vand.u32 3, %v2720_v60  ;;  %v1690_v23 = vmul.f32 %v11865_v2, %v1682_v26  ;;  %vm2558_vm13 = vcmp.lt.s32.totalorder %v11876_v57, 3 }
 0x92d   :  { %vm2559_vm1 = vcmp.lt.s32.totalorder %v11876_v57, 4  ;;  %v2564_v52 = vsel %vm2556_vm9, %v2543_v37, %v2546_v44  ;;  %v11905_v42 = vpop.eup %9894  ;;  %v2540_v51 = vshrl.u32 %v14847_v12, %v2539_v34  ;;  %vm1610_vm12 = vcmp.lt.f32.partialorder %v11744_v40, 0.0 }
 0x92e   :  { %v2561_v27 = vsel %vm2559_vm1, %v2549_v39, 2102212464  ;;  %v2565_v29 = vsel %vm2559_vm1, %v2552_v54, 920167782  ;;  %v2569_v28 = vsel %vm2559_vm1, %v2555_v63, 1326507024  ;;  %v11908_v45 = vpop.eup %9896  ;;  %v2568_v30 = vsel %vm2556_vm9, %v2546_v44, %v2549_v39 }
 0x92f   :  { %v1698_v60 = vadd.f32 -0.28449672, %v1690_v23  ;;  %vm2557_vm15 = vcmp.lt.s32.totalorder %v11876_v57, 2  ;;  %v2566_v0 = vsel %vm2558_vm13, %v2549_v39, %v2565_v29  ;;  %v2570_v34 = vsel %vm2558_vm13, %v2552_v54, %v2569_v28 }
 0x930   :  { %v2567_v38 = vsel %vm2557_vm15, %v2564_v52, %v2566_v0  ;;  %vm2723_vm2 = vcmp.eq.s32.totalorder %v2721_v10, 0  ;;  %vm2726_vm1 = vcmp.eq.s32.totalorder %v2721_v10, 2  ;;  %v2487_v9 = vsub.s32 0, %v11897_v13 }
 0x931   :  { %v9899_v41 = vpop.eup %9898  ;;  %v1706_v8 = vmul.f32 %v11865_v2, %v1698_v60  ;;  %v2560_v33 = vsel %vm2556_vm9, %v2540_v51, %v2543_v37  ;;  %v2562_v21 = vsel %vm2558_vm13, %v2546_v44, %v2561_v27  ;;  %v2571_v39 = vsel %vm2557_vm15, %v2568_v30, %v2570_v34 }
 0x932   :  { %v11929_v50 = vmul.u32.u64.low %v11888_v17, %v2567_v38  ;;  %v11930_v26 = vmul.u32.u64.high %v11888_v17, %v2567_v38, %v11929_v50  ;;  %v2725_v54 = vsel %vm2723_vm2, %v14881_v1, %v1899_v3  ;;  %vm2722_vm4 = vcmp.lt.s32.totalorder %v2721_v10, 2 }
 0x933   :  { %v1714_v63 = vadd.f32 0.2548296, %v1706_v8  ;;  %v2728_v37 = vsel %vm2726_vm1, %v1902_v7, %v14880_v47  ;;  %v11939_v44 = vmul.u32.u64.low %v11888_v17, %v2571_v39  ;;  %v11940_v23 = vmul.u32.u64.high %v11888_v17, %v2571_v39, %v11939_v44 }
 0x934   :  { %v2729_v52 = vsel %vm2722_vm4, %v2725_v54, %v2728_v37  ;;  %vm1898_vm9 = vcmp.eq.s32.totalorder %v1896_v46, 0  ;;  %v2563_v27 = vsel %vm2557_vm15, %v2560_v33, %v2562_v21  ;;  %v8919_v28 = vmin.u32 %v2487_v9, %v11897_v13  ;;  %v14886_v54 = vld [vmem:[#allocation47_spill] sm:$0xff] }
 0x935   :  { %v1722_v51 = vmul.f32 %v11865_v2, %v1714_v63  ;;  %v11947_v29 = vsel %vm1895_vm5, nan, %v2729_v52  ;;  %v1900_v10 = vsel %vm1898_vm9, %v14881_v1, %v1899_v3  ;;  %v2582_v60 = vadd.s32 1, %v11930_v26  ;;  %v14883_v2 = vld [vmem:[#allocation38_spill] sm:$0xff] }
 0x936   :  { %3517 = vperm.xlu1 %9576, %v11947_v29   ;;  %vm1901_vm4 = vcmp.eq.s32.totalorder %v1896_v46, 2  ;;  %v1993_v57 = vsel %vm1908_vm14, %v1992_v22, %v14882_v53  ;;  %vm1897_vm13 = vcmp.lt.s32.totalorder %v1896_v46, 2  ;;  %v2579_v38 = vmul.u32 %v11888_v17, %v2563_v27 }
 0x937   :  { %v1762_v0 = vmul.f32 %v9899_v41, %v1722_v51  ;;  %v1903_v30 = vsel %vm1901_vm4, %v1902_v7, %v14880_v47  ;;  %vm2581_vm15 = vc.u32 %v11940_v23, %v11929_v50  ;;  %v1995_v34 = vsel %vm11534_vm0, 0, %v1993_v57  ;;  %v14885_v41 = vld [vmem:[#allocation48_spill] sm:$0xff] }
 0x938   :  { %v1904_v3 = vsel %vm1897_vm13, %v1900_v10, %v1903_v30  ;;  %v2396_v9 = vshll.u32 %v11869_v58, 23  ;;  %v2583_v33 = vsel %vm2581_vm15, %v2582_v60, %v11930_v26  ;;  %v2489_v46 = vclz %v8919_v28  ;;  %v14887_v28 = vld [vmem:[#allocation40_spill] sm:$0xff] }
 0x939   :  { %v1770_v8 = vsub.f32 1.0, %v1762_v0  ;;  %v11968_v53 = vsel %vm1895_vm5, nan, %v1904_v3  ;;  %v1618_v47 = vsel %vm1610_vm12, -1.0, %v14854_v49  ;;  %v2584_v17 = vadd.s32 %v2583_v33, %v2579_v38 }
 0x93a   :  { %3462 = vperm.xlu0 %9575, %v11968_v53   ;;  %v14766_v7 = vmov 1   ;;  %v2824_v22 = vadd.s32 3, %v1995_v34  ;;  %v2002_v21 = vxor.u32 2147483648, %v14885_v41  ;;  %v1999_v19 = vand.u32 3, %v1995_v34 }
 0x93b   :  { %9577 = vset.pattern.permute.xlu1 %v14766_v7  ;;  %v1778_v58 = vmul.f32 %v1770_v8, %v1618_v47  ;;  %v1793_v39 = vmul.f32 %v11871_v18, %v11849_v4  ;;  %v2585_v26 = vadd.s32 536870912, %v2584_v17  ;;  %v2005_v40 = vxor.u32 2147483648, %v14886_v54  ;;  %v14891_v47 = vld [vmem:[#allocation41_spill] sm:$0xff] }
 0x93c   :  { %3580 = vperm.xlu1 %9577, %v11968_v53   ;;  %v2825_v63 = vand.u32 3, %v2824_v22  ;;  %v11980_v37 = vor.u32 4788187, %v2396_v9  ;;  %v2400_v44 = vcvt.s32.f32 %v11867_v43  ;;  %vm1998_vm5 = vweird.f32 %v14883_v2 }
 0x93d   :  { %v1786_v52 = vadd.f32 1.0, %v1778_v58  ;;  %v8920_v51 = vadd.s32 4294967294, %v2489_v46  ;;  %v11984_v27 = vshrl.u32 %v2585_v26, 30  ;;  %v14764_v10 = vmov 2  }
 0x93e   :  { %9578 = vset.pattern.permute.xlu0 %v14764_v10  ;;  %vm2827_vm14 = vcmp.eq.s32.totalorder %v2825_v63, 0  ;;  %v2095_v4 = vsub.s32 4, %v14887_v28  ;;  %vm2830_vm0 = vcmp.eq.s32.totalorder %v2825_v63, 2  ;;  %vm2001_vm12 = vcmp.eq.s32.totalorder %v1999_v19, 0 }
 0x93f   :  { %v1794_v18 = vmul.f32 %v1786_v52, %v11861_v11  ;;  %3692 = vperm.xlu0 %9578, %v11968_v53   ;;  %v2829_v60 = vsel %vm2827_vm14, %v14886_v54, %v2002_v21  ;;  %v2587_v57 = vshll.u32 %v11984_v27, 30  ;;  %vm2826_vm2 = vcmp.lt.s32.totalorder %v2825_v63, 2 }
 0x940   :  { %3628 = vperm.xlu1 %9577, %v11947_v29   ;;  %v2832_v0 = vsel %vm2830_vm0, %v2005_v40, %v14885_v41  ;;  %vm2004_vm1 = vcmp.eq.s32.totalorder %v1999_v19, 2  ;;  %v2003_v3 = vsel %vm2001_vm12, %v14886_v54, %v2002_v21  ;;  %v14888_v1 = vand.u32 2147483647, %v11421_v14 }
 0x941   :  { %v4148_v30 = vpack.c.bf16 %v1794_v18, %v1793_v39  ;;  %v2833_v38 = vsel %vm2826_vm2, %v2829_v60, %v2832_v0  ;;  %v2006_v11 = vsel %vm2004_vm1, %v2005_v40, %v14885_v41  ;;  %vm8921_vm4 = vcmp.lt.s32.totalorder %v8920_v51, 0 }
 0x942   :  { %vm11998_vm9 = vcmp.le.f32.partialorder %v14888_v1, 0.7853982  ;;  %v12002_v9 = vsub.s32 %v2584_v17, %v2587_v57  ;;  %v12006_v8 = vsel %vm1998_vm5, nan, %v2833_v38  ;;  %vm2000_vm13 = vcmp.lt.s32.totalorder %v1999_v19, 2 }
 0x943   :  { %9362 = vmatmul.mubr.bf16.gmra.mxu0 %v4148_v30  ;;  %3744 = vperm.xlu0 %9578, %v12006_v8   ;;  %v2096_v33 = vsel %vm2011_vm11, %v2095_v4, %v14887_v28  ;;  %v2105_v46 = vxor.u32 2147483648, %v11893_v32  ;;  %v2198_v22 = vsub.s32 4, %v14891_v47  ;;  %v2007_v17 = vsel %vm2000_vm13, %v2003_v3, %v2006_v11 }
 0x944   :  { %v2590_v58 = vsub.s32 0, %v12002_v9  ;;  %9579 = vset.pattern.permute.xlu1 %v14764_v10  ;;  %v2098_v41 = vsel %vm11780_vm7, 0, %v2096_v33  ;;  %v2108_v21 = vxor.u32 2147483648, %v11890_v5  ;;  %v2398_v19 = vand.u32 2147483647, %v11980_v37 }
 0x945   :  { %3740 = vperm.xlu1 %9579, %v11947_v29   ;;  %v2102_v39 = vand.u32 3, %v2098_v41  ;;  %v2928_v26 = vadd.s32 3, %v2098_v41  ;;  %v2199_v54 = vsel %vm2114_vm10, %v2198_v22, %v14891_v47  ;;  %v12025_v40 = vsel %vm8921_vm4, 0, %v8920_v51  ;;  %v14893_v41 = vld [vmem:[#allocation43_spill] sm:$0xff] }
 0x946   :  { %v8923_v63 = vmin.u32 %v2590_v58, %v12002_v9  ;;  %vm2101_vm11 = vweird.f32 %v11229_v20  ;;  %v2201_v48 = vsel %vm11795_vm6, 0, %v2199_v54  ;;  %v14762_v52 = vmov 3  }
 0x947   :  { %9584 = vset.pattern.permute.xlu0 %v14762_v52  ;;  %v12034_v37 = vsel %vm1998_vm5, nan, %v2007_v17  ;;  %vm2104_vm7 = vcmp.eq.s32.totalorder %v2102_v39, 0  ;;  %vm2107_vm15 = vcmp.eq.s32.totalorder %v2102_v39, 2  ;;  %v2929_v28 = vand.u32 3, %v2928_v26 }
 0x948   :  { %v2592_v4 = vclz %v8923_v63  ;;  %3808 = vperm.xlu0 %9584, %v12034_v37   ;;  %vm2103_vm10 = vcmp.lt.s32.totalorder %v2102_v39, 2  ;;  %v2106_v51 = vsel %vm2104_vm7, %v11890_v5, %v2105_v46  ;;  %v2109_v18 = vsel %vm2107_vm15, %v2108_v21, %v11893_v32 }
 0x949   :  { %9580 = vset.pattern.permute.xlu1 %v14762_v52  ;;  %v2110_v56 = vsel %vm2103_vm10, %v2106_v51, %v2109_v18  ;;  %vm2931_vm6 = vcmp.eq.s32.totalorder %v2929_v28, 0  ;;  %vm2934_vm14 = vcmp.eq.s32.totalorder %v2929_v28, 2  ;;  %v2205_v60 = vand.u32 3, %v2201_v48 }
 0x94a   :  { %3804 = vperm.xlu1 %9580, %v11968_v53   ;;  %v2933_v2 = vsel %vm2931_vm6, %v11890_v5, %v2105_v46  ;;  %v2936_v57 = vsel %vm2934_vm14, %v2108_v21, %v11893_v32  ;;  %v2208_v0 = vxor.u32 2147483648, %v11908_v45  ;;  %v2211_v30 = vxor.u32 2147483648, %v11905_v42 }
 0x94b   :  { %v2303_v38 = vsel %vm11998_vm9, %v11421_v14, %v11858_v25  ;;  %v12051_v3 = vsel %vm2101_vm11, nan, %v2110_v56  ;;  %vm2930_vm5 = vcmp.lt.s32.totalorder %v2929_v28, 2  ;;  %v2401_v53 = vmul.f32 %v2400_v44, %v2398_v19 }
 0x94c   :  { %v2497_v5 = vsub.s32 4294967266, %v12025_v40  ;;  %v8924_v32 = vadd.s32 4294967294, %v2592_v4  ;;  %3812 = vperm.xlu0 %9584, %v12051_v3   ;;  %v2937_v11 = vsel %vm2930_vm5, %v2933_v2, %v2936_v57  ;;  %vm2207_vm0 = vcmp.eq.s32.totalorder %v2205_v60, 0 }
 0x94d   :  { %vm2210_vm12 = vcmp.eq.s32.totalorder %v2205_v60, 2  ;;  %v3032_v1 = vadd.s32 3, %v2201_v48  ;;  %v2209_v25 = vsel %vm2207_vm0, %v11905_v42, %v2208_v0  ;;  %9900 = vcosq.f32 %v2303_v38  ;;  %v14897_v48 = vld [vmem:[#allocation44_spill] sm:$0xff] }
 0x94e   :  { %3852 = vperm.xlu1 %9580, %v11947_v29   ;;  %v2212_v33 = vsel %vm2210_vm12, %v2211_v30, %v11908_v45  ;;  %v12062_v43 = vsel %vm2101_vm11, nan, %v2937_v11  ;;  %v2402_v46 = vxor.u32 2147483648, %v2401_v53  ;;  %v2498_v47 = vadd.s32 127, %v2497_v5 }
 0x94f   :  { %v3033_v44 = vand.u32 3, %v3032_v1  ;;  %vm8925_vm2 = vcmp.lt.s32.totalorder %v8924_v32, 0  ;;  %vm2206_vm1 = vcmp.lt.s32.totalorder %v2205_v60, 2  ;;  %9902 = vsinq.f32 %v2303_v38 }
 0x950   :  { %3860 = vperm.xlu0 %9584, %v12062_v43   ;;  %v2213_v22 = vsel %vm2206_vm1, %v2209_v25, %v2212_v33  ;;  %v2493_v29 = vsub.s32 32, %v12025_v40  ;;  %v14892_v58 = vmov 0   ;;  %vm2320_vm11 = vcmp.lt.s32.totalorder %v14893_v41, 0 }
 0x951   :  { %vm3035_vm4 = vcmp.eq.s32.totalorder %v3033_v44, 0  ;;  %vm3038_vm13 = vcmp.eq.s32.totalorder %v3033_v44, 2  ;;  %v2477_v21 = vadd.s32 %v11804_v35, %v11802_v61  ;;  %v2595_v19 = vsel %vm8925_vm2, 0, %v8924_v32 }
 0x952   :  { %9581 = vset.pattern.permute.xlu1 %v14892_v58  ;;  %v3037_v17 = vsel %vm3035_vm4, %v11905_v42, %v2208_v0  ;;  %v3040_v20 = vsel %vm3038_vm13, %v2211_v30, %v11908_v45  ;;  %vm2204_vm7 = vweird.f32 %v11259_v36  ;;  %v2403_v39 = vsel %vm2320_vm11, %v2402_v46, %v2401_v53  ;;  %v14898_v36 = vld [vmem:[#allocation50_spill] sm:$0xff] }
 0x953   :  { %3467 = vperm.xlu1 %9581, %v12034_v37   ;;  %v2499_v26 = vshll.u32 %v2498_v47, 23  ;;  %v12079_v42 = vsel %vm2204_vm7, nan, %v2213_v22  ;;  %vm3034_vm15 = vcmp.lt.s32.totalorder %v3033_v44, 2  ;;  %v14894_v61 = vand.u32 2147483647, %v14893_v41 }
 0x954   :  { %9589 = vset.pattern.permute.xlu0 %v14892_v58  ;;  %v3041_v45 = vsel %vm3034_vm15, %v3037_v17, %v3040_v20  ;;  %v2495_v54 = vshrl.u32 %v2477_v21, %v2493_v29  ;;  %v2600_v63 = vsub.s32 4294967266, %v2595_v19  ;;  %v2301_v28 = vsub.s32 4, %v14897_v48 }
 0x955   :  { %3477 = vperm.xlu0 %9589, %v12079_v42   ;;  %vm12084_vm10 = vcmp.le.f32.partialorder %v14894_v61, 0.7853982  ;;  %v2494_v51 = vshll.u32 %v11897_v13, %v12025_v40  ;;  %v2500_v18 = vor.u32 4788187, %v2499_v26  ;;  %v12097_v56 = vsel %vm2204_vm7, nan, %v3041_v45 }
 0x956   :  { %v2406_v4 = vsel %vm12084_vm10, %v14893_v41, %v2403_v39  ;;  %v2601_v2 = vadd.s32 127, %v2600_v63  ;;  %v2302_v57 = vsel %vm2217_vm8, %v2301_v28, %v14897_v48  ;;  %v2596_v40 = vsub.s32 32, %v2595_v19  ;;  %v14899_v39 = vld [vmem:[#allocation49_spill] sm:$0xff] }
 0x957   :  { %3522 = vperm.xlu1 %9581, %v12006_v8   ;;  %9904 = vcosq.f32 %v2406_v4  ;;  %v2496_v60 = vor.u32 %v2495_v54, %v2494_v51  ;;  %v2501_v13 = vand.u32 2147483647, %v2500_v18  ;;  %v2404_v30 = vsub.s32 4, %v14898_v36 }
 0x958   :  { %9906 = vsinq.f32 %v2406_v4  ;;  %v12111_v38 = vsel %vm11998_vm9, 0, %v2302_v57  ;;  %v2580_v32 = vadd.s32 %v11929_v50, %v11940_v23  ;;  %v2602_v11 = vshll.u32 %v2601_v2, 23 }
 0x959   :  { %3532 = vperm.xlu0 %9589, %v12097_v56   ;;  %v2503_v5 = vcvt.s32.f32 %v2496_v60  ;;  %v2308_v33 = vand.u32 3, %v12111_v38  ;;  %v2405_v34 = vsel %vm2320_vm11, %v2404_v30, %v14898_v36  ;;  %v2597_v47 = vshll.u32 %v12002_v9, %v2595_v19 }
 0x95a   :  { %v12104_v0 = vpop.eup %9900  ;;  %v2598_v25 = vshrl.u32 %v2580_v32, %v2596_v40  ;;  %v2603_v50 = vor.u32 4788187, %v2602_v11  ;;  %v2407_v23 = vsel %vm12084_vm10, 0, %v2405_v34  ;;  %vm2423_vm6 = vcmp.lt.s32.totalorder %v14899_v39, 0 }
 0x95b   :  { %9582 = vset.pattern.permute.xlu1 %v14766_v7  ;;  %v2504_v1 = vmul.f32 %v2503_v5, %v2501_v13  ;;  %v2314_v46 = vxor.u32 2147483648, %v12104_v0  ;;  %vm2310_vm8 = vcmp.eq.s32.totalorder %v2308_v33, 0  ;;  %vm2313_vm9 = vcmp.eq.s32.totalorder %v2308_v33, 2 }
 0x95c   :  { %3584 = vperm.xlu1 %9582, %v12034_v37   ;;  %v12113_v53 = vpop.eup %9902  ;;  %v2599_v29 = vor.u32 %v2598_v25, %v2597_v47  ;;  %v2604_v20 = vand.u32 2147483647, %v2603_v50  ;;  %v3240_v21 = vadd.s32 3, %v2407_v23  ;;  %vm2309_vm14 = vcmp.lt.s32.totalorder %v2308_v33, 2 }
 0x95d   :  { %9590 = vset.pattern.permute.xlu0 %v14766_v7  ;;  %v2311_v44 = vxor.u32 2147483648, %v12113_v53  ;;  %v2505_v22 = vxor.u32 2147483648, %v2504_v1  ;;  %v2315_v17 = vsel %vm2313_vm9, %v2314_v46, %v12113_v53  ;;  %v14900_v35 = vand.u32 2147483647, %v14899_v39 }
 0x95e   :  { %3592 = vperm.xlu0 %9590, %v12079_v42   ;;  %v2606_v45 = vcvt.s32.f32 %v2599_v29  ;;  %vm2307_vm0 = vweird.f32 %v11421_v14  ;;  %v3241_v48 = vand.u32 3, %v3240_v21  ;;  %v2411_v57 = vand.u32 3, %v2407_v23 }
 0x95f   :  { %v2312_v9 = vsel %vm2310_vm8, %v12104_v0, %v2311_v44  ;;  %vm12145_vm5 = vcmp.le.f32.partialorder %v14900_v35, 0.7853982  ;;  %vm2526_vm1 = vcmp.lt.s32.totalorder %v11791_v31, 0  ;;  %vm12169_vm13 = vcmp.le.f32.partialorder %v2524_v55, 0.7853982 }
 0x960   :  { %3632 = vperm.xlu1 %9582, %v12006_v8   ;;  %v2316_v61 = vsel %vm2309_vm14, %v2312_v9, %v2315_v17  ;;  %v2607_v63 = vmul.f32 %v2606_v45, %v2604_v20  ;;  %vm3243_vm12 = vcmp.eq.s32.totalorder %v3241_v48, 0  ;;  %vm3246_vm2 = vcmp.eq.s32.totalorder %v3241_v48, 2 }
 0x961   :  { %v12157_v4 = vsel %vm2307_vm0, nan, %v2316_v61  ;;  %vm3242_vm4 = vcmp.lt.s32.totalorder %v3241_v48, 2  ;;  %vm2413_vm11 = vcmp.eq.s32.totalorder %v2411_v57, 0  ;;  %vm2416_vm7 = vcmp.eq.s32.totalorder %v2411_v57, 2 }
 0x962   :  { %9592 = vset.pattern.permute.xlu0 %v14764_v10  ;;  %v2608_v60 = vxor.u32 2147483648, %v2607_v63  ;;  %vm2410_vm15 = vweird.f32 %v14893_v41  ;;  %v2507_v32 = vsub.s32 4, %v11854_v24  ;;  %vm2412_vm10 = vcmp.lt.s32.totalorder %v2411_v57, 2 }
 0x963   :  { %3704 = vperm.xlu0 %9592, %v12079_v42   ;;  %v2610_v34 = vsub.s32 4, %v11984_v27  ;;  %vm2513_vm14 = vweird.f32 %v14899_v39 }
 0x964   :  { %9583 = vset.pattern.permute.xlu1 %v14764_v10  ;;  %v9905_v19 = vpop.eup %9904  ;;  %v2609_v13 = vsel %vm2526_vm1, %v2608_v60, %v2607_v63  ;;  %v2508_v25 = vsel %vm2423_vm6, %v2507_v32, %v11854_v24 }
 0x965   :  { %3696 = vperm.xlu1 %9583, %v12034_v37   ;;  %v9907_v26 = vpop.eup %9906  ;;  %v2506_v37 = vsel %vm2423_vm6, %v2505_v22, %v2504_v1  ;;  %v2417_v18 = vxor.u32 2147483648, %v9905_v19  ;;  %v2612_v11 = vsel %vm12169_vm13, %v11791_v31, %v2609_v13  ;;  %v12201_v50 = vsel %vm12145_vm5, 0, %v2508_v25 }
 0x966   :  { %v2509_v28 = vsel %vm12145_vm5, %v14899_v39, %v2506_v37  ;;  %v2414_v51 = vxor.u32 2147483648, %v9907_v26  ;;  %v2514_v24 = vand.u32 3, %v12201_v50  ;;  %v2611_v41 = vsel %vm2526_vm1, %v2610_v34, %v11984_v27  ;;  %v12295_v34 = vld [vmem:[%s14905_s10] ss:$0 sm:$0xff] }
 0x967   :  { %3752 = vperm.xlu0 %9592, %v12097_v56   ;;  %9908 = vcosq.f32 %v2509_v28  ;;  %v3248_v2 = vsel %vm3246_vm2, %v2417_v18, %v9907_v26  ;;  %v2418_v5 = vsel %vm2416_vm7, %v2417_v18, %v9907_v26  ;;  %v2613_v9 = vsel %vm12169_vm13, 0, %v2611_v41 }
 0x968   :  { %9910 = vsinq.f32 %v2509_v28  ;;  %v2415_v30 = vsel %vm2413_vm11, %v9905_v19, %v2414_v51  ;;  %vm2516_vm8 = vcmp.eq.s32.totalorder %v2514_v24, 0  ;;  %vm2519_vm9 = vcmp.eq.s32.totalorder %v2514_v24, 2 }
 0x969   :  { %9585 = vset.pattern.permute.xlu1 %v14762_v52  ;;  %v2419_v1 = vsel %vm2412_vm10, %v2415_v30, %v2418_v5  ;;  %9912 = vcosq.f32 %v2612_v11  ;;  %v3448_v20 = vadd.s32 3, %v2613_v9  ;;  %vm2515_vm6 = vcmp.lt.s32.totalorder %v2514_v24, 2  ;;  %v12304_v24 = vld [vmem:[%s14906_s11 + $0x2] ss:$0 sm:$0xff] }
 0x96a   :  { %3856 = vperm.xlu1 %9585, %v12006_v8   ;;  %v3245_v8 = vsel %vm3243_vm12, %v9905_v19, %v2414_v51  ;;  %9914 = vsinq.f32 %v2612_v11  ;;  %v12193_v33 = vsel %vm2410_vm15, nan, %v2419_v1  ;;  %v3136_v37 = vadd.s32 3, %v12111_v38 }
 0x96b   :  { %9594 = vset.pattern.permute.xlu0 %v14892_v58  ;;  %v3249_v40 = vsel %vm3242_vm4, %v3245_v8, %v3248_v2  ;;  %v3449_v26 = vand.u32 3, %v3448_v20  ;;  %v2617_v38 = vand.u32 3, %v2613_v9  ;;  %vm2616_vm7 = vweird.f32 %v11791_v31  ;;  %v12310_v9 = vld [vmem:[%s14905_s10 + $0x2] ss:$0 sm:$0xff] }
 0x96c   :  { %3482 = vperm.xlu0 %9594, %v12157_v4   ;;  %v12182_v55 = vsel %vm2410_vm15, nan, %v3249_v40  ;;  %v3344_v31 = vadd.s32 3, %v12201_v50  ;;  %v12301_v50 = vld [vmem:[%s14906_s11 + $0x1] ss:$0 sm:$0xff] }
 0x96d   :  { %vm3451_vm5 = vcmp.eq.s32.totalorder %v3449_v26, 0  ;;  %vm3454_vm12 = vcmp.eq.s32.totalorder %v3449_v26, 2  ;;  %vm3450_vm2 = vcmp.lt.s32.totalorder %v3449_v26, 2  ;;  %vm2619_vm13 = vcmp.eq.s32.totalorder %v2617_v38, 0 }
 0x96e   :  { %9586 = vset.pattern.permute.xlu1 %v14892_v58  ;;  %vm2622_vm11 = vcmp.eq.s32.totalorder %v2617_v38, 2  ;;  %vm2618_vm10 = vcmp.lt.s32.totalorder %v2617_v38, 2 }
 0x96f   :  { %3472 = vperm.xlu1 %9586, %v12051_v3  }
 0x970   :  { %9597 = vset.pattern.permute.xlu0 %v14764_v10 }
 0x971   :  { %3708 = vperm.xlu0 %9597, %v12157_v4  }
 0x973   :  { %3527 = vperm.xlu1 %9586, %v12062_v43  }
 0x974   :  { %v12196_v47 = vpop.eup %9908 }
 0x975   :  { %9601 = vset.pattern.permute.xlu0 %v14892_v58  ;;  %v12203_v23 = vpop.eup %9910  ;;  %v2520_v29 = vxor.u32 2147483648, %v12196_v47 }
 0x976   :  { %3542 = vperm.xlu0 %9601, %v12182_v55   ;;  %v2517_v22 = vxor.u32 2147483648, %v12203_v23  ;;  %v9913_v21 = vpop.eup %9912 }
 0x977   :  { %9587 = vset.pattern.permute.xlu1 %v14766_v7  ;;  %v2521_v17 = vsel %vm2519_vm9, %v2520_v29, %v12203_v23  ;;  %v2623_v35 = vxor.u32 2147483648, %v9913_v21 }
 0x978   :  { %3588 = vperm.xlu1 %9587, %v12051_v3   ;;  %v2518_v27 = vsel %vm2516_vm8, %v12196_v47, %v2517_v22 }
 0x979   :  { %v2522_v19 = vsel %vm2515_vm6, %v2518_v27, %v2521_v17  ;;  %v12313_v27 = vld [vmem:[%s14905_s10 + $0x3] ss:$0 sm:$0xff]  ;;  %vm3975_vm6 = vcmask 130048  }
 0x97a   :  { %9602 = vset.pattern.permute.xlu0 %v14766_v7  ;;  %v12232_v45 = vsel %vm2513_vm14, nan, %v2522_v19 }
 0x97b   :  { %3600 = vperm.xlu0 %9602, %v12193_v33  }
 0x97c   :  { %3636 = vperm.xlu1 %9587, %v12062_v43  }
 0x97f   :  { %9605 = vset.pattern.permute.xlu0 %v14764_v10 }
 0x980   :  { %3760 = vperm.xlu0 %9605, %v12182_v55   ;;  %9588 = vset.pattern.permute.xlu1 %v14764_v10 }
 0x981   :  { %3700 = vperm.xlu1 %9588, %v12051_v3   ;;  %v9915_v3 = vpop.eup %9914 }
 0x982   :  { %v2620_v61 = vxor.u32 2147483648, %v9915_v3  ;;  %v3456_v63 = vsel %vm3454_vm12, %v2623_v35, %v9915_v3  ;;  %v2624_v60 = vsel %vm2622_vm11, %v2623_v35, %v9915_v3 }
 0x984   :  { %9606 = vset.pattern.permute.xlu0 %v14762_v52  ;;  %v3453_v54 = vsel %vm3451_vm5, %v9913_v21, %v2620_v61  ;;  %v2621_v18 = vsel %vm2619_vm13, %v9913_v21, %v2620_v61  ;;  %vm14921_vm5 = vcmask 785408  }
 0x985   :  { %3824 = vperm.xlu0 %9606, %v12193_v33   ;;  %3748 = vperm.xlu1 %9588, %v12062_v43   ;;  %v3137_v43 = vand.u32 3, %v3136_v37  ;;  %v3457_v48 = vsel %vm3450_vm2, %v3453_v54, %v3456_v63  ;;  %v12326_v63 = vld [vmem:[%s14906_s11 + $0x3] ss:$0 sm:$0xff]  ;;  %vm14923_vm2 = vmmov %vm14921_vm5 }
 0x986   :  { %vm14927_vm11 = vmmov %vm14923_vm2 }
 0x987   :  { %vm3139_vm1 = vcmp.eq.s32.totalorder %v3137_v43, 0  ;;  %vm3142_vm4 = vcmp.eq.s32.totalorder %v3137_v43, 2  ;;  %vm3138_vm15 = vcmp.lt.s32.totalorder %v3137_v43, 2 }
 0x988   :  { %v3141_v28 = vsel %vm3139_vm1, %v12104_v0, %v2311_v44  ;;  %v3144_v51 = vsel %vm3142_vm4, %v2314_v46, %v12113_v53  ;;  %v2625_v44 = vsel %vm2618_vm10, %v2621_v18, %v2624_v60  ;;  %vm14925_vm4 = vmmov %vm14923_vm2 }
 0x989   :  { %9608 = vset.pattern.permute.xlu0 %v14892_v58  ;;  %9591 = vset.pattern.permute.xlu1 %v14766_v7  ;;  %v3145_v8 = vsel %vm3138_vm15, %v3141_v28, %v3144_v51  ;;  %v12258_v53 = vsel %vm2616_vm7, nan, %v2625_v44  ;;  %vm14929_vm15 = vmmov %vm14923_vm2 }
 0x98a   :  { %3492 = vperm.xlu0 %9608, %v12232_v45   ;;  %3640 = vperm.xlu1 %9591, %v12097_v56   ;;  %v3146_v0 = vsel %vm2307_vm0, nan, %v3145_v8 }
 0x98e   :  { %9612 = vset.pattern.permute.xlu0 %v14762_v52  ;;  %9593 = vset.pattern.permute.xlu1 %v14762_v52 }
 0x98f   :  { %3828 = vperm.xlu0 %9612, %v12232_v45   ;;  %3816 = vperm.xlu1 %9593, %v12079_v42   ;;  %v12249_v42 = vsel %vm2616_vm7, nan, %v3457_v48 }
 0x993   :  { %9614 = vset.pattern.permute.xlu0 %v14892_v58  ;;  %3864 = vperm.xlu1 %9593, %v12097_v56   ;;  %v3345_v56 = vand.u32 3, %v3344_v31 }
 0x994   :  { %3552 = vperm.xlu0 %9614, %v12249_v42  }
 0x995   :  { %vm3347_vm8 = vcmp.eq.s32.totalorder %v3345_v56, 0  ;;  %vm3350_vm0 = vcmp.eq.s32.totalorder %v3345_v56, 2  ;;  %vm3346_vm9 = vcmp.lt.s32.totalorder %v3345_v56, 2 }
 0x996   :  { %v3349_v14 = vsel %vm3347_vm8, %v12196_v47, %v2517_v22  ;;  %v3352_v46 = vsel %vm3350_vm0, %v2520_v29, %v12203_v23  ;;  %v12298_v47 = vld [vmem:[%s14906_s11] ss:$0 sm:$0xff]  ;;  %vm14931_vm8 = vmmov %vm14923_vm2 }
 0x997   :  { %9595 = vset.pattern.permute.xlu1 %v14892_v58  ;;  %v3353_v2 = vsel %vm3346_vm9, %v3349_v14, %v3352_v46  ;;  %vm14933_vm9 = vmmov %vm14923_vm2 }
 0x998   :  { %9615 = vset.pattern.permute.xlu0 %v14766_v7  ;;  %3537 = vperm.xlu1 %9595, %v3146_v0   ;;  %v3354_v57 = vsel %vm2513_vm14, nan, %v3353_v2  ;;  %vm14920_vm14 = vcmask 523264  }
 0x999   :  { %3608 = vperm.xlu0 %9615, %v12258_v53   ;;  %vm14922_vm12 = vmmov %vm14920_vm14 }
 0x99a   :  { %vm14924_vm1 = vmmov %vm14922_vm12 }
 0x99b   :  { %vm14926_vm13 = vmmov %vm14924_vm1 }
 0x99c   :  { %9596 = vset.pattern.permute.xlu1 %v14766_v7  ;;  %vm14928_vm7 = vmmov %vm14924_vm1 }
 0x99d   :  { %9617 = vset.pattern.permute.xlu0 %v14764_v10  ;;  %3596 = vperm.xlu1 %9596, %v12157_v4   ;;  %vm14930_vm10 = vmmov %vm14924_vm1 }
 0x99e   :  { %3720 = vperm.xlu0 %9617, %v12258_v53   ;;  %vm14932_vm0 = vmmov %vm14924_vm1 }
 0x9a1   :  { %3644 = vperm.xlu1 %9596, %v3146_v0  }
 0x9a2   :  { %3768 = vperm.xlu0 %9617, %v12249_v42  }
 0x9a5   :  { %9598 = vset.pattern.permute.xlu1 %v14764_v10 }
 0x9a6   :  { %9618 = vset.pattern.permute.xlu0 %v14762_v52  ;;  %3756 = vperm.xlu1 %9598, %v3146_v0  }
 0x9a7   :  { %3876 = vperm.xlu0 %9618, %v3354_v57  }
 0x9aa   :  { %9599 = vset.pattern.permute.xlu1 %v14762_v52 }
 0x9ab   :  { %3820 = vperm.xlu1 %9599, %v12157_v4  }
 0x9af   :  { %3868 = vperm.xlu1 %9599, %v3146_v0  }
 0x9b1   :  { %v3518_v13 = vpop.permute.xlu1 %3517 }
 0x9b2   :  { %v3561_v22 = vmul.f32 %v12295_v34, %v3518_v13 }
 0x9b3   :  { %9600 = vset.pattern.permute.xlu1 %v14892_v58 }
 0x9b4   :  { %3487 = vperm.xlu1 %9600, %v12193_v33  }
 0x9b5   :  { %v3463_v5 = vpop.permute.xlu0 %3462 }
 0x9b6   :  { %v3506_v29 = vmul.f32 %v12298_v47, %v3463_v5 }
 0x9b7   :  { %v3581_v40 = vpop.permute.xlu1 %3580 }
 0x9b8   :  { %9603 = vset.pattern.permute.xlu1 %v14766_v7  ;;  %v3617_v17 = vmul.f32 %v12301_v50, %v3581_v40  ;;  %v3569_v43 = vadd.f32 %v3561_v22, %v3506_v29 }
 0x9b9   :  { %3648 = vperm.xlu1 %9603, %v12182_v55  }
 0x9ba   :  { %v3693_v11 = vpop.permute.xlu0 %3692 }
 0x9bb   :  { %v3629_v36 = vpop.permute.xlu1 %3628  ;;  %v3729_v19 = vmul.f32 %v12304_v24, %v3693_v11 }
 0x9bd   :  { %9604 = vset.pattern.permute.xlu1 %v14764_v10 }
 0x9be   :  { %3712 = vperm.xlu1 %9604, %v12193_v33   ;;  %v3745_v25 = vpop.permute.xlu0 %3744  ;;  %v12292_v33 = vld [vmem:[%s14905_s10 + $0x1] ss:$0 sm:$0xff] }
 0x9bf   :  { %v3665_v41 = vmul.f32 %v12292_v33, %v3629_v36  ;;  %v3778_v54 = vmul.f32 %v12310_v9, %v3745_v25 }
 0x9c0   :  { %v3741_v39 = vpop.permute.xlu1 %3740 }
 0x9c1   :  { %v3777_v20 = vmul.f32 %v12310_v9, %v3741_v39  ;;  %v3673_v26 = vadd.f32 %v3665_v41, %v3617_v17  ;;  %v12339_v39 = vld [vmem:[%s14907_s15] ss:$0 sm:$0xff] }
 0x9c2   :  { %9607 = vset.pattern.permute.xlu1 %v14762_v52 }
 0x9c3   :  { %3872 = vperm.xlu1 %9607, %v12182_v55   ;;  %v3809_v21 = vpop.permute.xlu0 %3808  ;;  %v3785_v48 = vadd.f32 %v3777_v20, %v3729_v19  ;;  %v3681_v60 = vmul.f32 %v3673_v26, %v3569_v43 }
 0x9c4   :  { %v3842_v46 = vmul.f32 %v12326_v63, %v3809_v21 }
 0x9c5   :  { %v3805_v4 = vpop.permute.xlu1 %3804  ;;  %v3793_v14 = vmul.f32 %v3785_v48, %v3681_v60 }
 0x9c6   :  { %v3841_v28 = vmul.f32 %v12326_v63, %v3805_v4 }
 0x9c7   :  { %9609 = vset.pattern.permute.xlu1 %v14892_v58  ;;  %v3813_v8 = vpop.permute.xlu0 %3812 }
 0x9c8   :  { %3547 = vperm.xlu1 %9609, %v3354_v57  }
 0x9c9   :  { %v3853_v30 = vpop.permute.xlu1 %3852 }
 0x9ca   :  { %v3889_v37 = vmul.f32 %v12313_v27, %v3853_v30 }
 0x9cb   :  { %v3861_v4 = vpop.permute.xlu0 %3860 }
 0x9cc   :  { %9610 = vset.pattern.permute.xlu1 %v14766_v7  ;;  %v3897_v44 = vadd.f32 %v3889_v37, %v3841_v28 }
 0x9cd   :  { %3604 = vperm.xlu1 %9610, %v12232_v45  }
 0x9ce   :  { %v3468_v32 = vpop.permute.xlu1 %3467  ;;  %v12335_v13 = vmul.f32 %v3897_v44, %v3793_v14 }
 0x9cf   :  { %v3507_v51 = vmul.f32 %v12298_v47, %v3468_v32 }
 0x9d0   :  { %v3935_v32 = vmul.f32 %v12339_v39, %v12335_v13  ;;  %v3478_v25 = vpop.permute.xlu0 %3477 }
 0x9d1   :  { %3652 = vperm.xlu1 %9610, %v3354_v57   ;;  %v3509_v28 = vmul.f32 %v12298_v47, %v3478_v25 }
 0x9d2   :  { %v3523_v55 = vpop.permute.xlu1 %3522 }
 0x9d4   :  { %v3533_v41 = vpop.permute.xlu0 %3532 }
 0x9d5   :  { %9611 = vset.pattern.permute.xlu1 %v14764_v10  ;;  %v3564_v37 = vmul.f32 %v12295_v34, %v3533_v41 }
 0x9d6   :  { %3716 = vperm.xlu1 %9611, %v12232_v45   ;;  %v3562_v45 = vmul.f32 %v12295_v34, %v3523_v55 }
 0x9d7   :  { %v3585_v1 = vpop.permute.xlu1 %3584 }
 0x9d8   :  { %v3618_v61 = vmul.f32 %v12301_v50, %v3585_v1  ;;  %v3570_v0 = vadd.f32 %v3562_v45, %v3507_v51 }
 0x9d9   :  { %v3593_v29 = vpop.permute.xlu0 %3592 }
 0x9da   :  { %3764 = vperm.xlu1 %9611, %v3354_v57   ;;  %v3620_v45 = vmul.f32 %v12301_v50, %v3593_v29 }
 0x9db   :  { %v3633_v23 = vpop.permute.xlu1 %3632 }
 0x9dc   :  { %v3666_v3 = vmul.f32 %v12292_v33, %v3633_v23  ;;  %v9728_v23 = vld [vmem:[%s14908_s16 + $0x8] sm:$0xff]  }
 0x9dd   :  { %9319 = vmatprep.subr.bf16.mxu1 %v9728_v23 }
 0x9de   :  { %9613 = vset.pattern.permute.xlu1 %v14892_v58  ;;  %v3674_v18 = vadd.f32 %v3666_v3, %v3618_v61  ;;  %9320 = vmatpush3.bf16.msra.mxu1 %v9728_v23  ;;  %v3705_v21 = vpop.permute.xlu0 %3704 }
 0x9df   :  { %3497 = vperm.xlu1 %9613, %v12258_v53  }
 0x9e0   :  { %v3697_v35 = vpop.permute.xlu1 %3696  ;;  %v3682_v2 = vmul.f32 %v3674_v18, %v3570_v0  ;;  %v3891_v0 = vmul.f32 %v12313_v27, %v3861_v4 }
 0x9e1   :  { %v3730_v38 = vmul.f32 %v12304_v24, %v3697_v35 }
 0x9e2   :  { %v3753_v48 = vpop.permute.xlu0 %3752 }
 0x9e3   :  { %9616 = vset.pattern.permute.xlu1 %v14766_v7  ;;  %v3786_v31 = vadd.f32 %v3778_v54, %v3730_v38 }
 0x9e4   :  { %3656 = vperm.xlu1 %9616, %v12249_v42  }
 0x9e5   :  { %v3857_v56 = vpop.permute.xlu1 %3856  ;;  %v3794_v40 = vmul.f32 %v3786_v31, %v3682_v2  ;;  %v3572_v31 = vadd.f32 %v3564_v37, %v3509_v28  ;;  %v3732_v2 = vmul.f32 %v12304_v24, %v3705_v21 }
 0x9e6   :  { %v3890_v57 = vmul.f32 %v12313_v27, %v3857_v56  ;;  %v3780_v56 = vmul.f32 %v12310_v9, %v3753_v48 }
 0x9e7   :  { %v3483_v29 = vpop.permute.xlu0 %3482 }
 0x9e8   :  { %v3898_v36 = vadd.f32 %v3890_v57, %v3842_v46  ;;  %9619 = vset.pattern.permute.xlu1 %v14762_v52  ;;  %v3843_v46 = vmul.f32 %v12326_v63, %v3813_v8 }
 0x9e9   :  { %3832 = vperm.xlu1 %9619, %v12258_v53  }
 0x9ea   :  { %v12342_v30 = vmul.f32 %v3898_v36, %v3794_v40  ;;  %v3473_v5 = vpop.permute.xlu1 %3472 }
 0x9eb   :  { %v3508_v35 = vmul.f32 %v12298_v47, %v3473_v5  ;;  %v3899_v5 = vadd.f32 %v3891_v0, %v3843_v46 }
 0x9ec   :  { %v3936_v11 = vmul.f32 %v12339_v39, %v12342_v30  ;;  %v3709_v21 = vpop.permute.xlu0 %3708 }
 0x9ed   :  { %3880 = vperm.xlu1 %9619, %v12249_v42  }
 0x9ee   :  { %v3528_v55 = vpop.permute.xlu1 %3527  ;;  %v9620_v1 = vpack.i.bf16 %v3936_v11, %v3935_v32  ;;  %v3788_v32 = vadd.f32 %v3780_v56, %v3732_v2 }
 0x9ef   :  { %v3563_v3 = vmul.f32 %v12295_v34, %v3528_v55 }
 0x9f0   :  { %9621 = vrot.lane.b32.xlu0 %v9620_v1, %s10286_s18  ;;  %v9729_v1 = vld [vmem:[%s14908_s16] sm:$0xff]  }
 0x9f1   :  { %9640 = vset.pattern.permute.xlu1 %v14892_v58  ;;  %v3571_v51 = vadd.f32 %v3563_v3, %v3508_v35  ;;  %9321 = vmatprep.subr.bf16.mxu1 %v9729_v1 }
 0x9f2   :  { %9322 = vmatpush3.bf16.msra.mxu1 %v9729_v1 }
 0x9f3   :  { %v3589_v53 = vpop.permute.xlu1 %3588 }
 0x9f4   :  { %v3619_v19 = vmul.f32 %v12301_v50, %v3589_v53 }
 0x9f7   :  { %v3637_v22 = vpop.permute.xlu1 %3636 }
 0x9f8   :  { %v3667_v42 = vmul.f32 %v12292_v33, %v3637_v22 }
 0x9fa   :  { %v3675_v43 = vadd.f32 %v3667_v42, %v3619_v19  ;;  %v3543_v19 = vpop.permute.xlu0 %3542 }
 0x9fb   :  { %v3566_v2 = vmul.f32 %v12295_v34, %v3543_v19 }
 0x9fc   :  { %v3701_v17 = vpop.permute.xlu1 %3700  ;;  %v3683_v14 = vmul.f32 %v3675_v43, %v3571_v51 }
 0x9fd   :  { %v3731_v54 = vmul.f32 %v12304_v24, %v3701_v17 }
 0x9fe   :  { %v3601_v37 = vpop.permute.xlu0 %3600 }
 0x9ff   :  { %v3622_v0 = vmul.f32 %v12301_v50, %v3601_v37 }
 0xa00   :  { %v3749_v20 = vpop.permute.xlu1 %3748 }
 0xa01   :  { %v3779_v26 = vmul.f32 %v12310_v9, %v3749_v20 }
 0xa03   :  { %v3787_v18 = vadd.f32 %v3779_v26, %v3731_v54 }
 0xa05   :  { %v3641_v61 = vpop.permute.xlu1 %3640  ;;  %v3795_v57 = vmul.f32 %v3787_v18, %v3683_v14 }
 0xa06   :  { %v3668_v38 = vmul.f32 %v12292_v33, %v3641_v61  ;;  %v3761_v61 = vpop.permute.xlu0 %3760 }
 0xa07   :  { %v12369_v25 = vmul.f32 %v3899_v5, %v3795_v57  ;;  %v3782_v57 = vmul.f32 %v12310_v9, %v3761_v61 }
 0xa08   :  { %v3676_v60 = vadd.f32 %v3668_v38, %v3620_v45 }
 0xa09   :  { %v3937_v22 = vmul.f32 %v12339_v39, %v12369_v25 }
 0xa0a   :  { %v3817_v44 = vpop.permute.xlu1 %3816  ;;  %v3684_v40 = vmul.f32 %v3676_v60, %v3572_v31  ;;  %v3825_v43 = vpop.permute.xlu0 %3824  ;;  %v3510_v60 = vmul.f32 %v12298_v47, %v3483_v29 }
 0xa0b   :  { %v3844_v11 = vmul.f32 %v12326_v63, %v3817_v44  ;;  %v3733_v44 = vmul.f32 %v12304_v24, %v3709_v21 }
 0xa0c   :  { %v3796_v4 = vmul.f32 %v3788_v32, %v3684_v40 }
 0xa0e   :  { %v3865_v36 = vpop.permute.xlu1 %3864  ;;  %v3493_v40 = vpop.permute.xlu0 %3492 }
 0xa0f   :  { %v3892_v55 = vmul.f32 %v12313_v27, %v3865_v36 }
 0xa11   :  { %v3900_v53 = vadd.f32 %v3892_v55, %v3844_v11 }
 0xa12   :  { %v3829_v21 = vpop.permute.xlu0 %3828 }
 0xa13   :  { %v12371_v23 = vmul.f32 %v3900_v53, %v3796_v4  ;;  %v3538_v8 = vpop.permute.xlu1 %3537 }
 0xa14   :  { %v3565_v48 = vmul.f32 %v12295_v34, %v3538_v8 }
 0xa15   :  { %v3938_v41 = vmul.f32 %v12339_v39, %v12371_v23 }
 0xa16   :  { %v3573_v5 = vadd.f32 %v3565_v48, %v3510_v60 }
 0xa17   :  { %v9625_v17 = vpack.i.bf16 %v3938_v41, %v3937_v22  ;;  %v3846_v22 = vmul.f32 %v12326_v63, %v3825_v43 }
 0xa18   :  { %v3597_v20 = vpop.permute.xlu1 %3596 }
 0xa19   :  { %9626 = vrot.lane.b32.xlu1 %v9625_v17, %s10286_s18  ;;  %v3621_v28 = vmul.f32 %v12301_v50, %v3597_v20 }
 0xa1c   :  { %v3645_v42 = vpop.permute.xlu1 %3644 }
 0xa1d   :  { %v3669_v38 = vmul.f32 %v12292_v33, %v3645_v42 }
 0xa1f   :  { %v3677_v31 = vadd.f32 %v3669_v38, %v3621_v28 }
 0xa21   :  { %v3757_v3 = vpop.permute.xlu1 %3756  ;;  %v3685_v1 = vmul.f32 %v3677_v31, %v3573_v5  ;;  %v3512_v5 = vmul.f32 %v12298_v47, %v3493_v40 }
 0xa22   :  { %v3781_v51 = vmul.f32 %v12310_v9, %v3757_v3 }
 0xa24   :  { %v3789_v32 = vadd.f32 %v3781_v51, %v3733_v44 }
 0xa26   :  { %v3821_v26 = vpop.permute.xlu1 %3820  ;;  %v3797_v29 = vmul.f32 %v3789_v32, %v3685_v1 }
 0xa27   :  { %v3845_v11 = vmul.f32 %v12326_v63, %v3821_v26 }
 0xa2a   :  { %v3869_v45 = vpop.permute.xlu1 %3868 }
 0xa2b   :  { %v3893_v56 = vmul.f32 %v12313_v27, %v3869_v45 }
 0xa2d   :  { %v3901_v4 = vadd.f32 %v3893_v56, %v3845_v11 }
 0xa2f   :  { %v3488_v35 = vpop.permute.xlu1 %3487  ;;  %v12394_v42 = vmul.f32 %v3901_v4, %v3797_v29 }
 0xa30   :  { %v3511_v14 = vmul.f32 %v12298_v47, %v3488_v35  ;;  %v3553_v35 = vpop.permute.xlu0 %3552 }
 0xa31   :  { %v3939_v45 = vmul.f32 %v12339_v39, %v12394_v42 }
 0xa32   :  { %v3574_v53 = vadd.f32 %v3566_v2, %v3511_v14 }
 0xa34   :  { %v3649_v54 = vpop.permute.xlu1 %3648  ;;  %v3609_v38 = vpop.permute.xlu0 %3608 }
 0xa35   :  { %v3670_v18 = vmul.f32 %v12292_v33, %v3649_v54  ;;  %v3624_v11 = vmul.f32 %v12301_v50, %v3609_v38 }
 0xa37   :  { %v3678_v55 = vadd.f32 %v3670_v18, %v3622_v0  ;;  %v12404_v0 = vld [vmem:[%s14909_s22] ss:$0 sm:$0xff] }
 0xa38   :  { %v3721_v51 = vpop.permute.xlu0 %3720 }
 0xa39   :  { %v3713_v46 = vpop.permute.xlu1 %3712  ;;  %v3686_v17 = vmul.f32 %v3678_v55, %v3574_v53  ;;  %v3921_v53 = vmul.f32 %v12404_v0, %v12342_v30 }
 0xa3a   :  { %v3734_v36 = vmul.f32 %v12304_v24, %v3713_v46 }
 0xa3c   :  { %v3790_v8 = vadd.f32 %v3782_v57, %v3734_v36  ;;  %v3769_v60 = vpop.permute.xlu0 %3768  ;;  %v3920_v36 = vmul.f32 %v12404_v0, %v12335_v13 }
 0xa3e   :  { %v3873_v41 = vpop.permute.xlu1 %3872  ;;  %v3798_v3 = vmul.f32 %v3790_v8, %v3686_v17  ;;  %v3568_v8 = vmul.f32 %v12295_v34, %v3553_v35 }
 0xa3f   :  { %v3894_v20 = vmul.f32 %v12313_v27, %v3873_v41 }
 0xa40   :  { %v3877_v56 = vpop.permute.xlu0 %3876 }
 0xa41   :  { %v3902_v19 = vadd.f32 %v3894_v20, %v3846_v22 }
 0xa43   :  { %v12396_v37 = vmul.f32 %v3902_v19, %v3798_v3  ;;  %v3548_v26 = vpop.permute.xlu1 %3547 }
 0xa44   :  { %v3567_v14 = vmul.f32 %v12295_v34, %v3548_v26  ;;  %v3847_v34 = vmul.f32 %v12326_v63, %v3829_v21 }
 0xa45   :  { %v3940_v61 = vmul.f32 %v12339_v39, %v12396_v37 }
 0xa46   :  { %v3575_v41 = vadd.f32 %v3567_v14, %v3512_v5  ;;  %v3925_v5 = vmul.f32 %v12404_v0, %v12396_v37 }
 0xa47   :  { %v9630_v43 = vpack.i.bf16 %v3940_v61, %v3939_v45  ;;  %v3736_v45 = vmul.f32 %v12304_v24, %v3721_v51 }
 0xa48   :  { %v3605_v54 = vpop.permute.xlu1 %3604 }
 0xa49   :  { %9631 = vrot.lane.b32.xlu0 %v9630_v43, %s10286_s18  ;;  %v3623_v46 = vmul.f32 %v12301_v50, %v3605_v54  ;;  %v3895_v50 = vmul.f32 %v12313_v27, %v3877_v56  ;;  %v3922_v56 = vmul.f32 %v12404_v0, %v12369_v25 }
 0xa4b   :  { %v3903_v54 = vadd.f32 %v3895_v50, %v3847_v34 }
 0xa4c   :  { %v3653_v48 = vpop.permute.xlu1 %3652 }
 0xa4d   :  { %v3671_v31 = vmul.f32 %v12292_v33, %v3653_v48 }
 0xa4f   :  { %v3679_v55 = vadd.f32 %v3671_v31, %v3623_v46 }
 0xa51   :  { %v3717_v28 = vpop.permute.xlu1 %3716  ;;  %v3687_v3 = vmul.f32 %v3679_v55, %v3575_v41 }
 0xa52   :  { %v3735_v1 = vmul.f32 %v12304_v24, %v3717_v28 }
 0xa55   :  { %v3765_v18 = vpop.permute.xlu1 %3764 }
 0xa56   :  { %v3783_v2 = vmul.f32 %v12310_v9, %v3765_v18 }
 0xa58   :  { %v3791_v13 = vadd.f32 %v3783_v2, %v3735_v1 }
 0xa5a   :  { %v3498_v44 = vpop.permute.xlu1 %3497  ;;  %v3799_v61 = vmul.f32 %v3791_v13, %v3687_v3  ;;  %v9313_v13 = vpop.f32.mrf.mxu1 }
 0xa5b   :  { %v3513_v4 = vmul.f32 %v12298_v47, %v3498_v44 }
 0xa5c   :  { %v3911_v28 = vmul.f32 %v3903_v54, %v3799_v61 }
 0xa5d   :  { %v3576_v19 = vadd.f32 %v3568_v8, %v3513_v4 }
 0xa5e   :  { %v3941_v21 = vmul.f32 %v12339_v39, %v3911_v28  ;;  %v3926_v4 = vmul.f32 %v12404_v0, %v3911_v28 }
 0xa5f   :  { %v3657_v57 = vpop.permute.xlu1 %3656 }
 0xa60   :  { %v3672_v32 = vmul.f32 %v12292_v33, %v3657_v57  ;;  %v3784_v33 = vmul.f32 %v12310_v9, %v3769_v60 }
 0xa62   :  { %v9622_v22 = vpop.permute.xlu0 %9621  ;;  %v3680_v29 = vadd.f32 %v3672_v32, %v3624_v11  ;;  %v3792_v9 = vadd.f32 %v3784_v33, %v3736_v45 }
 0xa63   :  { %v9624_v40 = vunpack.i.h.bf16 %v9622_v22  ;;  %v9623_v17 = vunpack.i.l.bf16 %v9622_v22 }
 0xa64   :  { %v3833_v20 = vpop.permute.xlu1 %3832  ;;  %v3688_v35 = vmul.f32 %v3680_v29, %v3576_v19  ;;  %v12451_v29 = vpop.f32.mrf.mxu1 }
 0xa65   :  { %v3977_v47 = vsel %vm3975_vm6, %v3921_v53, %v9624_v40  ;;  %v3976_v30 = vsel %vm3975_vm6, %v3920_v36, %v9623_v17  ;;  %v3848_v38 = vmul.f32 %v12326_v63, %v3833_v20  ;;  %v3923_v63 = vmul.f32 %v12404_v0, %v12371_v23 }
 0xa66   :  { %v3988_v26 = vpack.c.bf16 %v3977_v47, %v3976_v30  ;;  %v3800_v18 = vmul.f32 %v3792_v9, %v3688_v35  ;;  %v3924_v36 = vmul.f32 %v12404_v0, %v12394_v42  ;;  %v12453_v40 = vpop.f32.mrf.mxu1  ;;  %v9730_v47 = vld [vmem:[%s14910_s23] sm:$0xff]  }
 0xa67   :  { %9331 = vmatprep.subr.bf16.mxu1 %v9730_v47 }
 0xa68   :  { %v3881_v43 = vpop.permute.xlu1 %3880  ;;  %9323 = vmatprep.mubr.msk.bf16.mxu1 %vm226_vm3, %v3988_v26  ;;  %v12455_v17 = vpop.f32.mrf.mxu1 }
 0xa69   :  { %v3896_v48 = vmul.f32 %v12313_v27, %v3881_v43 }
 0xa6a   :  { %v12457_v33 = vpop.f32.mrf.mxu1 }
 0xa6b   :  { %v3904_v60 = vadd.f32 %v3896_v48, %v3848_v38 }
 0xa6d   :  { %v3912_v44 = vmul.f32 %v3904_v60, %v3800_v18 }
 0xa6f   :  { %v3942_v31 = vmul.f32 %v12339_v39, %v3912_v44  ;;  %v3927_v53 = vmul.f32 %v12404_v0, %v3912_v44  ;;  %v12459_v0 = vpop.f32.mrf.mxu1 }
 0xa71   :  { %v9635_v24 = vpack.i.bf16 %v3942_v31, %v3941_v21  ;;  %v12461_v50 = vpop.f32.mrf.mxu1 }
 0xa73   :  { %9636 = vrot.lane.b32.xlu1 %v9635_v24, %s10286_s18  ;;  %v12463_v20 = vpop.f32.mrf.mxu1 }
 0xa8b   :  { %v9627_v51 = vpop.permute.xlu1 %9626 }
 0xa8c   :  { %v9629_v14 = vunpack.i.h.bf16 %v9627_v51  ;;  %v9628_v27 = vunpack.i.l.bf16 %v9627_v51 }
 0xa8e   :  { %v3978_v46 = vsel %vm3975_vm6, %v3922_v56, %v9628_v27  ;;  %v3979_v2 = vsel %vm3975_vm6, %v3923_v63, %v9629_v14 }
 0xa8f   :  { %v3989_v57 = vpack.c.bf16 %v3979_v2, %v3978_v46 }
 0xa91   :  { %9324 = vmatmul.mubr.msk.bf16.vlgmr.msra.gmra.mxu1 %vm226_vm3, %v3989_v57 }
 0xa92   :  { %9332 = vmatpush3.bf16.msra.mxu1 %v9730_v47 }
 0xabb   :  { %v9632_v39 = vpop.permute.xlu0 %9631 }
 0xabc   :  { %v9634_v25 = vunpack.i.h.bf16 %v9632_v39  ;;  %v9633_v32 = vunpack.i.l.bf16 %v9632_v39 }
 0xabe   :  { %v3981_v23 = vsel %vm3975_vm6, %v3925_v5, %v9634_v25  ;;  %v3980_v11 = vsel %vm3975_vm6, %v3924_v36, %v9633_v32 }
 0xabf   :  { %v3990_v55 = vpack.c.bf16 %v3981_v23, %v3980_v11 }
 0xac1   :  { %9327 = vmatprep.mubr.msk.bf16.mxu1 %vm226_vm3, %v3990_v55 }
 0xae5   :  { %v9637_v1 = vpop.permute.xlu1 %9636 }
 0xae6   :  { %v9639_v8 = vunpack.i.h.bf16 %v9637_v1  ;;  %v9638_v42 = vunpack.i.l.bf16 %v9637_v1  ;;  %v1436_v1 = vsub.f32 0.0, %v9313_v13 }
 0xae8   :  { %v3983_v41 = vsel %vm3975_vm6, %v3927_v53, %v9639_v8  ;;  %v3982_v37 = vsel %vm3975_vm6, %v3926_v4, %v9638_v42  ;;  %v1434_v4 = vsub.f32 0.0, %v12451_v29  ;;  %v1446_v53 = vmul.f32 1.442695, %v1436_v1 }
 0xae9   :  { %v3991_v22 = vpack.c.bf16 %v3983_v41, %v3982_v37  ;;  %v1437_v8 = vsub.f32 0.0, %v12453_v40  ;;  %v1435_v41 = vsub.f32 0.0, %v12455_v17  ;;  %v9359_v40 = vpop.f32.mrf.mxu0  ;;  %v1438_v1 = vsub.f32 0.0, %v12459_v0 }
 0xaea   :  { %v1442_v42 = vmul.f32 1.442695, %v1434_v4  ;;  %9916 = vpow2.f32 %v1446_v53  ;;  %v1441_v53 = vsub.f32 0.0, %v12461_v50 }
 0xaeb   :  { %9328 = vmatmul.mubr.msk.bf16.gmra.mxu1 %vm226_vm3, %v3991_v22  ;;  %v1448_v37 = vmul.f32 1.442695, %v1437_v8  ;;  %v1444_v22 = vmul.f32 1.442695, %v1435_v41  ;;  %v4320_v17 = vpop.f32.mrf.mxu0  ;;  %v1450_v8 = vmul.f32 1.442695, %v1438_v1 }
 0xaec   :  { %9918 = vpow2.f32 %v1442_v42  ;;  %v1439_v42 = vsub.f32 0.0, %v12463_v20  ;;  %v1456_v41 = vmul.f32 1.442695, %v1441_v53 }
 0xaed   :  { %9920 = vpow2.f32 %v1448_v37 }
 0xaee   :  { %9922 = vpow2.f32 %v1444_v22  ;;  %v1452_v37 = vmul.f32 1.442695, %v1439_v42 }
 0xb51   :  { %v9325_v3 = vpop.f32.mrf.mxu1 }
 0xb52   :  { %v4083_v45 = vmul.f32 %v9325_v3, %v9325_v3  ;;  %v9917_v3 = vpop.eup %9916 }
 0xb53   :  { %v4050_v19 = vpop.f32.mrf.mxu1  ;;  %v1460_v47 = vadd.f32 1.0, %v9917_v3 }
 0xb54   :  { %v4081_v30 = vmul.f32 %v4050_v19, %v4050_v19  ;;  %v9919_v19 = vpop.eup %9918 }
 0xb55   :  { %v9326_v26 = vpop.f32.mrf.mxu1  ;;  %9924 = vrcp.f32 %v1460_v47 }
 0xb56   :  { %4097 = vrot.lane.b32.xlu0 %v4081_v30, %s10287_s26  ;;  %v4084_v35 = vmul.f32 %v9326_v26, %v9326_v26  ;;  %v1458_v26 = vadd.f32 1.0, %v9919_v19 }
 0xb57   :  { %v4053_v34 = vpop.f32.mrf.mxu1 }
 0xb58   :  { %v4082_v61 = vmul.f32 %v4053_v34, %v4053_v34  ;;  %9926 = vrcp.f32 %v1458_v26 }
 0xb5a   :  { %4101 = vrot.lane.b32.xlu0 %v4083_v45, %s10287_s26  ;;  %4099 = vrot.lane.b32.xlu1 %v4082_v61, %s10287_s26 }
 0xb5e   :  { %4103 = vrot.lane.b32.xlu1 %v4084_v35, %s10287_s26 }
 0xbab   :  { %v9329_v43 = vpop.f32.mrf.mxu1 }
 0xbac   :  { %v4087_v28 = vmul.f32 %v9329_v43, %v9329_v43 }
 0xbad   :  { %v4066_v9 = vpop.f32.mrf.mxu1 }
 0xbae   :  { %v4085_v54 = vmul.f32 %v4066_v9, %v4066_v9 }
 0xbaf   :  { %v9330_v38 = vpop.f32.mrf.mxu1 }
 0xbb0   :  { %4105 = vrot.lane.b32.xlu0 %v4085_v54, %s10287_s26  ;;  %v4088_v60 = vmul.f32 %v9330_v38, %v9330_v38 }
 0xbb1   :  { %v4069_v48 = vpop.f32.mrf.mxu1 }
 0xbb2   :  { %v4086_v18 = vmul.f32 %v4069_v48, %v4069_v48 }
 0xbb4   :  { %4109 = vrot.lane.b32.xlu0 %v4087_v28, %s10287_s26  ;;  %4107 = vrot.lane.b32.xlu1 %v4086_v18, %s10287_s26 }
 0xbb8   :  { %4111 = vrot.lane.b32.xlu1 %v4088_v60, %s10287_s26 }
 0xbc8   :  { %v4098_v44 = vpop.permute.xlu0 %4097 }
 0xbc9   :  { %v4121_v21 = vadd.f32 %v4098_v44, %v4081_v30  ;;  %v9921_v30 = vpop.eup %9920 }
 0xbca   :  { %v9923_v13 = vpop.eup %9922  ;;  %v1461_v29 = vadd.f32 1.0, %v9921_v30 }
 0xbcb   :  { %v1459_v34 = vadd.f32 1.0, %v9923_v13  ;;  %v9925_v9 = vpop.eup %9924 }
 0xbcc   :  { %v4100_v31 = vpop.permute.xlu1 %4099  ;;  %v4102_v51 = vpop.permute.xlu0 %4101  ;;  %9928 = vrcp.f32 %v1461_v29 }
 0xbcd   :  { %v4122_v24 = vadd.f32 %v4100_v31, %v4082_v61  ;;  %v4123_v14 = vadd.f32 %v4102_v51, %v4083_v45  ;;  %9930 = vrcp.f32 %v1459_v34  ;;  %v9927_v38 = vpop.eup %9926 }
 0xbcf   :  { %v4151_v56 = vpack.c.bf16 %v4122_v24, %v4121_v21  ;;  %v14911_v24 = vld [vmem:[#allocation30_spill] sm:$0xff] }
 0xbd0   :  { %v4104_v63 = vpop.permute.xlu1 %4103 }
 0xbd1   :  { %v4124_v27 = vadd.f32 %v4104_v63, %v4084_v35  ;;  %9333 = vmatprep.mubr.msk.bf16.mxu1 %vm3975_vm6, %v4151_v56  ;;  %v9360_v35 = vpop.f32.mrf.mxu0 }
 0xbd3   :  { %v4152_v46 = vpack.c.bf16 %v4124_v27, %v4123_v14  ;;  %v4323_v44 = vpop.f32.mrf.mxu0  ;;  %v14912_v14 = vld [vmem:[#allocation31_spill] sm:$0xff] }
 0xbd5   :  { %9334 = vmatmul.mubr.msk.bf16.vlgmr.msra.gmra.mxu1 %vm3975_vm6, %v4152_v46  ;;  %v9363_v50 = vpop.f32.mrf.mxu0 }
 0xbd7   :  { %v4336_v20 = vpop.f32.mrf.mxu0 }
 0xbd9   :  { %v9929_v21 = vpop.eup %9928  ;;  %v9364_v34 = vpop.f32.mrf.mxu0 }
 0xbda   :  { %v9931_v63 = vpop.eup %9930 }
 0xc22   :  { %v4106_v2 = vpop.permute.xlu0 %4105 }
 0xc23   :  { %v4125_v39 = vadd.f32 %v4106_v2, %v4085_v54 }
 0xc26   :  { %v4108_v57 = vpop.permute.xlu1 %4107  ;;  %v4110_v5 = vpop.permute.xlu0 %4109 }
 0xc27   :  { %v4126_v36 = vadd.f32 %v4108_v57, %v4086_v18  ;;  %v4127_v23 = vadd.f32 %v4110_v5, %v4087_v28  ;;  %v14914_v5 = vld [vmem:[#allocation33_spill] sm:$0xff] }
 0xc29   :  { %v4153_v25 = vpack.c.bf16 %v4126_v36, %v4125_v39  ;;  %v14913_v39 = vld [vmem:[#allocation32_spill] sm:$0xff] }
 0xc2a   :  { %v4112_v32 = vpop.permute.xlu1 %4111 }
 0xc2b   :  { %v4128_v11 = vadd.f32 %v4112_v32, %v4088_v60  ;;  %9337 = vmatprep.mubr.msk.bf16.mxu1 %vm3975_vm6, %v4153_v25 }
 0xc2d   :  { %v4154_v55 = vpack.c.bf16 %v4128_v11, %v4127_v23 }
 0xc2f   :  { %9338 = vmatmul.mubr.msk.bf16.gmra.mxu1 %vm3975_vm6, %v4154_v55  ;;  %v1440_v55 = vsub.f32 0.0, %v12457_v33 }
 0xc31   :  { %v1454_v4 = vmul.f32 1.442695, %v1440_v55 }
 0xc33   :  { %9932 = vpow2.f32 %v1454_v4 }
 0xc34   :  { %9934 = vpow2.f32 %v1450_v8 }
 0xc35   :  { %9936 = vpow2.f32 %v1456_v41 }
 0xc36   :  { %9938 = vpow2.f32 %v1452_v37 }
 0xc40   :  { %v9933_v22 = vpop.eup %9932 }
 0xc41   :  { %v9935_v3 = vpop.eup %9934  ;;  %v1464_v19 = vadd.f32 1.0, %v9933_v22 }
 0xc42   :  { %v9937_v47 = vpop.eup %9936  ;;  %v1462_v30 = vadd.f32 1.0, %v9935_v3 }
 0xc43   :  { %v9939_v33 = vpop.eup %9938  ;;  %9940 = vrcp.f32 %v1464_v19  ;;  %v1465_v0 = vadd.f32 1.0, %v9937_v47 }
 0xc44   :  { %9942 = vrcp.f32 %v1462_v30  ;;  %v1463_v26 = vadd.f32 1.0, %v9939_v33 }
 0xc45   :  { %9944 = vrcp.f32 %v1465_v0 }
 0xc46   :  { %9946 = vrcp.f32 %v1463_v26 }
 0xc95   :  { %v9335_v45 = vpop.f32.mrf.mxu1 }
 0xc96   :  { %v4329_v61 = vadd.f32 %v9359_v40, %v9335_v45 }
 0xc97   :  { %v4207_v43 = vpop.f32.mrf.mxu1 }
 0xc98   :  { %v4321_v54 = vadd.f32 %v4320_v17, %v4207_v43  ;;  %v4353_v28 = vmul.f32 %v9925_v9, %v4329_v61  ;;  %v9941_v17 = vpop.eup %9940 }
 0xc99   :  { %v9336_v48 = vpop.f32.mrf.mxu1  ;;  %v9943_v61 = vpop.eup %9942 }
 0xc9a   :  { %v4351_v18 = vmul.f32 %v9927_v38, %v4321_v54  ;;  %v4332_v60 = vadd.f32 %v9360_v35, %v9336_v48  ;;  %v12485_v27 = vadd.f32 %v4353_v28, %v14912_v14  ;;  %v4339_v38 = vpop.f32.mrf.mxu0  ;;  %v9945_v28 = vpop.eup %9944 }
 0xc9b   :  { %v4210_v31 = vpop.f32.mrf.mxu1 }
 0xc9c   :  { %v12482_v51 = vadd.f32 %v4351_v18, %v14911_v24  ;;  %v4324_v56 = vadd.f32 %v4323_v44, %v4210_v31  ;;  %v4354_v46 = vmul.f32 %v9929_v21, %v4332_v60  ;;  %v4378_v32 = vsel %vm226_vm3, %v12485_v27, 0.0  ;;  %v14915_v18 = vld [vmem:[#allocation34_spill] sm:$0xff]  ;;  %v9947_v31 = vpop.eup %9946  ;;  %v14916_v21 = vld [vmem:[#allocation35_spill] sm:$0xff] }
 0xc9e   :  { %v4352_v2 = vmul.f32 %v9931_v63, %v4324_v56  ;;  %v4372_v57 = vsel %vm226_vm3, %v12482_v51, 0.0  ;;  %v12493_v25 = vadd.f32 %v4354_v46, %v14914_v5  ;;  %v14917_v46 = vld [vmem:[#allocation36_spill] sm:$0xff] }
 0xc9f   :  { %4373 = vadd.xlane.f32.xlu0 %v4372_v57  ;;  %v14918_v57 = vld [vmem:[#allocation37_spill] sm:$0xff] }
 0xca0   :  { %v12490_v36 = vadd.f32 %v4352_v2, %v14913_v39  ;;  %v4381_v11 = vsel %vm226_vm3, %v12493_v25, 0.0 }
 0xca2   :  { %v4375_v23 = vsel %vm226_vm3, %v12490_v36, 0.0 }
 0xca3   :  { %4379 = vadd.xlane.f32.xlu0 %v4378_v32  ;;  %4376 = vadd.xlane.f32.xlu1 %v4375_v23 }
 0xca7   :  { %4382 = vadd.xlane.f32.xlu0 %v4381_v11 }
 0xcef   :  { %v9339_v13 = vpop.f32.mrf.mxu1 }
 0xcf0   :  { %v4345_v29 = vadd.f32 %v9363_v50, %v9339_v13 }
 0xcf1   :  { %v4223_v40 = vpop.f32.mrf.mxu1 }
 0xcf2   :  { %v4337_v45 = vadd.f32 %v4336_v20, %v4223_v40  ;;  %v4357_v43 = vmul.f32 %v9941_v17, %v4345_v29  ;;  %v9731_v29 = vld [vmem:[%s10337_s3 + $0x18] sm:$0xff]  }
 0xcf3   :  { %v9340_v35 = vpop.f32.mrf.mxu1  ;;  %9365 = vmatprep.subr.bf16.mxu1 %v9731_v29 }
 0xcf4   :  { %v4355_v9 = vmul.f32 %v9943_v61, %v4337_v45  ;;  %v4348_v54 = vadd.f32 %v9364_v34, %v9340_v35  ;;  %v12509_v24 = vadd.f32 %v4357_v43, %v14916_v21  ;;  %v9732_v34 = vld [vmem:[%s10337_s3 + $0x10] sm:$0xff]   ;;  %9366 = vmatpush3.bf16.msra.mxu1 %v9731_v29 }
 0xcf5   :  { %v4226_v48 = vpop.f32.mrf.mxu1  ;;  %9367 = vmatprep.subr.bf16.mxu1 %v9732_v34 }
 0xcf6   :  { %v12506_v60 = vadd.f32 %v4355_v9, %v14915_v18  ;;  %v4340_v44 = vadd.f32 %v4339_v38, %v4226_v48  ;;  %v4358_v56 = vmul.f32 %v9945_v28, %v4348_v54  ;;  %v4390_v5 = vsel %vm226_vm3, %v12509_v24, 0.0 }
 0xcf8   :  { %v4356_v63 = vmul.f32 %v9947_v31, %v4340_v44  ;;  %v4384_v14 = vsel %vm226_vm3, %v12506_v60, 0.0  ;;  %v12517_v39 = vadd.f32 %v4358_v56, %v14918_v57  ;;  %9368 = vmatpush3.bf16.msra.mxu1 %v9732_v34  ;;  %v8996_v34 = vld [vmem:[%s10322_s21 + $0x1] ss:$0 sm:$0xff]  ;;  %s15022_s21 = sld [smem:[#allocation21_spill]] }
 0xcf9   :  { %4385 = vadd.xlane.f32.xlu1 %v4384_v14 }
 0xcfa   :  { %v12514_v2 = vadd.f32 %v4356_v63, %v14917_v46  ;;  %v4393_v23 = vsel %vm226_vm3, %v12517_v39, 0.0 }
 0xcfc   :  { %v4387_v32 = vsel %vm226_vm3, %v12514_v2, 0.0 }
 0xcfd   :  { %4391 = vadd.xlane.f32.xlu1 %v4390_v5  ;;  %4388 = vadd.xlane.f32.xlu0 %v4387_v32 }
 0xd01   :  { %4394 = vadd.xlane.f32.xlu0 %v4393_v23 }
 0xd28   :  { %v4374_v11 = vpop.xlane.xlu0 %4373 }
 0xd29   :  { %v4396_v55 = vmul.f32 0.03125, %v4374_v11 }
 0xd2b   :  { %v12526_v1 = vsub.f32 %v12482_v51, %v4396_v55 }
 0xd2c   :  { %v4380_v4 = vpop.xlane.xlu0 %4379  ;;  %v4377_v53 = vpop.xlane.xlu1 %4376 }
 0xd2d   :  { %v4398_v8 = vmul.f32 0.03125, %v4380_v4  ;;  %v4397_v42 = vmul.f32 0.03125, %v4377_v53  ;;  %v4412_v41 = vmul.f32 %v12526_v1, %v12526_v1 }
 0xd2f   :  { %v12531_v37 = vsub.f32 %v12485_v27, %v4398_v8  ;;  %v12534_v22 = vsub.f32 %v12490_v36, %v4397_v42  ;;  %v4420_v3 = vsel %vm226_vm3, %v4412_v41, 0.0 }
 0xd30   :  { %v4383_v19 = vpop.xlane.xlu0 %4382  ;;  %4421 = vadd.xlane.f32.xlu1 %v4420_v3 }
 0xd31   :  { %v4399_v47 = vmul.f32 0.03125, %v4383_v19  ;;  %v4414_v30 = vmul.f32 %v12531_v37, %v12531_v37  ;;  %v4413_v33 = vmul.f32 %v12534_v22, %v12534_v22 }
 0xd33   :  { %v12542_v0 = vsub.f32 %v12493_v25, %v4399_v47  ;;  %v4426_v26 = vsel %vm226_vm3, %v4414_v30, 0.0  ;;  %v4423_v50 = vsel %vm226_vm3, %v4413_v33, 0.0  ;;  %v8995_v33 = vld [vmem:[%s10317_s17 + $0x1] ss:$0 sm:$0xff]  ;;  %s15016_s17 = sld [smem:[#allocation23_spill]] }
 0xd34   :  { %4427 = vadd.xlane.f32.xlu1 %v4426_v26  ;;  %4424 = vadd.xlane.f32.xlu0 %v4423_v50 }
 0xd35   :  { %v4415_v20 = vmul.f32 %v12542_v0, %v12542_v0 }
 0xd37   :  { %v4429_v13 = vsel %vm226_vm3, %v4415_v20, 0.0 }
 0xd38   :  { %4430 = vadd.xlane.f32.xlu0 %v4429_v13 }
 0xd82   :  { %v4386_v40 = vpop.xlane.xlu1 %4385 }
 0xd83   :  { %v4400_v17 = vmul.f32 0.03125, %v4386_v40 }
 0xd85   :  { %v12552_v45 = vsub.f32 %v12506_v60, %v4400_v17 }
 0xd86   :  { %v4389_v61 = vpop.xlane.xlu0 %4388  ;;  %v4392_v35 = vpop.xlane.xlu1 %4391 }
 0xd87   :  { %v4401_v43 = vmul.f32 0.03125, %v4389_v61  ;;  %v4402_v9 = vmul.f32 0.03125, %v4392_v35  ;;  %v4416_v54 = vmul.f32 %v12552_v45, %v12552_v45 }
 0xd89   :  { %v12557_v38 = vsub.f32 %v12514_v2, %v4401_v43  ;;  %v12560_v48 = vsub.f32 %v12509_v24, %v4402_v9  ;;  %v4432_v28 = vsel %vm226_vm3, %v4416_v54, 0.0 }
 0xd8a   :  { %v4395_v18 = vpop.xlane.xlu0 %4394  ;;  %4433 = vadd.xlane.f32.xlu1 %v4432_v28 }
 0xd8b   :  { %v4403_v44 = vmul.f32 0.03125, %v4395_v18  ;;  %v4417_v31 = vmul.f32 %v12557_v38, %v12557_v38  ;;  %v4418_v21 = vmul.f32 %v12560_v48, %v12560_v48 }
 0xd8d   :  { %v12568_v56 = vsub.f32 %v12517_v39, %v4403_v44  ;;  %v4435_v63 = vsel %vm226_vm3, %v4417_v31, 0.0  ;;  %v4438_v14 = vsel %vm226_vm3, %v4418_v21, 0.0 }
 0xd8e   :  { %4436 = vadd.xlane.f32.xlu0 %v4435_v63  ;;  %4439 = vadd.xlane.f32.xlu1 %v4438_v14 }
 0xd8f   :  { %v4419_v46 = vmul.f32 %v12568_v56, %v12568_v56 }
 0xd91   :  { %v4441_v57 = vsel %vm226_vm3, %v4419_v46, 0.0 }
 0xd92   :  { %4442 = vadd.xlane.f32.xlu0 %v4441_v57 }
 0xdb9   :  { %v4422_v5 = vpop.xlane.xlu1 %4421 }
 0xdba   :  { %v4444_v32 = vmul.f32 0.03125, %v4422_v5 }
 0xdbc   :  { %v4452_v23 = vadd.f32 1e-05, %v4444_v32 }
 0xdbd   :  { %v4425_v11 = vpop.xlane.xlu0 %4424  ;;  %v4428_v55 = vpop.xlane.xlu1 %4427 }
 0xdbe   :  { %9948 = vrsqrt.f32 %v4452_v23  ;;  %v4445_v4 = vmul.f32 0.03125, %v4425_v11  ;;  %v4446_v53 = vmul.f32 0.03125, %v4428_v55 }
 0xdc0   :  { %v4453_v8 = vadd.f32 1e-05, %v4445_v4  ;;  %v4454_v42 = vadd.f32 1e-05, %v4446_v53 }
 0xdc1   :  { %v4431_v41 = vpop.xlane.xlu0 %4430 }
 0xdc2   :  { %9950 = vrsqrt.f32 %v4453_v8  ;;  %v4447_v3 = vmul.f32 0.03125, %v4431_v41 }
 0xdc3   :  { %9952 = vrsqrt.f32 %v4454_v42 }
 0xdc4   :  { %v4455_v19 = vadd.f32 1e-05, %v4447_v3 }
 0xdc6   :  { %9954 = vrsqrt.f32 %v4455_v19 }
 0xdcb   :  { %v9949_v47 = vpop.eup %9948 }
 0xdcc   :  { %v4468_v30 = vmul.f32 %v9949_v47, %v12526_v1 }
 0xdce   :  { %v4482_v13 = vmul.f32 %v8995_v33, %v4468_v30 }
 0xdcf   :  { %v9951_v26 = vpop.eup %9950 }
 0xdd0   :  { %v9953_v50 = vpop.eup %9952  ;;  %v4469_v20 = vmul.f32 %v9951_v26, %v12534_v22  ;;  %v4496_v43 = vadd.f32 %v8996_v34, %v4482_v13 }
 0xdd1   :  { %v4470_v29 = vmul.f32 %v9953_v50, %v12531_v37 }
 0xdd2   :  { %v4483_v40 = vmul.f32 %v8995_v33, %v4469_v20 }
 0xdd3   :  { %v9955_v17 = vpop.eup %9954  ;;  %v4484_v61 = vmul.f32 %v8995_v33, %v4470_v29 }
 0xdd4   :  { %v4471_v35 = vmul.f32 %v9955_v17, %v12542_v0  ;;  %v4497_v9 = vadd.f32 %v8996_v34, %v4483_v40 }
 0xdd5   :  { %v4498_v1 = vadd.f32 %v8996_v34, %v4484_v61 }
 0xdd6   :  { %v4485_v54 = vmul.f32 %v8995_v33, %v4471_v35  ;;  %v4509_v28 = vpack.c.bf16 %v4497_v9, %v4496_v43  ;;  %v12598_v35 = vld [vmem:[%s10332_s29 + $0x1] ss:$0 sm:$0xff]  ;;  %s10288_s29 = smov [#allocation8]  }
 0xdd7   :  { %s8802_s3 = sshll.u32 %s10288_s29, 4  ;;  %s8803_s3 = int_to_ptr.vmem [resolvable:$true] %s8802_s3 }
 0xdd8   :  { %9369 = vmatprep.mubr.msk.bf16.mxu1 %vm226_vm3, %v4509_v28  ;;  %v4499_v18 = vadd.f32 %v8996_v34, %v4485_v54  ;;  %p10161_p1 = scmp.lt.s32.totalorder %s8803_s3, %s8803_s3 }
 0xdda   :  { %v4510_v44 = vpack.c.bf16 %v4499_v18, %v4498_v1 }
 0xddc   :  { %9370 = vmatmul.mubr.msk.bf16.vlgmr.msra.gmra.mxu1 %vm226_vm3, %v4510_v44 }
 0xe13   :  { %v4434_v22 = vpop.xlane.xlu1 %4433 }
 0xe14   :  { %v4448_v31 = vmul.f32 0.03125, %v4434_v22 }
 0xe16   :  { %v4456_v37 = vadd.f32 1e-05, %v4448_v31 }
 0xe17   :  { %v4437_v21 = vpop.xlane.xlu0 %4436  ;;  %v4440_v63 = vpop.xlane.xlu1 %4439 }
 0xe18   :  { %9956 = vrsqrt.f32 %v4456_v37  ;;  %v4449_v14 = vmul.f32 0.03125, %v4437_v21  ;;  %v4450_v46 = vmul.f32 0.03125, %v4440_v63 }
 0xe1a   :  { %v4457_v0 = vadd.f32 1e-05, %v4449_v14  ;;  %v4458_v57 = vadd.f32 1e-05, %v4450_v46 }
 0xe1b   :  { %v4443_v5 = vpop.xlane.xlu0 %4442 }
 0xe1c   :  { %9958 = vrsqrt.f32 %v4457_v0  ;;  %v4451_v32 = vmul.f32 0.03125, %v4443_v5 }
 0xe1d   :  { %9960 = vrsqrt.f32 %v4458_v57 }
 0xe1e   :  { %v4459_v23 = vadd.f32 1e-05, %v4451_v32 }
 0xe20   :  { %9962 = vrsqrt.f32 %v4459_v23 }
 0xe25   :  { %v9957_v11 = vpop.eup %9956 }
 0xe26   :  { %v4472_v55 = vmul.f32 %v9957_v11, %v12552_v45 }
 0xe28   :  { %v4486_v42 = vmul.f32 %v8995_v33, %v4472_v55 }
 0xe29   :  { %v9959_v4 = vpop.eup %9958 }
 0xe2a   :  { %v9961_v53 = vpop.eup %9960  ;;  %v4473_v8 = vmul.f32 %v9959_v4, %v12557_v38  ;;  %v4500_v47 = vadd.f32 %v8996_v34, %v4486_v42  ;;  %v12590_v38 = vld [vmem:[%s10327_s25 + $0x1] ss:$0 sm:$0xff]  ;;  %s15023_s25 = sld [smem:[#allocation22_spill]] }
 0xe2b   :  { %v4474_v41 = vmul.f32 %v9961_v53, %v12560_v48  ;;  %v4660_v48 = vsub.f32 -1e+38, %v12590_v38 }
 0xe2c   :  { %v4487_v3 = vmul.f32 %v8995_v33, %v4473_v8 }
 0xe2d   :  { %v9963_v19 = vpop.eup %9962  ;;  %v4488_v50 = vmul.f32 %v8995_v33, %v4474_v41 }
 0xe2e   :  { %v4501_v30 = vadd.f32 %v8996_v34, %v4487_v3  ;;  %v4475_v26 = vmul.f32 %v9963_v19, %v12568_v56 }
 0xe2f   :  { %v4502_v45 = vadd.f32 %v8996_v34, %v4488_v50 }
 0xe30   :  { %v4511_v20 = vpack.c.bf16 %v4501_v30, %v4500_v47  ;;  %v4489_v13 = vmul.f32 %v8995_v33, %v4475_v26 }
 0xe32   :  { %9373 = vmatprep.mubr.msk.bf16.mxu1 %vm226_vm3, %v4511_v20  ;;  %v4503_v29 = vadd.f32 %v8996_v34, %v4489_v13 }
 0xe34   :  { %v4512_v40 = vpack.c.bf16 %v4503_v29, %v4502_v45 }
 0xe36   :  { %9374 = vmatmul.mubr.msk.bf16.gmra.mxu1 %vm226_vm3, %v4512_v40 }
 0xe9c   :  { %v12593_v17 = vpop.f32.mrf.mxu1 }
 0xe9d   :  { %v4770_v22 = vadd.f32 %v12593_v17, %v12598_v35 }
 0xe9e   :  { %v12595_v61 = vpop.f32.mrf.mxu1 }
 0xe9f   :  { %v12601_v56 = vmax.f32 %v4660_v48, %v12595_v61  ;;  %v12605_v33 = vadd.f32 %v12598_v35, %v12595_v61 }
 0xea0   :  { %v12607_v34 = vpop.f32.mrf.mxu1 }
 0xea1   :  { %v4665_v43 = vsub.f32 %v12595_v61, %v12601_v56  ;;  %v4664_v54 = vsub.f32 %v4660_v48, %v12601_v56  ;;  %v4653_v28 = vmax.f32 %v12605_v33, -1e+38  ;;  %v4710_v1 = vsub.f32 %v12601_v56, %v12590_v38 }
 0xea2   :  { %v12611_v9 = vpop.f32.mrf.mxu1  ;;  %v4832_v57 = vadd.f32 %v12607_v34, %v12598_v35 }
 0xea3   :  { %4675 = vrot.lane.b32.xlu1 %v4665_v43, %s10274_s9  ;;  %v4708_v18 = vadd.f32 %v12598_v35, %v12611_v9  ;;  %4671 = vrot.lane.b32.xlu0 %v4664_v54, %s10272_s0  ;;  %v12622_v44 = vmax.f32 %v4710_v1, %v12611_v9  ;;  %v4663_v31 = vsub.f32 %v12605_v33, %v4653_v28 }
 0xea5   :  { %v12630_v37 = vmax.f32 %v12601_v56, %v4708_v18  ;;  %v4714_v21 = vsub.f32 %v4710_v1, %v12622_v44  ;;  %v12634_v63 = vmax.f32 %v12622_v44, %v4770_v22  ;;  %v4772_v14 = vsub.f32 %v12622_v44, %v12590_v38 }
 0xea6   :  { %v4715_v32 = vsub.f32 %v12611_v9, %v12622_v44 }
 0xea7   :  { %4667 = vrot.lane.b32.xlu1 %v4663_v31, %s10273_s5  ;;  %v4712_v46 = vsub.f32 %v12601_v56, %v12630_v37  ;;  %4721 = vrot.lane.b32.xlu0 %v4714_v21, %s10272_s0  ;;  %v12643_v0 = vmax.f32 %v4772_v14, %v12593_v17  ;;  %v4774_v5 = vsub.f32 %v12622_v44, %v12634_v63 }
 0xea8   :  { %v4775_v23 = vsub.f32 %v4770_v22, %v12634_v63  ;;  %v4713_v53 = vsub.f32 %v4708_v18, %v12630_v37 }
 0xea9   :  { %v4834_v11 = vsub.f32 %v12643_v0, %v12590_v38  ;;  %v12655_v55 = vmax.f32 %v12643_v0, %v4832_v57  ;;  %v4777_v8 = vsub.f32 %v12593_v17, %v12643_v0  ;;  %v4776_v41 = vsub.f32 %v4772_v14, %v12643_v0 }
 0xeab   :  { %4725 = vrot.lane.b32.xlu1 %v4715_v32, %s10274_s9  ;;  %4779 = vrot.lane.b32.xlu0 %v4775_v23, %s10273_s5  ;;  %v4836_v4 = vsub.f32 %v12643_v0, %v12655_v55  ;;  %v12665_v42 = vmax.f32 %v4834_v11, %v12607_v34  ;;  %v4837_v19 = vsub.f32 %v4832_v57, %v12655_v55 }
 0xead   :  { %v4838_v3 = vsub.f32 %v4834_v11, %v12665_v42  ;;  %v4839_v47 = vsub.f32 %v12607_v34, %v12665_v42  ;;  %v4896_v26 = vsub.f32 %v12665_v42, %v12590_v38 }
 0xeaf   :  { %4717 = vrot.lane.b32.xlu1 %v4713_v53, %s10273_s5  ;;  %4787 = vrot.lane.b32.xlu0 %v4777_v8, %s10274_s9 }
 0xeb3   :  { %4783 = vrot.lane.b32.xlu1 %v4776_v41, %s10272_s0  ;;  %4845 = vrot.lane.b32.xlu0 %v4838_v3, %s10272_s0 }
 0xeb7   :  { %4841 = vrot.lane.b32.xlu1 %v4837_v19, %s10273_s5 }
 0xebb   :  { %4849 = vrot.lane.b32.xlu1 %v4839_v47, %s10274_s9 }
 0xef6   :  { %v12678_v30 = vpop.f32.mrf.mxu1 }
 0xef7   :  { %v5018_v22 = vadd.f32 %v12678_v30, %v12598_v35 }
 0xef8   :  { %v12682_v50 = vpop.f32.mrf.mxu1 }
 0xef9   :  { %v12685_v20 = vmax.f32 %v4896_v26, %v12682_v50  ;;  %v4894_v13 = vadd.f32 %v12598_v35, %v12682_v50 }
 0xefa   :  { %v12689_v45 = vpop.f32.mrf.mxu1 }
 0xefb   :  { %14919 = vst [vmem:[#allocation46_spill] sm:$0xff] %v12689_v45  ;;  %v4901_v29 = vsub.f32 %v12682_v50, %v12685_v20  ;;  %v4900_v48 = vsub.f32 %v4896_v26, %v12685_v20  ;;  %v12697_v43 = vmax.f32 %v12665_v42, %v4894_v13  ;;  %v4958_v54 = vsub.f32 %v12685_v20, %v12590_v38 }
 0xefc   :  { %v12693_v40 = vpop.f32.mrf.mxu1  ;;  %v12728_v53 = vadd.f32 %v12689_v45, %v12598_v35 }
 0xefd   :  { %4911 = vrot.lane.b32.xlu0 %v4901_v29, %s10274_s9  ;;  %v4956_v1 = vadd.f32 %v12598_v35, %v12693_v40  ;;  %4907 = vrot.lane.b32.xlu1 %v4900_v48, %s10272_s0  ;;  %v12706_v18 = vmax.f32 %v4958_v54, %v12693_v40  ;;  %v4899_v31 = vsub.f32 %v4894_v13, %v12697_v43 }
 0xeff   :  { %v12712_v21 = vmax.f32 %v12685_v20, %v4956_v1  ;;  %v12715_v14 = vmax.f32 %v12706_v18, %v5018_v22  ;;  %v5020_v57 = vsub.f32 %v12706_v18, %v12590_v38  ;;  %v4962_v41 = vsub.f32 %v4958_v54, %v12706_v18 }
 0xf00   :  { %v4963_v35 = vsub.f32 %v12693_v40, %v12706_v18 }
 0xf01   :  { %4903 = vrot.lane.b32.xlu0 %v4899_v31, %s10273_s5  ;;  %v4961_v32 = vsub.f32 %v4956_v1, %v12712_v21  ;;  %v4960_v23 = vsub.f32 %v12685_v20, %v12712_v21  ;;  %v12724_v11 = vmax.f32 %v5020_v57, %v12678_v30  ;;  %v5022_v8 = vsub.f32 %v12706_v18, %v12715_v14 }
 0xf02   :  { %v5023_v13 = vsub.f32 %v5018_v22, %v12715_v14  ;;  %v4662_v1 = vsub.f32 -1e+38, %v4653_v28 }
 0xf03   :  { %4965 = vrot.lane.b32.xlu1 %v4961_v32, %s10273_s5  ;;  %v5082_v3 = vsub.f32 %v12724_v11, %v12590_v38  ;;  %v12738_v19 = vmax.f32 %v12724_v11, %v12728_v53  ;;  %v5024_v38 = vsub.f32 %v5020_v57, %v12724_v11  ;;  %v5025_v29 = vsub.f32 %v12678_v30, %v12724_v11 }
 0xf05   :  { %4969 = vrot.lane.b32.xlu0 %v4962_v41, %s10272_s0  ;;  %v5083_v47 = vmax.f32 %v5082_v3, %v12689_v45  ;;  %v5084_v26 = vsub.f32 %v12724_v11, %v12738_v19  ;;  %v5085_v55 = vsub.f32 %v12728_v53, %v12738_v19 }
 0xf07   :  { %4973 = vrot.lane.b32.xlu1 %v4963_v35, %s10274_s9  ;;  %5155 = vst.msk [vmem:[#allocation7 + $0x8] sm:$0xff] %vm226_vm3, %v5083_v47 }
 0xf09   :  { %5027 = vrot.lane.b32.xlu0 %v5023_v13, %s10273_s5 }
 0xf0b   :  { %5031 = vrot.lane.b32.xlu1 %v5024_v38, %s10272_s0 }
 0xf0d   :  { %5035 = vrot.lane.b32.xlu0 %v5025_v29, %s10274_s9 }
 0xf0f   :  { %4699 = vrot.lane.b32.xlu1 %v12595_v61, %s10272_s0 }
 0xf11   :  { %4759 = vrot.lane.b32.xlu0 %v12611_v9, %s10272_s0 }
 0xf13   :  { %4821 = vrot.lane.b32.xlu1 %v12593_v17, %s10272_s0 }
 0xf15   :  { %4883 = vrot.lane.b32.xlu0 %v12607_v34, %s10272_s0  ;;  %v4676_v48 = vpop.permute.xlu1 %4675  ;;  %v4672_v54 = vpop.permute.xlu0 %4671 }
 0xf17   :  { %4945 = vrot.lane.b32.xlu1 %v12682_v50, %s10272_s0 }
 0xf19   :  { %5007 = vrot.lane.b32.xlu0 %v12693_v40, %s10272_s0  ;;  %v4668_v22 = vpop.permute.xlu1 %4667  ;;  %v4722_v31 = vpop.permute.xlu0 %4721 }
 0xf1a   :  { %v4678_v57 = vsel %vm226_vm3, %v4662_v1, %v4668_v22 }
 0xf1b   :  { %v4679_v32 = vsel %vm14920_vm14, %v4678_v57, %v4672_v54  ;;  %5069 = vrot.lane.b32.xlu1 %v12678_v30, %s10272_s0  ;;  %vm14934_vm14 = vmmov %vm14932_vm0 }
 0xf1c   :  { %v4680_v41 = vsel %vm14921_vm5, %v4679_v32, %v4676_v48  ;;  %vm14935_vm5 = vmmov %vm14923_vm2 }
 0xf1d   :  { %v4681_v35 = vmul.f32 1.442695, %v4680_v41  ;;  %v4726_v13 = vpop.permute.xlu1 %4725  ;;  %v4780_v38 = vpop.permute.xlu0 %4779 }
 0xf1e   :  { %v4790_v54 = vsel %vm226_vm3, %v4774_v5, %v4780_v38  ;;  %v5086_v38 = vsub.f32 %v5082_v3, %v5083_v47 }
 0xf1f   :  { %9964 = vpow2.f32 %v4681_v35 }
 0xf21   :  { %v4718_v33 = vpop.permute.xlu1 %4717  ;;  %v4788_v57 = vpop.permute.xlu0 %4787 }
 0xf22   :  { %v4728_v28 = vsel %vm226_vm3, %v4712_v46, %v4718_v33 }
 0xf23   :  { %v4729_v29 = vsel %vm14922_vm12, %v4728_v28, %v4722_v31 }
 0xf24   :  { %v4730_v1 = vsel %vm14923_vm2, %v4729_v29, %v4726_v13 }
 0xf25   :  { %v4731_v48 = vmul.f32 1.442695, %v4730_v1  ;;  %v4784_v22 = vpop.permute.xlu1 %4783  ;;  %v4846_v44 = vpop.permute.xlu0 %4845  ;;  %v4898_v1 = vsub.f32 %v12665_v42, %v12697_v43 }
 0xf26   :  { %v4791_v32 = vsel %vm14924_vm1, %v4790_v54, %v4784_v22 }
 0xf27   :  { %9966 = vpow2.f32 %v4731_v48  ;;  %v4792_v41 = vsel %vm14925_vm4, %v4791_v32, %v4788_v57 }
 0xf28   :  { %v4793_v56 = vmul.f32 1.442695, %v4792_v41 }
 0xf29   :  { %v4842_v37 = vpop.permute.xlu1 %4841 }
 0xf2a   :  { %9968 = vpow2.f32 %v4793_v56  ;;  %v4852_v46 = vsel %vm226_vm3, %v4836_v4, %v4842_v37  ;;  %v5087_v4 = vsub.f32 %v12689_v45, %v5083_v47 }
 0xf2b   :  { %v4853_v63 = vsel %vm14926_vm13, %v4852_v46, %v4846_v44 }
 0xf2c   :  { %v12790_v31 = vpop.eup %9964 }
 0xf2d   :  { %4691 = vrot.lane.b32.xlu0 %v12790_v31, %s10274_s9  ;;  %v4850_v5 = vpop.permute.xlu1 %4849 }
 0xf2e   :  { %v4854_v35 = vsel %vm14927_vm11, %v4853_v63, %v4850_v5 }
 0xf2f   :  { %v4855_v13 = vmul.f32 1.442695, %v4854_v35 }
 0xf31   :  { %9970 = vpow2.f32 %v4855_v13  ;;  %5093 = vrot.lane.b32.xlu0 %v5086_v38, %s10272_s0 }
 0xf34   :  { %v12797_v33 = vpop.eup %9966 }
 0xf35   :  { %4750 = vrot.lane.b32.xlu1 %v12797_v33, %s10274_s9 }
 0xf37   :  { %v12801_v0 = vpop.eup %9968 }
 0xf38   :  { %4812 = vrot.lane.b32.xlu0 %v12801_v0, %s10274_s9 }
 0xf39   :  { %5089 = vrot.lane.b32.xlu1 %v5085_v55, %s10273_s5 }
 0xf3d   :  { %5097 = vrot.lane.b32.xlu1 %v5087_v4, %s10274_s9 }
 0xf3e   :  { %v12810_v3 = vpop.eup %9970 }
 0xf3f   :  { %4874 = vrot.lane.b32.xlu0 %v12810_v3, %s10274_s9 }
 0xf6f   :  { %v4912_v28 = vpop.permute.xlu0 %4911  ;;  %v4908_v29 = vpop.permute.xlu1 %4907 }
 0xf73   :  { %v4904_v53 = vpop.permute.xlu0 %4903 }
 0xf74   :  { %v4914_v54 = vsel %vm226_vm3, %v4898_v1, %v4904_v53 }
 0xf75   :  { %v4915_v48 = vsel %vm14928_vm7, %v4914_v54, %v4908_v29  ;;  %v4966_v22 = vpop.permute.xlu1 %4965 }
 0xf76   :  { %v4916_v47 = vsel %vm14929_vm15, %v4915_v48, %v4912_v28  ;;  %v4976_v57 = vsel %vm226_vm3, %v4960_v23, %v4966_v22 }
 0xf77   :  { %v4917_v32 = vmul.f32 1.442695, %v4916_v47  ;;  %v4970_v41 = vpop.permute.xlu0 %4969 }
 0xf78   :  { %v4977_v56 = vsel %vm14930_vm10, %v4976_v57, %v4970_v41  ;;  %v4684_v57 = vmul.f32 %v12790_v31, %v12595_v61  ;;  %v4738_v41 = vmul.f32 %v12797_v33, %v12611_v9 }
 0xf79   :  { %9972 = vpow2.f32 %v4917_v32  ;;  %v4974_v37 = vpop.permute.xlu1 %4973 }
 0xf7a   :  { %v4978_v42 = vsel %vm14931_vm8, %v4977_v56, %v4974_v37  ;;  %v4683_v56 = vmul.f32 0.0, %v12790_v31 }
 0xf7b   :  { %v4979_v43 = vmul.f32 1.442695, %v4978_v42  ;;  %v5028_v46 = vpop.permute.xlu0 %5027 }
 0xf7c   :  { %v5038_v44 = vsel %vm226_vm3, %v5022_v8, %v5028_v46 }
 0xf7d   :  { %9974 = vpow2.f32 %v4979_v43  ;;  %v5032_v63 = vpop.permute.xlu1 %5031 }
 0xf7e   :  { %v5039_v20 = vsel %vm14932_vm0, %v5038_v44, %v5032_v63 }
 0xf7f   :  { %v5036_v21 = vpop.permute.xlu0 %5035 }
 0xf80   :  { %v5040_v23 = vsel %vm14933_vm9, %v5039_v20, %v5036_v21 }
 0xf81   :  { %v5041_v5 = vmul.f32 1.442695, %v5040_v23  ;;  %v4700_v35 = vpop.permute.xlu1 %4699 }
 0xf82   :  { %v4702_v13 = vmul.f32 %v12790_v31, %v4700_v35 }
 0xf83   :  { %9976 = vpow2.f32 %v5041_v5  ;;  %v4760_v38 = vpop.permute.xlu0 %4759 }
 0xf84   :  { %4704 = vrot.lane.b32.xlu1 %v4702_v13, %s10274_s9  ;;  %v4762_v18 = vmul.f32 %v12797_v33, %v4760_v38 }
 0xf85   :  { %v4822_v14 = vpop.permute.xlu1 %4821 }
 0xf86   :  { %v12833_v55 = vpop.eup %9972  ;;  %v4824_v28 = vmul.f32 %v12801_v0, %v4822_v14 }
 0xf87   :  { %4936 = vrot.lane.b32.xlu0 %v12833_v55, %s10274_s9  ;;  %v4884_v8 = vpop.permute.xlu0 %4883 }
 0xf88   :  { %4764 = vrot.lane.b32.xlu1 %v4762_v18, %s10274_s9  ;;  %v4886_v29 = vmul.f32 %v12810_v3, %v4884_v8 }
 0xf89   :  { %v4946_v54 = vpop.permute.xlu1 %4945 }
 0xf8a   :  { %v12839_v4 = vpop.eup %9974  ;;  %v4948_v22 = vmul.f32 %v12833_v55, %v4946_v54 }
 0xf8b   :  { %4998 = vrot.lane.b32.xlu0 %v12839_v4, %s10274_s9  ;;  %v5008_v1 = vpop.permute.xlu0 %5007 }
 0xf8c   :  { %4826 = vrot.lane.b32.xlu1 %v4824_v28, %s10274_s9  ;;  %v5010_v48 = vmul.f32 %v12839_v4, %v5008_v1 }
 0xf8d   :  { %v5070_v47 = vpop.permute.xlu1 %5069 }
 0xf90   :  { %v12846_v53 = vpop.eup %9976  ;;  %4888 = vrot.lane.b32.xlu1 %v4886_v29, %s10274_s9 }
 0xf91   :  { %5060 = vrot.lane.b32.xlu0 %v12846_v53, %s10274_s9  ;;  %v5072_v32 = vmul.f32 %v12846_v53, %v5070_v47 }
 0xf94   :  { %5012 = vrot.lane.b32.xlu1 %v5010_v48, %s10274_s9 }
 0xf95   :  { %4950 = vrot.lane.b32.xlu0 %v4948_v22, %s10274_s9 }
 0xf98   :  { %4686 = vrot.lane.b32.xlu1 %v4684_v57, %s10274_s9 }
 0xf99   :  { %5074 = vrot.lane.b32.xlu0 %v5072_v32, %s10274_s9 }
 0xf9d   :  { %4740 = vrot.lane.b32.xlu0 %v4738_v41, %s10274_s9 }
 0xf9f   :  { %v4692_v37 = vpop.permute.xlu0 %4691 }
 0xfa0   :  { %v4694_v42 = vadd.f32 %v4692_v37, %v4683_v56  ;;  %v4862_v37 = vmul.f32 %v12810_v3, %v12607_v34 }
 0xfa2   :  { %4745 = vrot.lane.b32.xlu1 %v4694_v42, %s10272_s0  ;;  %v4768_v46 = vmul.f32 %v12797_v33, %v4694_v42 }
 0xfa3   :  { %v5094_v63 = vpop.permute.xlu0 %5093 }
 0xfa7   :  { %v12865_v43 = vpop.permute.xlu1 %4750 }
 0xfa8   :  { %v4769_v44 = vadd.f32 %v4768_v46, %v12865_v43 }
 0xfaa   :  { %v4830_v21 = vmul.f32 %v12801_v0, %v4769_v44  ;;  %v12870_v23 = vpop.permute.xlu0 %4812 }
 0xfab   :  { %v5090_v20 = vpop.permute.xlu1 %5089 }
 0xfac   :  { %v5100_v31 = vsel %vm226_vm3, %v5084_v26, %v5090_v20  ;;  %v4831_v5 = vadd.f32 %v4830_v21, %v12870_v23 }
 0xfad   :  { %v5101_v13 = vsel %vm14934_vm14, %v5100_v31, %v5094_v63 }
 0xfae   :  { %v4892_v14 = vmul.f32 %v12810_v3, %v4831_v5 }
 0xfaf   :  { %v5098_v35 = vpop.permute.xlu1 %5097 }
 0xfb0   :  { %v5102_v38 = vsel %vm14935_vm5, %v5101_v13, %v5098_v35 }
 0xfb1   :  { %v12879_v18 = vpop.permute.xlu0 %4874  ;;  %v5103_v28 = vmul.f32 1.442695, %v5102_v38 }
 0xfb2   :  { %v4893_v29 = vadd.f32 %v4892_v14, %v12879_v18 }
 0xfb3   :  { %9978 = vpow2.f32 %v5103_v28 }
 0xfb4   :  { %v4954_v26 = vmul.f32 %v12833_v55, %v4893_v29  ;;  %9980 = vrcp.f32 %v4694_v42  ;;  %v4800_v42 = vmul.f32 %v12801_v0, %v12593_v17 }
 0xfc0   :  { %v12908_v38 = vpop.eup %9978 }
 0xfc1   :  { %14936 = vst [vmem:[#allocation45_spill] sm:$0xff] %v12908_v38 }
 0xff6   :  { %v4705_v8 = vpop.permute.xlu1 %4704 }
 0xff7   :  { %v4707_v1 = vadd.f32 %v4705_v8, %v4683_v56 }
 0xff9   :  { %v12883_v54 = vpop.permute.xlu0 %4936  ;;  %4734 = vrot.lane.b32.xlu0 %v4707_v1, %s10272_s0  ;;  %v4757_v11 = vmul.f32 %v12797_v33, %v4707_v1 }
 0xffa   :  { %v4765_v19 = vpop.permute.xlu1 %4764  ;;  %v4955_v22 = vadd.f32 %v4954_v26, %v12883_v54 }
 0xffb   :  { %v4767_v48 = vadd.f32 %v4765_v19, %v4757_v11  ;;  %v9981_v19 = vpop.eup %9980 }
 0xffc   :  { %v5016_v46 = vmul.f32 %v12839_v4, %v4955_v22 }
 0xffd   :  { %4807 = vrot.lane.b32.xlu0 %v4769_v44, %s10272_s0  ;;  %4796 = vrot.lane.b32.xlu1 %v4767_v48, %s10272_s0  ;;  %v4819_v47 = vmul.f32 %v12801_v0, %v4767_v48  ;;  %v12892_v32 = vpop.permute.xlu0 %4998 }
 0xffe   :  { %v4827_v57 = vpop.permute.xlu1 %4826  ;;  %v5017_v31 = vadd.f32 %v5016_v46, %v12892_v32  ;;  %v5110_v46 = vmul.f32 %v12908_v38, %v12689_v45 }
 0xfff   :  { %v4829_v41 = vadd.f32 %v4827_v57, %v4819_v47  ;;  %v4924_v47 = vmul.f32 %v12833_v55, %v12682_v50 }
0x1000   :  { %v5078_v14 = vmul.f32 %v12846_v53, %v5017_v31 }
0x1001   :  { %4864 = vrot.lane.b32.xlu0 %v4862_v37, %s10274_s9  ;;  %4869 = vrot.lane.b32.xlu1 %v4831_v5, %s10272_s0  ;;  %v4881_v44 = vmul.f32 %v12810_v3, %v4829_v41  ;;  %v5048_v37 = vmul.f32 %v12846_v53, %v12678_v30 }
0x1002   :  { %v4889_v63 = vpop.permute.xlu1 %4888 }
0x1003   :  { %v4891_v20 = vadd.f32 %v4889_v63, %v4881_v44  ;;  %v12900_v21 = vpop.permute.xlu0 %5060 }
0x1004   :  { %v12915_v28 = vadd.f32 %v5078_v14, %v12900_v21 }
0x1005   :  { %4802 = vrot.lane.b32.xlu1 %v4800_v42, %s10274_s9  ;;  %4858 = vrot.lane.b32.xlu0 %v4829_v41, %s10272_s0  ;;  %v4943_v13 = vmul.f32 %v12833_v55, %v4891_v20 }
0x1006   :  { %v5013_v35 = vpop.permute.xlu1 %5012  ;;  %14937 = vst [vmem:[#allocation39_spill] sm:$0xff] %v12915_v28 }
0x1007   :  { %v4951_v5 = vpop.permute.xlu0 %4950 }
0x1008   :  { %v4953_v1 = vadd.f32 %v4951_v5, %v4943_v13 }
0x1009   :  { %5122 = vrot.lane.b32.xlu1 %v12908_v38, %s10274_s9  ;;  %4993 = vrot.lane.b32.xlu0 %v4955_v22, %s10272_s0 }
0x100a   :  { %v4687_v8 = vpop.permute.xlu1 %4686  ;;  %v5005_v48 = vmul.f32 %v12839_v4, %v4953_v1 }
0x100b   :  { %v4689_v11 = vadd.f32 %v4687_v8, %v4683_v56  ;;  %v5075_v57 = vpop.permute.xlu0 %5074 }
0x100c   :  { %v5015_v22 = vadd.f32 %v5013_v35, %v5005_v48 }
0x100d   :  { %v4696_v26 = vmul.f32 %v9981_v19, %v4689_v11  ;;  %4931 = vrot.lane.b32.xlu1 %v4893_v29, %s10272_s0  ;;  %5117 = vrot.lane.b32.xlu0 %v12915_v28, %s10272_s0  ;;  %v4986_v29 = vmul.f32 %v12839_v4, %v12693_v40 }
0x100e   :  { %v5067_v56 = vmul.f32 %v12846_v53, %v5015_v22 }
0x100f   :  { %4697 = vst.msk [vmem:[#allocation2] sm:$0xff] %vm226_vm3, %v4696_v26 }
0x1010   :  { %v12933_v41 = vadd.f32 %v5075_v57, %v5067_v56 }
0x1011   :  { %5055 = vrot.lane.b32.xlu1 %v5017_v31, %s10272_s0  ;;  %4920 = vrot.lane.b32.xlu0 %v4891_v20, %s10272_s0  ;;  %v4741_v31 = vpop.permute.xlu0 %4740 }
0x1012   :  { %14938 = vst [vmem:[#allocation38_spill] sm:$0xff] %v12933_v41 }
0x1014   :  { %v4746_v63 = vpop.permute.xlu1 %4745 }
0x1015   :  { %4982 = vrot.lane.b32.xlu1 %v4953_v1, %s10272_s0  ;;  %5044 = vrot.lane.b32.xlu0 %v5015_v22, %s10272_s0  ;;  %v4748_v20 = vmul.f32 %v12797_v33, %v4746_v63 }
0x1016   :  { %v5156_v44 = vld [vmem:[#allocation2] sm:$0xff] }
0x1017   :  { %v4753_v42 = vadd.f32 %v12865_v43, %v4748_v20 }
0x1019   :  { %4988 = vrot.lane.b32.xlu1 %v4986_v29, %s10274_s9  ;;  %4926 = vrot.lane.b32.xlu0 %v4924_v47, %s10274_s9  ;;  %9982 = vrcp.f32 %v4753_v42 }
0x101d   :  { %5050 = vrot.lane.b32.xlu0 %v5048_v37, %s10274_s9  ;;  %5106 = vrot.lane.b32.xlu1 %v12933_v41, %s10272_s0 }
0x1021   :  { %5112 = vrot.lane.b32.xlu1 %v5110_v46, %s10274_s9  ;;  %5172 = vrot.lane.b32.xlu0 %v5156_v44, %s10272_s0 }
0x1026   :  { %v9983_v14 = vpop.eup %9982 }
0x106b   :  { %v4735_v35 = vpop.permute.xlu0 %4734 }
0x106c   :  { %v4737_v13 = vmul.f32 %v12797_v33, %v4735_v35 }
0x106e   :  { %v4743_v5 = vadd.f32 %v4741_v31, %v4737_v13 }
0x106f   :  { %v4808_v8 = vpop.permute.xlu0 %4807  ;;  %v4797_v1 = vpop.permute.xlu1 %4796 }
0x1070   :  { %v4755_v11 = vmul.f32 %v9983_v14, %v4743_v5  ;;  %v4810_v19 = vmul.f32 %v12801_v0, %v4808_v8 }
0x1072   :  { %4756 = vst.msk [vmem:[#allocation2 + $0x8] sm:$0xff] %vm226_vm3, %v4755_v11  ;;  %v4815_v26 = vadd.f32 %v12870_v23, %v4810_v19  ;;  %v4799_v23 = vmul.f32 %v12801_v0, %v4797_v1 }
0x1073   :  { %v4865_v48 = vpop.permute.xlu0 %4864  ;;  %v4870_v22 = vpop.permute.xlu1 %4869 }
0x1074   :  { %9984 = vrcp.f32 %v4815_v26  ;;  %v4872_v43 = vmul.f32 %v12810_v3, %v4870_v22 }
0x1076   :  { %v4877_v56 = vadd.f32 %v12879_v18, %v4872_v43 }
0x1077   :  { %v4859_v29 = vpop.permute.xlu0 %4858  ;;  %v4803_v33 = vpop.permute.xlu1 %4802 }
0x1078   :  { %9986 = vrcp.f32 %v4877_v56  ;;  %v4861_v63 = vmul.f32 %v12810_v3, %v4859_v29  ;;  %v4805_v18 = vadd.f32 %v4803_v33, %v4799_v23 }
0x1079   :  { %v5157_v47 = vld [vmem:[#allocation2 + $0x8] sm:$0xff] }
0x107a   :  { %5174 = vrot.lane.b32.xlu1 %v5157_v47, %s10272_s0  ;;  %v4867_v1 = vadd.f32 %v4865_v48, %v4861_v63 }
0x107b   :  { %v4994_v57 = vpop.permute.xlu0 %4993  ;;  %v12953_v37 = vpop.permute.xlu1 %5122 }
0x107c   :  { %14939 = vst [vmem:[#allocation42_spill] sm:$0xff] %v12953_v37  ;;  %v4996_v46 = vmul.f32 %v12839_v4, %v4994_v57 }
0x107e   :  { %v5001_v44 = vadd.f32 %v12892_v32, %v4996_v46 }
0x107f   :  { %v5118_v20 = vpop.permute.xlu0 %5117  ;;  %v4932_v42 = vpop.permute.xlu1 %4931 }
0x1080   :  { %9988 = vrcp.f32 %v5001_v44  ;;  %v5120_v31 = vmul.f32 %v12908_v38, %v5118_v20  ;;  %v4934_v35 = vmul.f32 %v12833_v55, %v4932_v42 }
0x1081   :  { %v9985_v13 = vpop.eup %9984 }
0x1082   :  { %v4817_v5 = vmul.f32 %v9985_v13, %v4805_v18  ;;  %v4939_v14 = vadd.f32 %v12883_v54, %v4934_v35  ;;  %v5125_v8 = vadd.f32 %v12953_v37, %v5120_v31 }
0x1083   :  { %v4921_v11 = vpop.permute.xlu0 %4920  ;;  %v5056_v0 = vpop.permute.xlu1 %5055 }
0x1084   :  { %4818 = vst.msk [vmem:[#allocation2 + $0x10] sm:$0xff] %vm226_vm3, %v4817_v5  ;;  %v5058_v3 = vmul.f32 %v12846_v53, %v5056_v0  ;;  %9990 = vrcp.f32 %v4939_v14  ;;  %v4923_v46 = vmul.f32 %v12833_v55, %v4921_v11 }
0x1085   :  { %v9987_v32 = vpop.eup %9986  ;;  %9992 = vrcp.f32 %v5125_v8 }
0x1086   :  { %v4879_v19 = vmul.f32 %v9987_v32, %v4867_v1  ;;  %v5063_v26 = vadd.f32 %v12900_v21, %v5058_v3  ;;  %v4602_v3 = vsub.f32 0.0, %v12595_v61  ;;  %v4603_v32 = vsub.f32 0.0, %v12611_v9  ;;  %v9733_v61 = vld [vmem:[%s10342_s8 + $0x18] sm:$0xff]   ;;  %v9734_v9 = vld [vmem:[%s10342_s8 + $0x10] sm:$0xff]   ;;  %s10156_s8 = scalar_lea.vmem %s8803_s3, 256 }
0x1087   :  { %v5045_v22 = vpop.permute.xlu0 %5044  ;;  %v4983_v43 = vpop.permute.xlu1 %4982  ;;  %9377 = vmatprep.subr.bf16.mxu0 %v9733_v61  ;;  %p10157_p0 = scmp.ne.s32.totalorder %s8803_s3, %s10156_s8  ;;  %p10162_p2 = scmp.lt.s32.totalorder %s10156_s8, %s10156_s8 }
0x1088   :  { %4880 = vst.msk [vmem:[#allocation2 + $0x18] sm:$0xff] %vm226_vm3, %v4879_v19  ;;  %9994 = vrcp.f32 %v5063_v26  ;;  %v4985_v54 = vmul.f32 %v12839_v4, %v4983_v43  ;;  %v5047_v4 = vmul.f32 %v12846_v53, %v5045_v22  ;;  %v4610_v19 = vmul.f32 1.442695, %v4602_v3  ;;  %9378 = vmatpush3.bf16.msra.mxu0 %v9733_v61 }
0x1089   :  { %v4612_v26 = vmul.f32 1.442695, %v4603_v32  ;;  %9379 = vmatprep.subr.bf16.mxu0 %v9734_v9  ;;  %p10163_p3 = por %p10162_p2, %p10161_p1 }
0x108a   :  { %9996 = vpow2.f32 %v4610_v19 }
0x108b   :  { %v4927_v56 = vpop.permute.xlu0 %4926  ;;  %v4989_v29 = vpop.permute.xlu1 %4988  ;;  %v5158_v48 = vld [vmem:[#allocation2 + $0x10] sm:$0xff]  ;;  %9998 = vpow2.f32 %v4612_v26  ;;  %p10164_p4 = pnand %p10163_p3, %p10157_p0 }
0x108c   :  { %v4991_v33 = vadd.f32 %v4989_v29, %v4985_v54  ;;  %5176 = vrot.lane.b32.xlu0 %v5158_v48, %s10272_s0  ;;  %v4929_v44 = vadd.f32 %v4927_v56, %v4923_v46  ;;  %v4604_v54 = vsub.f32 0.0, %v12593_v17  ;;  %v4605_v56 = vsub.f32 0.0, %v12607_v34  ;;  %9380 = vmatpush3.bf16.msra.mxu0 %v9734_v9 }
0x108d   :  { %v9989_v47 = vpop.eup %9988  ;;  %v4607_v46 = vsub.f32 0.0, %v12693_v40  ;;  %v4609_v34 = vsub.f32 0.0, %v12689_v45 }
0x108e   :  { %v5003_v57 = vmul.f32 %v9989_v47, %v4991_v33  ;;  %v4614_v33 = vmul.f32 1.442695, %v4604_v54  ;;  %v4616_v47 = vmul.f32 1.442695, %v4605_v56 }
0x108f   :  { %v5107_v23 = vpop.permute.xlu1 %5106  ;;  %v5159_v21 = vld [vmem:[#allocation2 + $0x18] sm:$0xff]  ;;  %v5051_v63 = vpop.permute.xlu0 %5050 }
0x1090   :  { %5004 = vst.msk [vmem:[#allocation2 + $0x28] sm:$0xff] %vm226_vm3, %v5003_v57  ;;  %5178 = vrot.lane.b32.xlu1 %v5159_v21, %s10272_s0  ;;  %v5109_v42 = vmul.f32 %v12908_v38, %v5107_v23  ;;  %v5053_v13 = vadd.f32 %v5051_v63, %v5047_v4  ;;  %v4606_v57 = vsub.f32 0.0, %v12682_v50  ;;  %v4608_v23 = vsub.f32 0.0, %v12678_v30 }
0x1091   :  { %v9991_v20 = vpop.eup %9990  ;;  %v4620_v21 = vmul.f32 1.442695, %v4607_v46 }
0x1092   :  { %v4941_v18 = vmul.f32 %v9991_v20, %v4929_v44  ;;  %v9993_v35 = vpop.eup %9992  ;;  %v4618_v17 = vmul.f32 1.442695, %v4606_v57 }
0x1093   :  { %v5113_v31 = vpop.permute.xlu1 %5112  ;;  %v5173_v44 = vpop.permute.xlu0 %5172 }
0x1094   :  { %v5115_v5 = vadd.f32 %v5113_v31, %v5109_v42  ;;  %4942 = vst.msk [vmem:[#allocation2 + $0x20] sm:$0xff] %vm226_vm3, %v4941_v18  ;;  %v4624_v18 = vmul.f32 1.442695, %v4609_v34 }
0x1095   :  { %v9995_v14 = vpop.eup %9994 }
0x1096   :  { %v5065_v55 = vmul.f32 %v9995_v14, %v5053_v13  ;;  %v5127_v8 = vmul.f32 %v9993_v35, %v5115_v5  ;;  %v4622_v35 = vmul.f32 1.442695, %v4608_v23 }
0x1097   :  { %v5161_v11 = vld [vmem:[#allocation2 + $0x28] sm:$0xff]  ;;  %v9997_v22 = vpop.eup %9996 }
0x1098   :  { %5066 = vst.msk [vmem:[#allocation2 + $0x30] sm:$0xff] %vm226_vm3, %v5065_v55  ;;  %5128 = vst.msk [vmem:[#allocation2 + $0x38] sm:$0xff] %vm226_vm3, %v5127_v8  ;;  %5182 = vrot.lane.b32.xlu1 %v5161_v11, %s10272_s0  ;;  %v9999_v43 = vpop.eup %9998  ;;  %v4626_v29 = vadd.f32 1.0, %v9997_v22 }
0x1099   :  { %v4627_v48 = vadd.f32 1.0, %v9999_v43 }
0x109a   :  { %10000 = vrcp.f32 %v4626_v29 }
0x109b   :  { %v5160_v53 = vld [vmem:[#allocation2 + $0x20] sm:$0xff]  ;;  %10002 = vrcp.f32 %v4627_v48 }
0x109c   :  { %5180 = vrot.lane.b32.xlu0 %v5160_v53, %s10272_s0  ;;  %10004 = vpow2.f32 %v4614_v33 }
0x109d   :  { %10006 = vpow2.f32 %v4616_v47 }
0x109e   :  { %10008 = vpow2.f32 %v4618_v17 }
0x109f   :  { %v5162_v0 = vld [vmem:[#allocation2 + $0x30] sm:$0xff]  ;;  %v5163_v1 = vld [vmem:[#allocation2 + $0x38] sm:$0xff]  ;;  %10010 = vpow2.f32 %v4620_v21 }
0x10a0   :  { %5186 = vrot.lane.b32.xlu1 %v5163_v1, %s10272_s0  ;;  %5184 = vrot.lane.b32.xlu0 %v5162_v0, %s10272_s0  ;;  %10012 = vpow2.f32 %v4624_v18 }
0x10a1   :  { %10014 = vpow2.f32 %v4622_v35 }
0x10a7   :  { %v10001_v63 = vpop.eup %10000 }
0x10a8   :  { %v10003_v20 = vpop.eup %10002  ;;  %v5196_v50 = vmul.f32 %v10001_v63, %v5173_v44 }
0x10a9   :  { %v10005_v42 = vpop.eup %10004 }
0x10aa   :  { %v10007_v40 = vpop.eup %10006  ;;  %v4628_v5 = vadd.f32 1.0, %v10005_v42 }
0x10ab   :  { %v4629_v30 = vadd.f32 1.0, %v10007_v40  ;;  %v10009_v14 = vpop.eup %10008 }
0x10ac   :  { %10016 = vrcp.f32 %v4628_v5  ;;  %v10011_v55 = vpop.eup %10010  ;;  %v4630_v8 = vadd.f32 1.0, %v10009_v14 }
0x10ad   :  { %10018 = vrcp.f32 %v4629_v30  ;;  %v10013_v11 = vpop.eup %10012  ;;  %v4631_v53 = vadd.f32 1.0, %v10011_v55 }
0x10ae   :  { %v10015_v0 = vpop.eup %10014  ;;  %10020 = vrcp.f32 %v4630_v8  ;;  %v4633_v32 = vadd.f32 1.0, %v10013_v11 }
0x10af   :  { %10022 = vrcp.f32 %v4631_v53  ;;  %v4632_v22 = vadd.f32 1.0, %v10015_v0 }
0x10b0   :  { %10024 = vrcp.f32 %v4633_v32 }
0x10b1   :  { %10026 = vrcp.f32 %v4632_v22 }
0x10b9   :  { %v10017_v3 = vpop.eup %10016 }
0x10ba   :  { %v10019_v19 = vpop.eup %10018 }
0x10bb   :  { %v10021_v48 = vpop.eup %10020 }
0x10bc   :  { %v10023_v33 = vpop.eup %10022 }
0x10bd   :  { %v10025_v57 = vpop.eup %10024 }
0x10be   :  { %v10027_v34 = vpop.eup %10026 }
0x10ec   :  { %v5175_v4 = vpop.permute.xlu1 %5174 }
0x10ed   :  { %v5197_v31 = vmul.f32 %v10003_v20, %v5175_v4 }
0x10ef   :  { %v5209_v13 = vpack.c.bf16 %v5197_v31, %v5196_v50 }
0x10f1   :  { %5217 = vrot.lane.b32.xlu0 %v5209_v13, %s10272_s0 }
0x10fe   :  { %v5177_v1 = vpop.permute.xlu0 %5176 }
0x10ff   :  { %v5198_v43 = vmul.f32 %v10017_v3, %v5177_v1 }
0x1102   :  { %v5179_v26 = vpop.permute.xlu1 %5178 }
0x1103   :  { %v5199_v54 = vmul.f32 %v10019_v19, %v5179_v26 }
0x1105   :  { %v5210_v56 = vpack.c.bf16 %v5199_v54, %v5198_v43 }
0x1107   :  { %5219 = vrot.lane.b32.xlu1 %v5210_v56, %s10272_s0 }
0x110a   :  { %v5183_v29 = vpop.permute.xlu1 %5182 }
0x110b   :  { %v5201_v61 = vmul.f32 %v10023_v33, %v5183_v29 }
0x110e   :  { %v5181_v47 = vpop.permute.xlu0 %5180 }
0x110f   :  { %v5200_v9 = vmul.f32 %v10021_v48, %v5181_v47 }
0x1111   :  { %v5211_v46 = vpack.c.bf16 %v5201_v61, %v5200_v9 }
0x1112   :  { %v5187_v17 = vpop.permute.xlu1 %5186  ;;  %v5185_v23 = vpop.permute.xlu0 %5184 }
0x1113   :  { %v5203_v21 = vmul.f32 %v10025_v57, %v5187_v17  ;;  %v5202_v44 = vmul.f32 %v10027_v34, %v5185_v23  ;;  %5221 = vrot.lane.b32.xlu0 %v5211_v46, %s10272_s0 }
0x1115   :  { %v5212_v63 = vpack.c.bf16 %v5203_v21, %v5202_v44 }
0x1117   :  { %5223 = vrot.lane.b32.xlu1 %v5212_v63, %s10272_s0 }
0x1163   :  { %v5218_v20 = vpop.permute.xlu0 %5217 }
0x1164   :  { %9381 = vmatprep.mubr.msk.bf16.mxu0 %vm226_vm3, %v5218_v20 }
0x1179   :  { %v5220_v4 = vpop.permute.xlu1 %5219 }
0x117a   :  { %9382 = vmatmul.mubr.msk.bf16.vlgmr.msra.gmra.mxu0 %vm226_vm3, %v5220_v4 }
0x1185   :  { %v5222_v42 = vpop.permute.xlu0 %5221 }
0x1186   :  { %9385 = vmatprep.mubr.msk.bf16.mxu0 %vm226_vm3, %v5222_v42 }
0x1189   :  { %v5224_v18 = vpop.permute.xlu1 %5223 }
0x118a   :  { %9386 = vmatmul.mubr.msk.bf16.gmra.mxu0 %vm226_vm3, %v5224_v18 }
0x118b   :  { %5701 = vmatprep.mubr.bf16.mxu0 %v14892_v58 }
0x123a   :  { %v9383_v50 = vpop.f32.mrf.mxu0 }
0x123b   :  { %v13004_v13 = vadd.f32 %v9383_v50, %v12485_v27 }
0x123c   :  { %v5283_v31 = vpop.f32.mrf.mxu0 }
0x123d   :  { %v13001_v40 = vadd.f32 %v5283_v31, %v12482_v51  ;;  %14941 = vst [vmem:[#allocation47_spill] sm:$0xff] %v13004_v13  ;;  %v5332_v8 = vsel %vm226_vm3, %v13004_v13, 0.0 }
0x123e   :  { %v9384_v35 = vpop.f32.mrf.mxu0 }
0x123f   :  { %14940 = vst [vmem:[#allocation48_spill] sm:$0xff] %v13001_v40  ;;  %v5326_v5 = vsel %vm226_vm3, %v13001_v40, 0.0  ;;  %v13012_v55 = vadd.f32 %v9384_v35, %v12493_v25 }
0x1240   :  { %5327 = vadd.xlane.f32.xlu0 %v5326_v5  ;;  %v5286_v30 = vpop.f32.mrf.mxu0 }
0x1241   :  { %v13009_v14 = vadd.f32 %v5286_v30, %v12490_v36  ;;  %14943 = vst [vmem:[#allocation41_spill] sm:$0xff] %v13012_v55  ;;  %v5335_v27 = vsel %vm226_vm3, %v13012_v55, 0.0 }
0x1243   :  { %14942 = vst [vmem:[#allocation40_spill] sm:$0xff] %v13009_v14  ;;  %v5329_v51 = vsel %vm226_vm3, %v13009_v14, 0.0 }
0x1244   :  { %5333 = vadd.xlane.f32.xlu0 %v5332_v8  ;;  %5330 = vadd.xlane.f32.xlu1 %v5329_v51 }
0x1248   :  { %5336 = vadd.xlane.f32.xlu0 %v5335_v27 }
0x124a   :  { %v9387_v11 = vpop.f32.mrf.mxu0 }
0x124b   :  { %v13024_v25 = vadd.f32 %v9387_v11, %v12509_v24 }
0x124c   :  { %v5299_v53 = vpop.f32.mrf.mxu0 }
0x124d   :  { %v13021_v36 = vadd.f32 %v5299_v53, %v12506_v60  ;;  %14945 = vst [vmem:[#allocation44_spill] sm:$0xff] %v13024_v25  ;;  %v5344_v26 = vsel %vm226_vm3, %v13024_v25, 0.0 }
0x124e   :  { %v9388_v0 = vpop.f32.mrf.mxu0 }
0x124f   :  { %14944 = vst [vmem:[#allocation43_spill] sm:$0xff] %v13021_v36  ;;  %v5338_v1 = vsel %vm226_vm3, %v13021_v36, 0.0  ;;  %v13032_v19 = vadd.f32 %v9388_v0, %v12517_v39 }
0x1250   :  { %5339 = vadd.xlane.f32.xlu1 %v5338_v1  ;;  %v5302_v3 = vpop.f32.mrf.mxu0 }
0x1251   :  { %v13029_v32 = vadd.f32 %v5302_v3, %v12514_v2  ;;  %14947 = vst [vmem:[#allocation49_spill] sm:$0xff] %v13032_v19  ;;  %v5347_v24 = vsel %vm226_vm3, %v13032_v19, 0.0 }
0x1253   :  { %14946 = vst [vmem:[#allocation50_spill] sm:$0xff] %v13029_v32  ;;  %v5341_v60 = vsel %vm226_vm3, %v13029_v32, 0.0 }
0x1254   :  { %5345 = vadd.xlane.f32.xlu1 %v5344_v26  ;;  %5342 = vadd.xlane.f32.xlu0 %v5341_v60 }
0x1258   :  { %5348 = vadd.xlane.f32.xlu0 %v5347_v24 }
0x12c9   :  { %v5328_v22 = vpop.xlane.xlu0 %5327 }
0x12ca   :  { %v5350_v43 = vmul.f32 0.03125, %v5328_v22  ;;  %v9735_v22 = vld [vmem:[%s10372_s12 + $0x30] ss:$8 sps:$4 sm:$0xff]  }
0x12cc   :  { %v13041_v2 = vsub.f32 %v13001_v40, %v5350_v43  ;;  %v9737_v43 = vld [vmem:[%s10372_s12 + $0x34] ss:$8 sps:$4 sm:$0xff]  }
0x12cd   :  { %v5334_v54 = vpop.xlane.xlu0 %5333  ;;  %v5331_v39 = vpop.xlane.xlu1 %5330  ;;  %5681 = vmatprep.subr.bf16.mxu0 %v9737_v43 }
0x12ce   :  { %v5352_v56 = vmul.f32 0.03125, %v5334_v54  ;;  %v5351_v29 = vmul.f32 0.03125, %v5331_v39  ;;  %v5366_v48 = vmul.f32 %v13041_v2, %v13041_v2  ;;  %v9740_v54 = vld [vmem:[%s10372_s12 + $0x24] ss:$8 sps:$4 sm:$0xff]   ;;  %5682 = vmatpush1.bf16.msra.mxu0 %v9735_v22  ;;  %v9738_v39 = vld [vmem:[%s10372_s12 + $0x20] ss:$8 sps:$4 sm:$0xff]  }
0x12cf   :  { %5683 = vmatprep.subr.bf16.mxu0 %v9740_v54 }
0x12d0   :  { %v13046_v33 = vsub.f32 %v13004_v13, %v5352_v56  ;;  %v13049_v47 = vsub.f32 %v13009_v14, %v5351_v29  ;;  %v5374_v61 = vsel %vm226_vm3, %v5366_v48, 0.0  ;;  %v9741_v56 = vld [vmem:[%s10367_s6 + $0x18] sm:$0xff]   ;;  %v9742_v29 = vld [vmem:[%s10367_s6 + $0x10] sm:$0xff]  }
0x12d1   :  { %v5337_v9 = vpop.xlane.xlu0 %5336  ;;  %5375 = vadd.xlane.f32.xlu1 %v5374_v61  ;;  %9389 = vmatprep.subr.bf16.mxu1 %v9741_v56 }
0x12d2   :  { %v5353_v57 = vmul.f32 0.03125, %v5337_v9  ;;  %v5368_v46 = vmul.f32 %v13046_v33, %v13046_v33  ;;  %v5367_v17 = vmul.f32 %v13049_v47, %v13049_v47  ;;  %5684 = vmatpush1.bf16.msra.mxu0 %v9738_v39  ;;  %9390 = vmatpush3.bf16.msra.mxu1 %v9741_v56 }
0x12d3   :  { %9391 = vmatprep.subr.bf16.mxu1 %v9742_v29 }
0x12d4   :  { %v13057_v34 = vsub.f32 %v13012_v55, %v5353_v57  ;;  %v5380_v23 = vsel %vm226_vm3, %v5368_v46, 0.0  ;;  %v5377_v21 = vsel %vm226_vm3, %v5367_v17, 0.0 }
0x12d5   :  { %5381 = vadd.xlane.f32.xlu1 %v5380_v23  ;;  %5378 = vadd.xlane.f32.xlu0 %v5377_v21 }
0x12d6   :  { %v5369_v44 = vmul.f32 %v13057_v34, %v13057_v34  ;;  %9392 = vmatpush3.bf16.msra.mxu1 %v9742_v29 }
0x12d8   :  { %v5383_v63 = vsel %vm226_vm3, %v5369_v44, 0.0 }
0x12d9   :  { %5384 = vadd.xlane.f32.xlu0 %v5383_v63  ;;  %v5340_v20 = vpop.xlane.xlu1 %5339 }
0x12da   :  { %v5354_v4 = vmul.f32 0.03125, %v5340_v20 }
0x12dc   :  { %v13065_v42 = vsub.f32 %v13021_v36, %v5354_v4 }
0x12dd   :  { %v5343_v18 = vpop.xlane.xlu0 %5342  ;;  %v5346_v50 = vpop.xlane.xlu1 %5345 }
0x12de   :  { %v5355_v31 = vmul.f32 0.03125, %v5343_v18  ;;  %v5356_v35 = vmul.f32 0.03125, %v5346_v50  ;;  %v5370_v5 = vmul.f32 %v13065_v42, %v13065_v42 }
0x12e0   :  { %v13070_v30 = vsub.f32 %v13029_v32, %v5355_v31  ;;  %v13073_v8 = vsub.f32 %v13024_v25, %v5356_v35  ;;  %v5386_v51 = vsel %vm226_vm3, %v5370_v5, 0.0  ;;  %v13095_v31 = vld [vmem:[%s10347_s14 + $0x1] ss:$0 sm:$0xff]  ;;  %v9743_v25 = vld [vmem:[%s14844_s7 + $0x78] sm:$0xff]  }
0x12e1   :  { %v5349_v27 = vpop.xlane.xlu0 %5348  ;;  %5387 = vadd.xlane.f32.xlu1 %v5386_v51  ;;  %9423 = vmatprep.subr.bf16.mxu0 %v9743_v25 }
0x12e2   :  { %v5357_v11 = vmul.f32 0.03125, %v5349_v27  ;;  %v5371_v53 = vmul.f32 %v13070_v30, %v13070_v30  ;;  %v5372_v0 = vmul.f32 %v13073_v8, %v13073_v8  ;;  %v13099_v27 = vld [vmem:[%s10352_s19 + $0x1] ss:$0 sm:$0xff] }
0x12e4   :  { %v13081_v1 = vsub.f32 %v13032_v19, %v5357_v11  ;;  %v5389_v3 = vsel %vm226_vm3, %v5371_v53, 0.0  ;;  %v5392_v26 = vsel %vm226_vm3, %v5372_v0, 0.0 }
0x12e5   :  { %5390 = vadd.xlane.f32.xlu0 %v5389_v3  ;;  %5393 = vadd.xlane.f32.xlu1 %v5392_v26 }
0x12e6   :  { %v5373_v60 = vmul.f32 %v13081_v1, %v13081_v1 }
0x12e8   :  { %v5395_v24 = vsel %vm226_vm3, %v5373_v60, 0.0 }
0x12e9   :  { %5396 = vadd.xlane.f32.xlu0 %v5395_v24 }
0x135a   :  { %v5376_v48 = vpop.xlane.xlu1 %5375 }
0x135b   :  { %v5398_v61 = vmul.f32 0.03125, %v5376_v48  ;;  %v13107_v48 = vld [vmem:[%s10357_s24 + $0x1] ss:$0 sm:$0xff] }
0x135d   :  { %v5406_v9 = vadd.f32 1e-05, %v5398_v61  ;;  %v9028_v61 = vld [vmem:[%s14841_s13 + $0x1] ss:$0 sm:$0xff] }
0x135e   :  { %v5379_v57 = vpop.xlane.xlu0 %5378  ;;  %v5382_v46 = vpop.xlane.xlu1 %5381 }
0x135f   :  { %10028 = vrsqrt.f32 %v5406_v9  ;;  %v5399_v17 = vmul.f32 0.03125, %v5379_v57  ;;  %v5400_v23 = vmul.f32 0.03125, %v5382_v46 }
0x1361   :  { %v5407_v21 = vadd.f32 1e-05, %v5399_v17  ;;  %v5408_v44 = vadd.f32 1e-05, %v5400_v23 }
0x1362   :  { %v5385_v63 = vpop.xlane.xlu0 %5384 }
0x1363   :  { %10030 = vrsqrt.f32 %v5407_v21  ;;  %v5401_v20 = vmul.f32 0.03125, %v5385_v63 }
0x1364   :  { %10032 = vrsqrt.f32 %v5408_v44 }
0x1365   :  { %v5409_v4 = vadd.f32 1e-05, %v5401_v20 }
0x1367   :  { %10034 = vrsqrt.f32 %v5409_v4 }
0x136a   :  { %v5388_v18 = vpop.xlane.xlu1 %5387 }
0x136b   :  { %v5402_v35 = vmul.f32 0.03125, %v5388_v18 }
0x136c   :  { %v10029_v50 = vpop.eup %10028 }
0x136d   :  { %v5422_v5 = vmul.f32 %v10029_v50, %v13041_v2  ;;  %v5410_v51 = vadd.f32 1e-05, %v5402_v35 }
0x136e   :  { %v5391_v11 = vpop.xlane.xlu0 %5390  ;;  %v5394_v53 = vpop.xlane.xlu1 %5393 }
0x136f   :  { %v5436_v0 = vmul.f32 %v13095_v31, %v5422_v5  ;;  %10036 = vrsqrt.f32 %v5410_v51  ;;  %v5403_v26 = vmul.f32 0.03125, %v5391_v11  ;;  %v5404_v60 = vmul.f32 0.03125, %v5394_v53 }
0x1370   :  { %v10031_v3 = vpop.eup %10030 }
0x1371   :  { %v10033_v24 = vpop.eup %10032  ;;  %v5423_v22 = vmul.f32 %v10031_v3, %v13049_v47  ;;  %v5411_v54 = vadd.f32 1e-05, %v5403_v26  ;;  %v5412_v2 = vadd.f32 1e-05, %v5404_v60  ;;  %v5450_v39 = vadd.f32 %v13099_v27, %v5436_v0 }
0x1372   :  { %v5424_v43 = vmul.f32 %v10033_v24, %v13046_v33  ;;  %v5397_v56 = vpop.xlane.xlu0 %5396 }
0x1373   :  { %v5437_v29 = vmul.f32 %v13095_v31, %v5423_v22  ;;  %10038 = vrsqrt.f32 %v5411_v54  ;;  %v5405_v46 = vmul.f32 0.03125, %v5397_v56  ;;  %v5466_v23 = vmul.f32 %v13107_v48, %v5450_v39 }
0x1374   :  { %v10035_v9 = vpop.eup %10034  ;;  %v5438_v57 = vmul.f32 %v13095_v31, %v5424_v43  ;;  %10040 = vrsqrt.f32 %v5412_v2  ;;  %v5482_v21 = vmul.f32 %v9028_v61, %v5450_v39 }
0x1375   :  { %v5425_v17 = vmul.f32 %v10035_v9, %v13057_v34  ;;  %v5451_v33 = vadd.f32 %v13099_v27, %v5437_v29  ;;  %v5413_v47 = vadd.f32 1e-05, %v5405_v46 }
0x1376   :  { %v5452_v44 = vadd.f32 %v13099_v27, %v5438_v57 }
0x1377   :  { %v5439_v63 = vmul.f32 %v13095_v31, %v5425_v17  ;;  %v5467_v20 = vmul.f32 %v13107_v48, %v5451_v33  ;;  %v5483_v4 = vmul.f32 %v9028_v61, %v5451_v33  ;;  %10042 = vrsqrt.f32 %v5413_v47 }
0x1378   :  { %v5484_v34 = vmul.f32 %v9028_v61, %v5452_v44  ;;  %v5468_v3 = vmul.f32 %v13107_v48, %v5452_v44 }
0x1379   :  { %v5453_v18 = vadd.f32 %v13099_v27, %v5439_v63  ;;  %v5495_v50 = vpack.c.bf16 %v5483_v4, %v5482_v21  ;;  %v5633_v35 = vpack.c.bf16 %v5467_v20, %v5466_v23 }
0x137b   :  { %9393 = vmatprep.mubr.msk.bf16.mxu1 %vm226_vm3, %v5495_v50  ;;  %9047 = vmatmul.mubr.msk.bf16.vlgmr.msra.gmra.mxu0 %vm226_vm3, %v5633_v35  ;;  %v5485_v5 = vmul.f32 %v9028_v61, %v5453_v18  ;;  %v5469_v53 = vmul.f32 %v13107_v48, %v5453_v18 }
0x137c   :  { %5711 = vmatprep.mubr.bf16.mxu0 %v14892_v58  ;;  %v10037_v51 = vpop.eup %10036  ;;  %9424 = vmatpush3.bf16.msra.mxu0 %v9743_v25 }
0x137d   :  { %v5496_v11 = vpack.c.bf16 %v5485_v5, %v5484_v34  ;;  %v5426_v0 = vmul.f32 %v10037_v51, %v13065_v42  ;;  %v5634_v24 = vpack.c.bf16 %v5469_v53, %v5468_v3 }
0x137f   :  { %9394 = vmatmul.mubr.msk.bf16.vlgmr.msra.gmra.mxu1 %vm226_vm3, %v5496_v11  ;;  %v5440_v26 = vmul.f32 %v13095_v31, %v5426_v0 }
0x1380   :  { %v10039_v60 = vpop.eup %10038 }
0x1381   :  { %v10041_v22 = vpop.eup %10040  ;;  %v5427_v43 = vmul.f32 %v10039_v60, %v13070_v30  ;;  %v5454_v54 = vadd.f32 %v13099_v27, %v5440_v26 }
0x1382   :  { %v5428_v2 = vmul.f32 %v10041_v22, %v13073_v8 }
0x1383   :  { %9048 = vmatmul.mubr.msk.bf16.gmra.mxu0 %vm226_vm3, %v5634_v24  ;;  %v5441_v42 = vmul.f32 %v13095_v31, %v5427_v43  ;;  %v5486_v57 = vmul.f32 %v9028_v61, %v5454_v54  ;;  %v5470_v30 = vmul.f32 %v13107_v48, %v5454_v54 }
0x1384   :  { %5721 = vmatprep.mubr.bf16.mxu0 %v14892_v58  ;;  %v10043_v39 = vpop.eup %10042  ;;  %v5442_v56 = vmul.f32 %v13095_v31, %v5428_v2 }
0x1385   :  { %v5429_v29 = vmul.f32 %v10043_v39, %v13081_v1  ;;  %v5455_v9 = vadd.f32 %v13099_v27, %v5441_v42 }
0x1386   :  { %v5456_v8 = vadd.f32 %v13099_v27, %v5442_v56 }
0x1387   :  { %v5487_v46 = vmul.f32 %v9028_v61, %v5455_v9  ;;  %v5471_v17 = vmul.f32 %v13107_v48, %v5455_v9  ;;  %v5443_v33 = vmul.f32 %v13095_v31, %v5429_v29 }
0x1388   :  { %v5488_v1 = vmul.f32 %v9028_v61, %v5456_v8  ;;  %v5472_v31 = vmul.f32 %v13107_v48, %v5456_v8 }
0x1389   :  { %v5497_v47 = vpack.c.bf16 %v5487_v46, %v5486_v57  ;;  %v5635_v23 = vpack.c.bf16 %v5471_v17, %v5470_v30  ;;  %v5457_v21 = vadd.f32 %v13099_v27, %v5443_v33 }
0x138b   :  { %9397 = vmatprep.mubr.msk.bf16.mxu1 %vm226_vm3, %v5497_v47  ;;  %9049 = vmatmul.mubr.msk.bf16.gmra.mxu0 %vm226_vm3, %v5635_v23  ;;  %v5489_v44 = vmul.f32 %v9028_v61, %v5457_v21  ;;  %8519 = vst.msk [vmem:[#allocation8 + $0x8] sm:$0xff] %vm226_vm3, %v5457_v21  ;;  %v5473_v20 = vmul.f32 %v13107_v48, %v5457_v21 }
0x138c   :  { %5731 = vmatprep.mubr.bf16.mxu0 %v14892_v58 }
0x138d   :  { %v5498_v63 = vpack.c.bf16 %v5489_v44, %v5488_v1  ;;  %v5636_v4 = vpack.c.bf16 %v5473_v20, %v5472_v31 }
0x138f   :  { %9398 = vmatmul.mubr.msk.bf16.gmra.mxu1 %vm226_vm3, %v5498_v63 }
0x1393   :  { %9050 = vmatmul.mubr.msk.bf16.gmra.mxu0 %vm226_vm3, %v5636_v4 }
0x143b   :  { %v13148_v27 = vpop.f32.mrf.mxu0 }
0x143c   :  { %v13151_v50 = vmul.f32 0.70710677, %v13148_v27 }
0x143d   :  { %v5705_v18 = vpop.f32.mrf.mxu0 }
0x143e   :  { %v13153_v61 = vmul.f32 0.5, %v5705_v18  ;;  %v13159_v5 = vand.u32 2147483647, %v13151_v50  ;;  %vm5758_vm5 = vcmp.lt.f32.partialorder %v13151_v50, 0.0 }
0x143f   :  { %v13155_v35 = vpop.f32.mrf.mxu0  ;;  %v13299_v50 = vsel %vm5758_vm5, -1.0, %v14854_v49 }
0x1440   :  { %v5961_v34 = vand.u32 2139095040, %v13153_v61  ;;  %v5782_v53 = vmul.f32 0.3275911, %v13159_v5  ;;  %v14769_v26 = vand.u32 2147483647, %v13153_v61 }
0x1441   :  { %v5709_v48 = vpop.f32.mrf.mxu0  ;;  %v13166_v60 = vmul.f32 0.70710677, %v13155_v35 }
0x1442   :  { %v5962_v51 = vshrl.u32 %v5961_v34, 23  ;;  %v13162_v0 = vmul.f32 0.5, %v5709_v48  ;;  %v5790_v22 = vadd.f32 1.0, %v5782_v53  ;;  %v5965_v2 = vand.u32 8388607, %v14769_v26 }
0x1443   :  { %v13172_v39 = vand.u32 2147483647, %v13166_v60 }
0x1444   :  { %v9051_v11 = vadd.s32 4294967169, %v5962_v51  ;;  %v6064_v24 = vand.u32 2139095040, %v13162_v0  ;;  %10044 = vrcp.f32 %v5790_v22  ;;  %v5966_v31 = vor.u32 8388608, %v5965_v2 }
0x1445   :  { %v5783_v51 = vmul.f32 0.3275911, %v13172_v39 }
0x1446   :  { %v5968_v3 = vadd.s32 1, %v9051_v11  ;;  %v6065_v56 = vshrl.u32 %v6064_v24, 23 }
0x1448   :  { %vm5969_vm12 = vcmp.gt.s32.totalorder %v5968_v3, 0  ;;  %v9055_v20 = vadd.s32 4294967169, %v6065_v56  ;;  %v5791_v56 = vadd.f32 1.0, %v5783_v51 }
0x1449   :  { %v5970_v43 = vsel %vm5969_vm12, %v5968_v3, 0  ;;  %vm5759_vm12 = vcmp.lt.f32.partialorder %v13166_v60, 0.0 }
0x144a   :  { %v5972_v54 = vand.u32 31, %v5970_v43  ;;  %v5971_v29 = vshrl.u32 %v5970_v43, 5  ;;  %v6071_v22 = vadd.s32 1, %v9055_v20  ;;  %10046 = vrcp.f32 %v5791_v56 }
0x144c   :  { %v5973_v42 = vsub.s32 32, %v5972_v54  ;;  %v5975_v9 = vshll.u32 %v14847_v12, %v5972_v54  ;;  %v5978_v57 = vshll.u32 %v14848_v16, %v5972_v54  ;;  %v5981_v17 = vshll.u32 %v14845_v62, %v5972_v54 }
0x144d   :  { %v5984_v8 = vshll.u32 %v14849_v15, %v5972_v54  ;;  %v5987_v23 = vshll.u32 %v14859_v6, %v5972_v54  ;;  %vm5990_vm2 = vcmp.lt.s32.totalorder %v5971_v29, 1  ;;  %vm5993_vm1 = vcmp.lt.s32.totalorder %v5971_v29, 4 }
0x144e   :  { %v5976_v30 = vshrl.u32 %v14848_v16, %v5973_v42  ;;  %v5979_v46 = vshrl.u32 %v14845_v62, %v5973_v42  ;;  %v5982_v33 = vshrl.u32 %v14849_v15, %v5973_v42  ;;  %v5985_v47 = vshrl.u32 %v14859_v6, %v5973_v42 }
0x144f   :  { %v5988_v21 = vshrl.u32 %v14846_v59, %v5973_v42  ;;  %vm5992_vm4 = vcmp.lt.s32.totalorder %v5971_v29, 3  ;;  %vm5991_vm13 = vcmp.lt.s32.totalorder %v5971_v29, 2  ;;  %v6006_v54 = vshll.u32 %v5966_v31, 8 }
0x1450   :  { %v5977_v1 = vor.u32 %v5976_v30, %v5975_v9  ;;  %v5980_v44 = vor.u32 %v5979_v46, %v5978_v57  ;;  %v5983_v63 = vor.u32 %v5982_v33, %v5981_v17  ;;  %v5986_v4 = vor.u32 %v5985_v47, %v5984_v8 }
0x1451   :  { %v5989_v18 = vor.u32 %v5988_v21, %v5987_v23  ;;  %vm6072_vm11 = vcmp.gt.s32.totalorder %v6071_v22, 0  ;;  %v13200_v33 = vpop.eup %10044  ;;  %v14768_v8 = vand.u32 2147483647, %v13162_v0  ;;  %v5974_v21 = vshrl.u32 %v14847_v12, %v5973_v42 }
0x1452   :  { %v5998_v34 = vsel %vm5990_vm2, %v5977_v1, %v5980_v44  ;;  %v5999_v48 = vsel %vm5993_vm1, %v5986_v4, 920167782  ;;  %v6002_v11 = vsel %vm5990_vm2, %v5980_v44, %v5983_v63  ;;  %v6073_v17 = vsel %vm6072_vm11, %v6071_v22, 0 }
0x1453   :  { %v6003_v53 = vsel %vm5993_vm1, %v5989_v18, 1326507024  ;;  %v6000_v3 = vsel %vm5992_vm4, %v5983_v63, %v5999_v48  ;;  %v5995_v47 = vsel %vm5993_vm1, %v5983_v63, 2102212464  ;;  %v6075_v23 = vand.u32 31, %v6073_v17 }
0x1454   :  { %v6004_v24 = vsel %vm5992_vm4, %v5986_v4, %v6003_v53  ;;  %v6001_v43 = vsel %vm5991_vm13, %v5998_v34, %v6000_v3  ;;  %v5806_v31 = vmul.f32 1.0614054, %v13200_v33  ;;  %v5994_v4 = vsel %vm5990_vm2, %v5974_v21, %v5977_v1 }
0x1455   :  { %v6005_v2 = vsel %vm5991_vm13, %v6002_v11, %v6004_v24  ;;  %v13193_v9 = vmul.u32.u64.low %v6006_v54, %v6001_v43  ;;  %v13194_v57 = vmul.u32.u64.high %v6006_v54, %v6001_v43, %v13193_v9  ;;  %v6076_v20 = vsub.s32 32, %v6075_v23 }
0x1456   :  { %v13197_v30 = vmul.u32.u64.low %v6006_v54, %v6005_v2  ;;  %v13198_v46 = vmul.u32.u64.high %v6006_v54, %v6005_v2, %v13197_v30  ;;  %v5996_v18 = vsel %vm5992_vm4, %v5980_v44, %v5995_v47  ;;  %v6068_v34 = vand.u32 8388607, %v14768_v8 }
0x1457   :  { %v6016_v51 = vadd.s32 1, %v13194_v57  ;;  %v6078_v48 = vshll.u32 %v14847_v12, %v6075_v23  ;;  %v6081_v11 = vshll.u32 %v14848_v16, %v6075_v23  ;;  %v6087_v63 = vshll.u32 %v14849_v15, %v6075_v23 }
0x1458   :  { %v6079_v42 = vshrl.u32 %v14848_v16, %v6076_v20  ;;  %v6082_v53 = vshrl.u32 %v14845_v62, %v6076_v20  ;;  %v6085_v3 = vshrl.u32 %v14849_v15, %v6076_v20  ;;  %v6088_v1 = vshrl.u32 %v14859_v6, %v6076_v20 }
0x1459   :  { %v5997_v44 = vsel %vm5991_vm13, %v5994_v4, %v5996_v18  ;;  %vm6015_vm7 = vc.u32 %v13198_v46, %v13193_v9  ;;  %v6074_v24 = vshrl.u32 %v6073_v17, 5  ;;  %v6084_v2 = vshll.u32 %v14845_v62, %v6075_v23 }
0x145a   :  { %v6080_v22 = vor.u32 %v6079_v42, %v6078_v48  ;;  %v6083_v43 = vor.u32 %v6082_v53, %v6081_v11  ;;  %v6089_v56 = vor.u32 %v6088_v1, %v6087_v63  ;;  %v6090_v30 = vshll.u32 %v14859_v6, %v6075_v23  ;;  %v13227_v48 = vpop.eup %10046  ;;  %v13229_v23 = vpop.f32.mrf.mxu0 }
0x145b   :  { %v6091_v47 = vshrl.u32 %v14846_v59, %v6076_v20  ;;  %v5814_v21 = vadd.f32 -1.4531521, %v5806_v31  ;;  %v6017_v52 = vsel %vm6015_vm7, %v6016_v51, %v13194_v57  ;;  %v6069_v10 = vor.u32 8388608, %v6068_v34 }
0x145c   :  { %v6086_v7 = vor.u32 %v6085_v3, %v6084_v2  ;;  %v6013_v29 = vmul.u32 %v6006_v54, %v5997_v44  ;;  %vm6093_vm15 = vcmp.lt.s32.totalorder %v6074_v24, 1  ;;  %vm6096_vm10 = vcmp.lt.s32.totalorder %v6074_v24, 4 }
0x145d   :  { %v6092_v4 = vor.u32 %v6091_v47, %v6090_v30  ;;  %v6101_v17 = vsel %vm6093_vm15, %v6080_v22, %v6083_v43  ;;  %v6102_v18 = vsel %vm6096_vm10, %v6089_v56, 920167782  ;;  %vm6095_vm8 = vcmp.lt.s32.totalorder %v6074_v24, 3 }
0x145e   :  { %v6018_v11 = vadd.s32 %v6017_v52, %v6013_v29  ;;  %vm6094_vm0 = vcmp.lt.s32.totalorder %v6074_v24, 2  ;;  %v6103_v31 = vsel %vm6095_vm8, %v6086_v7, %v6102_v18  ;;  %v6105_v57 = vsel %vm6093_vm15, %v6083_v43, %v6086_v7  ;;  %v5715_v29 = vpop.f32.mrf.mxu0 }
0x145f   :  { %v6106_v54 = vsel %vm6096_vm10, %v6092_v4, 1326507024  ;;  %v5822_v34 = vmul.f32 %v13200_v33, %v5814_v21  ;;  %v6104_v51 = vsel %vm6094_vm0, %v6101_v17, %v6103_v31  ;;  %v6109_v63 = vshll.u32 %v6069_v10, 8 }
0x1460   :  { %v5807_v42 = vmul.f32 1.0614054, %v13227_v48  ;;  %v6107_v53 = vsel %vm6095_vm8, %v6089_v56, %v6106_v54  ;;  %v13239_v52 = vmul.f32 0.70710677, %v13229_v23  ;;  %v6019_v3 = vadd.s32 536870912, %v6018_v11 }
0x1461   :  { %v6108_v1 = vsel %vm6094_vm0, %v6105_v57, %v6107_v53  ;;  %v13242_v44 = vmul.u32.u64.low %v6109_v63, %v6104_v51  ;;  %v13243_v2 = vmul.u32.u64.high %v6109_v63, %v6104_v51, %v13242_v44  ;;  %v5830_v21 = vadd.f32 1.4214138, %v5822_v34  ;;  %v13261_v34 = vpop.f32.mrf.mxu0 }
0x1462   :  { %v13246_v30 = vmul.u32.u64.low %v6109_v63, %v6108_v1  ;;  %v13247_v47 = vmul.u32.u64.high %v6109_v63, %v6108_v1, %v13246_v30  ;;  %v5878_v10 = vsub.f32 0.0, %v13159_v5  ;;  %v5815_v4 = vadd.f32 -1.4531521, %v5807_v42 }
0x1463   :  { %v13251_v56 = vand.u32 2147483647, %v13239_v52  ;;  %v13253_v17 = vshrl.u32 %v6019_v3, 30  ;;  %v6098_v18 = vsel %vm6096_vm10, %v6086_v7, 2102212464  ;;  %v6077_v31 = vshrl.u32 %v14847_v12, %v6076_v20 }
0x1464   :  { %v13257_v57 = vmul.f32 0.5, %v5715_v29  ;;  %v5838_v54 = vmul.f32 %v13200_v33, %v5830_v21  ;;  %v5886_v51 = vmul.f32 %v5878_v10, %v13159_v5  ;;  %v5823_v53 = vmul.f32 %v13227_v48, %v5815_v4 }
0x1465   :  { %14948 = vst [vmem:[#allocation30_spill] sm:$0xff] %v13253_v17  ;;  %v6097_v42 = vsel %vm6093_vm15, %v6077_v31, %v6080_v22  ;;  %v6099_v1 = vsel %vm6095_vm8, %v6083_v43, %v6098_v18  ;;  %v5784_v3 = vmul.f32 0.3275911, %v13251_v56  ;;  %v6021_v7 = vshll.u32 %v13253_v17, 30 }
0x1466   :  { %14949 = vst [vmem:[#allocation31_spill] sm:$0xff] %v13257_v57  ;;  %v6119_v20 = vadd.s32 1, %v13243_v2  ;;  %vm6118_vm9 = vc.u32 %v13247_v47, %v13242_v44  ;;  %v6167_v30 = vand.u32 2139095040, %v13257_v57  ;;  %v13273_v5 = vmul.f32 0.70710677, %v13261_v34 }
0x1467   :  { %v5846_v21 = vadd.f32 -0.28449672, %v5838_v54  ;;  %v5894_v10 = vmul.f32 1.442695, %v5886_v51  ;;  %v6100_v22 = vsel %vm6094_vm0, %v6097_v42, %v6099_v1  ;;  %v5831_v29 = vadd.f32 1.4214138, %v5823_v53 }
0x1468   :  { %v5792_v43 = vadd.f32 1.0, %v5784_v3  ;;  %v6168_v4 = vshrl.u32 %v6167_v30, 23  ;;  %v13276_v18 = vsub.s32 %v6018_v11, %v6021_v7  ;;  %v6120_v31 = vsel %vm6118_vm9, %v6119_v20, %v13243_v2  ;;  %v5719_v2 = vpop.f32.mrf.mxu0 }
0x1469   :  { %v6116_v8 = vmul.u32 %v6109_v63, %v6100_v22  ;;  %v13280_v41 = vand.u32 2147483647, %v13273_v5  ;;  %v5854_v37 = vmul.f32 %v13200_v33, %v5846_v21  ;;  %10048 = vpow2.f32 %v5894_v10 }
0x146a   :  { %v9059_v26 = vadd.s32 4294967169, %v6168_v4  ;;  %v5879_v54 = vsub.f32 0.0, %v13172_v39  ;;  %v5839_v24 = vmul.f32 %v13227_v48, %v5831_v29  ;;  %10050 = vrcp.f32 %v5792_v43 }
0x146b   :  { %v6121_v51 = vadd.s32 %v6120_v31, %v6116_v8  ;;  %v6024_v11 = vsub.s32 0, %v13276_v18  ;;  %v14772_v42 = vand.u32 2147483647, %v13257_v57  ;;  %v5785_v63 = vmul.f32 0.3275911, %v13280_v41 }
0x146c   :  { %v6174_v53 = vadd.s32 1, %v9059_v26  ;;  %v5887_v1 = vmul.f32 %v5879_v54, %v13172_v39  ;;  %v5862_v7 = vadd.f32 0.2548296, %v5854_v37  ;;  %v5847_v20 = vadd.f32 -0.28449672, %v5839_v24 }
0x146d   :  { %v6122_v30 = vadd.s32 536870912, %v6121_v51  ;;  %v9052_v8 = vmin.u32 %v6024_v11, %v13276_v18  ;;  %v6171_v26 = vand.u32 8388607, %v14772_v42  ;;  %v13293_v10 = vmul.f32 0.5, %v5719_v2 }
0x146e   :  { %vm6175_vm14 = vcmp.gt.s32.totalorder %v6174_v53, 0  ;;  %v13296_v22 = vmul.f32 0.5, %v13148_v27  ;;  %v5793_v43 = vadd.f32 1.0, %v5785_v63  ;;  %v13302_v37 = vmul.f32 0.5, %v13155_v35 }
0x146f   :  { %v6176_v3 = vsel %vm6175_vm14, %v6174_v53, 0  ;;  %v5896_v39 = vmul.f32 1.442695, %v5887_v1  ;;  %v5870_v4 = vmul.f32 %v13200_v33, %v5862_v7  ;;  %v5855_v31 = vmul.f32 %v13227_v48, %v5847_v20 }
0x1470   :  { %v6178_v21 = vand.u32 31, %v6176_v3  ;;  %v13307_v54 = vshrl.u32 %v6122_v30, 30  ;;  %v6026_v24 = vclz %v9052_v8  ;;  %v6172_v53 = vor.u32 8388608, %v6171_v26 }
0x1471   :  { %v6270_v63 = vand.u32 2139095040, %v13293_v10  ;;  %10052 = vrcp.f32 %v5793_v43  ;;  %v6177_v33 = vshrl.u32 %v6176_v3, 5  ;;  %v13325_v43 = vsel %vm5759_vm12, -1.0, %v14854_v49 }
0x1472   :  { %v6179_v29 = vsub.s32 32, %v6178_v21  ;;  %14950 = vst [vmem:[#allocation32_spill] sm:$0xff] %v13307_v54  ;;  %v6181_v35 = vshll.u32 %v14847_v12, %v6178_v21  ;;  %v6184_v2 = vshll.u32 %v14848_v16, %v6178_v21  ;;  %v6187_v7 = vshll.u32 %v14845_v62, %v6178_v21 }
0x1473   :  { %v6190_v20 = vshll.u32 %v14849_v15, %v6178_v21  ;;  %v6124_v26 = vshll.u32 %v13307_v54, 30  ;;  %v6193_v32 = vshll.u32 %v14859_v6, %v6178_v21  ;;  %v5863_v55 = vadd.f32 0.2548296, %v5855_v31 }
0x1474   :  { %v6182_v27 = vshrl.u32 %v14848_v16, %v6179_v29  ;;  %v6185_v11 = vshrl.u32 %v14845_v62, %v6179_v29  ;;  %v6188_v1 = vshrl.u32 %v14849_v15, %v6179_v29  ;;  %v6191_v30 = vshrl.u32 %v14859_v6, %v6179_v29 }
0x1475   :  { %v6194_v38 = vshrl.u32 %v14846_v59, %v6179_v29  ;;  %10054 = vpow2.f32 %v5896_v39  ;;  %vm6196_vm2 = vcmp.lt.s32.totalorder %v6177_v33, 1  ;;  %v13333_v60 = vsub.s32 %v6121_v51, %v6124_v26 }
0x1476   :  { %v10049_v8 = vpop.eup %10048  ;;  %v6183_v42 = vor.u32 %v6182_v27, %v6181_v35  ;;  %v6186_v45 = vor.u32 %v6185_v11, %v6184_v2  ;;  %v6189_v3 = vor.u32 %v6188_v1, %v6187_v7  ;;  %v6192_v19 = vor.u32 %v6191_v30, %v6190_v20 }
0x1477   :  { %v13320_v28 = vpop.eup %10050  ;;  %v13329_v36 = vmul.f32 %v10049_v8, %v5870_v4  ;;  %v6271_v27 = vshrl.u32 %v6270_v63, 23  ;;  %v9053_v11 = vadd.s32 4294967294, %v6026_v24  ;;  %v6195_v35 = vor.u32 %v6194_v38, %v6193_v32  ;;  %v9744_v63 = vld [vmem:[%s14844_s7 + $0x70] sm:$0xff]  }
0x1478   :  { %v13331_v2 = vshll.u32 %v6172_v53, 8  ;;  %v5808_v1 = vmul.f32 1.0614054, %v13320_v28  ;;  %vm6199_vm1 = vcmp.lt.s32.totalorder %v6177_v33, 4  ;;  %v6204_v21 = vsel %vm6196_vm2, %v6183_v42, %v6186_v45  ;;  %9425 = vmatprep.subr.bf16.mxu0 %v9744_v63 }
0x1479   :  { %v6180_v4 = vshrl.u32 %v14847_v12, %v6179_v29  ;;  %vm6198_vm4 = vcmp.lt.s32.totalorder %v6177_v33, 3  ;;  %v6201_v39 = vsel %vm6199_vm1, %v6189_v3, 2102212464  ;;  %v6205_v31 = vsel %vm6199_vm1, %v6192_v19, 920167782  ;;  %9426 = vmatpush3.bf16.msra.mxu0 %v9744_v63 }
0x147a   :  { %vm6197_vm13 = vcmp.lt.s32.totalorder %v6177_v33, 2  ;;  %v6206_v38 = vsel %vm6198_vm4, %v6189_v3, %v6205_v31  ;;  %v6208_v32 = vsel %vm6196_vm2, %v6186_v45, %v6189_v3  ;;  %v9063_v24 = vadd.s32 4294967169, %v6271_v27  ;;  %v9746_v33 = vld [vmem:[%s14844_s7 + $0x60] sm:$0xff]  }
0x147b   :  { %v5880_v51 = vsub.f32 0.0, %v13251_v56  ;;  %v6200_v53 = vsel %vm6196_vm2, %v6180_v4, %v6183_v42  ;;  %v6207_v7 = vsel %vm6197_vm13, %v6204_v21, %v6206_v38  ;;  %v6209_v20 = vsel %vm6199_vm1, %v6195_v35, 1326507024  ;;  %v9745_v42 = vld [vmem:[%s14844_s7 + $0x68] sm:$0xff]  }
0x147c   :  { %v6202_v25 = vsel %vm6198_vm4, %v6186_v45, %v6201_v39  ;;  %v6210_v29 = vsel %vm6198_vm4, %v6192_v19, %v6209_v20  ;;  %v13344_v30 = vmul.u32.u64.low %v13331_v2, %v6207_v7  ;;  %v13345_v8 = vmul.u32.u64.high %v13331_v2, %v6207_v7, %v13344_v30  ;;  %9427 = vmatprep.subr.bf16.mxu0 %v9745_v42 }
0x147d   :  { %vm9054_vm11 = vcmp.lt.s32.totalorder %v9053_v11, 0  ;;  %v6127_v26 = vsub.s32 0, %v13333_v60  ;;  %v6211_v3 = vsel %vm6197_vm13, %v6208_v32, %v6210_v29  ;;  %v14782_v27 = vand.u32 2147483647, %v13293_v10  ;;  %9428 = vmatpush3.bf16.msra.mxu0 %v9745_v42 }
0x147e   :  { %v5816_v4 = vadd.f32 -1.4531521, %v5808_v1  ;;  %v13353_v35 = vmul.u32.u64.low %v13331_v2, %v6211_v3  ;;  %v13354_v21 = vmul.u32.u64.high %v13331_v2, %v6211_v3, %v13353_v35  ;;  %v6277_v45 = vadd.s32 1, %v9063_v24  ;;  %v13356_v19 = vpop.eup %10052  ;;  %9429 = vmatprep.subr.bf16.mxu0 %v9746_v33 }
0x147f   :  { %v5918_v39 = vsub.f32 1.0, %v13329_v36  ;;  %v13360_v31 = vmul.f32 0.5, %v13229_v23  ;;  %vm5760_vm7 = vcmp.lt.f32.partialorder %v13239_v52, 0.0  ;;  %v6203_v63 = vsel %vm6197_vm13, %v6200_v53, %v6202_v25 }
0x1480   :  { %v5871_v1 = vmul.f32 %v13227_v48, %v5863_v55  ;;  %v5888_v38 = vmul.f32 %v5880_v51, %v13251_v56  ;;  %v6222_v32 = vadd.s32 1, %v13345_v8  ;;  %vm6278_vm15 = vcmp.gt.s32.totalorder %v6277_v45, 0 }
0x1481   :  { %v13368_v24 = vsel %vm9054_vm11, 0, %v9053_v11  ;;  %v9056_v36 = vmin.u32 %v6127_v26, %v13333_v60  ;;  %v6274_v23 = vand.u32 8388607, %v14782_v27  ;;  %v6279_v7 = vsel %vm6278_vm15, %v6277_v45, 0  ;;  %9430 = vmatpush3.bf16.msra.mxu0 %v9746_v33 }
0x1482   :  { %v5824_v53 = vmul.f32 %v13320_v28, %v5816_v4  ;;  %v6219_v55 = vmul.u32 %v13331_v2, %v6203_v63  ;;  %vm6221_vm10 = vc.u32 %v13354_v21, %v13344_v30  ;;  %v5809_v48 = vmul.f32 1.0614054, %v13356_v19  ;;  %v10055_v56 = vpop.eup %10054  ;;  %v9747_v4 = vld [vmem:[%s14844_s7 + $0x58] sm:$0xff]  }
0x1483   :  { %v13381_v11 = vadd.s32 %v13193_v9, %v13198_v46  ;;  %v13386_v51 = vsel %vm5760_vm7, -1.0, %v14854_v49  ;;  %v6223_v20 = vsel %vm6221_vm10, %v6222_v32, %v13345_v8  ;;  %v6281_v25 = vand.u32 31, %v6279_v7  ;;  %9431 = vmatprep.subr.bf16.mxu0 %v9747_v4 }
0x1484   :  { %v13390_v2 = vmul.f32 %v5918_v39, %v13299_v50  ;;  %v13392_v29 = vmul.f32 %v10055_v56, %v5871_v1  ;;  %v13394_v26 = vmul.f32 1.442695, %v5888_v38  ;;  %v6224_v3 = vadd.s32 %v6223_v20, %v6219_v55  ;;  %v9748_v20 = vld [vmem:[%s14844_s7 + $0x50] sm:$0xff]  }
0x1485   :  { %v6034_v9 = vsub.s32 4294967266, %v13368_v24  ;;  %v6129_v46 = vclz %v9056_v36  ;;  %v6275_v42 = vor.u32 8388608, %v6274_v23  ;;  %v6282_v52 = vsub.s32 32, %v6281_v25  ;;  %9432 = vmatpush3.bf16.msra.mxu0 %v9747_v4 }
0x1486   :  { %v5832_v35 = vadd.f32 1.4214138, %v5824_v53  ;;  %v6225_v45 = vadd.s32 536870912, %v6224_v3  ;;  %v5817_v8 = vadd.f32 -1.4531521, %v5809_v48  ;;  %v13398_v63 = vshrl.u32 %v6279_v7, 5  ;;  %v13408_v7 = vpop.f32.mrf.mxu0  ;;  %9433 = vmatprep.subr.bf16.mxu0 %v9748_v20 }
0x1487   :  { %v6284_v50 = vshll.u32 %v14847_v12, %v6281_v25  ;;  %v6285_v39 = vshrl.u32 %v14848_v16, %v6282_v52  ;;  %v6287_v1 = vshll.u32 %v14848_v16, %v6281_v25  ;;  %v6288_v38 = vshrl.u32 %v14845_v62, %v6282_v52 }
0x1488   :  { %v6290_v32 = vshll.u32 %v14845_v62, %v6281_v25  ;;  %v6291_v36 = vshrl.u32 %v14849_v15, %v6282_v52  ;;  %v6293_v23 = vshll.u32 %v14849_v15, %v6281_v25  ;;  %v6294_v33 = vshrl.u32 %v14859_v6, %v6282_v52 }
0x1489   :  { %v13410_v53 = vadd.s32 127, %v6034_v9  ;;  %v13412_v55 = vshrl.u32 %v6225_v45, 30  ;;  %v6286_v48 = vor.u32 %v6285_v39, %v6284_v50  ;;  %v6289_v56 = vor.u32 %v6288_v38, %v6287_v1  ;;  %v5725_v50 = vpop.f32.mrf.mxu0  ;;  %9434 = vmatpush3.bf16.msra.mxu0 %v9748_v20 }
0x148a   :  { %v6292_v27 = vor.u32 %v6291_v36, %v6290_v32  ;;  %v6295_v14 = vor.u32 %v6294_v33, %v6293_v23  ;;  %v6296_v40 = vshll.u32 %v14859_v6, %v6281_v25  ;;  %v6297_v13 = vshrl.u32 %v14846_v59, %v6282_v52 }
0x148b   :  { %14951 = vst [vmem:[#allocation33_spill] sm:$0xff] %v13412_v55  ;;  %v9057_v58 = vadd.s32 4294967294, %v6129_v46  ;;  %v5840_v54 = vmul.f32 %v13320_v28, %v5832_v35  ;;  %v5881_v17 = vsub.f32 0.0, %v13280_v41  ;;  %v13419_v4 = vshll.u32 %v6275_v42, 8  ;;  %v9749_v35 = vld [vmem:[%s14844_s7 + $0x48] sm:$0xff]  }
0x148c   :  { %v5825_v9 = vmul.f32 %v13356_v19, %v5817_v8  ;;  %v6298_v45 = vor.u32 %v6297_v13, %v6296_v40  ;;  %vm6299_vm8 = vcmp.lt.s32.totalorder %v13398_v63, 1  ;;  %vm6302_vm0 = vcmp.lt.s32.totalorder %v13398_v63, 4  ;;  %9435 = vmatprep.subr.bf16.mxu0 %v9749_v35 }
0x148d   :  { %v6227_v25 = vshll.u32 %v13412_v55, 30  ;;  %vm6301_vm9 = vcmp.lt.s32.totalorder %v13398_v63, 3  ;;  %v6307_v46 = vsel %vm6299_vm8, %v6286_v48, %v6289_v56  ;;  %v6308_v42 = vsel %vm6302_vm0, %v6295_v14, 920167782  ;;  %9436 = vmatpush3.bf16.msra.mxu0 %v9749_v35 }
0x148e   :  { %vm6300_vm14 = vcmp.lt.s32.totalorder %v13398_v63, 2  ;;  %v6309_v40 = vsel %vm6301_vm9, %v6292_v27, %v6308_v42  ;;  %v6311_v13 = vsel %vm6299_vm8, %v6289_v56, %v6292_v27  ;;  %v13437_v8 = vmul.f32 0.70710677, %v13408_v7  ;;  %v9750_v42 = vld [vmem:[%s14844_s7 + $0x40] sm:$0xff]  }
0x148f   :  { %vm9058_vm5 = vcmp.lt.s32.totalorder %v9057_v58, 0  ;;  %v6310_v39 = vsel %vm6300_vm14, %v6307_v46, %v6309_v40  ;;  %v6312_v1 = vsel %vm6302_vm0, %v6298_v45, 1326507024  ;;  %v13443_v38 = vmul.f32 0.5, %v5725_v50  ;;  %9437 = vmatprep.subr.bf16.mxu0 %v9750_v42 }
0x1490   :  { %v6304_v32 = vsel %vm6302_vm0, %v6292_v27, 2102212464  ;;  %v6313_v36 = vsel %vm6301_vm9, %v6295_v14, %v6312_v1  ;;  %v13450_v23 = vmul.u32.u64.low %v13419_v4, %v6310_v39  ;;  %v13451_v33 = vmul.u32.u64.high %v13419_v4, %v6310_v39, %v13450_v23 }
0x1491   :  { %14952 = vst [vmem:[#allocation34_spill] sm:$0xff] %v13443_v38  ;;  %v13454_v20 = vsub.s32 %v6224_v3, %v6227_v25  ;;  %v5833_v46 = vadd.f32 1.4214138, %v5825_v9  ;;  %v6283_v45 = vshrl.u32 %v14847_v12, %v6282_v52  ;;  %v6314_v50 = vsel %vm6300_vm14, %v6311_v13, %v6313_v36  ;;  %9438 = vmatpush3.bf16.msra.mxu0 %v9750_v42 }
0x1492   :  { %v13460_v40 = vsel %vm9058_vm5, 0, %v9057_v58  ;;  %v13463_v27 = vmul.u32.u64.low %v13419_v4, %v6314_v50  ;;  %v13464_v14 = vmul.u32.u64.high %v13419_v4, %v6314_v50, %v13463_v27  ;;  %v13467_v39 = vand.u32 2147483647, %v13437_v8 }
0x1493   :  { %v6030_v35 = vsub.s32 32, %v13368_v24  ;;  %v6036_v3 = vshll.u32 %v13410_v53, 23  ;;  %v6303_v52 = vsel %vm6299_vm8, %v6283_v45, %v6286_v48  ;;  %v6305_v9 = vsel %vm6301_vm9, %v6289_v56, %v6304_v32 }
0x1494   :  { %v5848_v58 = vadd.f32 -0.28449672, %v5840_v54  ;;  %v5889_v25 = vmul.f32 %v5881_v17, %v13280_v41  ;;  %v6325_v13 = vadd.s32 1, %v13451_v33  ;;  %v6373_v1 = vand.u32 2139095040, %v13443_v38 }
0x1495   :  { %v5919_v36 = vsub.f32 1.0, %v13392_v29  ;;  %v6137_v50 = vsub.s32 4294967266, %v13460_v40  ;;  %v6230_v53 = vsub.s32 0, %v13454_v20  ;;  %v5841_v48 = vmul.f32 %v13356_v19, %v5833_v46 }
0x1496   :  { %v6306_v56 = vsel %vm6300_vm14, %v6303_v52, %v6305_v9  ;;  %vm6324_vm12 = vc.u32 %v13464_v14, %v13450_v23  ;;  %v5786_v41 = vmul.f32 0.3275911, %v13467_v39  ;;  %v6374_v17 = vshrl.u32 %v6373_v1, 23 }
0x1497   :  { %v6031_v54 = vshll.u32 %v13276_v18, %v13368_v24  ;;  %v6032_v29 = vshrl.u32 %v13381_v11, %v6030_v35  ;;  %v6037_v32 = vor.u32 4788187, %v6036_v3  ;;  %10056 = vpow2.f32 %v13394_v26 }
0x1498   :  { %v6133_v45 = vsub.s32 32, %v13460_v40  ;;  %v5856_v46 = vmul.f32 %v13320_v28, %v5848_v58  ;;  %v5900_v63 = vmul.f32 1.442695, %v5889_v25  ;;  %v6326_v42 = vsel %vm6324_vm12, %v6325_v13, %v13451_v33 }
0x1499   :  { %v6138_v27 = vadd.s32 127, %v6137_v50  ;;  %v5849_v52 = vadd.f32 -0.28449672, %v5841_v48  ;;  %v6322_v9 = vmul.u32 %v13419_v4, %v6306_v56  ;;  %v9067_v1 = vadd.s32 4294967169, %v6374_v17 }
0x149a   :  { %v5934_v55 = vadd.f32 1.0, %v13390_v2  ;;  %v6117_v18 = vadd.s32 %v13242_v44, %v13247_v47  ;;  %v9060_v24 = vmin.u32 %v6230_v53, %v13454_v20  ;;  %v5794_v11 = vadd.f32 1.0, %v5786_v41 }
0x149b   :  { %v6033_v26 = vor.u32 %v6032_v29, %v6031_v54  ;;  %v5927_v35 = vmul.f32 %v5919_v36, %v13325_v43  ;;  %v13500_v3 = vadd.s32 %v6326_v42, %v6322_v9  ;;  %v6380_v58 = vadd.s32 1, %v9067_v1 }
0x149c   :  { %v6038_v33 = vand.u32 2147483647, %v6037_v32  ;;  %v6135_v25 = vshrl.u32 %v6117_v18, %v6133_v45  ;;  %vm5761_vm2 = vcmp.lt.f32.partialorder %v13273_v5, 0.0  ;;  %10058 = vpow2.f32 %v5900_v63 }
0x149d   :  { %v6139_v4 = vshll.u32 %v6138_v27, 23  ;;  %v5864_v13 = vadd.f32 0.2548296, %v5856_v46  ;;  %v5857_v2 = vmul.f32 %v13356_v19, %v5849_v52  ;;  %vm6381_vm1 = vcmp.gt.s32.totalorder %v6380_v58, 0 }
0x149e   :  { %v6232_v44 = vclz %v9060_v24  ;;  %10060 = vrcp.f32 %v5794_v11  ;;  %v14793_v47 = vand.u32 2147483647, %v13443_v38  ;;  %v6382_v50 = vsel %vm6381_vm1, %v6380_v58, 0 }
0x149f   :  { %v6040_v53 = vcvt.s32.f32 %v6033_v26  ;;  %v6134_v43 = vshll.u32 %v13333_v60, %v13460_v40  ;;  %v6328_v36 = vadd.s32 536870912, %v13500_v3  ;;  %v6384_v48 = vand.u32 31, %v6382_v50 }
0x14a0   :  { %v13509_v56 = vmul.f32 %v5934_v55, %v13296_v22  ;;  %v13511_v41 = vadd.f32 1.0, %v5927_v35  ;;  %v13514_v17 = vmul.f32 0.5, %v13261_v34  ;;  %v13519_v54 = vsel %vm5761_vm2, -1.0, %v14854_v49 }
0x14a1   :  { %v13521_v29 = vmul.f32 %v6040_v53, %v6038_v33  ;;  %v6136_v32 = vor.u32 %v6135_v25, %v6134_v43  ;;  %v6140_v60 = vor.u32 4788187, %v6139_v4  ;;  %v6385_v40 = vsub.s32 32, %v6384_v48  ;;  %v13542_v4 = vpop.f32.mrf.mxu0 }
0x14a2   :  { %v5872_v45 = vmul.f32 %v13320_v28, %v5864_v13  ;;  %v9061_v46 = vadd.s32 4294967294, %v6232_v44  ;;  %v5865_v22 = vadd.f32 0.2548296, %v5857_v2  ;;  %v6377_v55 = vand.u32 8388607, %v14793_v47 }
0x14a3   :  { %v13526_v63 = vshrl.u32 %v6328_v36, 30  ;;  %v6388_v34 = vshrl.u32 %v14848_v16, %v6385_v40  ;;  %v6391_v5 = vshrl.u32 %v14845_v62, %v6385_v40  ;;  %v6394_v42 = vshrl.u32 %v14849_v15, %v6385_v40 }
0x14a4   :  { %v10057_v27 = vpop.eup %10056  ;;  %v6387_v52 = vshll.u32 %v14847_v12, %v6384_v48  ;;  %v6390_v9 = vshll.u32 %v14848_v16, %v6384_v48  ;;  %v6396_v28 = vshll.u32 %v14849_v15, %v6384_v48  ;;  %v6397_v1 = vshrl.u32 %v14859_v6, %v6385_v40 }
0x14a5   :  { %14953 = vst [vmem:[#allocation35_spill] sm:$0xff] %v13526_v63  ;;  %v6042_v18 = vxor.u32 2147483648, %v13521_v29  ;;  %v13536_v24 = vshrl.u32 %v6382_v50, 5  ;;  %v6393_v11 = vshll.u32 %v14845_v62, %v6384_v48  ;;  %v6400_v26 = vshrl.u32 %v14846_v59, %v6385_v40 }
0x14a6   :  { %v13540_v35 = vmul.f32 %v10057_v27, %v5872_v45  ;;  %v6389_v58 = vor.u32 %v6388_v34, %v6387_v52  ;;  %v6392_v33 = vor.u32 %v6391_v5, %v6390_v9  ;;  %v6398_v25 = vor.u32 %v6397_v1, %v6396_v28 }
0x14a7   :  { %v6143_v13 = vcvt.s32.f32 %v6136_v32  ;;  %v6330_v2 = vshll.u32 %v13526_v63, 30  ;;  %v6395_v44 = vor.u32 %v6394_v42, %v6393_v11  ;;  %v6399_v53 = vshll.u32 %v14859_v6, %v6384_v48 }
0x14a8   :  { %vm5960_vm4 = vcmp.lt.s32.totalorder %v13153_v61, 0  ;;  %v6141_v50 = vand.u32 2147483647, %v6140_v60  ;;  %vm9062_vm13 = vcmp.lt.s32.totalorder %v9061_v46, 0  ;;  %v5873_v43 = vmul.f32 %v13356_v19, %v5865_v22 }
0x14a9   :  { %v6378_v36 = vor.u32 8388608, %v6377_v55  ;;  %v10059_v45 = vpop.eup %10058  ;;  %v6401_v27 = vor.u32 %v6400_v26, %v6399_v53  ;;  %vm6402_vm11 = vcmp.lt.s32.totalorder %v13536_v24, 1  ;;  %vm6405_vm7 = vcmp.lt.s32.totalorder %v13536_v24, 4 }
0x14aa   :  { %v13551_v32 = vmul.f32 0.70710677, %v13542_v4  ;;  %v5920_v34 = vsub.f32 1.0, %v13540_v35  ;;  %vm6404_vm15 = vcmp.lt.s32.totalorder %v13536_v24, 3  ;;  %v6410_v48 = vsel %vm6402_vm11, %v6389_v58, %v6392_v33 }
0x14ab   :  { %v6411_v19 = vsel %vm6405_vm7, %v6398_v25, 920167782  ;;  %v13559_v60 = vpop.eup %10060  ;;  %v14954_v22 = vand.u32 2147483647, %v13153_v61  ;;  %v13567_v5 = vsel %vm9062_vm13, 0, %v9061_v46  ;;  %v13570_v42 = vsub.s32 %v13500_v3, %v6330_v2 }
0x14ac   :  { %vm6403_vm8 = vcmp.lt.s32.totalorder %v13536_v24, 2  ;;  %v6412_v52 = vsel %vm6404_vm15, %v6395_v44, %v6411_v19  ;;  %vm6063_vm0 = vcmp.lt.s32.totalorder %v13162_v0, 0  ;;  %v6144_v9 = vmul.f32 %v6143_v13, %v6141_v50  ;;  %v5729_v19 = vpop.f32.mrf.mxu0 }
0x14ad   :  { %vm13563_vm10 = vcmp.le.f32.partialorder %v14954_v22, 0.7853982  ;;  %v5913_v28 = vmul.f32 %v10059_v45, %v5873_v43  ;;  %v6413_v1 = vsel %vm6403_vm8, %v6410_v48, %v6412_v52  ;;  %v6418_v11 = vshll.u32 %v6378_v36, 8 }
0x14ae   :  { %v6407_v46 = vsel %vm6405_vm7, %v6395_v44, 2102212464  ;;  %v6414_v3 = vsel %vm6402_vm11, %v6392_v33, %v6395_v44  ;;  %v6415_v26 = vsel %vm6405_vm7, %v6401_v27, 1326507024  ;;  %v13585_v35 = vand.u32 2147483647, %v13551_v32 }
0x14af   :  { %v6240_v2 = vsub.s32 4294967266, %v13567_v5  ;;  %v5810_v13 = vmul.f32 1.0614054, %v13559_v60  ;;  %v6386_v53 = vshrl.u32 %v14847_v12, %v6385_v40  ;;  %v6416_v50 = vsel %vm6404_vm15, %v6398_v25, %v6415_v26 }
0x14b0   :  { %v14957_v43 = vand.u32 2147483647, %v13162_v0  ;;  %v14958_v36 = vmov 0  ;;  %v6333_v44 = vsub.s32 0, %v13570_v42  ;;  %v6417_v45 = vsel %vm6403_vm8, %v6414_v3, %v6416_v50 }
0x14b1   :  { %v13601_v27 = vmul.u32.u64.low %v6418_v11, %v6413_v1  ;;  %v13602_v48 = vmul.u32.u64.high %v6418_v11, %v6413_v1, %v13601_v27  ;;  %v6406_v40 = vsel %vm6402_vm11, %v6386_v53, %v6389_v58  ;;  %v6408_v25 = vsel %vm6404_vm15, %v6392_v33, %v6407_v46 }
0x14b2   :  { %vm13594_vm9 = vcmp.le.f32.partialorder %v14957_v43, 0.7853982  ;;  %v13609_v22 = vmul.u32.u64.low %v6418_v11, %v6417_v45  ;;  %v13610_v52 = vmul.u32.u64.high %v6418_v11, %v6417_v45, %v13609_v22  ;;  %v6043_v26 = vsel %vm5960_vm4, %v6042_v18, %v13521_v29 }
0x14b3   :  { %v14959_v36 = vsel %vm13594_vm9, 4294967295, %v14958_v36  ;;  %v6145_v43 = vxor.u32 2147483648, %v6144_v9  ;;  %v5921_v3 = vsub.f32 1.0, %v5913_v28  ;;  %v5787_v1 = vmul.f32 0.3275911, %v13585_v35 }
0x14b4   :  { %14960 = vst [vmem:[#allocation36_spill] sm:$0xff] %v14959_v36  ;;  %v6236_v50 = vsub.s32 32, %v13567_v5  ;;  %v6241_v47 = vadd.s32 127, %v6240_v2  ;;  %v5818_v38 = vadd.f32 -1.4531521, %v5810_v13  ;;  %v13617_v63 = vmul.f32 0.5, %v5729_v19 }
0x14b5   :  { %v9064_v58 = vmin.u32 %v6333_v44, %v13570_v42  ;;  %v6409_v33 = vsel %vm6403_vm8, %v6406_v40, %v6408_v25  ;;  %v6428_v46 = vadd.s32 1, %v13602_v48  ;;  %v5795_v53 = vadd.f32 1.0, %v5787_v1 }
0x14b6   :  { %14961 = vst [vmem:[#allocation37_spill] sm:$0xff] %v13617_v63  ;;  %v6046_v29 = vsel %vm13563_vm10, %v13153_v61, %v6043_v26  ;;  %v5928_v18 = vmul.f32 %v5920_v34, %v13386_v51  ;;  %v6220_v28 = vadd.s32 %v13344_v30, %v13354_v21  ;;  %vm6427_vm14 = vc.u32 %v13610_v52, %v13601_v27  ;;  %v13640_v30 = vpop.f32.mrf.mxu0 }
0x14b7   :  { %v6146_v2 = vsel %vm6063_vm0, %v6145_v43, %v6144_v9  ;;  %v5929_v24 = vmul.f32 %v5921_v3, %v13519_v54  ;;  %v6429_v13 = vsel %vm6427_vm14, %v6428_v46, %v13602_v48  ;;  %10062 = vrcp.f32 %v5795_v53 }
0x14b8   :  { %v13637_v44 = vmul.f32 %v13511_v41, %v13302_v37  ;;  %v6242_v45 = vshll.u32 %v6241_v47, 23  ;;  %v5826_v51 = vmul.f32 %v13559_v60, %v5818_v38  ;;  %v6425_v34 = vmul.u32 %v6418_v11, %v6409_v33 }
0x14b9   :  { %v6238_v21 = vshrl.u32 %v6220_v28, %v6236_v50  ;;  %v6335_v19 = vclz %v9064_v58  ;;  %v13643_v40 = vmul.f32 0.5, %v13408_v7  ;;  %v6476_v54 = vand.u32 2139095040, %v13617_v63 }
0x14ba   :  { %10064 = vcosq.f32 %v6046_v29  ;;  %v6149_v9 = vsel %vm13594_vm9, %v13162_v0, %v6146_v2  ;;  %v5936_v37 = vadd.f32 1.0, %v5928_v18  ;;  %v13649_v41 = vadd.s32 %v6429_v13, %v6425_v34 }
0x14bb   :  { %v6237_v38 = vshll.u32 %v13454_v20, %v13567_v5  ;;  %v5937_v47 = vadd.f32 1.0, %v5929_v24  ;;  %v6477_v11 = vshrl.u32 %v6476_v54, 23  ;;  %v13654_v48 = vmul.f32 0.70710677, %v13640_v30 }
0x14bc   :  { %10066 = vsinq.f32 %v6046_v29  ;;  %v6243_v7 = vor.u32 4788187, %v6242_v45  ;;  %v5834_v25 = vadd.f32 1.4214138, %v5826_v51  ;;  %v5882_v22 = vsub.f32 0.0, %v13467_v39 }
0x14bd   :  { %v6239_v26 = vor.u32 %v6238_v21, %v6237_v38  ;;  %v9065_v43 = vadd.s32 4294967294, %v6335_v19  ;;  %v5883_v3 = vsub.f32 0.0, %v13585_v35  ;;  %v9071_v1 = vadd.s32 4294967169, %v6477_v11 }
0x14be   :  { %10068 = vcosq.f32 %v6149_v9  ;;  %vm5762_vm5 = vcmp.lt.f32.partialorder %v13437_v8, 0.0  ;;  %v6431_v20 = vadd.s32 536870912, %v13649_v41  ;;  %v13661_v5 = vand.u32 2147483647, %v13654_v48 }
0x14bf   :  { %10070 = vsinq.f32 %v6149_v9  ;;  %v13664_v50 = vmul.f32 %v5936_v37, %v13360_v31  ;;  %v13667_v58 = vmul.f32 %v5937_v47, %v13514_v17  ;;  %v6483_v33 = vadd.s32 1, %v9071_v1 }
0x14c0   :  { %v6244_v46 = vand.u32 2147483647, %v6243_v7  ;;  %v5842_v53 = vmul.f32 %v13559_v60, %v5834_v25  ;;  %v5890_v29 = vmul.f32 %v5882_v22, %v13467_v39  ;;  %v5788_v18 = vmul.f32 0.3275911, %v13661_v5 }
0x14c1   :  { %v6246_v28 = vcvt.s32.f32 %v6239_v26  ;;  %vm9066_vm12 = vcmp.lt.s32.totalorder %v9065_v43, 0  ;;  %v5891_v2 = vmul.f32 %v5883_v3, %v13585_v35  ;;  %vm6484_vm2 = vcmp.gt.s32.totalorder %v6483_v33, 0 }
0x14c2   :  { %v13673_v24 = vshrl.u32 %v6431_v20, 30  ;;  %v14798_v31 = vand.u32 2147483647, %v13617_v63  ;;  %v6485_v13 = vsel %vm6484_vm2, %v6483_v33, 0  ;;  %v5796_v17 = vadd.f32 1.0, %v5788_v18 }
0x14c3   :  { %v13680_v51 = vadd.s32 %v13450_v23, %v13464_v14  ;;  %v13685_v39 = vsel %vm5762_vm5, -1.0, %v14854_v49  ;;  %v6487_v35 = vand.u32 31, %v6485_v13  ;;  %v13689_v21 = vmul.f32 %v6246_v28, %v6244_v46 }
0x14c4   :  { %14962 = vst [vmem:[#allocation51_spill] sm:$0xff] %v13673_v24  ;;  %v13687_v34 = vpop.eup %10062  ;;  %v5850_v19 = vadd.f32 -0.28449672, %v5842_v53  ;;  %v5902_v54 = vmul.f32 1.442695, %v5890_v29  ;;  %10072 = vrcp.f32 %v5796_v17  ;;  %v13692_v9 = vsel %vm9066_vm12, 0, %v9065_v43 }
0x14c5   :  { %v5811_v37 = vmul.f32 1.0614054, %v13687_v34  ;;  %v5904_v23 = vmul.f32 1.442695, %v5891_v2  ;;  %v6488_v14 = vsub.s32 32, %v6487_v35  ;;  %v6433_v38 = vshll.u32 %v13673_v24, 30 }
0x14c6   :  { %v6480_v8 = vand.u32 8388607, %v14798_v31  ;;  %v13698_v47 = vshrl.u32 %v6485_v13, 5  ;;  %v6490_v11 = vshll.u32 %v14847_v12, %v6487_v35  ;;  %v6493_v26 = vshll.u32 %v14848_v16, %v6487_v35 }
0x14c7   :  { %v13701_v7 = vpop.eup %10064  ;;  %v5819_v25 = vadd.f32 -1.4531521, %v5811_v37  ;;  %v6491_v22 = vshrl.u32 %v14848_v16, %v6488_v14  ;;  %v6494_v43 = vshrl.u32 %v14845_v62, %v6488_v14  ;;  %v6496_v3 = vshll.u32 %v14845_v62, %v6487_v35 }
0x14c8   :  { %v6497_v1 = vshrl.u32 %v14849_v15, %v6488_v14  ;;  %v6499_v20 = vshll.u32 %v14849_v15, %v6487_v35  ;;  %v6500_v33 = vshrl.u32 %v14859_v6, %v6488_v14  ;;  %v6503_v28 = vshrl.u32 %v14846_v59, %v6488_v14 }
0x14c9   :  { %v13710_v46 = vpop.eup %10066  ;;  %v5827_v53 = vmul.f32 %v13687_v34, %v5819_v25  ;;  %v6492_v29 = vor.u32 %v6491_v22, %v6490_v11  ;;  %v6495_v18 = vor.u32 %v6494_v43, %v6493_v26  ;;  %10074 = vpow2.f32 %v5902_v54 }
0x14ca   :  { %v13715_v2 = vsub.s32 %v13649_v41, %v6433_v38  ;;  %v6481_v13 = vor.u32 8388608, %v6480_v8  ;;  %v6501_v17 = vor.u32 %v6500_v33, %v6499_v20  ;;  %v6248_v31 = vxor.u32 2147483648, %v13689_v21 }
0x14cb   :  { %v13717_v37 = vpop.eup %10068  ;;  %v5835_v45 = vadd.f32 1.4214138, %v5827_v53  ;;  %v6498_v24 = vor.u32 %v6497_v1, %v6496_v3  ;;  %v6502_v63 = vshll.u32 %v14859_v6, %v6487_v35  ;;  %v6343_v11 = vsub.s32 4294967266, %v13692_v9  ;;  %v5735_v1 = vpop.f32.mrf.mxu0 }
0x14cc   :  { %14963 = vst [vmem:[#allocation52_spill] sm:$0xff] %v13717_v37  ;;  %v13721_v36 = vpop.eup %10070  ;;  %v5858_v25 = vmul.f32 %v13559_v60, %v5850_v19  ;;  %10076 = vpow2.f32 %v5904_v23  ;;  %vm6505_vm1 = vcmp.lt.s32.totalorder %v13698_v47, 1  ;;  %vm6166_vm13 = vcmp.lt.s32.totalorder %v13257_v57, 0 }
0x14cd   :  { %v5843_v41 = vmul.f32 %v13687_v34, %v5835_v45  ;;  %v6504_v54 = vor.u32 %v6503_v28, %v6502_v63  ;;  %vm6508_vm11 = vcmp.lt.s32.totalorder %v13698_v47, 4  ;;  %v6513_v38 = vsel %vm6505_vm1, %v6492_v29, %v6495_v18 }
0x14ce   :  { %v6436_v35 = vsub.s32 0, %v13715_v2  ;;  %vm6507_vm7 = vcmp.lt.s32.totalorder %v13698_v47, 3  ;;  %v6514_v19 = vsel %vm6508_vm11, %v6501_v17, 920167782  ;;  %v6521_v23 = vshll.u32 %v6481_v13, 8 }
0x14cf   :  { %v5851_v8 = vadd.f32 -0.28449672, %v5843_v41  ;;  %vm6506_vm15 = vcmp.lt.s32.totalorder %v13698_v47, 2  ;;  %v6510_v45 = vsel %vm6508_vm11, %v6498_v24, 2102212464  ;;  %v6515_v63 = vsel %vm6507_vm7, %v6498_v24, %v6514_v19 }
0x14d0   :  { %v5866_v22 = vadd.f32 0.2548296, %v5858_v25  ;;  %v6489_v26 = vshrl.u32 %v14847_v12, %v6488_v14  ;;  %v6516_v43 = vsel %vm6506_vm15, %v6513_v38, %v6515_v63  ;;  %v6517_v3 = vsel %vm6505_vm1, %v6495_v18, %v6498_v24 }
0x14d1   :  { %v13745_v20 = vpop.eup %10072  ;;  %v5859_v33 = vmul.f32 %v13687_v34, %v5851_v8  ;;  %v6518_v53 = vsel %vm6508_vm11, %v6504_v54, 1326507024  ;;  %v13750_v28 = vmul.u32.u64.low %v6521_v23, %v6516_v43  ;;  %v13751_v13 = vmul.u32.u64.high %v6521_v23, %v6516_v43, %v13750_v28 }
0x14d2   :  { %v9068_v14 = vmin.u32 %v6436_v35, %v13715_v2  ;;  %v6509_v25 = vsel %vm6505_vm1, %v6489_v26, %v6492_v29  ;;  %v6511_v24 = vsel %vm6507_vm7, %v6495_v18, %v6510_v45  ;;  %v6519_v41 = vsel %vm6507_vm7, %v6501_v17, %v6518_v53 }
0x14d3   :  { %14964 = vst [vmem:[#allocation53_spill] sm:$0xff] %v13750_v28  ;;  %v14965_v38 = vand.u32 2147483647, %v13257_v57  ;;  %v14966_v19 = vmov 0  ;;  %v5867_v54 = vadd.f32 0.2548296, %v5859_v33  ;;  %v6520_v8 = vsel %vm6506_vm15, %v6517_v3, %v6519_v41 }
0x14d4   :  { %v5812_v35 = vmul.f32 1.0614054, %v13745_v20  ;;  %v13770_v63 = vmul.f32 0.5, %v5735_v1  ;;  %v6339_v29 = vsub.s32 32, %v13692_v9  ;;  %v6344_v18 = vadd.s32 127, %v6343_v11 }
0x14d5   :  { %vm13763_vm8 = vcmp.le.f32.partialorder %v14965_v38, 0.7853982  ;;  %v13773_v45 = vmul.u32.u64.low %v6521_v23, %v6520_v8  ;;  %v13774_v26 = vmul.u32.u64.high %v6521_v23, %v6520_v8, %v13773_v45  ;;  %v5874_v17 = vmul.f32 %v13559_v60, %v5866_v22 }
0x14d6   :  { %v14967_v19 = vsel %vm13763_vm8, 4294967295, %v14966_v19  ;;  %14969 = vst [vmem:[#allocation55_spill] sm:$0xff] %v13770_v63  ;;  %v6512_v43 = vsel %vm6506_vm15, %v6509_v25, %v6511_v24  ;;  %v6531_v33 = vadd.s32 1, %v13751_v13  ;;  %v5820_v53 = vadd.f32 -1.4531521, %v5812_v35  ;;  %v10075_v38 = vpop.eup %10074 }
0x14d7   :  { %14968 = vst [vmem:[#allocation54_spill] sm:$0xff] %v14967_v19  ;;  %14970 = vst [vmem:[#allocation56_spill] sm:$0xff] %v13774_v26  ;;  %v6249_v3 = vsel %vm6166_vm13, %v6248_v31, %v13689_v21  ;;  %v6438_v1 = vclz %v9068_v14  ;;  %v13784_v41 = vmul.f32 0.5, %v13542_v4  ;;  %v5884_v11 = vsub.f32 0.0, %v13661_v5 }
0x14d8   :  { %v6340_v60 = vshll.u32 %v13570_v42, %v13692_v9  ;;  %v5875_v47 = vmul.f32 %v13687_v34, %v5867_v54  ;;  %v5828_v22 = vmul.f32 %v13745_v20, %v5820_v53  ;;  %v6579_v25 = vand.u32 2139095040, %v13770_v63  ;;  %v13796_v42 = vpop.f32.mrf.mxu0 }
0x14d9   :  { %v6341_v24 = vshrl.u32 %v13680_v51, %v6339_v29  ;;  %v6345_v8 = vshll.u32 %v6344_v18, 23  ;;  %v6528_v31 = vmul.u32 %v6521_v23, %v6512_v43  ;;  %vm6530_vm14 = vc.u32 %v13774_v26, %v13750_v28  ;;  %v10077_v4 = vpop.eup %10076  ;;  %14971 = vst [vmem:[#allocation57_spill] sm:$0xff] %v13796_v42 }
0x14da   :  { %v5914_v21 = vmul.f32 %v10075_v38, %v5874_v17  ;;  %v6532_v14 = vsel %vm6530_vm14, %v6531_v33, %v13751_v13  ;;  %v5836_v35 = vadd.f32 1.4214138, %v5828_v22  ;;  %v6580_v45 = vshrl.u32 %v6579_v25, 23 }
0x14db   :  { %v9069_v34 = vadd.s32 4294967294, %v6438_v1  ;;  %v6533_v9 = vadd.s32 %v6532_v14, %v6528_v31  ;;  %v5892_v54 = vmul.f32 %v5884_v11, %v13661_v5  ;;  %v14804_v53 = vand.u32 2147483647, %v13770_v63 }
0x14dc   :  { %vm5763_vm5 = vcmp.lt.f32.partialorder %v13551_v32, 0.0  ;;  %v5915_v51 = vmul.f32 %v10077_v4, %v5875_v47  ;;  %v5844_v23 = vmul.f32 %v13745_v20, %v5836_v35  ;;  %v9075_v29 = vadd.s32 4294967169, %v6580_v45 }
0x14dd   :  { %v13805_v13 = vsel %vm13763_vm8, %v13257_v57, %v6249_v3  ;;  %v6342_v18 = vor.u32 %v6341_v24, %v6340_v60  ;;  %v6534_v17 = vadd.s32 536870912, %v6533_v9  ;;  %v13808_v43 = vmul.f32 0.70710677, %v13796_v42 }
0x14de   :  { %v6346_v33 = vor.u32 4788187, %v6345_v8  ;;  %v5922_v5 = vsub.f32 1.0, %v5914_v21  ;;  %v5852_v1 = vadd.f32 -0.28449672, %v5844_v23  ;;  %v6586_v11 = vadd.s32 1, %v9075_v29 }
0x14df   :  { %vm9070_vm12 = vcmp.lt.s32.totalorder %v9069_v34, 0  ;;  %v13810_v38 = vshrl.u32 %v6534_v17, 30  ;;  %v5906_v47 = vmul.f32 1.442695, %v5892_v54  ;;  %v6583_v22 = vand.u32 8388607, %v14804_v53 }
0x14e0   :  { %v5923_v25 = vsub.f32 1.0, %v5915_v51  ;;  %v5860_v3 = vmul.f32 %v13745_v20, %v5852_v1  ;;  %vm6587_vm2 = vcmp.gt.s32.totalorder %v6586_v11, 0  ;;  %v13816_v60 = vand.u32 2147483647, %v13808_v43 }
0x14e1   :  { %14972 = vst [vmem:[#allocation58_spill] sm:$0xff] %v13810_v38  ;;  %10078 = vcosq.f32 %v13805_v13  ;;  %v5771_v24 = vsel %vm5763_vm5, -1.0, %v14854_v49  ;;  %v6536_v8 = vshll.u32 %v13810_v38, 30  ;;  %v6588_v31 = vsel %vm6587_vm2, %v6586_v11, 0 }
0x14e2   :  { %v6347_v4 = vand.u32 2147483647, %v6346_v33  ;;  %v6349_v21 = vcvt.s32.f32 %v6342_v18  ;;  %v5930_v14 = vmul.f32 %v5922_v5, %v13685_v39  ;;  %v6590_v35 = vand.u32 31, %v6588_v31 }
0x14e3   :  { %v13825_v45 = vsel %vm9070_vm12, 0, %v9069_v34  ;;  %v13827_v54 = vsub.s32 %v6533_v9, %v6536_v8  ;;  %10080 = vpow2.f32 %v5906_v47  ;;  %v6584_v51 = vor.u32 8388608, %v6583_v22 }
0x14e4   :  { %v5931_v23 = vmul.f32 %v5923_v25, %v5771_v24  ;;  %v5868_v29 = vadd.f32 0.2548296, %v5860_v3  ;;  %v6591_v17 = vsub.s32 32, %v6590_v35  ;;  %v5789_v32 = vmul.f32 0.3275911, %v13816_v60 }
0x14e5   :  { %v6539_v1 = vsub.s32 0, %v13827_v54  ;;  %v13831_v11 = vshrl.u32 %v6588_v31, 5  ;;  %v6593_v18 = vshll.u32 %v14847_v12, %v6590_v35  ;;  %v6596_v39 = vshll.u32 %v14848_v16, %v6590_v35 }
0x14e6   :  { %v6594_v34 = vshrl.u32 %v14848_v16, %v6591_v17  ;;  %v6597_v9 = vshrl.u32 %v14845_v62, %v6591_v17  ;;  %v6599_v33 = vshll.u32 %v14845_v62, %v6590_v35  ;;  %v6602_v5 = vshll.u32 %v14849_v15, %v6590_v35 }
0x14e7   :  { %v6600_v47 = vshrl.u32 %v14849_v15, %v6591_v17  ;;  %v6603_v22 = vshrl.u32 %v14859_v6, %v6591_v17  ;;  %v6605_v25 = vshll.u32 %v14859_v6, %v6590_v35  ;;  %v6606_v3 = vshrl.u32 %v14846_v59, %v6591_v17 }
0x14e8   :  { %v13843_v24 = vmul.f32 %v6349_v21, %v6347_v4  ;;  %v5938_v8 = vadd.f32 1.0, %v5930_v14  ;;  %v6595_v31 = vor.u32 %v6594_v34, %v6593_v18  ;;  %v6598_v53 = vor.u32 %v6597_v9, %v6596_v39  ;;  %v5739_v21 = vpop.f32.mrf.mxu0 }
0x14e9   :  { %v6446_v63 = vsub.s32 4294967266, %v13825_v45  ;;  %v6601_v38 = vor.u32 %v6600_v47, %v6599_v33  ;;  %v6604_v19 = vor.u32 %v6603_v22, %v6602_v5  ;;  %v6607_v57 = vor.u32 %v6606_v3, %v6605_v25 }
0x14ea   :  { %v5939_v42 = vadd.f32 1.0, %v5931_v23  ;;  %vm6608_vm1 = vcmp.lt.s32.totalorder %v13831_v11, 1  ;;  %v13847_v28 = vshll.u32 %v6584_v51, 8  ;;  %v5797_v26 = vadd.f32 1.0, %v5789_v32 }
0x14eb   :  { %v9072_v35 = vmin.u32 %v6539_v1, %v13827_v54  ;;  %v5876_v37 = vmul.f32 %v13745_v20, %v5868_v29  ;;  %vm6611_vm11 = vcmp.lt.s32.totalorder %v13831_v11, 4  ;;  %v6616_v4 = vsel %vm6608_vm1, %v6595_v31, %v6598_v53 }
0x14ec   :  { %vm6610_vm7 = vcmp.lt.s32.totalorder %v13831_v11, 3  ;;  %v6613_v14 = vsel %vm6611_vm11, %v6601_v38, 2102212464  ;;  %v6617_v18 = vsel %vm6611_vm11, %v6604_v19, 920167782  ;;  %v6620_v23 = vsel %vm6608_vm1, %v6598_v53, %v6601_v38 }
0x14ed   :  { %v6592_v51 = vshrl.u32 %v14847_v12, %v6591_v17  ;;  %vm6609_vm15 = vcmp.lt.s32.totalorder %v13831_v11, 2  ;;  %v6618_v20 = vsel %vm6610_vm7, %v6601_v38, %v6617_v18  ;;  %v6621_v29 = vsel %vm6611_vm11, %v6607_v57, 1326507024 }
0x14ee   :  { %v13861_v32 = vpop.eup %10078  ;;  %v5947_v1 = vmul.f32 %v5939_v42, %v13784_v41  ;;  %v6619_v39 = vsel %vm6609_vm15, %v6616_v4, %v6618_v20  ;;  %v6622_v34 = vsel %vm6610_vm7, %v6604_v19, %v6621_v29  ;;  %v13868_v9 = vmul.f32 0.5, %v5739_v21  ;;  %v14977_v29 = vld [vmem:[#allocation30_spill] sm:$0xff] }
0x14ef   :  { %vm6269_vm14 = vcmp.lt.s32.totalorder %v13293_v10, 0  ;;  %v6541_v17 = vclz %v9072_v35  ;;  %v6612_v33 = vsel %vm6608_vm1, %v6592_v51, %v6595_v31  ;;  %v6614_v57 = vsel %vm6610_vm7, %v6598_v53, %v6613_v14 }
0x14f0   :  { %v6623_v41 = vsel %vm6609_vm15, %v6620_v23, %v6622_v34  ;;  %v10081_v42 = vpop.eup %10080  ;;  %v13882_v19 = vmul.u32.u64.low %v13847_v28, %v6619_v39  ;;  %v13883_v47 = vmul.u32.u64.high %v13847_v28, %v6619_v39, %v13882_v19  ;;  %v5946_v22 = vmul.f32 %v5938_v8, %v13643_v40 }
0x14f1   :  { %v13878_v38 = vmul.u32.u64.low %v13847_v28, %v6623_v41  ;;  %v13879_v5 = vmul.u32.u64.high %v13847_v28, %v6623_v41, %v13878_v38  ;;  %v5916_v25 = vmul.f32 %v10081_v42, %v5876_v37  ;;  %10082 = vrcp.f32 %v5797_v26 }
0x14f2   :  { %v5885_v3 = vsub.f32 0.0, %v13816_v60  ;;  %v14973_v53 = vand.u32 2147483647, %v13293_v10  ;;  %v6426_v35 = vadd.s32 %v13601_v27, %v13610_v52  ;;  %v6679_v4 = vand.u32 2147483647, %v13868_v9 }
0x14f3   :  { %v6682_v21 = vand.u32 2139095040, %v13868_v9  ;;  %v8295_v40 = vpack.c.bf16 %v13637_v44, %v13509_v56  ;;  %v6442_v37 = vsub.s32 32, %v13825_v45  ;;  %v9073_v26 = vadd.s32 4294967294, %v6541_v17 }
0x14f4   :  { %vm13890_vm5 = vcmp.le.f32.partialorder %v14973_v53, 0.7853982  ;;  %v6615_v8 = vsel %vm6609_vm15, %v6612_v33, %v6614_v57  ;;  %v8297_v14 = vpack.c.bf16 %v5947_v1, %v5946_v22  ;;  %v6351_v18 = vxor.u32 2147483648, %v13843_v24 }
0x14f5   :  { %v6447_v23 = vadd.s32 127, %v6446_v63  ;;  %vm6633_vm12 = vc.u32 %v13879_v5, %v13882_v19  ;;  %v6634_v27 = vadd.s32 1, %v13883_v47  ;;  %9439 = vmatprep.mubr.bf16.mxu0 %v8295_v40  ;;  %vm5764_vm2 = vcmp.lt.f32.partialorder %v13654_v48, 0.0 }
0x14f6   :  { %v5924_v52 = vsub.f32 1.0, %v5916_v25  ;;  %v5893_v56 = vmul.f32 %v5885_v3, %v13816_v60  ;;  %v6683_v44 = vshrl.u32 %v6682_v21, 23  ;;  %v14976_v11 = vpack.c.bf16 %v13667_v58, %v13664_v50 }
0x14f7   :  { %v6631_v51 = vmul.u32 %v13847_v28, %v6615_v8  ;;  %v6635_v63 = vsel %vm6633_vm12, %v6634_v27, %v13883_v47  ;;  %v6686_v20 = vand.u32 8388607, %v6679_v4  ;;  %v6044_v1 = vsub.s32 4, %v14977_v29 }
0x14f8   :  { %9440 = vmatmul.mubr.bf16.vlgmr.msra.gmra.mxu0 %v14976_v11  ;;  %10084 = vsinq.f32 %v13805_v13  ;;  %v6444_v39 = vshrl.u32 %v6426_v35, %v6442_v37  ;;  %vm9074_vm1 = vcmp.lt.s32.totalorder %v9073_v26, 0  ;;  %v9079_v60 = vadd.s32 4294967169, %v6683_v44 }
0x14f9   :  { %9443 = vmatprep.mubr.bf16.mxu0 %v8297_v14  ;;  %v6352_v50 = vsel %vm6269_vm14, %v6351_v18, %v13843_v24  ;;  %v6448_v58 = vshll.u32 %v6447_v23, 23  ;;  %v5772_v28 = vsel %vm5764_vm2, -1.0, %v14854_v49  ;;  %v13924_v34 = vadd.s32 %v6635_v63, %v6631_v51  ;;  %v14978_v14 = vld [vmem:[#allocation32_spill] sm:$0xff] }
0x14fa   :  { %v6443_v17 = vshll.u32 %v13715_v2, %v13825_v45  ;;  %v5932_v33 = vmul.f32 %v5924_v52, %v5772_v28  ;;  %v6689_v57 = vadd.s32 1, %v9079_v60  ;;  %v6045_v13 = vsel %vm5960_vm4, %v6044_v1, %v14977_v29 }
0x14fb   :  { %v13931_v41 = vsel %vm9074_vm1, 0, %v9073_v26  ;;  %vm5765_vm11 = vcmp.lt.f32.partialorder %v13808_v43, 0.0  ;;  %v5908_v24 = vmul.f32 1.442695, %v5893_v56  ;;  %v6687_v42 = vor.u32 8388608, %v6686_v20 }
0x14fc   :  { %v13937_v48 = vsel %vm13890_vm5, %v13293_v10, %v6352_v50  ;;  %v13939_v38 = vor.u32 %v6444_v39, %v6443_v17  ;;  %v13942_v2 = vmul.f32 0.5, %v13640_v30  ;;  %vm6690_vm7 = vcmp.gt.s32.totalorder %v6689_v57, 0 }
0x14fd   :  { %v13944_v45 = vor.u32 4788187, %v6448_v58  ;;  %v6637_v47 = vadd.s32 536870912, %v13924_v34  ;;  %v6691_v22 = vsel %vm6690_vm7, %v6689_v57, 0  ;;  %v6047_v43 = vsel %vm13563_vm10, 0, %v6045_v13 }
0x14fe   :  { %v6549_v25 = vsub.s32 4294967266, %v13931_v41  ;;  %v13950_v3 = vadd.f32 1.0, %v5932_v33  ;;  %v13953_v53 = vsel %vm5765_vm11, -1.0, %v14854_v49  ;;  %v6693_v35 = vand.u32 31, %v6691_v22  ;;  %v13955_v21 = vpop.eup %10082 }
0x14ff   :  { %10086 = vpow2.f32 %v5908_v24  ;;  %v13957_v30 = vshll.u32 %v6687_v42, 8  ;;  %v6054_v40 = vxor.u32 2147483648, %v13710_v46  ;;  %v6057_v37 = vxor.u32 2147483648, %v13701_v7 }
0x1500   :  { %v5813_v55 = vmul.f32 1.0614054, %v13955_v21  ;;  %v6694_v26 = vsub.s32 32, %v6693_v35  ;;  %v6051_v8 = vand.u32 3, %v6047_v43  ;;  %v6147_v18 = vsub.s32 4, %v14978_v14 }
0x1501   :  { %v13963_v23 = vshrl.u32 %v6637_v47, 30  ;;  %v13965_v49 = vshrl.u32 %v6691_v22, 5  ;;  %v6696_v27 = vshll.u32 %v14847_v12, %v6693_v35  ;;  %v6875_v52 = vadd.s32 3, %v6047_v43 }
0x1502   :  { %v5821_v56 = vadd.f32 -1.4531521, %v5813_v55  ;;  %v6697_v44 = vshrl.u32 %v14848_v16, %v6694_v26  ;;  %v6699_v11 = vshll.u32 %v14848_v16, %v6693_v35  ;;  %v6702_v51 = vshll.u32 %v14845_v62, %v6693_v35 }
0x1503   :  { %v6700_v63 = vshrl.u32 %v14845_v62, %v6694_v26  ;;  %v6703_v20 = vshrl.u32 %v14849_v15, %v6694_v26  ;;  %v6705_v29 = vshll.u32 %v14849_v15, %v6693_v35  ;;  %v6706_v1 = vshrl.u32 %v14859_v6, %v6694_v26 }
0x1504   :  { %v5829_v39 = vmul.f32 %v13955_v21, %v5821_v56  ;;  %v6698_v60 = vor.u32 %v6697_v44, %v6696_v27  ;;  %v6708_v50 = vshll.u32 %v14859_v6, %v6693_v35  ;;  %v6148_v58 = vsel %vm6063_vm0, %v6147_v18, %v14978_v14 }
0x1505   :  { %v13980_v16 = vpop.eup %10084  ;;  %v6701_v28 = vor.u32 %v6700_v63, %v6699_v11  ;;  %v6704_v17 = vor.u32 %v6703_v20, %v6702_v51  ;;  %v6707_v62 = vor.u32 %v6706_v1, %v6705_v29  ;;  %v6709_v33 = vshrl.u32 %v14846_v59, %v6694_v26 }
0x1506   :  { %vm6050_vm4 = vweird.f32 %v13153_v61  ;;  %v6639_v15 = vshll.u32 %v13963_v23, 30  ;;  %v5837_v57 = vadd.f32 1.4214138, %v5829_v39  ;;  %vm6053_vm10 = vcmp.eq.s32.totalorder %v6051_v8, 0 }
0x1507   :  { %vm6056_vm15 = vcmp.eq.s32.totalorder %v6051_v8, 2  ;;  %v6710_v13 = vor.u32 %v6709_v33, %v6708_v50  ;;  %vm6711_vm12 = vcmp.lt.s32.totalorder %v13965_v49, 1  ;;  %v6055_v6 = vsel %vm6053_vm10, %v13701_v7, %v6054_v40 }
0x1508   :  { %v6058_v24 = vsel %vm6056_vm15, %v6057_v37, %v13710_v46  ;;  %v5845_v59 = vmul.f32 %v13955_v21, %v5837_v57  ;;  %vm6713_vm0 = vcmp.lt.s32.totalorder %v13965_v49, 3  ;;  %vm6714_vm2 = vcmp.lt.s32.totalorder %v13965_v49, 4 }
0x1509   :  { %v6719_v42 = vsel %vm6711_vm12, %v6698_v60, %v6701_v28  ;;  %v6695_v47 = vshrl.u32 %v14847_v12, %v6694_v26  ;;  %v6716_v22 = vsel %vm6714_vm2, %v6704_v17, 2102212464  ;;  %v6720_v43 = vsel %vm6714_vm2, %v6707_v62, 920167782 }
0x150a   :  { %v6724_v35 = vsel %vm6714_vm2, %v6710_v13, 1326507024  ;;  %v5853_v55 = vadd.f32 -0.28449672, %v5845_v59  ;;  %vm6712_vm1 = vcmp.lt.s32.totalorder %v13965_v49, 2  ;;  %v6721_v14 = vsel %vm6713_vm0, %v6704_v17, %v6720_v43 }
0x150b   :  { %v6723_v18 = vsel %vm6711_vm12, %v6701_v28, %v6704_v17  ;;  %v6722_v27 = vsel %vm6712_vm1, %v6719_v42, %v6721_v14  ;;  %v6725_v56 = vsel %vm6713_vm0, %v6707_v62, %v6724_v35  ;;  %vm6052_vm11 = vcmp.lt.s32.totalorder %v6051_v8, 2 }
0x150c   :  { %v6876_v12 = vand.u32 3, %v6875_v52  ;;  %v10087_v26 = vpop.eup %10086  ;;  %v14008_v44 = vsub.s32 %v13924_v34, %v6639_v15  ;;  %v5861_v11 = vmul.f32 %v13955_v21, %v5853_v55  ;;  %v6715_v51 = vsel %vm6711_vm12, %v6695_v47, %v6698_v60 }
0x150d   :  { %v6717_v63 = vsel %vm6713_vm0, %v6701_v28, %v6716_v22  ;;  %v6726_v20 = vsel %vm6712_vm1, %v6723_v18, %v6725_v56  ;;  %v14018_v29 = vmul.u32.u64.low %v13957_v30, %v6722_v27  ;;  %v14019_v1 = vmul.u32.u64.high %v13957_v30, %v6722_v27, %v14018_v29 }
0x150e   :  { %v6059_v8 = vsel %vm6052_vm11, %v6055_v6, %v6058_v24  ;;  %v6545_v34 = vsub.s32 32, %v13931_v41  ;;  %v5869_v52 = vadd.f32 0.2548296, %v5861_v11  ;;  %v6150_v50 = vsel %vm13594_vm9, 0, %v6148_v58  ;;  %v14984_v11 = vld [vmem:[#allocation53_spill] sm:$0xff] }
0x150f   :  { %v14025_v39 = vsel %vm6050_vm4, nan, %v6059_v8  ;;  %v14031_v28 = vadd.s32 127, %v6549_v25  ;;  %v14034_v17 = vmul.u32.u64.low %v13957_v30, %v6726_v20  ;;  %v14035_v62 = vmul.u32.u64.high %v13957_v30, %v6726_v20, %v14034_v17 }
0x1510   :  { %7954 = vperm.xlu0 %9618, %v14025_v39   ;;  %7617 = vperm.xlu1 %9640, %v14025_v39   ;;  %vm6878_vm7 = vcmp.eq.s32.totalorder %v6876_v12, 0  ;;  %v6642_v33 = vsub.s32 0, %v14008_v44  ;;  %v5877_v15 = vmul.f32 %v13955_v21, %v5869_v52  ;;  %v6718_v58 = vsel %vm6712_vm1, %v6715_v51, %v6717_v63  ;;  %v14980_v21 = vld [vmem:[#allocation52_spill] sm:$0xff]  ;;  %v14985_v63 = vld [vmem:[#allocation57_spill] sm:$0xff] }
0x1511   :  { %v6880_v25 = vsel %vm6878_vm7, %v13701_v7, %v6054_v40  ;;  %v6737_v57 = vadd.s32 1, %v14019_v1  ;;  %vm6881_vm9 = vcmp.eq.s32.totalorder %v6876_v12, 2  ;;  %v6154_v13 = vand.u32 3, %v6150_v50 }
0x1512   :  { %v6157_v6 = vxor.u32 2147483648, %v13721_v36  ;;  %v5917_v24 = vmul.f32 %v10087_v26, %v5877_v15  ;;  %vm6877_vm10 = vcmp.lt.s32.totalorder %v6876_v12, 2  ;;  %v6883_v59 = vsel %vm6881_vm9, %v6057_v37, %v13710_v46  ;;  %v14982_v12 = vld [vmem:[#allocation33_spill] sm:$0xff]  ;;  %v14983_v26 = vld [vmem:[#allocation56_spill] sm:$0xff] }
0x1513   :  { %v6160_v42 = vxor.u32 2147483648, %v14980_v21  ;;  %v6734_v49 = vmul.u32 %v13957_v30, %v6718_v58  ;;  %vm6736_vm15 = vc.u32 %v14035_v62, %v14018_v29  ;;  %v14981_v40 = vmov 0  }
0x1514   :  { %9644 = vset.pattern.permute.xlu0 %v14981_v40  ;;  %v6884_v47 = vsel %vm6877_vm10, %v6880_v25, %v6883_v59  ;;  %vm6153_vm12 = vweird.f32 %v13162_v0  ;;  %v9076_v22 = vmin.u32 %v6642_v33, %v14008_v44  ;;  %v5925_v43 = vsub.f32 1.0, %v5917_v24 }
0x1515   :  { %v6738_v35 = vsel %vm6736_vm15, %v6737_v57, %v14019_v1  ;;  %v14061_v7 = vsel %vm6050_vm4, nan, %v6884_v47  ;;  %vm6156_vm0 = vcmp.eq.s32.totalorder %v6154_v13, 0  ;;  %vm6159_vm2 = vcmp.eq.s32.totalorder %v6154_v13, 2 }
0x1516   :  { %v6739_v46 = vadd.s32 %v6738_v35, %v6734_v49  ;;  %7672 = vperm.xlu1 %9640, %v14061_v7   ;;  %v6979_v30 = vadd.s32 3, %v6150_v50  ;;  %v5933_v37 = vmul.f32 %v5925_v43, %v13953_v53  ;;  %vm6155_vm1 = vcmp.lt.s32.totalorder %v6154_v13, 2 }
0x1517   :  { %v6158_v55 = vsel %vm6156_vm0, %v14980_v21, %v6157_v6  ;;  %v6161_v14 = vsel %vm6159_vm2, %v6160_v42, %v13721_v36  ;;  %v6250_v61 = vsub.s32 4, %v14982_v12  ;;  %v6529_v51 = vadd.s32 %v14984_v11, %v14983_v26 }
0x1518   :  { %v6740_v18 = vadd.s32 536870912, %v6739_v46  ;;  %v6162_v27 = vsel %vm6155_vm1, %v6158_v55, %v6161_v14  ;;  %v6980_v56 = vand.u32 3, %v6979_v30  ;;  %v5749_v20 = vmul.f32 0.5, %v14985_v63  ;;  %v14990_v30 = vld [vmem:[#allocation35_spill] sm:$0xff] }
0x1519   :  { %v5941_v1 = vadd.f32 1.0, %v5933_v37  ;;  %v14073_v8 = vsel %vm6153_vm12, nan, %v6162_v27  ;;  %v6450_v53 = vand.u32 2147483647, %v13944_v45  ;;  %v6452_v52 = vcvt.s32.f32 %v13939_v38  ;;  %v14987_v38 = vld [vmem:[#allocation31_spill] sm:$0xff] }
0x151a   :  { %v6644_v60 = vclz %v9076_v22  ;;  %v14077_v50 = vshrl.u32 %v6740_v18, 30  ;;  %7622 = vperm.xlu0 %9644, %v14073_v8   ;;  %v14986_v17 = vmov 1   ;;  %v6547_v33 = vshrl.u32 %v6529_v51, %v6545_v34  ;;  %v14992_v51 = vld [vmem:[#allocation34_spill] sm:$0xff] }
0x151b   :  { %9641 = vset.pattern.permute.xlu1 %v14986_v17  ;;  %v6551_v15 = vshll.u32 %v14031_v28, 23  ;;  %v5948_v58 = vmul.f32 %v13950_v3, %v13942_v2  ;;  %v5949_v25 = vmul.f32 %v5941_v1, %v5749_v20  ;;  %vm6982_vm4 = vcmp.eq.s32.totalorder %v6980_v56, 0  ;;  %v14996_v28 = vld [vmem:[#allocation37_spill] sm:$0xff] }
0x151c   :  { %7734 = vperm.xlu1 %9641, %v14025_v39   ;;  %v6742_v45 = vshll.u32 %v14077_v50, 30  ;;  %vm6985_vm11 = vcmp.eq.s32.totalorder %v6980_v56, 2  ;;  %v6251_v57 = vsel %vm6166_vm13, %v6250_v61, %v14982_v12  ;;  %v6984_v24 = vsel %vm6982_vm4, %v14980_v21, %v6157_v6 }
0x151d   :  { %v8298_v13 = vpack.c.bf16 %v5949_v25, %v5948_v58  ;;  %v6987_v34 = vsel %vm6985_vm11, %v6160_v42, %v13721_v36  ;;  %v6253_v59 = vsel %vm13763_vm8, 0, %v6251_v57  ;;  %10088 = vcosq.f32 %v13937_v48 }
0x151e   :  { %v9077_v2 = vadd.s32 4294967294, %v6644_v60  ;;  %v14094_v3 = vsub.s32 %v6739_v46, %v6742_v45  ;;  %v14989_v49 = vmov 2   ;;  %v6453_v47 = vmul.f32 %v6452_v52, %v6450_v53 }
0x151f   :  { %9647 = vset.pattern.permute.xlu0 %v14989_v49  ;;  %v6546_v22 = vshll.u32 %v13827_v54, %v13931_v41  ;;  %9444 = vmatmul.mubr.bf16.gmra.mxu0 %v8298_v13  ;;  %vm6981_vm13 = vcmp.lt.s32.totalorder %v6980_v56, 2  ;;  %v7083_v6 = vadd.s32 3, %v6253_v59  ;;  %v6552_v36 = vor.u32 4788187, %v6551_v15 }
0x1520   :  { %7848 = vperm.xlu0 %9647, %v14073_v8   ;;  %7781 = vperm.xlu1 %9641, %v14061_v7   ;;  %v6988_v21 = vsel %vm6981_vm13, %v6984_v24, %v6987_v34  ;;  %v6260_v42 = vxor.u32 2147483648, %v13980_v16  ;;  %v6263_v43 = vxor.u32 2147483648, %v13861_v32  ;;  %10090 = vsinq.f32 %v13937_v48 }
0x1521   :  { %v6548_v35 = vor.u32 %v6547_v33, %v6546_v22  ;;  %v7084_v46 = vand.u32 3, %v7083_v6  ;;  %vm9078_vm8 = vcmp.lt.s32.totalorder %v9077_v2, 0  ;;  %v6745_v54 = vsub.s32 0, %v14094_v3 }
0x1522   :  { %v6257_v41 = vand.u32 3, %v6253_v59  ;;  %v6353_v37 = vsub.s32 4, %v14990_v30  ;;  %v6454_v55 = vxor.u32 2147483648, %v6453_v47  ;;  %v14991_v14 = vmov 3  }
0x1523   :  { %v14109_v18 = vsel %vm6153_vm12, nan, %v6988_v21  ;;  %vm7086_vm7 = vcmp.eq.s32.totalorder %v7084_v46, 0  ;;  %vm7089_vm9 = vcmp.eq.s32.totalorder %v7084_v46, 2  ;;  %v6553_v27 = vand.u32 2147483647, %v6552_v36 }
0x1524   :  { %9650 = vset.pattern.permute.xlu0 %v14991_v14  ;;  %9642 = vset.pattern.permute.xlu1 %v14989_v49  ;;  %vm7085_vm10 = vcmp.lt.s32.totalorder %v7084_v46, 2  ;;  %v7088_v48 = vsel %vm7086_vm7, %v13861_v32, %v6260_v42  ;;  %v7091_v56 = vsel %vm7089_vm9, %v6263_v43, %v13980_v16  ;;  %v6555_v12 = vcvt.s32.f32 %v6548_v35  ;;  %v15000_v35 = vld [vmem:[#allocation51_spill] sm:$0xff] }
0x1525   :  { %8005 = vperm.xlu0 %9650, %v14109_v18   ;;  %v14116_v61 = vsel %vm9078_vm8, 0, %v9077_v2  ;;  %7844 = vperm.xlu1 %9642, %v14025_v39   ;;  %v7092_v0 = vsel %vm7085_vm10, %v7088_v48, %v7091_v56  ;;  %v9080_v26 = vmin.u32 %v6745_v54, %v14094_v3  ;;  %vm6259_vm15 = vcmp.eq.s32.totalorder %v6257_v41, 0 }
0x1526   :  { %vm6262_vm12 = vcmp.eq.s32.totalorder %v6257_v41, 2  ;;  %v6354_v11 = vsel %vm6269_vm14, %v6353_v37, %v14990_v30  ;;  %vm6372_vm0 = vcmp.lt.s32.totalorder %v14992_v51, 0  ;;  %vm6256_vm2 = vweird.f32 %v14987_v38 }
0x1527   :  { %v6261_v63 = vsel %vm6259_vm15, %v13861_v32, %v6260_v42  ;;  %v6264_v20 = vsel %vm6262_vm12, %v6263_v43, %v13980_v16  ;;  %v6455_v39 = vsel %vm6372_vm0, %v6454_v55, %v6453_v47  ;;  %v6556_v1 = vmul.f32 %v6555_v12, %v6553_v27 }
0x1528   :  { %v6652_v53 = vsub.s32 4294967266, %v14116_v61  ;;  %v14133_v52 = vsel %vm6256_vm2, nan, %v7092_v0  ;;  %vm6258_vm14 = vcmp.lt.s32.totalorder %v6257_v41, 2  ;;  %v6356_v32 = vsel %vm13890_vm5, 0, %v6354_v11 }
0x1529   :  { %9652 = vset.pattern.permute.xlu0 %v14981_v40  ;;  %7891 = vperm.xlu1 %9642, %v14061_v7   ;;  %v14993_v16 = vand.u32 2147483647, %v14992_v51  ;;  %v6747_v33 = vclz %v9080_v26  ;;  %v6265_v15 = vsel %vm6258_vm14, %v6261_v63, %v6264_v20  ;;  %v6557_v45 = vxor.u32 2147483648, %v6556_v1 }
0x152a   :  { %7682 = vperm.xlu0 %9652, %v14133_v52   ;;  %v10089_v58 = vpop.eup %10088  ;;  %v6653_v57 = vadd.s32 127, %v6652_v53  ;;  %v7187_v13 = vadd.s32 3, %v6356_v32  ;;  %v14151_v31 = vsel %vm6256_vm2, nan, %v6265_v15  ;;  %vm6475_vm5 = vcmp.lt.s32.totalorder %v14996_v28, 0 }
0x152b   :  { %vm14141_vm1 = vcmp.le.f32.partialorder %v14993_v16, 0.7853982  ;;  %v9081_v34 = vadd.s32 4294967294, %v6747_v33  ;;  %v6648_v59 = vsub.s32 32, %v14116_v61  ;;  %v6558_v2 = vsel %vm6475_vm5, %v6557_v45, %v6556_v1  ;;  %v15001_v33 = vld [vmem:[#allocation58_spill] sm:$0xff] }
0x152c   :  { %v6458_v25 = vsel %vm14141_vm1, %v14992_v51, %v6455_v39  ;;  %v6654_v38 = vshll.u32 %v6653_v57, 23  ;;  %v7188_v47 = vand.u32 3, %v7187_v13  ;;  %v6632_v22 = vadd.s32 %v13882_v19, %v13879_v5 }
0x152d   :  { %9643 = vset.pattern.permute.xlu1 %v14991_v14  ;;  %v10091_v24 = vpop.eup %10090  ;;  %10092 = vcosq.f32 %v6458_v25  ;;  %v6366_v36 = vxor.u32 2147483648, %v10089_v58  ;;  %v14997_v21 = vand.u32 2147483647, %v14996_v28  ;;  %vm9082_vm11 = vcmp.lt.s32.totalorder %v9081_v34, 0 }
0x152e   :  { %9653 = vset.pattern.permute.xlu0 %v14986_v17  ;;  %8001 = vperm.xlu1 %9643, %v14061_v7   ;;  %10094 = vsinq.f32 %v6458_v25  ;;  %v6363_v6 = vxor.u32 2147483648, %v10091_v24  ;;  %v6649_v5 = vshll.u32 %v14008_v44, %v14116_v61  ;;  %v6650_v19 = vshrl.u32 %v6632_v22, %v6648_v59 }
0x152f   :  { %7742 = vperm.xlu0 %9653, %v14151_v31   ;;  %vm14164_vm4 = vcmp.le.f32.partialorder %v14997_v21, 0.7853982  ;;  %v6655_v43 = vor.u32 4788187, %v6654_v38  ;;  %vm7190_vm13 = vcmp.eq.s32.totalorder %v7188_v47, 0  ;;  %vm7193_vm8 = vcmp.eq.s32.totalorder %v7188_v47, 2 }
0x1530   :  { %v6561_v7 = vsel %vm14164_vm4, %v14996_v28, %v6558_v2  ;;  %v6456_v46 = vsub.s32 4, %v15000_v35  ;;  %v6750_v54 = vsel %vm9082_vm11, 0, %v9081_v34  ;;  %v7192_v41 = vsel %vm7190_vm13, %v10089_v58, %v6363_v6  ;;  %v15002_v34 = vld [vmem:[#allocation55_spill] sm:$0xff] }
0x1531   :  { %v7195_v30 = vsel %vm7193_vm8, %v6366_v36, %v10091_v24  ;;  %v6360_v37 = vand.u32 3, %v6356_v32  ;;  %v6651_v55 = vor.u32 %v6650_v19, %v6649_v5  ;;  %vm7189_vm7 = vcmp.lt.s32.totalorder %v7188_v47, 2 }
0x1532   :  { %9645 = vset.pattern.permute.xlu1 %v14981_v40  ;;  %10096 = vcosq.f32 %v6561_v7  ;;  %v6755_v44 = vsub.s32 4294967266, %v6750_v54  ;;  %v7196_v27 = vsel %vm7189_vm7, %v7192_v41, %v7195_v30  ;;  %v6457_v48 = vsel %vm6372_vm0, %v6456_v46, %v15000_v35 }
0x1533   :  { %9655 = vset.pattern.permute.xlu0 %v14989_v49  ;;  %7677 = vperm.xlu1 %9645, %v14109_v18   ;;  %10098 = vsinq.f32 %v6561_v7  ;;  %v6656_v56 = vand.u32 2147483647, %v6655_v43  ;;  %vm6362_vm9 = vcmp.eq.s32.totalorder %v6360_v37, 0  ;;  %vm6365_vm10 = vcmp.eq.s32.totalorder %v6360_v37, 2 }
0x1534   :  { %7852 = vperm.xlu0 %9655, %v14151_v31   ;;  %vm6359_vm15 = vweird.f32 %v13293_v10  ;;  %v6364_v12 = vsel %vm6362_vm9, %v10089_v58, %v6363_v6  ;;  %v6367_v61 = vsel %vm6365_vm10, %v6366_v36, %v10091_v24  ;;  %v6658_v26 = vcvt.s32.f32 %v6651_v55 }
0x1535   :  { %v14190_v11 = vsel %vm6359_vm15, nan, %v7196_v27  ;;  %v14194_v63 = vsel %vm14141_vm1, 0, %v6457_v48  ;;  %v6756_v39 = vadd.s32 127, %v6755_v44  ;;  %vm6361_vm12 = vcmp.lt.s32.totalorder %v6360_v37, 2 }
0x1536   :  { %v6659_v1 = vmul.f32 %v6658_v26, %v6656_v56  ;;  %v6368_v53 = vsel %vm6361_vm12, %v6364_v12, %v6367_v61  ;;  %v6751_v32 = vsub.s32 32, %v6750_v54  ;;  %v6463_v16 = vand.u32 3, %v14194_v63 }
0x1537   :  { %9646 = vset.pattern.permute.xlu1 %v14986_v17  ;;  %v6559_v15 = vsub.s32 4, %v15001_v33  ;;  %v6735_v25 = vadd.s32 %v14018_v29, %v14035_v62  ;;  %v6757_v45 = vshll.u32 %v6756_v39, 23  ;;  %v14209_v57 = vsel %vm6359_vm15, nan, %v6368_v53  ;;  %v14374_v39 = vld [vmem:[%s14905_s10 + $0x2] ss:$0 sm:$0xff] }
0x1538   :  { %7899 = vperm.xlu0 %9655, %v14133_v52   ;;  %7738 = vperm.xlu1 %9646, %v14073_v8   ;;  %v6660_v13 = vxor.u32 2147483648, %v6659_v1  ;;  %vm6465_vm0 = vcmp.eq.s32.totalorder %v6463_v16, 0  ;;  %vm6468_vm2 = vcmp.eq.s32.totalorder %v6463_v16, 2  ;;  %vm6578_vm14 = vcmp.lt.s32.totalorder %v15002_v34, 0 }
0x1539   :  { %v6753_v24 = vshrl.u32 %v6735_v25, %v6751_v32  ;;  %v6560_v29 = vsel %vm6475_vm5, %v6559_v15, %v15001_v33  ;;  %v6752_v59 = vshll.u32 %v14094_v3, %v6750_v54  ;;  %vm6464_vm1 = vcmp.lt.s32.totalorder %v6463_v16, 2 }
0x153a   :  { %v14185_v0 = vpop.eup %10092  ;;  %v6661_v38 = vsel %vm6578_vm14, %v6660_v13, %v6659_v1  ;;  %v6562_v47 = vsel %vm14164_vm4, 0, %v6560_v29  ;;  %v15003_v3 = vand.u32 2147483647, %v15002_v34  ;;  %vm6462_vm11 = vweird.f32 %v14992_v51 }
0x153b   :  { %v14196_v20 = vpop.eup %10094  ;;  %v6469_v60 = vxor.u32 2147483648, %v14185_v0  ;;  %v6754_v6 = vor.u32 %v6753_v24, %v6752_v59  ;;  %v6566_v42 = vand.u32 3, %v6562_v47  ;;  %v7395_v35 = vadd.s32 3, %v6562_v47 }
0x153c   :  { %9659 = vset.pattern.permute.xlu0 %v14986_v17  ;;  %7785 = vperm.xlu1 %9646, %v14109_v18   ;;  %v6466_v58 = vxor.u32 2147483648, %v14196_v20  ;;  %vm14234_vm5 = vcmp.le.f32.partialorder %v15003_v3, 0.7853982  ;;  %vm6565_vm10 = vweird.f32 %v14996_v28  ;;  %v6662_v56 = vsub.s32 4, %v13963_v23 }
0x153d   :  { %7793 = vperm.xlu0 %9659, %v14190_v11   ;;  %v6470_v62 = vsel %vm6468_vm2, %v6469_v60, %v14196_v20  ;;  %v6664_v7 = vsel %vm14234_vm5, %v15002_v34, %v6661_v38  ;;  %v6761_v46 = vcvt.s32.f32 %v6754_v6  ;;  %vm6568_vm4 = vcmp.eq.s32.totalorder %v6566_v42, 0 }
0x153e   :  { %v6467_v10 = vsel %vm6465_vm0, %v14185_v0, %v6466_v58  ;;  %10100 = vcosq.f32 %v6664_v7  ;;  %vm6571_vm13 = vcmp.eq.s32.totalorder %v6566_v42, 2  ;;  %v7396_v37 = vand.u32 3, %v7395_v35 }
0x153f   :  { %v10097_v2 = vpop.eup %10096  ;;  %v6471_v36 = vsel %vm6464_vm1, %v6467_v10, %v6470_v62  ;;  %10102 = vsinq.f32 %v6664_v7  ;;  %vm6567_vm8 = vcmp.lt.s32.totalorder %v6566_v42, 2  ;;  %vm6681_vm15 = vcmp.lt.s32.totalorder %v13868_v9, 0 }
0x1540   :  { %9648 = vset.pattern.permute.xlu1 %v14989_v49  ;;  %v10099_v22 = vpop.eup %10098  ;;  %v6572_v43 = vxor.u32 2147483648, %v10097_v2  ;;  %vm7398_vm7 = vcmp.eq.s32.totalorder %v7396_v37, 0  ;;  %vm7401_vm9 = vcmp.eq.s32.totalorder %v7396_v37, 2  ;;  %vm7397_vm12 = vcmp.lt.s32.totalorder %v7396_v37, 2 }
0x1541   :  { %9661 = vset.pattern.permute.xlu0 %v14991_v14  ;;  %7895 = vperm.xlu1 %9648, %v14109_v18   ;;  %v6758_v18 = vor.u32 4788187, %v6757_v45  ;;  %v6569_v19 = vxor.u32 2147483648, %v10099_v22  ;;  %vm14269_vm0 = vcmp.le.f32.partialorder %v6679_v4, 0.7853982  ;;  %v6663_v1 = vsel %vm6578_vm14, %v6662_v56, %v13963_v23 }
0x1542   :  { %7966 = vperm.xlu0 %9661, %v14209_v57   ;;  %v6573_v30 = vsel %vm6571_vm13, %v6572_v43, %v10099_v22  ;;  %v7403_v48 = vsel %vm7401_vm9, %v6572_v43, %v10099_v22  ;;  %v6665_v4 = vsel %vm14234_vm5, 0, %v6663_v1  ;;  %vm6668_vm5 = vweird.f32 %v15002_v34 }
0x1543   :  { %v6759_v5 = vand.u32 2147483647, %v6758_v18  ;;  %v6570_v41 = vsel %vm6568_vm4, %v10097_v2, %v6569_v19  ;;  %v7400_v27 = vsel %vm7398_vm7, %v10097_v2, %v6569_v19  ;;  %v6669_v23 = vand.u32 3, %v6665_v4 }
0x1544   :  { %v6574_v44 = vsel %vm6567_vm8, %v6570_v41, %v6573_v30  ;;  %v7404_v26 = vsel %vm7397_vm12, %v7400_v27, %v7403_v48  ;;  %v7499_v45 = vadd.s32 3, %v6665_v4 }
0x1545   :  { %9649 = vset.pattern.permute.xlu1 %v14991_v14  ;;  %v6762_v54 = vmul.f32 %v6761_v46, %v6759_v5  ;;  %v14260_v12 = vsel %vm6565_vm10, nan, %v6574_v44  ;;  %vm6671_vm2 = vcmp.eq.s32.totalorder %v6669_v23, 0  ;;  %vm6674_vm14 = vcmp.eq.s32.totalorder %v6669_v23, 2 }
0x1546   :  { %8013 = vperm.xlu0 %9661, %v14190_v11   ;;  %7958 = vperm.xlu1 %9649, %v14073_v8   ;;  %v14245_v8 = vsel %vm6462_vm11, nan, %v6471_v36  ;;  %vm6670_vm1 = vcmp.lt.s32.totalorder %v6669_v23, 2  ;;  %v7500_v29 = vand.u32 3, %v7499_v45 }
0x1547   :  { %v6763_v55 = vxor.u32 2147483648, %v6762_v54 }
0x1548   :  { %vm7502_vm4 = vcmp.eq.s32.totalorder %v7500_v29, 0  ;;  %vm7505_vm13 = vcmp.eq.s32.totalorder %v7500_v29, 2  ;;  %vm7501_vm8 = vcmp.lt.s32.totalorder %v7500_v29, 2 }
0x1549   :  { %v6764_v61 = vsel %vm6681_vm15, %v6763_v55, %v6762_v54 }
0x154a   :  { %9663 = vset.pattern.permute.xlu0 %v14986_v17  ;;  %9651 = vset.pattern.permute.xlu1 %v14981_v40  ;;  %v6767_v53 = vsel %vm14269_vm0, %v13868_v9, %v6764_v61  ;;  %v14368_v61 = vld [vmem:[%s14905_s10] ss:$0 sm:$0xff] }
0x154b   :  { %7750 = vperm.xlu0 %9663, %v14245_v8   ;;  %7627 = vperm.xlu1 %9651, %v14151_v31   ;;  %v10101_v32 = vpop.eup %10100  ;;  %10104 = vcosq.f32 %v6767_v53 }
0x154c   :  { %v10103_v16 = vpop.eup %10102  ;;  %10106 = vsinq.f32 %v6767_v53  ;;  %v6675_v28 = vxor.u32 2147483648, %v10101_v32  ;;  %v14378_v53 = vld [vmem:[%s14906_s11 + $0x2] ss:$0 sm:$0xff] }
0x154d   :  { %v6672_v33 = vxor.u32 2147483648, %v10103_v16 }
0x154e   :  { %v6676_v25 = vsel %vm6674_vm14, %v6675_v28, %v10103_v16  ;;  %v7507_v38 = vsel %vm7505_vm13, %v6675_v28, %v10103_v16  ;;  %vm6771_vm14 = vweird.f32 %v13868_v9 }
0x154f   :  { %9666 = vset.pattern.permute.xlu0 %v14991_v14  ;;  %9654 = vset.pattern.permute.xlu1 %v14986_v17  ;;  %v6673_v15 = vsel %vm6671_vm2, %v10101_v32, %v6672_v33  ;;  %v7504_v2 = vsel %vm7502_vm4, %v10101_v32, %v6672_v33 }
0x1550   :  { %7970 = vperm.xlu0 %9666, %v14245_v8   ;;  %7789 = vperm.xlu1 %9654, %v14133_v52   ;;  %v6677_v13 = vsel %vm6670_vm1, %v6673_v15, %v6676_v25  ;;  %v7508_v3 = vsel %vm7501_vm8, %v7504_v2, %v7507_v38  ;;  %v14393_v15 = vld [vmem:[%s14906_s11 + $0x3] ss:$0 sm:$0xff] }
0x1551   :  { %v14304_v62 = vsel %vm6668_vm5, nan, %v6677_v13  ;;  %v14317_v42 = vsel %vm6668_vm5, nan, %v7508_v3  ;;  %v14398_v13 = vld [vmem:[%s14905_s10 + $0x3] ss:$0 sm:$0xff] }
0x1554   :  { %9668 = vset.pattern.permute.xlu0 %v14981_v40  ;;  %9656 = vset.pattern.permute.xlu1 %v14991_v14 }
0x1555   :  { %7642 = vperm.xlu0 %9668, %v14260_v12   ;;  %7962 = vperm.xlu1 %9656, %v14151_v31   ;;  %v14282_v31 = vsel %vm6565_vm10, nan, %v7404_v26  ;;  %v14371_v26 = vld [vmem:[%s14906_s11 + $0x1] ss:$0 sm:$0xff] }
0x1558   :  { %v10105_v10 = vpop.eup %10104 }
0x1559   :  { %9671 = vset.pattern.permute.xlu0 %v14986_v17  ;;  %8009 = vperm.xlu1 %9656, %v14133_v52   ;;  %v6765_v52 = vsub.s32 4, %v14077_v50  ;;  %v10107_v18 = vpop.eup %10106  ;;  %v6778_v6 = vxor.u32 2147483648, %v10105_v10 }
0x155a   :  { %7801 = vperm.xlu0 %9671, %v14282_v31   ;;  %v6775_v22 = vxor.u32 2147483648, %v10107_v18 }
0x155b   :  { %v6766_v24 = vsel %vm6681_vm15, %v6765_v52, %v14077_v50  ;;  %v7291_v50 = vadd.s32 3, %v14194_v63 }
0x155c   :  { %v6768_v59 = vsel %vm14269_vm0, 0, %v6766_v24 }
0x155d   :  { %9657 = vset.pattern.permute.xlu1 %v14981_v40  ;;  %v6772_v47 = vand.u32 3, %v6768_v59  ;;  %v7603_v36 = vadd.s32 3, %v6768_v59  ;;  %v7292_v21 = vand.u32 3, %v7291_v50 }
0x155e   :  { %9672 = vset.pattern.permute.xlu0 %v14989_v49  ;;  %7632 = vperm.xlu1 %9657, %v14209_v57  }
0x155f   :  { %7864 = vperm.xlu0 %9672, %v14260_v12   ;;  %vm6774_vm7 = vcmp.eq.s32.totalorder %v6772_v47, 0  ;;  %vm6777_vm9 = vcmp.eq.s32.totalorder %v6772_v47, 2  ;;  %v7604_v5 = vand.u32 3, %v7603_v36  ;;  %vm6773_vm10 = vcmp.lt.s32.totalorder %v6772_v47, 2 }
0x1560   :  { %v6776_v63 = vsel %vm6774_vm7, %v10105_v10, %v6775_v22  ;;  %v6779_v7 = vsel %vm6777_vm9, %v6778_v6, %v10107_v18  ;;  %vm7294_vm15 = vcmp.eq.s32.totalorder %v7292_v21, 0  ;;  %vm7297_vm12 = vcmp.eq.s32.totalorder %v7292_v21, 2 }
0x1561   :  { %v7296_v19 = vsel %vm7294_vm15, %v14185_v0, %v6466_v58  ;;  %v7299_v43 = vsel %vm7297_vm12, %v6469_v60, %v14196_v20  ;;  %vm7606_vm0 = vcmp.eq.s32.totalorder %v7604_v5, 0  ;;  %vm7609_vm2 = vcmp.eq.s32.totalorder %v7604_v5, 2 }
0x1562   :  { %7687 = vperm.xlu1 %9657, %v14190_v11   ;;  %vm7293_vm1 = vcmp.lt.s32.totalorder %v7292_v21, 2  ;;  %v7611_v34 = vsel %vm7609_vm2, %v6778_v6, %v10107_v18  ;;  %vm7605_vm5 = vcmp.lt.s32.totalorder %v7604_v5, 2 }
0x1563   :  { %9675 = vset.pattern.permute.xlu0 %v14991_v14  ;;  %v7300_v58 = vsel %vm7293_vm1, %v7296_v19, %v7299_v43 }
0x1564   :  { %8021 = vperm.xlu0 %9675, %v14282_v31   ;;  %v7301_v20 = vsel %vm6462_vm11, nan, %v7300_v58 }
0x1566   :  { %9658 = vset.pattern.permute.xlu1 %v14986_v17 }
0x1567   :  { %7746 = vperm.xlu1 %9658, %v14209_v57  }
0x1568   :  { %9677 = vset.pattern.permute.xlu0 %v14986_v17 }
0x1569   :  { %7758 = vperm.xlu0 %9677, %v14304_v62  }
0x156b   :  { %9660 = vset.pattern.permute.xlu1 %v14989_v49 }
0x156c   :  { %7856 = vperm.xlu1 %9660, %v14209_v57   ;;  %v6780_v57 = vsel %vm6773_vm10, %v6776_v63, %v6779_v7 }
0x156d   :  { %9679 = vset.pattern.permute.xlu0 %v14989_v49  ;;  %v14330_v35 = vsel %vm6771_vm14, nan, %v6780_v57 }
0x156e   :  { %7868 = vperm.xlu0 %9679, %v14304_v62  }
0x1570   :  { %7903 = vperm.xlu1 %9660, %v14190_v11   ;;  %v7608_v11 = vsel %vm7606_vm0, %v10105_v10, %v6775_v22 }
0x1571   :  { %v7612_v0 = vsel %vm7605_vm5, %v7608_v11, %v7611_v34  ;;  %v14414_v34 = vld [vmem:[%s14907_s15] ss:$0 sm:$0xff] }
0x1572   :  { %7915 = vperm.xlu0 %9679, %v14317_v42   ;;  %v14337_v9 = vsel %vm6771_vm14, nan, %v7612_v0 }
0x1574   :  { %9662 = vset.pattern.permute.xlu1 %v14981_v40 }
0x1575   :  { %7637 = vperm.xlu1 %9662, %v14245_v8  }
0x1576   :  { %9681 = vset.pattern.permute.xlu0 %v14981_v40 }
0x1577   :  { %7652 = vperm.xlu0 %9681, %v14330_v35  }
0x1579   :  { %7692 = vperm.xlu1 %9662, %v7301_v20  }
0x157b   :  { %9684 = vset.pattern.permute.xlu0 %v14986_v17 }
0x157c   :  { %7809 = vperm.xlu0 %9684, %v14337_v9  }
0x157d   :  { %9664 = vset.pattern.permute.xlu1 %v14986_v17 }
0x157e   :  { %7797 = vperm.xlu1 %9664, %v7301_v20  }
0x1580   :  { %9687 = vset.pattern.permute.xlu0 %v14991_v14 }
0x1581   :  { %7982 = vperm.xlu0 %9687, %v14330_v35  }
0x1582   :  { %9665 = vset.pattern.permute.xlu1 %v14989_v49 }
0x1583   :  { %7860 = vperm.xlu1 %9665, %v14245_v8  }
0x1585   :  { %8029 = vperm.xlu0 %9687, %v14337_v9  }
0x1587   :  { %7907 = vperm.xlu1 %9665, %v7301_v20  }
0x158b   :  { %9667 = vset.pattern.permute.xlu1 %v14991_v14  ;;  %v7618_v51 = vpop.permute.xlu1 %7617  ;;  %v7955_v37 = vpop.permute.xlu0 %7954 }
0x158c   :  { %8017 = vperm.xlu1 %9667, %v7301_v20   ;;  %v7991_v2 = vmul.f32 %v14393_v15, %v7955_v37 }
0x1590   :  { %9669 = vset.pattern.permute.xlu1 %v14981_v40 }
0x1591   :  { %7697 = vperm.xlu1 %9669, %v14282_v31   ;;  %v7673_v60 = vpop.permute.xlu1 %7672 }
0x1592   :  { %v7716_v23 = vmul.f32 %v14368_v61, %v7673_v60 }
0x1595   :  { %9670 = vset.pattern.permute.xlu1 %v14986_v17  ;;  %v7623_v44 = vpop.permute.xlu0 %7622 }
0x1596   :  { %7754 = vperm.xlu1 %9670, %v14260_v12  }
0x1597   :  { %v7735_v46 = vpop.permute.xlu1 %7734 }
0x1598   :  { %v7771_v33 = vmul.f32 %v14371_v26, %v7735_v46  ;;  %v9751_v46 = vld [vmem:[%s14908_s16 + $0x18] sm:$0xff]  }
0x1599   :  { %9401 = vmatprep.subr.bf16.mxu1 %v9751_v46 }
0x159a   :  { %9673 = vset.pattern.permute.xlu1 %v14989_v49  ;;  %9402 = vmatpush3.bf16.msra.mxu1 %v9751_v46 }
0x159b   :  { %7911 = vperm.xlu1 %9673, %v14282_v31   ;;  %v7782_v8 = vpop.permute.xlu1 %7781  ;;  %v7849_v56 = vpop.permute.xlu0 %7848  ;;  %v14382_v31 = vld [vmem:[%s14906_s11] ss:$0 sm:$0xff] }
0x159c   :  { %v7662_v25 = vmul.f32 %v14382_v31, %v7623_v44  ;;  %v7882_v45 = vmul.f32 %v14378_v53, %v7849_v56  ;;  %v7661_v29 = vmul.f32 %v14382_v31, %v7618_v51 }
0x159e   :  { %v7724_v38 = vadd.f32 %v7716_v23, %v7661_v29 }
0x159f   :  { %9674 = vset.pattern.permute.xlu1 %v14991_v14 }
0x15a0   :  { %7974 = vperm.xlu1 %9674, %v14260_v12   ;;  %v7845_v54 = vpop.permute.xlu1 %7844  ;;  %v14364_v12 = vld [vmem:[%s14905_s10 + $0x1] ss:$0 sm:$0xff] }
0x15a4   :  { %9676 = vset.pattern.permute.xlu1 %v14981_v40  ;;  %v7892_v41 = vpop.permute.xlu1 %7891 }
0x15a5   :  { %7647 = vperm.xlu1 %9676, %v14304_v62   ;;  %v7928_v28 = vmul.f32 %v14374_v39, %v7892_v41 }
0x15a9   :  { %7702 = vperm.xlu1 %9676, %v14317_v42   ;;  %v8002_v30 = vpop.permute.xlu1 %8001 }
0x15aa   :  { %v8038_v59 = vmul.f32 %v14398_v13, %v8002_v30 }
0x15ac   :  { %v8046_v63 = vadd.f32 %v8038_v59, %v7991_v2 }
0x15ad   :  { %9678 = vset.pattern.permute.xlu1 %v14986_v17 }
0x15ae   :  { %7805 = vperm.xlu1 %9678, %v14317_v42   ;;  %v7678_v55 = vpop.permute.xlu1 %7677 }
0x15af   :  { %v7717_v32 = vmul.f32 %v14368_v61, %v7678_v55 }
0x15b1   :  { %v7725_v18 = vadd.f32 %v7717_v32, %v7662_v25 }
0x15b2   :  { %9680 = vset.pattern.permute.xlu1 %v14991_v14 }
0x15b3   :  { %7978 = vperm.xlu1 %9680, %v14304_v62   ;;  %v7739_v27 = vpop.permute.xlu1 %7738  ;;  %v7881_v62 = vmul.f32 %v14378_v53, %v7845_v54 }
0x15b4   :  { %v7772_v4 = vmul.f32 %v14371_v26, %v7739_v27 }
0x15b5   :  { %v7936_v47 = vadd.f32 %v7928_v28, %v7881_v62 }
0x15b7   :  { %9682 = vset.pattern.permute.xlu1 %v14981_v40  ;;  %v7786_v48 = vpop.permute.xlu1 %7785  ;;  %v7818_v40 = vmul.f32 %v14364_v12, %v7782_v8 }
0x15b8   :  { %7707 = vperm.xlu1 %9682, %v14337_v9   ;;  %v7819_v1 = vmul.f32 %v14364_v12, %v7786_v48 }
0x15b9   :  { %v7826_v10 = vadd.f32 %v7818_v40, %v7771_v33 }
0x15ba   :  { %v7827_v24 = vadd.f32 %v7819_v1, %v7772_v4 }
0x15bb   :  { %v7834_v21 = vmul.f32 %v7826_v10, %v7724_v38 }
0x15bc   :  { %9683 = vset.pattern.permute.xlu1 %v14986_v17  ;;  %v7896_v16 = vpop.permute.xlu1 %7895  ;;  %v8006_v17 = vpop.permute.xlu0 %8005  ;;  %v7835_v36 = vmul.f32 %v7827_v24, %v7725_v18 }
0x15bd   :  { %v7929_v52 = vmul.f32 %v14374_v39, %v7896_v16  ;;  %7762 = vperm.xlu1 %9683, %v14330_v35   ;;  %v8039_v6 = vmul.f32 %v14398_v13, %v8006_v17  ;;  %v7944_v19 = vmul.f32 %v7936_v47, %v7834_v21 }
0x15bf   :  { %v7937_v50 = vadd.f32 %v7929_v52, %v7882_v45  ;;  %v14411_v11 = vmul.f32 %v8046_v63, %v7944_v19 }
0x15c0   :  { %v7683_v7 = vpop.permute.xlu0 %7682 }
0x15c1   :  { %9685 = vset.pattern.permute.xlu1 %v14989_v49  ;;  %v7959_v22 = vpop.permute.xlu1 %7958  ;;  %v7945_v5 = vmul.f32 %v7937_v50, %v7835_v36  ;;  %v8084_v0 = vmul.f32 %v14414_v34, %v14411_v11  ;;  %v7718_v48 = vmul.f32 %v14368_v61, %v7683_v7  ;;  %v9752_v36 = vld [vmem:[%s14908_s16 + $0x10] sm:$0xff]  }
0x15c2   :  { %v7992_v3 = vmul.f32 %v14393_v15, %v7959_v22  ;;  %7872 = vperm.xlu1 %9685, %v14330_v35   ;;  %9403 = vmatprep.subr.bf16.mxu1 %v9752_v36 }
0x15c3   :  { %9404 = vmatpush3.bf16.msra.mxu1 %v9752_v36 }
0x15c4   :  { %v8047_v57 = vadd.f32 %v8039_v6, %v7992_v3  ;;  %v7743_v35 = vpop.permute.xlu0 %7742 }
0x15c6   :  { %v14408_v43 = vmul.f32 %v8047_v57, %v7945_v5  ;;  %7919 = vperm.xlu1 %9685, %v14337_v9   ;;  %v7628_v49 = vpop.permute.xlu1 %7627 }
0x15c7   :  { %v7663_v27 = vmul.f32 %v14382_v31, %v7628_v49 }
0x15c8   :  { %v8085_v58 = vmul.f32 %v14414_v34, %v14408_v43  ;;  %v7853_v9 = vpop.permute.xlu0 %7852 }
0x15c9   :  { %v7726_v23 = vadd.f32 %v7718_v48, %v7663_v27  ;;  %v7883_v52 = vmul.f32 %v14378_v53, %v7853_v9 }
0x15ca   :  { %9686 = vset.pattern.permute.xlu1 %v14991_v14  ;;  %v9688_v51 = vpack.i.bf16 %v8085_v58, %v8084_v0 }
0x15cb   :  { %8025 = vperm.xlu1 %9686, %v14317_v42   ;;  %v7790_v20 = vpop.permute.xlu1 %7789  ;;  %v7773_v42 = vmul.f32 %v14371_v26, %v7743_v35 }
0x15cc   :  { %v7900_v54 = vpop.permute.xlu0 %7899  ;;  %v7820_v55 = vmul.f32 %v14364_v12, %v7790_v20 }
0x15cd   :  { %v7930_v40 = vmul.f32 %v14374_v39, %v7900_v54 }
0x15ce   :  { %v7828_v56 = vadd.f32 %v7820_v55, %v7773_v42 }
0x15cf   :  { %9689 = vrot.lane.b32.xlu1 %v9688_v51, %s10286_s18  ;;  %v7938_v29 = vadd.f32 %v7930_v40, %v7883_v52 }
0x15d0   :  { %v7963_v60 = vpop.permute.xlu1 %7962  ;;  %v7794_v30 = vpop.permute.xlu0 %7793  ;;  %v7836_v25 = vmul.f32 %v7828_v56, %v7726_v23 }
0x15d1   :  { %v7821_v4 = vmul.f32 %v14364_v12, %v7794_v30  ;;  %v7993_v45 = vmul.f32 %v14393_v15, %v7963_v60 }
0x15d2   :  { %v7946_v47 = vmul.f32 %v7938_v29, %v7836_v25 }
0x15d4   :  { %v8010_v8 = vpop.permute.xlu1 %8009  ;;  %v7967_v14 = vpop.permute.xlu0 %7966 }
0x15d5   :  { %v8040_v33 = vmul.f32 %v14398_v13, %v8010_v8  ;;  %v7994_v38 = vmul.f32 %v14393_v15, %v7967_v14 }
0x15d7   :  { %v8048_v59 = vadd.f32 %v8040_v33, %v7993_v45 }
0x15d8   :  { %v8014_v16 = vpop.permute.xlu0 %8013 }
0x15d9   :  { %v7633_v41 = vpop.permute.xlu1 %7632  ;;  %v8041_v10 = vmul.f32 %v14398_v13, %v8014_v16  ;;  %v14441_v21 = vmul.f32 %v8048_v59, %v7946_v47 }
0x15da   :  { %v7664_v17 = vmul.f32 %v14382_v31, %v7633_v41 }
0x15db   :  { %v8049_v3 = vadd.f32 %v8041_v10, %v7994_v38  ;;  %v8086_v57 = vmul.f32 %v14414_v34, %v14441_v21 }
0x15dc   :  { %v7751_v35 = vpop.permute.xlu0 %7750 }
0x15dd   :  { %v7688_v37 = vpop.permute.xlu1 %7687  ;;  %v7775_v14 = vmul.f32 %v14371_v26, %v7751_v35 }
0x15de   :  { %v7719_v28 = vmul.f32 %v14368_v61, %v7688_v37 }
0x15e0   :  { %v7727_v18 = vadd.f32 %v7719_v28, %v7664_v17  ;;  %v7971_v20 = vpop.permute.xlu0 %7970 }
0x15e1   :  { %v7995_v23 = vmul.f32 %v14393_v15, %v7971_v20 }
0x15e2   :  { %v7747_v44 = vpop.permute.xlu1 %7746 }
0x15e3   :  { %v7774_v1 = vmul.f32 %v14371_v26, %v7747_v44 }
0x15e4   :  { %v7643_v60 = vpop.permute.xlu0 %7642 }
0x15e5   :  { %v7829_v24 = vadd.f32 %v7821_v4, %v7774_v1  ;;  %v7666_v33 = vmul.f32 %v14382_v31, %v7643_v60 }
0x15e7   :  { %v7857_v32 = vpop.permute.xlu1 %7856  ;;  %v7837_v22 = vmul.f32 %v7829_v24, %v7727_v18 }
0x15e8   :  { %v7884_v50 = vmul.f32 %v14378_v53, %v7857_v32  ;;  %v7802_v8 = vpop.permute.xlu0 %7801 }
0x15e9   :  { %v7823_v27 = vmul.f32 %v14364_v12, %v7802_v8 }
0x15eb   :  { %v7904_v62 = vpop.permute.xlu1 %7903 }
0x15ec   :  { %v7931_v2 = vmul.f32 %v14374_v39, %v7904_v62  ;;  %v7865_v41 = vpop.permute.xlu0 %7864 }
0x15ed   :  { %v7886_v52 = vmul.f32 %v14378_v53, %v7865_v41 }
0x15ee   :  { %v7939_v6 = vadd.f32 %v7931_v2, %v7884_v50 }
0x15f0   :  { %v7947_v63 = vmul.f32 %v7939_v6, %v7837_v22  ;;  %v7638_v7 = vpop.permute.xlu1 %7637  ;;  %v8022_v56 = vpop.permute.xlu0 %8021 }
0x15f1   :  { %v7665_v48 = vmul.f32 %v14382_v31, %v7638_v7  ;;  %v8043_v18 = vmul.f32 %v14398_v13, %v8022_v56 }
0x15f2   :  { %v14443_v5 = vmul.f32 %v8049_v3, %v7947_v63 }
0x15f4   :  { %v8087_v19 = vmul.f32 %v14414_v34, %v14443_v5  ;;  %v7693_v49 = vpop.permute.xlu1 %7692  ;;  %v7759_v50 = vpop.permute.xlu0 %7758 }
0x15f5   :  { %v7720_v55 = vmul.f32 %v14368_v61, %v7693_v49 }
0x15f6   :  { %v9693_v58 = vpack.i.bf16 %v8087_v19, %v8086_v57 }
0x15f7   :  { %v7728_v25 = vadd.f32 %v7720_v55, %v7665_v48  ;;  %v7777_v55 = vmul.f32 %v14371_v26, %v7759_v50 }
0x15f8   :  { %9694 = vrot.lane.b32.xlu0 %v9693_v58, %s10286_s18  ;;  %v7869_v7 = vpop.permute.xlu0 %7868 }
0x15f9   :  { %v7798_v0 = vpop.permute.xlu1 %7797 }
0x15fa   :  { %v7822_v37 = vmul.f32 %v14364_v12, %v7798_v0 }
0x15fc   :  { %v7830_v1 = vadd.f32 %v7822_v37, %v7775_v14  ;;  %v7916_v35 = vpop.permute.xlu0 %7915 }
0x15fe   :  { %v7861_v51 = vpop.permute.xlu1 %7860  ;;  %v7838_v24 = vmul.f32 %v7830_v1, %v7728_v25 }
0x15ff   :  { %v7885_v40 = vmul.f32 %v14378_v53, %v7861_v51 }
0x1600   :  { %v7653_v20 = vpop.permute.xlu0 %7652 }
0x1602   :  { %v7908_v9 = vpop.permute.xlu1 %7907 }
0x1603   :  { %v7932_v44 = vmul.f32 %v14374_v39, %v7908_v9 }
0x1604   :  { %v7810_v60 = vpop.permute.xlu0 %7809 }
0x1605   :  { %v7940_v45 = vadd.f32 %v7932_v44, %v7885_v40  ;;  %v7825_v37 = vmul.f32 %v14364_v12, %v7810_v60 }
0x1607   :  { %v8018_v46 = vpop.permute.xlu1 %8017  ;;  %v7948_v2 = vmul.f32 %v7940_v45, %v7838_v24 }
0x1608   :  { %v8042_v32 = vmul.f32 %v14398_v13, %v8018_v46  ;;  %v7983_v8 = vpop.permute.xlu0 %7982 }
0x160a   :  { %v8050_v29 = vadd.f32 %v8042_v32, %v7995_v23 }
0x160c   :  { %v7698_v54 = vpop.permute.xlu1 %7697  ;;  %v14466_v22 = vmul.f32 %v8050_v29, %v7948_v2 }
0x160d   :  { %v7721_v4 = vmul.f32 %v14368_v61, %v7698_v54 }
0x160e   :  { %v8088_v57 = vmul.f32 %v14414_v34, %v14466_v22 }
0x160f   :  { %v7729_v10 = vadd.f32 %v7721_v4, %v7666_v33 }
0x1611   :  { %v7755_v30 = vpop.permute.xlu1 %7754 }
0x1612   :  { %v7776_v42 = vmul.f32 %v14371_v26, %v7755_v30 }
0x1614   :  { %v7831_v17 = vadd.f32 %v7823_v27, %v7776_v42  ;;  %v7668_v42 = vmul.f32 %v14382_v31, %v7653_v20  ;;  %v8030_v27 = vpop.permute.xlu0 %8029 }
0x1616   :  { %v7912_v16 = vpop.permute.xlu1 %7911  ;;  %v7839_v38 = vmul.f32 %v7831_v17, %v7729_v10  ;;  %v9129_v17 = vld [vmem:[%s14909_s22] ss:$0 sm:$0xff] }
0x1617   :  { %v7933_v28 = vmul.f32 %v14374_v39, %v7912_v16  ;;  %v7934_v16 = vmul.f32 %v14374_v39, %v7916_v35  ;;  %v8069_v50 = vmul.f32 %v9129_v17, %v14411_v11 }
0x1619   :  { %v7941_v62 = vadd.f32 %v7933_v28, %v7886_v52  ;;  %v7887_v28 = vmul.f32 %v14378_v53, %v7869_v7  ;;  %v7998_v52 = vmul.f32 %v14393_v15, %v7983_v8 }
0x161b   :  { %v7975_v59 = vpop.permute.xlu1 %7974  ;;  %v7949_v6 = vmul.f32 %v7941_v62, %v7839_v38  ;;  %v7942_v24 = vadd.f32 %v7934_v16, %v7887_v28  ;;  %v9753_v16 = vld [vmem:[%s14910_s23 + $0x8] sm:$0xff]  }
0x161c   :  { %v7996_v47 = vmul.f32 %v14393_v15, %v7975_v59  ;;  %9413 = vmatprep.subr.bf16.mxu1 %v9753_v16 }
0x161e   :  { %v8051_v36 = vadd.f32 %v8043_v18, %v7996_v47 }
0x1620   :  { %v14468_v3 = vmul.f32 %v8051_v36, %v7949_v6  ;;  %v7648_v63 = vpop.permute.xlu1 %7647 }
0x1621   :  { %v7667_v56 = vmul.f32 %v14382_v31, %v7648_v63 }
0x1622   :  { %v8089_v19 = vmul.f32 %v14414_v34, %v14468_v3 }
0x1624   :  { %v7703_v49 = vpop.permute.xlu1 %7702  ;;  %v9698_v58 = vpack.i.bf16 %v8089_v19, %v8088_v57  ;;  %v8072_v19 = vmul.f32 %v9129_v17, %v14443_v5 }
0x1625   :  { %v7722_v44 = vmul.f32 %v14368_v61, %v7703_v49 }
0x1626   :  { %9699 = vrot.lane.b32.xlu1 %v9698_v58, %s10286_s18 }
0x1627   :  { %v7730_v23 = vadd.f32 %v7722_v44, %v7667_v56  ;;  %v9395_v44 = vpop.f32.mrf.mxu1 }
0x1629   :  { %v7806_v0 = vpop.permute.xlu1 %7805 }
0x162a   :  { %v7824_v41 = vmul.f32 %v14364_v12, %v7806_v0 }
0x162c   :  { %v7832_v1 = vadd.f32 %v7824_v41, %v7777_v55 }
0x162e   :  { %v7979_v51 = vpop.permute.xlu1 %7978  ;;  %v7840_v31 = vmul.f32 %v7832_v1, %v7730_v23 }
0x162f   :  { %v7997_v10 = vmul.f32 %v14393_v15, %v7979_v51  ;;  %v8073_v51 = vmul.f32 %v9129_v17, %v14466_v22 }
0x1630   :  { %v7950_v59 = vmul.f32 %v7942_v24, %v7840_v31 }
0x1633   :  { %v7708_v9 = vpop.permute.xlu1 %7707 }
0x1634   :  { %v7723_v14 = vmul.f32 %v14368_v61, %v7708_v9  ;;  %v8074_v9 = vmul.f32 %v9129_v17, %v14468_v3 }
0x1636   :  { %v7731_v32 = vadd.f32 %v7723_v14, %v7668_v42  ;;  %v5557_v42 = vpop.f32.mrf.mxu1 }
0x1638   :  { %v7763_v46 = vpop.permute.xlu1 %7762 }
0x1639   :  { %v7778_v54 = vmul.f32 %v14371_v26, %v7763_v46  ;;  %v8045_v26 = vmul.f32 %v14398_v13, %v8030_v27  ;;  %v14513_v27 = vpop.f32.mrf.mxu1 }
0x163b   :  { %v7833_v48 = vadd.f32 %v7825_v37, %v7778_v54  ;;  %v8053_v29 = vadd.f32 %v8045_v26, %v7998_v52 }
0x163d   :  { %v7873_v30 = vpop.permute.xlu1 %7872  ;;  %v7841_v61 = vmul.f32 %v7833_v48, %v7731_v32  ;;  %v14515_v48 = vpop.f32.mrf.mxu1 }
0x163e   :  { %v7888_v4 = vmul.f32 %v14378_v53, %v7873_v30  ;;  %v8070_v53 = vmul.f32 %v9129_v17, %v14408_v43  ;;  %v8071_v43 = vmul.f32 %v9129_v17, %v14441_v21 }
0x163f   :  { %v14517_v56 = vpop.f32.mrf.mxu1 }
0x1641   :  { %v7920_v40 = vpop.permute.xlu1 %7919  ;;  %v14519_v1 = vpop.f32.mrf.mxu1 }
0x1642   :  { %v7935_v12 = vmul.f32 %v14374_v39, %v7920_v40 }
0x1643   :  { %v14521_v40 = vpop.f32.mrf.mxu1 }
0x1644   :  { %v7943_v33 = vadd.f32 %v7935_v12, %v7888_v4 }
0x1645   :  { %v14523_v32 = vpop.f32.mrf.mxu1 }
0x1646   :  { %v7951_v25 = vmul.f32 %v7943_v33, %v7841_v61  ;;  %v8026_v45 = vpop.permute.xlu1 %8025 }
0x1647   :  { %v8044_v62 = vmul.f32 %v14398_v13, %v8026_v45 }
0x1648   :  { %v8061_v39 = vmul.f32 %v8053_v29, %v7951_v25 }
0x1649   :  { %v8052_v18 = vadd.f32 %v8044_v62, %v7997_v10 }
0x164a   :  { %v9690_v2 = vpop.permute.xlu1 %9689  ;;  %v8091_v36 = vmul.f32 %v14414_v34, %v8061_v39  ;;  %v8076_v41 = vmul.f32 %v9129_v17, %v8061_v39 }
0x164b   :  { %v8060_v38 = vmul.f32 %v8052_v18, %v7950_v59  ;;  %v9692_v47 = vunpack.i.h.bf16 %v9690_v2  ;;  %v9691_v6 = vunpack.i.l.bf16 %v9690_v2 }
0x164d   :  { %v8090_v63 = vmul.f32 %v14414_v34, %v8060_v38  ;;  %v8125_v7 = vsel %vm3975_vm6, %v8070_v53, %v9692_v47  ;;  %v8124_v15 = vsel %vm3975_vm6, %v8069_v50, %v9691_v6  ;;  %v8075_v30 = vmul.f32 %v9129_v17, %v8060_v38 }
0x164e   :  { %v8137_v13 = vpack.c.bf16 %v8125_v7, %v8124_v15 }
0x164f   :  { %v9703_v57 = vpack.i.bf16 %v8091_v36, %v8090_v63 }
0x1650   :  { %9405 = vmatprep.mubr.msk.bf16.mxu1 %vm226_vm3, %v8137_v13 }
0x1651   :  { %9704 = vrot.lane.b32.xlu0 %v9703_v57, %s10286_s18 }
0x166a   :  { %v9695_v11 = vpop.permute.xlu0 %9694 }
0x166b   :  { %v9697_v49 = vunpack.i.h.bf16 %v9695_v11  ;;  %v9696_v58 = vunpack.i.l.bf16 %v9695_v11 }
0x166d   :  { %v8126_v35 = vsel %vm3975_vm6, %v8071_v43, %v9696_v58  ;;  %v8127_v34 = vsel %vm3975_vm6, %v8072_v19, %v9697_v49 }
0x166e   :  { %v8138_v0 = vpack.c.bf16 %v8127_v34, %v8126_v35  ;;  %v5590_v35 = vsub.f32 0.0, %v9395_v44  ;;  %v5588_v34 = vsub.f32 0.0, %v5557_v42 }
0x1670   :  { %9406 = vmatmul.mubr.msk.bf16.vlgmr.msra.gmra.mxu1 %vm226_vm3, %v8138_v0  ;;  %v5600_v0 = vmul.f32 1.442695, %v5590_v35 }
0x1671   :  { %9414 = vmatpush3.bf16.msra.mxu1 %v9753_v16 }
0x1672   :  { %10108 = vpow2.f32 %v5600_v0 }
0x1698   :  { %v9700_v20 = vpop.permute.xlu1 %9699 }
0x1699   :  { %v9702_v60 = vunpack.i.h.bf16 %v9700_v20  ;;  %v9701_v46 = vunpack.i.l.bf16 %v9700_v20  ;;  %v5591_v20 = vsub.f32 0.0, %v14513_v27 }
0x169b   :  { %v8129_v21 = vsel %vm3975_vm6, %v8074_v9, %v9702_v60  ;;  %v8128_v5 = vsel %vm3975_vm6, %v8073_v51, %v9701_v46  ;;  %v5596_v51 = vmul.f32 1.442695, %v5588_v34  ;;  %v5589_v9 = vsub.f32 0.0, %v14515_v48 }
0x169c   :  { %v8139_v8 = vpack.c.bf16 %v8129_v21, %v8128_v5  ;;  %v5602_v60 = vmul.f32 1.442695, %v5591_v20  ;;  %v10109_v21 = vpop.eup %10108 }
0x169d   :  { %10110 = vpow2.f32 %v5596_v51  ;;  %v5598_v46 = vmul.f32 1.442695, %v5589_v9 }
0x169e   :  { %9409 = vmatprep.mubr.msk.bf16.mxu1 %vm226_vm3, %v8139_v8  ;;  %10112 = vpow2.f32 %v5602_v60  ;;  %v5614_v8 = vadd.f32 1.0, %v10109_v21 }
0x169f   :  { %10114 = vpow2.f32 %v5598_v46 }
0x16a0   :  { %10116 = vrcp.f32 %v5614_v8 }
0x16aa   :  { %v10111_v5 = vpop.eup %10110 }
0x16c3   :  { %v9705_v54 = vpop.permute.xlu0 %9704 }
0x16c4   :  { %v9707_v37 = vunpack.i.h.bf16 %v9705_v54  ;;  %v9706_v14 = vunpack.i.l.bf16 %v9705_v54  ;;  %v10113_v54 = vpop.eup %10112 }
0x16c6   :  { %v8131_v55 = vsel %vm3975_vm6, %v8076_v41, %v9707_v37  ;;  %v8130_v22 = vsel %vm3975_vm6, %v8075_v30, %v9706_v14  ;;  %v5612_v41 = vadd.f32 1.0, %v10111_v5  ;;  %v10115_v30 = vpop.eup %10114  ;;  %v5615_v37 = vadd.f32 1.0, %v10113_v54 }
0x16c7   :  { %v8140_v3 = vpack.c.bf16 %v8131_v55, %v8130_v22  ;;  %v5613_v14 = vadd.f32 1.0, %v10115_v30  ;;  %v9441_v55 = vpop.f32.mrf.mxu0  ;;  %v10117_v42 = vpop.eup %10116 }
0x16c8   :  { %10118 = vrcp.f32 %v5612_v41 }
0x16c9   :  { %9410 = vmatmul.mubr.msk.bf16.gmra.mxu1 %vm226_vm3, %v8140_v3  ;;  %10120 = vrcp.f32 %v5615_v37  ;;  %v8471_v22 = vpop.f32.mrf.mxu0 }
0x16ca   :  { %10122 = vrcp.f32 %v5613_v14 }
0x16cb   :  { %v9442_v27 = vpop.f32.mrf.mxu0 }
0x16d5   :  { %v10119_v16 = vpop.eup %10118 }
0x1730   :  { %v9407_v4 = vpop.f32.mrf.mxu1 }
0x1731   :  { %v8232_v33 = vmul.f32 %v9407_v4, %v9407_v4 }
0x1732   :  { %v8199_v12 = vpop.f32.mrf.mxu1 }
0x1733   :  { %v8230_v26 = vmul.f32 %v8199_v12, %v8199_v12 }
0x1734   :  { %v9408_v23 = vpop.f32.mrf.mxu1 }
0x1735   :  { %8246 = vrot.lane.b32.xlu1 %v8230_v26, %s10287_s26  ;;  %v8233_v52 = vmul.f32 %v9408_v23, %v9408_v23 }
0x1736   :  { %v8202_v61 = vpop.f32.mrf.mxu1 }
0x1737   :  { %v8231_v28 = vmul.f32 %v8202_v61, %v8202_v61 }
0x1739   :  { %8250 = vrot.lane.b32.xlu1 %v8232_v33, %s10287_s26  ;;  %8248 = vrot.lane.b32.xlu0 %v8231_v28, %s10287_s26 }
0x173d   :  { %8252 = vrot.lane.b32.xlu0 %v8233_v52, %s10287_s26 }
0x1789   :  { %v9411_v31 = vpop.f32.mrf.mxu1 }
0x178a   :  { %v8236_v29 = vmul.f32 %v9411_v31, %v9411_v31 }
0x178b   :  { %v8215_v25 = vpop.f32.mrf.mxu1 }
0x178c   :  { %v8234_v45 = vmul.f32 %v8215_v25, %v8215_v25  ;;  %v10121_v25 = vpop.eup %10120 }
0x178d   :  { %v9412_v17 = vpop.f32.mrf.mxu1 }
0x178e   :  { %8254 = vrot.lane.b32.xlu1 %v8234_v45, %s10287_s26  ;;  %v8237_v62 = vmul.f32 %v9412_v17, %v9412_v17 }
0x178f   :  { %v8218_v24 = vpop.f32.mrf.mxu1 }
0x1790   :  { %v8235_v10 = vmul.f32 %v8218_v24, %v8218_v24  ;;  %v15009_v24 = vld [vmem:[#allocation48_spill] sm:$0xff] }
0x1792   :  { %8258 = vrot.lane.b32.xlu1 %v8236_v29, %s10287_s26  ;;  %8256 = vrot.lane.b32.xlu0 %v8235_v10, %s10287_s26 }
0x1796   :  { %8260 = vrot.lane.b32.xlu0 %v8237_v62, %s10287_s26 }
0x17a7   :  { %v8247_v39 = vpop.permute.xlu1 %8246 }
0x17a8   :  { %v8270_v18 = vadd.f32 %v8247_v39, %v8230_v26 }
0x17ab   :  { %v8249_v59 = vpop.permute.xlu0 %8248  ;;  %v8251_v2 = vpop.permute.xlu1 %8250 }
0x17ac   :  { %v8271_v50 = vadd.f32 %v8249_v59, %v8231_v28  ;;  %v8272_v47 = vadd.f32 %v8251_v2, %v8232_v33  ;;  %v15008_v33 = vld [vmem:[#allocation47_spill] sm:$0xff] }
0x17ae   :  { %v8302_v53 = vpack.c.bf16 %v8271_v50, %v8270_v18  ;;  %v15010_v18 = vld [vmem:[#allocation40_spill] sm:$0xff] }
0x17af   :  { %v8253_v38 = vpop.permute.xlu0 %8252 }
0x17b0   :  { %v8273_v6 = vadd.f32 %v8253_v38, %v8233_v52  ;;  %9415 = vmatprep.mubr.msk.bf16.mxu1 %vm3975_vm6, %v8302_v53  ;;  %v8474_v52 = vpop.f32.mrf.mxu0  ;;  %v15011_v53 = vld [vmem:[#allocation41_spill] sm:$0xff] }
0x17b2   :  { %v8303_v36 = vpack.c.bf16 %v8273_v6, %v8272_v47  ;;  %v5594_v6 = vsub.f32 0.0, %v14517_v56 }
0x17b4   :  { %9416 = vmatmul.mubr.msk.bf16.vlgmr.msra.gmra.mxu1 %vm3975_vm6, %v8303_v36  ;;  %v5592_v36 = vsub.f32 0.0, %v14519_v1 }
0x1800   :  { %v8255_v63 = vpop.permute.xlu1 %8254 }
0x1801   :  { %v8274_v15 = vadd.f32 %v8255_v63, %v8234_v45  ;;  %v5608_v63 = vmul.f32 1.442695, %v5594_v6 }
0x1803   :  { %10124 = vpow2.f32 %v5608_v63 }
0x1804   :  { %v8257_v7 = vpop.permute.xlu0 %8256  ;;  %v8259_v57 = vpop.permute.xlu1 %8258 }
0x1805   :  { %v8275_v13 = vadd.f32 %v8257_v7, %v8235_v10  ;;  %v8276_v19 = vadd.f32 %v8259_v57, %v8236_v29  ;;  %v10123_v10 = vpop.eup %10122  ;;  %v5595_v7 = vsub.f32 0.0, %v14521_v40  ;;  %v9445_v40 = vpop.f32.mrf.mxu0 }
0x1807   :  { %v8304_v11 = vpack.c.bf16 %v8275_v13, %v8274_v15  ;;  %v5604_v15 = vmul.f32 1.442695, %v5592_v36  ;;  %v5593_v13 = vsub.f32 0.0, %v14523_v32  ;;  %v5610_v57 = vmul.f32 1.442695, %v5595_v7  ;;  %v8487_v32 = vpop.f32.mrf.mxu0 }
0x1808   :  { %v8261_v43 = vpop.permute.xlu0 %8260 }
0x1809   :  { %v8277_v49 = vadd.f32 %v8261_v43, %v8237_v62  ;;  %9419 = vmatprep.mubr.msk.bf16.mxu1 %vm3975_vm6, %v8304_v11  ;;  %10126 = vpow2.f32 %v5604_v15  ;;  %v5606_v11 = vmul.f32 1.442695, %v5593_v13  ;;  %v9446_v51 = vpop.f32.mrf.mxu0  ;;  %v9754_v13 = vld [vmem:[%s15016_s17 + $0x8] sm:$0xff]  }
0x180a   :  { %10128 = vpow2.f32 %v5610_v57  ;;  %v9755_v57 = vld [vmem:[%s15016_s17] sm:$0xff]   ;;  %9447 = vmatprep.subr.bf16.mxu1 %v9754_v13 }
0x180b   :  { %v8305_v58 = vpack.c.bf16 %v8277_v49, %v8276_v19  ;;  %10130 = vpow2.f32 %v5606_v11  ;;  %v8490_v30 = vpop.f32.mrf.mxu0  ;;  %9448 = vmatpush3.bf16.msra.mxu1 %v9754_v13 }
0x180c   :  { %9449 = vmatprep.subr.bf16.mxu1 %v9755_v57 }
0x180d   :  { %9420 = vmatmul.mubr.msk.bf16.gmra.mxu1 %vm3975_vm6, %v8305_v58 }
0x180f   :  { %9450 = vmatpush3.bf16.msra.mxu1 %v9755_v57 }
0x1810   :  { %v10125_v43 = vpop.eup %10124 }
0x1811   :  { %v5618_v49 = vadd.f32 1.0, %v10125_v43 }
0x1813   :  { %10132 = vrcp.f32 %v5618_v49 }
0x1816   :  { %v10127_v19 = vpop.eup %10126 }
0x1817   :  { %v10129_v58 = vpop.eup %10128  ;;  %v5616_v35 = vadd.f32 1.0, %v10127_v19 }
0x1818   :  { %v10131_v56 = vpop.eup %10130  ;;  %v5619_v1 = vadd.f32 1.0, %v10129_v58 }
0x1819   :  { %10134 = vrcp.f32 %v5616_v35  ;;  %v5617_v34 = vadd.f32 1.0, %v10131_v56 }
0x181a   :  { %10136 = vrcp.f32 %v5619_v1 }
0x181b   :  { %10138 = vrcp.f32 %v5617_v34 }
0x1820   :  { %v10133_v60 = vpop.eup %10132 }
0x1826   :  { %v10135_v21 = vpop.eup %10134 }
0x1827   :  { %v10137_v14 = vpop.eup %10136 }
0x1874   :  { %v9417_v3 = vpop.f32.mrf.mxu1 }
0x1875   :  { %v8480_v44 = vadd.f32 %v9441_v55, %v9417_v3 }
0x1876   :  { %v8358_v48 = vpop.f32.mrf.mxu1 }
0x1877   :  { %v8504_v4 = vmul.f32 %v10117_v42, %v8480_v44  ;;  %v8472_v12 = vadd.f32 %v8471_v22, %v8358_v48  ;;  %v15012_v22 = vld [vmem:[#allocation43_spill] sm:$0xff]  ;;  %v10139_v44 = vpop.eup %10138 }
0x1878   :  { %v9418_v26 = vpop.f32.mrf.mxu1 }
0x1879   :  { %v8502_v23 = vmul.f32 %v10119_v16, %v8472_v12  ;;  %v8483_v61 = vadd.f32 %v9442_v27, %v9418_v26  ;;  %v14541_v28 = vadd.f32 %v8504_v4, %v15008_v33  ;;  %v15013_v4 = vld [vmem:[#allocation44_spill] sm:$0xff]  ;;  %v15014_v16 = vld [vmem:[#allocation50_spill] sm:$0xff]  ;;  %v15015_v33 = vld [vmem:[#allocation49_spill] sm:$0xff] }
0x187a   :  { %v8361_v31 = vpop.f32.mrf.mxu1 }
0x187b   :  { %v8475_v45 = vadd.f32 %v8474_v52, %v8361_v31  ;;  %v8528_v17 = vsel %vm226_vm3, %v14541_v28, 0.0  ;;  %v14546_v29 = vadd.f32 %v8502_v23, %v15009_v24  ;;  %v8505_v62 = vmul.f32 %v10121_v25, %v8483_v61 }
0x187c   :  { %8529 = vadd.xlane.f32.xlu0 %v8528_v17 }
0x187d   :  { %v8503_v39 = vmul.f32 %v10123_v10, %v8475_v45  ;;  %v8522_v59 = vsel %vm226_vm3, %v14546_v29, 0.0  ;;  %v14556_v38 = vadd.f32 %v8505_v62, %v15011_v53 }
0x187e   :  { %8523 = vadd.xlane.f32.xlu1 %v8522_v59 }
0x187f   :  { %v14551_v50 = vadd.f32 %v8503_v39, %v15010_v18  ;;  %v8531_v47 = vsel %vm226_vm3, %v14556_v38, 0.0 }
0x1881   :  { %v8525_v2 = vsel %vm226_vm3, %v14551_v50, 0.0 }
0x1882   :  { %8526 = vadd.xlane.f32.xlu0 %v8525_v2 }
0x1886   :  { %8532 = vadd.xlane.f32.xlu0 %v8531_v47 }
0x18cd   :  { %v9421_v0 = vpop.f32.mrf.mxu1 }
0x18ce   :  { %v8496_v20 = vadd.f32 %v9445_v40, %v9421_v0 }
0x18cf   :  { %v8374_v9 = vpop.f32.mrf.mxu1 }
0x18d0   :  { %v8488_v46 = vadd.f32 %v8487_v32, %v8374_v9  ;;  %v8508_v8 = vmul.f32 %v10133_v60, %v8496_v20 }
0x18d1   :  { %v9422_v5 = vpop.f32.mrf.mxu1 }
0x18d2   :  { %v8506_v54 = vmul.f32 %v10135_v21, %v8488_v46  ;;  %v8499_v41 = vadd.f32 %v9446_v51, %v9422_v5  ;;  %v8516_v12 = vadd.f32 %v8508_v8, %v15013_v4  ;;  %v15017_v8 = vld [vmem:[#allocation25_spill] sm:$0xff] }
0x18d3   :  { %v8377_v37 = vpop.f32.mrf.mxu1 }
0x18d4   :  { %v8491_v55 = vadd.f32 %v8490_v30, %v8377_v37  ;;  %v8514_v3 = vadd.f32 %v8506_v54, %v15012_v22  ;;  %v8509_v42 = vmul.f32 %v10137_v14, %v8499_v41  ;;  %v8540_v23 = vsel %vm226_vm3, %v8516_v12, 0.0  ;;  %v15018_v54 = vld [vmem:[#allocation39_spill] sm:$0xff]  ;;  %v15019_v41 = vld [vmem:[#allocation45_spill] sm:$0xff]  ;;  %v15020_v37 = vld [vmem:[#allocation46_spill] sm:$0xff] }
0x18d5   :  { %v5140_v30 = vmul.f32 %v15019_v41, %v15018_v54  ;;  %v15021_v14 = vld [vmem:[#allocation42_spill] sm:$0xff] }
0x18d6   :  { %v8507_v27 = vmul.f32 %v10139_v44, %v8491_v55  ;;  %v8534_v48 = vsel %vm226_vm3, %v8514_v3, 0.0  ;;  %v8517_v52 = vadd.f32 %v8509_v42, %v15015_v33 }
0x18d7   :  { %8535 = vadd.xlane.f32.xlu1 %v8534_v48  ;;  %v5141_v55 = vadd.f32 %v5140_v30, %v15021_v14 }
0x18d8   :  { %v8515_v26 = vadd.f32 %v8507_v27, %v15014_v16  ;;  %v8543_v31 = vsel %vm226_vm3, %v8517_v52, 0.0 }
0x18da   :  { %v8537_v61 = vsel %vm226_vm3, %v8515_v26, 0.0 }
0x18db   :  { %8541 = vadd.xlane.f32.xlu1 %v8540_v23  ;;  %8538 = vadd.xlane.f32.xlu0 %v8537_v61 }
0x18df   :  { %8544 = vadd.xlane.f32.xlu0 %v8543_v31  ;;  %v9172_v31 = vld [vmem:[%s15022_s21] ss:$0 sm:$0xff] }
0x1905   :  { %v8530_v25 = vpop.xlane.xlu0 %8529 }
0x1906   :  { %v8548_v45 = vmul.f32 0.03125, %v8530_v25 }
0x1907   :  { %v8524_v17 = vpop.xlane.xlu1 %8523 }
0x1908   :  { %v8546_v24 = vmul.f32 0.03125, %v8524_v17  ;;  %v14573_v10 = vsub.f32 %v14541_v28, %v8548_v45 }
0x190a   :  { %v14576_v62 = vsub.f32 %v14546_v29, %v8546_v24  ;;  %v8564_v47 = vmul.f32 %v14573_v10, %v14573_v10 }
0x190b   :  { %v8527_v39 = vpop.xlane.xlu0 %8526 }
0x190c   :  { %v8547_v59 = vmul.f32 0.03125, %v8527_v39  ;;  %v8562_v18 = vmul.f32 %v14576_v62, %v14576_v62  ;;  %v8576_v63 = vsel %vm226_vm3, %v8564_v47, 0.0 }
0x190e   :  { %v14581_v2 = vsub.f32 %v14551_v50, %v8547_v59  ;;  %v8570_v53 = vsel %vm226_vm3, %v8562_v18, 0.0  ;;  %v9173_v59 = vld [vmem:[%s15023_s25] ss:$0 sm:$0xff] }
0x190f   :  { %8571 = vadd.xlane.f32.xlu1 %v8570_v53  ;;  %v8533_v28 = vpop.xlane.xlu0 %8532 }
0x1910   :  { %v8549_v6 = vmul.f32 0.03125, %v8533_v28  ;;  %v8563_v29 = vmul.f32 %v14581_v2, %v14581_v2 }
0x1912   :  { %v14589_v36 = vsub.f32 %v14556_v38, %v8549_v6  ;;  %v8573_v50 = vsel %vm226_vm3, %v8563_v29, 0.0 }
0x1913   :  { %8577 = vadd.xlane.f32.xlu1 %v8576_v63  ;;  %8574 = vadd.xlane.f32.xlu0 %v8573_v50 }
0x1914   :  { %v8565_v7 = vmul.f32 %v14589_v36, %v14589_v36 }
0x1916   :  { %v8579_v15 = vsel %vm226_vm3, %v8565_v7, 0.0 }
0x1917   :  { %8580 = vadd.xlane.f32.xlu0 %v8579_v15 }
0x1960   :  { %v8536_v38 = vpop.xlane.xlu1 %8535 }
0x1961   :  { %v8550_v11 = vmul.f32 0.03125, %v8536_v38 }
0x1963   :  { %v14598_v43 = vsub.f32 %v8514_v3, %v8550_v11 }
0x1964   :  { %v8542_v19 = vpop.xlane.xlu1 %8541  ;;  %v8539_v49 = vpop.xlane.xlu0 %8538 }
0x1965   :  { %v8552_v58 = vmul.f32 0.03125, %v8542_v19  ;;  %v8551_v35 = vmul.f32 0.03125, %v8539_v49  ;;  %v8566_v56 = vmul.f32 %v14598_v43, %v14598_v43 }
0x1967   :  { %v14602_v1 = vsub.f32 %v8516_v12, %v8552_v58  ;;  %v14604_v34 = vsub.f32 %v8515_v26, %v8551_v35  ;;  %v8582_v40 = vsel %vm226_vm3, %v8566_v56, 0.0  ;;  %v15024_v56 = vld [vmem:[#allocation26_spill] sm:$0xff] }
0x1968   :  { %8583 = vadd.xlane.f32.xlu1 %v8582_v40  ;;  %v8545_v32 = vpop.xlane.xlu0 %8544 }
0x1969   :  { %v8553_v0 = vmul.f32 0.03125, %v8545_v32  ;;  %v8568_v20 = vmul.f32 %v14602_v1, %v14602_v1  ;;  %v8567_v51 = vmul.f32 %v14604_v34, %v14604_v34 }
0x196b   :  { %v14611_v9 = vsub.f32 %v8517_v52, %v8553_v0  ;;  %v8588_v60 = vsel %vm226_vm3, %v8568_v20, 0.0  ;;  %v8585_v46 = vsel %vm226_vm3, %v8567_v51, 0.0 }
0x196c   :  { %8589 = vadd.xlane.f32.xlu1 %v8588_v60  ;;  %8586 = vadd.xlane.f32.xlu0 %v8585_v46  ;;  %v15025_v60 = vld [vmem:[#allocation27_spill] sm:$0xff] }
0x196d   :  { %v8569_v21 = vmul.f32 %v14611_v9, %v14611_v9  ;;  %v995_v46 = vmul.f32 %v15024_v56, %v15025_v60 }
0x196f   :  { %v8591_v5 = vsel %vm226_vm3, %v8569_v21, 0.0 }
0x1970   :  { %8592 = vadd.xlane.f32.xlu0 %v8591_v5  ;;  %v15026_v5 = vld [vmem:[#allocation29_spill] sm:$0xff] }
0x197d   :  { %986 = vrot.lane.b32.xlu1 %v15017_v8, %s10272_s0  ;;  %v996_v8 = vadd.f32 %v995_v46, %v15026_v5 }
0x1986   :  { %5131 = vrot.lane.b32.xlu0 %v15020_v37, %s10272_s0 }
0x198a   :  { %5149 = vrot.lane.b32.xlu0 %v5141_v55, %s10272_s0 }
0x1998   :  { %v8572_v22 = vpop.xlane.xlu1 %8571 }
0x1999   :  { %v8594_v3 = vmul.f32 0.03125, %v8572_v22 }
0x199b   :  { %v8602_v44 = vadd.f32 1e-05, %v8594_v3 }
0x199c   :  { %v8578_v42 = vpop.xlane.xlu1 %8577  ;;  %v8575_v27 = vpop.xlane.xlu0 %8574 }
0x199d   :  { %10140 = vrsqrt.f32 %v8602_v44  ;;  %v8596_v48 = vmul.f32 0.03125, %v8578_v42  ;;  %v8595_v4 = vmul.f32 0.03125, %v8575_v27 }
0x199f   :  { %v8604_v12 = vadd.f32 1e-05, %v8596_v48  ;;  %v8603_v16 = vadd.f32 1e-05, %v8595_v4 }
0x19a0   :  { %v8581_v26 = vpop.xlane.xlu0 %8580 }
0x19a1   :  { %10142 = vrsqrt.f32 %v8604_v12  ;;  %v8597_v23 = vmul.f32 0.03125, %v8581_v26 }
0x19a2   :  { %10144 = vrsqrt.f32 %v8603_v16 }
0x19a3   :  { %v8605_v61 = vadd.f32 1e-05, %v8597_v23 }
0x19a5   :  { %10146 = vrsqrt.f32 %v8605_v61 }
0x19aa   :  { %v10141_v33 = vpop.eup %10140 }
0x19ab   :  { %v8618_v52 = vmul.f32 %v10141_v33, %v14576_v62 }
0x19ad   :  { %v8632_v39 = vmul.f32 %v9172_v31, %v8618_v52 }
0x19ae   :  { %v10143_v25 = vpop.eup %10142 }
0x19af   :  { %v10145_v45 = vpop.eup %10144  ;;  %v8620_v17 = vmul.f32 %v10143_v25, %v14573_v10  ;;  %v8646_v6 = vadd.f32 %v9173_v59, %v8632_v39 }
0x19b0   :  { %v8619_v24 = vmul.f32 %v10145_v45, %v14581_v2 }
0x19b1   :  { %v8634_v47 = vmul.f32 %v9172_v31, %v8620_v17 }
0x19b2   :  { %v10147_v18 = vpop.eup %10146  ;;  %v8633_v53 = vmul.f32 %v9172_v31, %v8619_v24 }
0x19b3   :  { %v8621_v28 = vmul.f32 %v10147_v18, %v14589_v36  ;;  %v8648_v7 = vadd.f32 %v9173_v59, %v8634_v47 }
0x19b4   :  { %v8647_v29 = vadd.f32 %v9173_v59, %v8633_v53 }
0x19b5   :  { %v8635_v63 = vmul.f32 %v9172_v31, %v8621_v28 }
0x19b6   :  { %v8658_v50 = vpack.c.bf16 %v8647_v29, %v8646_v6 }
0x19b7   :  { %v8649_v62 = vadd.f32 %v9173_v59, %v8635_v63 }
0x19b8   :  { %9451 = vmatprep.mubr.msk.bf16.mxu1 %vm226_vm3, %v8658_v50 }
0x19b9   :  { %v8659_v15 = vpack.c.bf16 %v8649_v62, %v8648_v7 }
0x19bb   :  { %9452 = vmatmul.mubr.msk.bf16.vlgmr.msra.gmra.mxu1 %vm226_vm3, %v8659_v15 }
0x19f1   :  { %v8584_v10 = vpop.xlane.xlu1 %8583 }
0x19f2   :  { %v8598_v2 = vmul.f32 0.03125, %v8584_v10 }
0x19f4   :  { %v8606_v13 = vadd.f32 1e-05, %v8598_v2 }
0x19f5   :  { %v8590_v57 = vpop.xlane.xlu1 %8589  ;;  %v8587_v38 = vpop.xlane.xlu0 %8586 }
0x19f6   :  { %10148 = vrsqrt.f32 %v8606_v13  ;;  %v8600_v11 = vmul.f32 0.03125, %v8590_v57  ;;  %v8599_v19 = vmul.f32 0.03125, %v8587_v38 }
0x19f8   :  { %v8608_v36 = vadd.f32 1e-05, %v8600_v11  ;;  %v8607_v49 = vadd.f32 1e-05, %v8599_v19 }
0x19f9   :  { %v987_v58 = vpop.permute.xlu1 %986  ;;  %v8593_v35 = vpop.xlane.xlu0 %8592 }
0x19fa   :  { %10150 = vrsqrt.f32 %v8608_v36  ;;  %v989_v40 = vmul.f32 %v15024_v56, %v987_v58  ;;  %v8601_v32 = vmul.f32 0.03125, %v8593_v35 }
0x19fb   :  { %10152 = vrsqrt.f32 %v8607_v49 }
0x19fc   :  { %v8609_v0 = vadd.f32 1e-05, %v8601_v32  ;;  %991 = vrot.lane.b32.xlu1 %v989_v40, %s10274_s9 }
0x19fd   :  { %v5132_v20 = vpop.permute.xlu0 %5131 }
0x19fe   :  { %10154 = vrsqrt.f32 %v8609_v0  ;;  %v5134_v51 = vmul.f32 %v15019_v41, %v5132_v20 }
0x1a00   :  { %5136 = vrot.lane.b32.xlu1 %v5134_v51, %s10274_s9 }
0x1a01   :  { %v5150_v21 = vpop.permute.xlu0 %5149 }
0x1a02   :  { %5153 = vst.msk [vmem:[#allocation5 + $0x8] sm:$0xff] %vm226_vm3, %v5150_v21 }
0x1a03   :  { %v10149_v54 = vpop.eup %10148 }
0x1a04   :  { %1003 = vrot.lane.b32.xlu1 %v996_v8, %s10272_s0  ;;  %v8622_v30 = vmul.f32 %v10149_v54, %v14598_v43 }
0x1a06   :  { %v8636_v3 = vmul.f32 %v9172_v31, %v8622_v30 }
0x1a07   :  { %v10151_v37 = vpop.eup %10150 }
0x1a08   :  { %v10153_v14 = vpop.eup %10152  ;;  %v8624_v55 = vmul.f32 %v10151_v37, %v14602_v1  ;;  %v8650_v4 = vadd.f32 %v9173_v59, %v8636_v3  ;;  %v15027_v1 = vld [vmem:[#allocation28_spill] sm:$0xff] }
0x1a09   :  { %v8623_v22 = vmul.f32 %v10153_v14, %v14604_v34  ;;  %v984_v34 = vmul.f32 %v15024_v56, %v15027_v1 }
0x1a0a   :  { %v8638_v48 = vmul.f32 %v9172_v31, %v8624_v55 }
0x1a0b   :  { %v10155_v44 = vpop.eup %10154  ;;  %v8637_v42 = vmul.f32 %v9172_v31, %v8623_v22 }
0x1a0c   :  { %v8625_v27 = vmul.f32 %v10155_v44, %v14611_v9  ;;  %v8652_v23 = vadd.f32 %v9173_v59, %v8638_v48 }
0x1a0d   :  { %v8651_v12 = vadd.f32 %v9173_v59, %v8637_v42 }
0x1a0e   :  { %v8639_v16 = vmul.f32 %v9172_v31, %v8625_v27 }
0x1a0f   :  { %v8660_v26 = vpack.c.bf16 %v8651_v12, %v8650_v4 }
0x1a10   :  { %v8653_v61 = vadd.f32 %v9173_v59, %v8639_v16 }
0x1a11   :  { %9455 = vmatprep.mubr.msk.bf16.mxu1 %vm226_vm3, %v8660_v26 }
0x1a12   :  { %v8661_v43 = vpack.c.bf16 %v8653_v61, %v8652_v23 }
0x1a14   :  { %9456 = vmatmul.mubr.msk.bf16.gmra.mxu1 %vm226_vm3, %v8661_v43 }
0x1a6e   :  { %v992_v33 = vpop.permute.xlu1 %991 }
0x1a6f   :  { %v994_v9 = vadd.f32 %v992_v33, %v984_v34 }
0x1a70   :  { %10167 = shalt.err (!%p10164_p4)
}
0x1a71   :  { %s10289_s14 = smov 128   ;;  %s10290_s19 = smov 8   ;;  %998 = vrot.lane.b32.xlu1 %v994_v9, %s10272_s0  ;;  %v15028_v52 = vld [vmem:[#allocation38_spill] sm:$0xff] }
0x1a72   :  { %8808 = dma.vmem_to_hbm [thread:$0]  %s8803_s3, 256, %s10447_s4, [#allocation9], %s10289_s14, %s10289_s14, %s10290_s19   ;;  %v5129_v31 = vmul.f32 %v15019_v41, %v15028_v52  ;;  %v5137_v25 = vpop.permute.xlu1 %5136 }
0x1a73   :  { %s10291_s24 = smov [#allocation5]   ;;  %s10292_s12 = smov [#allocation7]  }
0x1a74   :  { %s8778_s6 = sshll.u32 %s10291_s24, 4  ;;  %v5139_v45 = vadd.f32 %v5137_v25, %v5129_v31  ;;  %s8790_s28 = sshll.u32 %s10292_s12, 4  ;;  %s8779_s6 = int_to_ptr.vmem [resolvable:$true] %s8778_s6  ;;  %s8791_s28 = int_to_ptr.vmem [resolvable:$true] %s8790_s28 }
0x1a75   :  { %s10176_s1 = scalar_lea.vmem %s8779_s6, 256  ;;  %p10181_p6 = scmp.lt.s32.totalorder %s8779_s6, %s8779_s6 }
0x1a76   :  { %5143 = vrot.lane.b32.xlu0 %v5139_v45, %s10272_s0  ;;  %v1004_v17 = vpop.permute.xlu1 %1003  ;;  %p10177_p5 = scmp.ne.s32.totalorder %s8779_s6, %s10176_s1  ;;  %p10182_p7 = scmp.lt.s32.totalorder %s10176_s1, %s10176_s1 }
0x1a77   :  { %1006 = vst.msk [vmem:[#allocation5] sm:$0xff] %vm226_vm3, %v1004_v17 }
0x1a78   :  { %p10183_p8 = por %p10182_p7, %p10181_p6 }
0x1a7a   :  { %p10184_p9 = pnand %p10183_p8, %p10177_p5 }
0x1a7c   :  { %10187 = shalt.err (!%p10184_p9)
}
0x1a7d   :  { %8784 = dma.vmem_to_hbm [thread:$0]  %s8779_s6, 256, %s10437_s20, [#allocation6], %s10289_s14, %s10289_s14, %s10290_s19  }
0x1a7e   :  { %s10196_s4 = scalar_lea.vmem %s8791_s28, 256  ;;  %p10201_p11 = scmp.lt.s32.totalorder %s8791_s28, %s8791_s28 }
0x1a7f   :  { %p10197_p10 = scmp.ne.s32.totalorder %s8791_s28, %s10196_s4  ;;  %p10202_p12 = scmp.lt.s32.totalorder %s10196_s4, %s10196_s4 }
0x1a81   :  { %p10203_p13 = por %p10202_p12, %p10201_p11 }
0x1a83   :  { %p10204_p0 = pnand %p10203_p13, %p10197_p10 }
0x1a85   :  { %10207 = shalt.err (!%p10204_p0)
}
0x1a86   :  { %s15029_s2 = sld [smem:[#allocation24_spill]]  ;;  %v9453_v41 = vpop.f32.mrf.mxu1  ;;  %vm15030_vm6 = vcmask 23552   ;;  %s10293_s20 = smov [#allocation3]  }
0x1a87   :  { %8796 = dma.vmem_to_hbm [thread:$0]  %s8791_s28, 256, %s10442_s27, [#allocation6], %s10289_s14, %s10289_s14, %s10290_s19   ;;  %vm15031_vm11 = vmmov %vm15030_vm6 }
0x1a88   :  { %v8720_v24 = vpop.f32.mrf.mxu1  ;;  %vm15032_vm4 = vmmov %vm15030_vm6  ;;  %s8766_s27 = sshll.u32 %s10293_s20, 4  ;;  %s8767_s27 = int_to_ptr.vmem [resolvable:$true] %s8766_s27 }
0x1a89   :  { %vm15033_vm13 = vmmov %vm15032_vm4  ;;  %s10216_s0 = scalar_lea.vmem %s8767_s27, 256  ;;  %p10221_p2 = scmp.lt.s32.totalorder %s8767_s27, %s8767_s27 }
0x1a8a   :  { %v9454_v39 = vpop.f32.mrf.mxu1  ;;  %vm15034_vm8 = vmmov %vm15032_vm4  ;;  %p10217_p1 = scmp.ne.s32.totalorder %s8767_s27, %s10216_s0  ;;  %p10222_p3 = scmp.lt.s32.totalorder %s10216_s0, %s10216_s0 }
0x1a8b   :  { %vm15035_vm7 = vmmov %vm15032_vm4 }
0x1a8c   :  { %8753 = vst.msk [vmem:[%s15029_s2 + $0x10] sm:$0xff] %vm15030_vm6, %v9453_v41  ;;  %v8723_v59 = vpop.f32.mrf.mxu1  ;;  %vm15036_vm9 = vmmov %vm15032_vm4  ;;  %p10223_p4 = por %p10222_p3, %p10221_p2 }
0x1a8d   :  { %8751 = vst.msk [vmem:[%s15029_s2] sm:$0xff] %vm15031_vm11, %v8720_v24  ;;  %vm15037_vm10 = vmmov %vm15032_vm4 }
0x1a8e   :  { %8754 = vst.msk [vmem:[%s15029_s2 + $0x18] sm:$0xff] %vm15032_vm4, %v9454_v39  ;;  %p10224_p5 = pnand %p10223_p4, %p10217_p1 }
0x1a8f   :  { %8752 = vst.msk [vmem:[%s15029_s2 + $0x8] sm:$0xff] %vm15033_vm13, %v8723_v59 }
0x1ad4   :  { %v9457_v18 = vpop.f32.mrf.mxu1 }
0x1ad5   :  { %8757 = vst.msk [vmem:[%s15029_s2 + $0x30] sm:$0xff] %vm15034_vm8, %v9457_v18 }
0x1ad6   :  { %v8736_v53 = vpop.f32.mrf.mxu1 }
0x1ad7   :  { %8755 = vst.msk [vmem:[%s15029_s2 + $0x20] sm:$0xff] %vm15035_vm7, %v8736_v53 }
0x1ad8   :  { %v9458_v47 = vpop.f32.mrf.mxu1 }
0x1ad9   :  { %8758 = vst.msk [vmem:[%s15029_s2 + $0x38] sm:$0xff] %vm15036_vm9, %v9458_v47 }
0x1ada   :  { %v8739_v28 = vpop.f32.mrf.mxu1 }
0x1adb   :  { %8756 = vst.msk [vmem:[%s15029_s2 + $0x28] sm:$0xff] %vm15037_vm10, %v8739_v28 }
0x1ae3   :  { %v999_v6 = vpop.permute.xlu1 %998 }
0x1ae4   :  { %1001 = vst.msk [vmem:[#allocation3] sm:$0xff] %vm226_vm3, %v999_v6 }
0x1ae8   :  { %v5144_v29 = vpop.permute.xlu0 %5143 }
0x1ae9   :  { %5147 = vst.msk [vmem:[#allocation3 + $0x8] sm:$0xff] %vm226_vm3, %v5144_v29 }
0x1aea   :  { %10227 = shalt.err (!%p10224_p5)
}
0x1aeb   :  { %8772 = dma.vmem_to_hbm [thread:$0]  %s8767_s27, 256, %s10432_s30, [#allocation4], %s10289_s14, %s10289_s14, %s10290_s19  }
0x1aec   :  { %10236 = dma.done.wait [#allocation4], 256  }
0x1aed   :  { %10237 = vsyncadd [#allocation4], 4294967040 }
0x1aee   :  { %10238 = dma.done.wait [#allocation6], 512  }
0x1aef   :  { %10239 = vsyncadd [#allocation6], 4294966784 }
0x1af0   :  { %10240 = dma.done.wait [#allocation9], 256  }
0x1af1   :  { %10241 = vsyncadd [#allocation9], 4294967040 }
0x1af2   :  { %8823 = vsyncpa [#allocation4], 1 }
0x1af3   :  { %8824 = vsyncpa [#allocation6], 1 }
0x1af4   :  { %8825 = vsyncpa [#allocation9], 1 }

</bundles_post_ra>
